<compile_context>
chip_gen: v7x
topology: tpu7x:2x2x1
jax: 0.10.0
libtpu: 0.0.40
codegen_flags: <defaults>
</compile_context>

<pallas_src>
import functools

import numpy as np
import jax
import jax.numpy as jnp
from jax.experimental import pallas as pl
from jax.experimental.pallas import tpu as pltpu

# ----------------------------------------------------------------------------
# Static model configuration — pure Python, never traced.
# ----------------------------------------------------------------------------
INPUT_SIZE = (1, 32, 32)          # (C, H, W)
CHANNEL_MULT = 4                  # int(64 * cfg['netSi']) with netSi = 1/16
SLOPE = 0.2
# (cin, cout, kernel, stride, pad)
LAYER_SPECS = (
    (INPUT_SIZE[0],    CHANNEL_MULT * 1, 4, 2, 1),
    (CHANNEL_MULT * 1, CHANNEL_MULT * 2, 4, 2, 1),
    (CHANNEL_MULT * 2, CHANNEL_MULT * 4, 4, 2, 1),
    (CHANNEL_MULT * 4, CHANNEL_MULT * 8, 4, 2, 1),
    (CHANNEL_MULT * 8, CHANNEL_MULT * 8, 3, 2, 1),
)


def _compute_layout():
    """Static slab geometry: per-layer (row_offset, Fout, Fin) plus slab dims."""
    _, h, w = INPUT_SIZE
    dims = []
    for (cin, cout, k, s, p) in LAYER_SPECS:
        ho = (h + 2 * p - k) // s + 1
        wo = (w + 2 * p - k) // s + 1
        dims.append((ho * wo * cout, h * w * cin))        # (Fout, Fin)
        h, w = ho, wo
    dims.append((1, LAYER_SPECS[-1][1]))                  # final Linear(nin -> 1)
    meta, row = [], 0
    for fout, fin in dims:
        meta.append((row, fout, fin))
        row += fout
    slab_rows = -(-row // 16) * 16                        # pad sublanes (bf16 tiling)
    slab_lanes = max(f for _, f in dims)                  # 1024 (multiple of 128)
    bias_rows = max(f for f, _ in dims)                   # 1024
    return tuple(meta), slab_rows, slab_lanes, bias_rows


_LAYERS_META, _SLAB_ROWS, _SLAB_LANES, _BIAS_ROWS = _compute_layout()


# ----------------------------------------------------------------------------
# Parameter init (torch-layout: Conv2d OIHW + bias, Linear (out, in) + bias).
# ~1/sqrt(fan_in) scaling keeps activations O(1) so the correctness checks are
# meaningful (review note on weak tolerances).
# ----------------------------------------------------------------------------
def init_params(key):
    conv = []
    for (cin, cout, k, _, _) in LAYER_SPECS:
        key, k1, k2 = jax.random.split(key, 3)
        std = 1.0 / float(np.sqrt(cin * k * k))
        w = jax.random.normal(k1, (cout, cin, k, k), jnp.float32) * std
        b = jax.random.normal(k2, (cout,), jnp.float32) * 0.05
        conv.append((w, b))
    nin = LAYER_SPECS[-1][1]
    key, k1, k2 = jax.random.split(key, 3)
    lin_w = jax.random.normal(k1, (1, nin), jnp.float32) / float(np.sqrt(nin))
    lin_b = jax.random.normal(k2, (1,), jnp.float32) * 0.05
    return {"conv": conv, "linear": (lin_w, lin_b)}


# ----------------------------------------------------------------------------
# One-time host-side weight preparation: fold every conv (stride/pad included)
# into a dense (Fout, Fin) matrix acting on the (h, w, c)-flattened activation,
# then pack all layers + the final Linear into one bf16 weight slab and one f32
# bias slab.
# ----------------------------------------------------------------------------
def prepare_params(params):
    _, sp_h, sp_w = INPUT_SIZE
    mats, biases = [], []
    for (wt, bb), (cin, cout, k, s, p) in zip(params["conv"], LAYER_SPECS):
        wt = np.asarray(wt, np.float32)            # (cout, cin, k, k) torch OIHW
        bb = np.asarray(bb, np.float32)
        ho = (sp_h + 2 * p - k) // s + 1
        wo = (sp_w + 2 * p - k) // s + 1
        mat = np.zeros((ho * wo * cout, sp_h * sp_w * cin), np.float32)
        for oh in range(ho):
            for ow in range(wo):
                r0 = (oh * wo + ow) * cout
                for i in range(k):
                    ih = s * oh + i - p
                    if not (0 <= ih < sp_h):
                        continue
                    for j in range(k):
                        iw = s * ow + j - p
                        if not (0 <= iw < sp_w):
                            continue
                        c0 = (ih * sp_w + iw) * cin
                        mat[r0:r0 + cout, c0:c0 + cin] += wt[:, :, i, j]
        mats.append(mat)
        biases.append(np.tile(bb, ho * wo))        # bias per (oh, ow, cout)
        sp_h, sp_w = ho, wo

    lin_w, lin_b = params["linear"]
    mats.append(np.asarray(lin_w, np.float32))     # (1, nin)
    biases.append(np.asarray(lin_b, np.float32))   # (1,)

    w_slab = np.zeros((_SLAB_ROWS, _SLAB_LANES), np.float32)
    b_slab = np.zeros((_BIAS_ROWS, 8), np.float32)           # one column per layer
    for li, ((row, fout, fin), mat, bvec) in enumerate(
            zip(_LAYERS_META, mats, biases)):
        w_slab[row:row + fout, :fin] = mat
        b_slab[:fout, li] = bvec
    return {"w_slab": jnp.asarray(w_slab, jnp.bfloat16),     # MXU operand slab
            "b_slab": jnp.asarray(b_slab, jnp.float32)}      # f32 bias columns


# ----------------------------------------------------------------------------
# Fused Pallas kernel: one grid step == TB images, everything stays in VMEM.
# Activations are (features, TB) with the batch on the LANE axis, so each layer
# is a single MXU matmul and the final Linear emits a lane-dense (1, TB) row.
# ----------------------------------------------------------------------------
def _aedisc_fused_kernel(x_ref, w_ref, b_ref, o_ref, *, meta, slope):
    act = x_ref[...]                                       # (F0, TB) bf16
    last = len(meta) - 1
    for li, (row, fout, fin) in enumerate(meta):           # static unroll: 6 layers
        w = w_ref[row:row + fout, 0:fin]                   # bf16 weight tile (view)
        y = jnp.dot(w, act, preferred_element_type=jnp.float32)   # (fout, TB) f32
        y = y + b_ref[0:fout, li:li + 1]                   # f32 bias, lane-broadcast
        if li < last:
            y = jnp.maximum(y, slope * y)                  # LeakyReLU(0.2), f32 VPU
            act = y.astype(jnp.bfloat16)                   # bf16 operand for next MXU op
        else:
            o_ref[0] = y                                   # (1, TB) lane-dense store


def aedisc_forward(prepared, x_nchw):
    n, c, h, w = x_nchw.shape
    f0 = h * w * c
    # NCHW -> (H*W*C, N): features on sublanes, batch on lanes; bf16 halves DMA.
    x = jnp.transpose(x_nchw, (2, 3, 1, 0)).reshape(f0, n).astype(jnp.bfloat16)

    tb = 128 if n <= 256 else 256          # modest batches still get >=2 grid steps
    n_pad = pl.cdiv(n, tb) * tb
    if n_pad != n:
        x = jnp.pad(x, ((0, 0), (0, n_pad - n)))
    g = n_pad // tb

    w_slab = prepared["w_slab"]
    b_slab = prepared["b_slab"]
    kern = functools.partial(_aedisc_fused_kernel, meta=_LAYERS_META, slope=SLOPE)
    out = pl.pallas_call(
        kern,
        out_shape=jax.ShapeDtypeStruct((g, 1, tb), jnp.float32),
        grid=(g,),
        in_specs=[
            pl.BlockSpec((f0, tb), lambda i: (0, i)),             # batch tile
            pl.BlockSpec(w_slab.shape, lambda i: (0, 0)),         # resident weights
            pl.BlockSpec(b_slab.shape, lambda i: (0, 0)),         # resident biases
        ],
        out_specs=pl.BlockSpec((1, 1, tb), lambda i: (i, 0, 0)),  # lane-dense output
        compiler_params=pltpu.CompilerParams(
            dimension_semantics=("parallel",),     # shard batch tiles over TCs (v7x)
            vmem_limit_bytes=32 * 1024 * 1024),
    )(x, w_slab, b_slab)
    return out.reshape(n_pad, 1)[:n]


# ----------------------------------------------------------------------------
# References.
# ----------------------------------------------------------------------------
def aedisc_reference(params, x_nchw):
    """Pure-JAX f32 reference with torch Conv2d / LeakyReLU / Linear semantics."""
    x = x_nchw.astype(jnp.float32)
    for (w, b), (_, _, k, s, p) in zip(params["conv"], LAYER_SPECS):
        x = jax.lax.conv_general_dilated(
            x, w, window_strides=(s, s), padding=((p, p), (p, p)),
            dimension_numbers=("NCHW", "OIHW", "NCHW"))
        x = x + b[None, :, None, None]
        x = jnp.maximum(x, SLOPE * x)
    x = x.reshape(x.shape[0], -1)
    lin_w, lin_b = params["linear"]
    return x @ lin_w.T + lin_b


def aedisc_dense_reference(prepared, x_nchw):
    """Pure-JAX replica of the exact kernel math (same slabs, same bf16/f32
    dtype schedule) — tight check of the Pallas plumbing."""
    n, c, h, w = x_nchw.shape
    act = jnp.transpose(x_nchw, (2, 3, 1, 0)).reshape(h * w * c, n)
    act = act.astype(jnp.bfloat16)
    w_slab, b_slab = prepared["w_slab"], prepared["b_slab"]
    last = len(_LAYERS_META) - 1
    out = None
    for li, (row, fout, fin) in enumerate(_LAYERS_META):
        y = jnp.dot(w_slab[row:row + fout, :fin], act,
                    preferred_element_type=jnp.float32)
        y = y + b_slab[:fout, li:li + 1]
        if li < last:
            act = jnp.maximum(y, SLOPE * y).astype(jnp.bfloat16)
        else:
            out = y
    return out.T                                            # (N, 1)


if __name__ == "__main__":
    key = jax.random.PRNGKey(0)
    k_param, k_x = jax.random.split(key)

    params = init_params(k_param)          # torch-format weights
    prepared = prepare_params(params)      # one-time fold into matmul slabs

    c, h, w = INPUT_SIZE
    n = 300   # not a multiple of the batch tile: exercises padding + a 2-step grid
    x = jax.random.normal(k_x, (n, c, h, w), jnp.float32)

    fwd = jax.jit(aedisc_forward)
    out = jax.block_until_ready(fwd(prepared, x))
    assert out.shape == (n, 1), out.shape

    # Tight check: identical math/dtype schedule in plain JAX (kernel plumbing).
    dense = jax.block_until_ready(jax.jit(aedisc_dense_reference)(prepared, x))
    assert jnp.allclose(out, dense, atol=5e-3, rtol=5e-3), \
        float(jnp.max(jnp.abs(out - dense)))

    # Semantic check vs. full-f32 conv reference (bf16 quantization is the only gap).
    ref = jax.block_until_ready(jax.jit(aedisc_reference)(params, x))
    assert jnp.allclose(out, ref, atol=2e-2, rtol=2e-2), \
        float(jnp.max(jnp.abs(out - ref)))

    print("KERNEL_OK")
</pallas_src>

<mosaic_0001>
module attributes {stable_mosaic.version = 11 : i64} {
  func.func @_aedisc_fused_kernel(%arg0: i32, %arg1: memref<1024x256xbf16, #tpu.memory_space<vmem>>, %arg2: memref<1968x1024xbf16, #tpu.memory_space<vmem>>, %arg3: memref<1024x8xf32, #tpu.memory_space<vmem>>, %arg4: memref<1x1x256xf32, #tpu.memory_space<vmem>>) attributes {dimension_semantics = [#tpu.dimension_semantics<parallel>], iteration_bounds = array<i64: 2>, scalar_prefetch = 0 : i64, scratch_operands = 0 : i64, tpu.core_type = #tpu.core_type<tc>, window_params = [{transform_indices = @transform_0, window_bounds = array<i64: 1024, 256>}, {pipeline_mode = #tpu.pipeline_mode<synchronous>, transform_indices = @transform_1, window_bounds = array<i64: 1968, 1024>}, {pipeline_mode = #tpu.pipeline_mode<synchronous>, transform_indices = @transform_2, window_bounds = array<i64: 1024, 8>}, {transform_indices = @transform_3, window_bounds = array<i64: 1, 1, 256>}]} {
    %c0 = arith.constant 0 : index
    %c0_0 = arith.constant 0 : index
    %0 = vector.load %arg1[%c0, %c0_0] : memref<1024x256xbf16, #tpu.memory_space<vmem>>, vector<1024x256xbf16>
    %c0_1 = arith.constant 0 : index
    %c0_2 = arith.constant 0 : index
    %1 = vector.load %arg2[%c0_1, %c0_2] : memref<1968x1024xbf16, #tpu.memory_space<vmem>>, vector<1024x1024xbf16>
    %cst = arith.constant dense<0.000000e+00> : vector<1024x256xf32>
    %2 = tpu.matmul %1, %0, %cst {dimension_numbers = #tpu.dot_dimension_numbers<[1], [0], [0], [1], [0, 0, 1, 1], [], []>} : vector<1024x1024xbf16>, vector<1024x256xbf16>, vector<1024x256xf32> -> vector<1024x256xf32>
    %c0_3 = arith.constant 0 : index
    %c0_4 = arith.constant 0 : index
    %3 = vector.load %arg3[%c0_3, %c0_4] : memref<1024x8xf32, #tpu.memory_space<vmem>>, vector<1024x1xf32>
    %4 = vector.broadcast %3 : vector<1024x1xf32> to vector<1024x256xf32>
    %5 = arith.addf %2, %4 : vector<1024x256xf32>
    %cst_5 = arith.constant 2.000000e-01 : f32
    %6 = vector.broadcast %cst_5 : f32 to vector<1024x256xf32>
    %7 = arith.mulf %6, %5 : vector<1024x256xf32>
    %8 = arith.maximumf %5, %7 : vector<1024x256xf32>
    %9 = arith.truncf %8 : vector<1024x256xf32> to vector<1024x256xbf16>
    %c1024 = arith.constant 1024 : index
    %c0_6 = arith.constant 0 : index
    %10 = vector.load %arg2[%c1024, %c0_6] : memref<1968x1024xbf16, #tpu.memory_space<vmem>>, vector<512x1024xbf16>
    %cst_7 = arith.constant dense<0.000000e+00> : vector<512x256xf32>
    %11 = tpu.matmul %10, %9, %cst_7 {dimension_numbers = #tpu.dot_dimension_numbers<[1], [0], [0], [1], [0, 0, 1, 1], [], []>} : vector<512x1024xbf16>, vector<1024x256xbf16>, vector<512x256xf32> -> vector<512x256xf32>
    %c0_8 = arith.constant 0 : index
    %c1 = arith.constant 1 : index
    %12 = vector.load %arg3[%c0_8, %c1] : memref<1024x8xf32, #tpu.memory_space<vmem>>, vector<512x1xf32>
    %13 = vector.broadcast %12 : vector<512x1xf32> to vector<512x256xf32>
    %14 = arith.addf %11, %13 : vector<512x256xf32>
    %cst_9 = arith.constant 2.000000e-01 : f32
    %15 = vector.broadcast %cst_9 : f32 to vector<512x256xf32>
    %16 = arith.mulf %15, %14 : vector<512x256xf32>
    %17 = arith.maximumf %14, %16 : vector<512x256xf32>
    %18 = arith.truncf %17 : vector<512x256xf32> to vector<512x256xbf16>
    %c1536 = arith.constant 1536 : index
    %c0_10 = arith.constant 0 : index
    %19 = vector.load %arg2[%c1536, %c0_10] : memref<1968x1024xbf16, #tpu.memory_space<vmem>>, vector<256x512xbf16>
    %cst_11 = arith.constant dense<0.000000e+00> : vector<256x256xf32>
    %20 = tpu.matmul %19, %18, %cst_11 {dimension_numbers = #tpu.dot_dimension_numbers<[1], [0], [0], [1], [0, 0, 1, 1], [], []>} : vector<256x512xbf16>, vector<512x256xbf16>, vector<256x256xf32> -> vector<256x256xf32>
    %c0_12 = arith.constant 0 : index
    %c2 = arith.constant 2 : index
    %21 = vector.load %arg3[%c0_12, %c2] : memref<1024x8xf32, #tpu.memory_space<vmem>>, vector<256x1xf32>
    %22 = vector.broadcast %21 : vector<256x1xf32> to vector<256x256xf32>
    %23 = arith.addf %20, %22 : vector<256x256xf32>
    %cst_13 = arith.constant 2.000000e-01 : f32
    %24 = vector.broadcast %cst_13 : f32 to vector<256x256xf32>
    %25 = arith.mulf %24, %23 : vector<256x256xf32>
    %26 = arith.maximumf %23, %25 : vector<256x256xf32>
    %27 = arith.truncf %26 : vector<256x256xf32> to vector<256x256xbf16>
    %c1792 = arith.constant 1792 : index
    %c0_14 = arith.constant 0 : index
    %28 = vector.load %arg2[%c1792, %c0_14] : memref<1968x1024xbf16, #tpu.memory_space<vmem>>, vector<128x256xbf16>
    %cst_15 = arith.constant dense<0.000000e+00> : vector<128x256xf32>
    %29 = tpu.matmul %28, %27, %cst_15 {dimension_numbers = #tpu.dot_dimension_numbers<[1], [0], [0], [1], [0, 0, 1, 1], [], []>} : vector<128x256xbf16>, vector<256x256xbf16>, vector<128x256xf32> -> vector<128x256xf32>
    %c0_16 = arith.constant 0 : index
    %c3 = arith.constant 3 : index
    %30 = vector.load %arg3[%c0_16, %c3] : memref<1024x8xf32, #tpu.memory_space<vmem>>, vector<128x1xf32>
    %31 = vector.broadcast %30 : vector<128x1xf32> to vector<128x256xf32>
    %32 = arith.addf %29, %31 : vector<128x256xf32>
    %cst_17 = arith.constant 2.000000e-01 : f32
    %33 = vector.broadcast %cst_17 : f32 to vector<128x256xf32>
    %34 = arith.mulf %33, %32 : vector<128x256xf32>
    %35 = arith.maximumf %32, %34 : vector<128x256xf32>
    %36 = arith.truncf %35 : vector<128x256xf32> to vector<128x256xbf16>
    %c1920 = arith.constant 1920 : index
    %c0_18 = arith.constant 0 : index
    %37 = vector.load %arg2[%c1920, %c0_18] : memref<1968x1024xbf16, #tpu.memory_space<vmem>>, vector<32x128xbf16>
    %cst_19 = arith.constant dense<0.000000e+00> : vector<32x256xf32>
    %38 = tpu.matmul %37, %36, %cst_19 {dimension_numbers = #tpu.dot_dimension_numbers<[1], [0], [0], [1], [0, 0, 1, 1], [], []>} : vector<32x128xbf16>, vector<128x256xbf16>, vector<32x256xf32> -> vector<32x256xf32>
    %c0_20 = arith.constant 0 : index
    %c4 = arith.constant 4 : index
    %39 = vector.load %arg3[%c0_20, %c4] : memref<1024x8xf32, #tpu.memory_space<vmem>>, vector<32x1xf32>
    %40 = vector.broadcast %39 : vector<32x1xf32> to vector<32x256xf32>
    %41 = arith.addf %38, %40 : vector<32x256xf32>
    %cst_21 = arith.constant 2.000000e-01 : f32
    %42 = vector.broadcast %cst_21 : f32 to vector<32x256xf32>
    %43 = arith.mulf %42, %41 : vector<32x256xf32>
    %44 = arith.maximumf %41, %43 : vector<32x256xf32>
    %45 = arith.truncf %44 : vector<32x256xf32> to vector<32x256xbf16>
    %c1952 = arith.constant 1952 : index
    %c0_22 = arith.constant 0 : index
    %46 = vector.load %arg2[%c1952, %c0_22] : memref<1968x1024xbf16, #tpu.memory_space<vmem>>, vector<1x32xbf16>
    %cst_23 = arith.constant dense<0.000000e+00> : vector<1x256xf32>
    %47 = tpu.matmul %46, %45, %cst_23 {dimension_numbers = #tpu.dot_dimension_numbers<[1], [0], [0], [1], [0, 0, 1, 1], [], []>} : vector<1x32xbf16>, vector<32x256xbf16>, vector<1x256xf32> -> vector<1x256xf32>
    %c0_24 = arith.constant 0 : index
    %c5 = arith.constant 5 : index
    %48 = vector.load %arg3[%c0_24, %c5] : memref<1024x8xf32, #tpu.memory_space<vmem>>, vector<1x1xf32>
    %49 = vector.broadcast %48 : vector<1x1xf32> to vector<1x256xf32>
    %50 = arith.addf %47, %49 : vector<1x256xf32>
    %c0_25 = arith.constant 0 : index
    %c0_26 = arith.constant 0 : index
    %c0_27 = arith.constant 0 : index
    %51 = vector.load %arg4[%c0_25, %c0_26, %c0_27] : memref<1x1x256xf32, #tpu.memory_space<vmem>>, vector<1x1x256xf32>
    %52 = vector.shape_cast %51 : vector<1x1x256xf32> to vector<1x256xf32>
    %53 = vector.shape_cast %50 : vector<1x256xf32> to vector<1x1x256xf32>
    tpu.vector_store %arg4[%c0_25, %c0_26, %c0_27], %53 {strides = array<i32>} : memref<1x1x256xf32, #tpu.memory_space<vmem>>, vector<1x1x256xf32>,
    return
  }
  func.func @transform_0(%arg0: i32) -> (i32, i32) {
    %c0_i32 = arith.constant 0 : i32
    %c0_i32_0 = arith.constant 0 : i32
    return %c0_i32, %arg0 : i32, i32
  }
  func.func @transform_1(%arg0: i32) -> (i32, i32) {
    %c0_i32 = arith.constant 0 : i32
    %c0_i32_0 = arith.constant 0 : i32
    %c0_i32_1 = arith.constant 0 : i32
    return %c0_i32, %c0_i32_0 : i32, i32
  }
  func.func @transform_2(%arg0: i32) -> (i32, i32) {
    %c0_i32 = arith.constant 0 : i32
    %c0_i32_0 = arith.constant 0 : i32
    %c0_i32_1 = arith.constant 0 : i32
    return %c0_i32, %c0_i32_0 : i32, i32
  }
  func.func @transform_3(%arg0: i32) -> (i32, i32, i32) {
    %c0_i32 = arith.constant 0 : i32
    %c0_i32_0 = arith.constant 0 : i32
    %c0_i32_1 = arith.constant 0 : i32
    return %arg0, %c0_i32, %c0_i32_0 : i32, i32, i32
  }
}

</mosaic_0001>

<bundles_post_ra>
// kernel: aedisc_forward.1
= control target key start
LH: loop header
LB: loop body
LE: loop exit
PB: predicated region body
PF: predicated region fallthrough
CT: control target
= control target key end

     0   :  { %s17033_s12 = smov 0   ;;  %s17035_s13 = smov 0   ;;  %s21805_s0 = inlined_call_operand.vmem [shape: bf16[1024,512], index: 0, kind: input, shape index: {}]   ;;  %s21806_s1 = inlined_call_operand.vmem [shape: bf16[1968,1024], index: 1, kind: input, shape index: {}]   ;;  %s21807_s2 = inlined_call_operand.vmem [shape: f32[1024,8], index: 2, kind: input, shape index: {}]   ;;  %s21808_s3 = inlined_call_operand.vmem [shape: f32[2,1,256], index: 3, kind: output, shape index: {}]  }
   0x1   :  { %s17037_s14 = smov 0  }
   0x2 LB: > { %s14060_s15 = sadd.s32 4294967295, %s17004_s14   ;;  %s17050_s16 = sadd.s32 1, %s17004_s14   ;;  %s17004_s14 = sphi %s17037_s14, %s22135_s14   ;;  %s17000_s13 = sphi %s17035_s13, %s22134_s13   ;;  %s16996_s12 = sphi %s17033_s12, %s22133_s12  }
   0x3   : > { %s17_s17 = ssub.s32 %s17004_s14, %s17050_s16  ;;  %s20_s18 = sadd.s32 1, %s17000_s13 }
   0x4   : > { %p18_p0 = scmp.eq.s32.totalorder %s17_s17, 0  ;;  %p27_p1 = scmp.ne.s32.totalorder %s17000_s13, %s16996_s12 }
   0x5   : > { %p28_p2 = scmp.eq.s32.totalorder %s17004_s14, 0  ;;  %p14063_p4 = scmp.ge.s32.totalorder %s17004_s14, 2 }
   0x6   : > { %s17059_s19 = scalar_select %p18_p0, %s17000_s13, %s20_s18  }
   0x7   : > { %p29_p3 = por %p28_p2, %p27_p1  ;;  %127 = sbr.rel (%p14063_p4) target bundleno = 82 (0x52), region = 24 }
   0xe   : > { %130 = sbr.rel (!%p29_p3) target bundleno = 82 (0x52), region = 28  ;;  %s132_s20 = sand.u32 (%p29_p3), 1, %s17000_s13  }
   0xf   : > { %s15051_s21 = sshll.u32 (%p29_p3), %s17004_s14, 3  ;;  %s14064_s22 = sshll.u32 (%p29_p3), %s132_s20, 10 }
  0x10   : > { %s17067_s25 = scalar_lea.vmem (%p29_p3), %s21805_s0, %s15051_s21  ;;  %s17072_s26 = scalar_lea.vmem (%p29_p3), [#allocation2], %s14064_s22 }
  0x11   : > { %v419_v0 = vld [vmem:[%s17067_s25] sm:$0xff] (%p29_p3)  ;;  %v421_v1 = vld [vmem:[%s17067_s25 + $0x10] sm:$0xff] (%p29_p3) }
  0x12   : > { %v423_v2 = vld [vmem:[%s17067_s25 + $0x20] sm:$0xff] (%p29_p3)  ;;  %420 = vst [vmem:[%s17072_s26] sm:$0xff] (%p29_p3), %v419_v0  ;;  %422 = vst [vmem:[%s17072_s26 + $0x8] sm:$0xff] (%p29_p3), %v421_v1  ;;  %v425_v3 = vld [vmem:[%s17067_s25 + $0x30] sm:$0xff] (%p29_p3) }
  0x13   : > { %424 = vst [vmem:[%s17072_s26 + $0x10] sm:$0xff] (%p29_p3), %v423_v2  ;;  %v427_v4 = vld [vmem:[%s17067_s25 + $0x40] sm:$0xff] (%p29_p3)  ;;  %v429_v5 = vld [vmem:[%s17067_s25 + $0x50] sm:$0xff] (%p29_p3)  ;;  %426 = vst [vmem:[%s17072_s26 + $0x18] sm:$0xff] (%p29_p3), %v425_v3 }
  0x14   : > { %428 = vst [vmem:[%s17072_s26 + $0x20] sm:$0xff] (%p29_p3), %v427_v4  ;;  %430 = vst [vmem:[%s17072_s26 + $0x28] sm:$0xff] (%p29_p3), %v429_v5  ;;  %v431_v6 = vld [vmem:[%s17067_s25 + $0x60] sm:$0xff] (%p29_p3)  ;;  %v433_v7 = vld [vmem:[%s17067_s25 + $0x70] sm:$0xff] (%p29_p3) }
  0x15   : > { %v435_v8 = vld [vmem:[%s17067_s25 + $0x80] sm:$0xff]  ;;  %432 = vst [vmem:[%s17072_s26 + $0x30] sm:$0xff] %v431_v6  ;;  %434 = vst [vmem:[%s17072_s26 + $0x38] sm:$0xff] %v433_v7  ;;  %v437_v9 = vld [vmem:[%s17067_s25 + $0x90] sm:$0xff] }
  0x16   : > { %436 = vst [vmem:[%s17072_s26 + $0x40] sm:$0xff] %v435_v8  ;;  %v439_v10 = vld [vmem:[%s17067_s25 + $0xa0] sm:$0xff]  ;;  %v441_v11 = vld [vmem:[%s17067_s25 + $0xb0] sm:$0xff]  ;;  %438 = vst [vmem:[%s17072_s26 + $0x48] sm:$0xff] %v437_v9 }
  0x17   : > { %440 = vst [vmem:[%s17072_s26 + $0x50] sm:$0xff] %v439_v10  ;;  %442 = vst [vmem:[%s17072_s26 + $0x58] sm:$0xff] %v441_v11  ;;  %v443_v12 = vld [vmem:[%s17067_s25 + $0xc0] sm:$0xff]  ;;  %v445_v13 = vld [vmem:[%s17067_s25 + $0xd0] sm:$0xff] }
  0x18   : > { %v447_v14 = vld [vmem:[%s17067_s25 + $0xe0] sm:$0xff]  ;;  %444 = vst [vmem:[%s17072_s26 + $0x60] sm:$0xff] %v443_v12  ;;  %446 = vst [vmem:[%s17072_s26 + $0x68] sm:$0xff] %v445_v13  ;;  %v449_v15 = vld [vmem:[%s17067_s25 + $0xf0] sm:$0xff] }
  0x19   : > { %448 = vst [vmem:[%s17072_s26 + $0x70] sm:$0xff] %v447_v14  ;;  %v451_v16 = vld [vmem:[%s17067_s25 + $0x100] sm:$0xff]  ;;  %v453_v17 = vld [vmem:[%s17067_s25 + $0x110] sm:$0xff]  ;;  %450 = vst [vmem:[%s17072_s26 + $0x78] sm:$0xff] %v449_v15 }
  0x1a   : > { %452 = vst [vmem:[%s17072_s26 + $0x80] sm:$0xff] %v451_v16  ;;  %454 = vst [vmem:[%s17072_s26 + $0x88] sm:$0xff] %v453_v17  ;;  %v455_v18 = vld [vmem:[%s17067_s25 + $0x120] sm:$0xff]  ;;  %v457_v19 = vld [vmem:[%s17067_s25 + $0x130] sm:$0xff] }
  0x1b   : > { %v459_v20 = vld [vmem:[%s17067_s25 + $0x140] sm:$0xff]  ;;  %456 = vst [vmem:[%s17072_s26 + $0x90] sm:$0xff] %v455_v18  ;;  %458 = vst [vmem:[%s17072_s26 + $0x98] sm:$0xff] %v457_v19  ;;  %v461_v21 = vld [vmem:[%s17067_s25 + $0x150] sm:$0xff] }
  0x1c   : > { %460 = vst [vmem:[%s17072_s26 + $0xa0] sm:$0xff] %v459_v20  ;;  %v463_v22 = vld [vmem:[%s17067_s25 + $0x160] sm:$0xff]  ;;  %v465_v23 = vld [vmem:[%s17067_s25 + $0x170] sm:$0xff]  ;;  %462 = vst [vmem:[%s17072_s26 + $0xa8] sm:$0xff] %v461_v21 }
  0x1d   : > { %464 = vst [vmem:[%s17072_s26 + $0xb0] sm:$0xff] %v463_v22  ;;  %466 = vst [vmem:[%s17072_s26 + $0xb8] sm:$0xff] %v465_v23  ;;  %v467_v24 = vld [vmem:[%s17067_s25 + $0x180] sm:$0xff]  ;;  %v469_v25 = vld [vmem:[%s17067_s25 + $0x190] sm:$0xff] }
  0x1e   : > { %v471_v26 = vld [vmem:[%s17067_s25 + $0x1a0] sm:$0xff]  ;;  %468 = vst [vmem:[%s17072_s26 + $0xc0] sm:$0xff] %v467_v24  ;;  %470 = vst [vmem:[%s17072_s26 + $0xc8] sm:$0xff] %v469_v25  ;;  %v473_v27 = vld [vmem:[%s17067_s25 + $0x1b0] sm:$0xff] }
  0x1f   : > { %472 = vst [vmem:[%s17072_s26 + $0xd0] sm:$0xff] %v471_v26  ;;  %v475_v28 = vld [vmem:[%s17067_s25 + $0x1c0] sm:$0xff]  ;;  %v477_v29 = vld [vmem:[%s17067_s25 + $0x1d0] sm:$0xff]  ;;  %474 = vst [vmem:[%s17072_s26 + $0xd8] sm:$0xff] %v473_v27 }
  0x20   : > { %476 = vst [vmem:[%s17072_s26 + $0xe0] sm:$0xff] %v475_v28  ;;  %478 = vst [vmem:[%s17072_s26 + $0xe8] sm:$0xff] %v477_v29  ;;  %v479_v30 = vld [vmem:[%s17067_s25 + $0x1e0] sm:$0xff]  ;;  %v481_v31 = vld [vmem:[%s17067_s25 + $0x1f0] sm:$0xff] }
  0x21   : > { %v483_v32 = vld [vmem:[%s17067_s25 + $0x200] sm:$0xff]  ;;  %480 = vst [vmem:[%s17072_s26 + $0xf0] sm:$0xff] %v479_v30  ;;  %482 = vst [vmem:[%s17072_s26 + $0xf8] sm:$0xff] %v481_v31  ;;  %v485_v33 = vld [vmem:[%s17067_s25 + $0x210] sm:$0xff] }
  0x22   : > { %484 = vst [vmem:[%s17072_s26 + $0x100] sm:$0xff] %v483_v32  ;;  %v487_v34 = vld [vmem:[%s17067_s25 + $0x220] sm:$0xff]  ;;  %v489_v35 = vld [vmem:[%s17067_s25 + $0x230] sm:$0xff]  ;;  %486 = vst [vmem:[%s17072_s26 + $0x108] sm:$0xff] %v485_v33 }
  0x23   : > { %488 = vst [vmem:[%s17072_s26 + $0x110] sm:$0xff] %v487_v34  ;;  %490 = vst [vmem:[%s17072_s26 + $0x118] sm:$0xff] %v489_v35  ;;  %v491_v36 = vld [vmem:[%s17067_s25 + $0x240] sm:$0xff]  ;;  %v493_v37 = vld [vmem:[%s17067_s25 + $0x250] sm:$0xff] }
  0x24   : > { %v495_v38 = vld [vmem:[%s17067_s25 + $0x260] sm:$0xff]  ;;  %492 = vst [vmem:[%s17072_s26 + $0x120] sm:$0xff] %v491_v36  ;;  %494 = vst [vmem:[%s17072_s26 + $0x128] sm:$0xff] %v493_v37  ;;  %v497_v39 = vld [vmem:[%s17067_s25 + $0x270] sm:$0xff] }
  0x25   : > { %496 = vst [vmem:[%s17072_s26 + $0x130] sm:$0xff] %v495_v38  ;;  %v499_v40 = vld [vmem:[%s17067_s25 + $0x280] sm:$0xff]  ;;  %v501_v41 = vld [vmem:[%s17067_s25 + $0x290] sm:$0xff]  ;;  %498 = vst [vmem:[%s17072_s26 + $0x138] sm:$0xff] %v497_v39 }
  0x26   : > { %500 = vst [vmem:[%s17072_s26 + $0x140] sm:$0xff] %v499_v40  ;;  %502 = vst [vmem:[%s17072_s26 + $0x148] sm:$0xff] %v501_v41  ;;  %v503_v42 = vld [vmem:[%s17067_s25 + $0x2a0] sm:$0xff]  ;;  %v505_v43 = vld [vmem:[%s17067_s25 + $0x2b0] sm:$0xff] }
  0x27   : > { %v507_v44 = vld [vmem:[%s17067_s25 + $0x2c0] sm:$0xff]  ;;  %504 = vst [vmem:[%s17072_s26 + $0x150] sm:$0xff] %v503_v42  ;;  %506 = vst [vmem:[%s17072_s26 + $0x158] sm:$0xff] %v505_v43  ;;  %v509_v45 = vld [vmem:[%s17067_s25 + $0x2d0] sm:$0xff] }
  0x28   : > { %508 = vst [vmem:[%s17072_s26 + $0x160] sm:$0xff] %v507_v44  ;;  %v511_v46 = vld [vmem:[%s17067_s25 + $0x2e0] sm:$0xff]  ;;  %v513_v47 = vld [vmem:[%s17067_s25 + $0x2f0] sm:$0xff]  ;;  %510 = vst [vmem:[%s17072_s26 + $0x168] sm:$0xff] %v509_v45 }
  0x29   : > { %512 = vst [vmem:[%s17072_s26 + $0x170] sm:$0xff] %v511_v46  ;;  %514 = vst [vmem:[%s17072_s26 + $0x178] sm:$0xff] %v513_v47  ;;  %v515_v48 = vld [vmem:[%s17067_s25 + $0x300] sm:$0xff]  ;;  %v517_v49 = vld [vmem:[%s17067_s25 + $0x310] sm:$0xff] }
  0x2a   : > { %v519_v50 = vld [vmem:[%s17067_s25 + $0x320] sm:$0xff]  ;;  %516 = vst [vmem:[%s17072_s26 + $0x180] sm:$0xff] %v515_v48  ;;  %518 = vst [vmem:[%s17072_s26 + $0x188] sm:$0xff] %v517_v49  ;;  %v521_v51 = vld [vmem:[%s17067_s25 + $0x330] sm:$0xff] }
  0x2b   : > { %520 = vst [vmem:[%s17072_s26 + $0x190] sm:$0xff] %v519_v50  ;;  %v523_v52 = vld [vmem:[%s17067_s25 + $0x340] sm:$0xff]  ;;  %v525_v53 = vld [vmem:[%s17067_s25 + $0x350] sm:$0xff]  ;;  %522 = vst [vmem:[%s17072_s26 + $0x198] sm:$0xff] %v521_v51 }
  0x2c   : > { %524 = vst [vmem:[%s17072_s26 + $0x1a0] sm:$0xff] %v523_v52  ;;  %526 = vst [vmem:[%s17072_s26 + $0x1a8] sm:$0xff] %v525_v53  ;;  %v527_v54 = vld [vmem:[%s17067_s25 + $0x360] sm:$0xff]  ;;  %v529_v55 = vld [vmem:[%s17067_s25 + $0x370] sm:$0xff] }
  0x2d   : > { %v531_v56 = vld [vmem:[%s17067_s25 + $0x380] sm:$0xff]  ;;  %528 = vst [vmem:[%s17072_s26 + $0x1b0] sm:$0xff] %v527_v54  ;;  %530 = vst [vmem:[%s17072_s26 + $0x1b8] sm:$0xff] %v529_v55  ;;  %v533_v57 = vld [vmem:[%s17067_s25 + $0x390] sm:$0xff] }
  0x2e   : > { %532 = vst [vmem:[%s17072_s26 + $0x1c0] sm:$0xff] %v531_v56  ;;  %v535_v58 = vld [vmem:[%s17067_s25 + $0x3a0] sm:$0xff]  ;;  %v537_v59 = vld [vmem:[%s17067_s25 + $0x3b0] sm:$0xff]  ;;  %534 = vst [vmem:[%s17072_s26 + $0x1c8] sm:$0xff] %v533_v57 }
  0x2f   : > { %536 = vst [vmem:[%s17072_s26 + $0x1d0] sm:$0xff] %v535_v58  ;;  %538 = vst [vmem:[%s17072_s26 + $0x1d8] sm:$0xff] %v537_v59  ;;  %v539_v60 = vld [vmem:[%s17067_s25 + $0x3c0] sm:$0xff]  ;;  %v541_v61 = vld [vmem:[%s17067_s25 + $0x3d0] sm:$0xff] }
  0x30   : > { %v543_v62 = vld [vmem:[%s17067_s25 + $0x3e0] sm:$0xff]  ;;  %540 = vst [vmem:[%s17072_s26 + $0x1e0] sm:$0xff] %v539_v60  ;;  %542 = vst [vmem:[%s17072_s26 + $0x1e8] sm:$0xff] %v541_v61  ;;  %v545_v63 = vld [vmem:[%s17067_s25 + $0x3f0] sm:$0xff] }
  0x31   : > { %544 = vst [vmem:[%s17072_s26 + $0x1f0] sm:$0xff] %v543_v62  ;;  %v547_v0 = vld [vmem:[%s17067_s25 + $0x400] sm:$0xff]  ;;  %v549_v1 = vld [vmem:[%s17067_s25 + $0x410] sm:$0xff]  ;;  %546 = vst [vmem:[%s17072_s26 + $0x1f8] sm:$0xff] %v545_v63 }
  0x32   : > { %548 = vst [vmem:[%s17072_s26 + $0x200] sm:$0xff] %v547_v0  ;;  %550 = vst [vmem:[%s17072_s26 + $0x208] sm:$0xff] %v549_v1  ;;  %v551_v2 = vld [vmem:[%s17067_s25 + $0x420] sm:$0xff]  ;;  %v553_v3 = vld [vmem:[%s17067_s25 + $0x430] sm:$0xff] }
  0x33   : > { %v555_v4 = vld [vmem:[%s17067_s25 + $0x440] sm:$0xff]  ;;  %552 = vst [vmem:[%s17072_s26 + $0x210] sm:$0xff] %v551_v2  ;;  %554 = vst [vmem:[%s17072_s26 + $0x218] sm:$0xff] %v553_v3  ;;  %v557_v5 = vld [vmem:[%s17067_s25 + $0x450] sm:$0xff] }
  0x34   : > { %556 = vst [vmem:[%s17072_s26 + $0x220] sm:$0xff] %v555_v4  ;;  %v559_v6 = vld [vmem:[%s17067_s25 + $0x460] sm:$0xff]  ;;  %v561_v7 = vld [vmem:[%s17067_s25 + $0x470] sm:$0xff]  ;;  %558 = vst [vmem:[%s17072_s26 + $0x228] sm:$0xff] %v557_v5 }
  0x35   : > { %560 = vst [vmem:[%s17072_s26 + $0x230] sm:$0xff] %v559_v6  ;;  %562 = vst [vmem:[%s17072_s26 + $0x238] sm:$0xff] %v561_v7  ;;  %v563_v8 = vld [vmem:[%s17067_s25 + $0x480] sm:$0xff]  ;;  %v565_v9 = vld [vmem:[%s17067_s25 + $0x490] sm:$0xff] }
  0x36   : > { %v567_v10 = vld [vmem:[%s17067_s25 + $0x4a0] sm:$0xff]  ;;  %564 = vst [vmem:[%s17072_s26 + $0x240] sm:$0xff] %v563_v8  ;;  %566 = vst [vmem:[%s17072_s26 + $0x248] sm:$0xff] %v565_v9  ;;  %v569_v11 = vld [vmem:[%s17067_s25 + $0x4b0] sm:$0xff] }
  0x37   : > { %568 = vst [vmem:[%s17072_s26 + $0x250] sm:$0xff] %v567_v10  ;;  %v571_v12 = vld [vmem:[%s17067_s25 + $0x4c0] sm:$0xff]  ;;  %v573_v13 = vld [vmem:[%s17067_s25 + $0x4d0] sm:$0xff]  ;;  %570 = vst [vmem:[%s17072_s26 + $0x258] sm:$0xff] %v569_v11 }
  0x38   : > { %572 = vst [vmem:[%s17072_s26 + $0x260] sm:$0xff] %v571_v12  ;;  %574 = vst [vmem:[%s17072_s26 + $0x268] sm:$0xff] %v573_v13  ;;  %v575_v14 = vld [vmem:[%s17067_s25 + $0x4e0] sm:$0xff]  ;;  %v577_v15 = vld [vmem:[%s17067_s25 + $0x4f0] sm:$0xff] }
  0x39   : > { %v579_v16 = vld [vmem:[%s17067_s25 + $0x500] sm:$0xff]  ;;  %576 = vst [vmem:[%s17072_s26 + $0x270] sm:$0xff] %v575_v14  ;;  %578 = vst [vmem:[%s17072_s26 + $0x278] sm:$0xff] %v577_v15  ;;  %v581_v17 = vld [vmem:[%s17067_s25 + $0x510] sm:$0xff] }
  0x3a   : > { %580 = vst [vmem:[%s17072_s26 + $0x280] sm:$0xff] %v579_v16  ;;  %v583_v18 = vld [vmem:[%s17067_s25 + $0x520] sm:$0xff]  ;;  %v585_v19 = vld [vmem:[%s17067_s25 + $0x530] sm:$0xff]  ;;  %582 = vst [vmem:[%s17072_s26 + $0x288] sm:$0xff] %v581_v17 }
  0x3b   : > { %584 = vst [vmem:[%s17072_s26 + $0x290] sm:$0xff] %v583_v18  ;;  %586 = vst [vmem:[%s17072_s26 + $0x298] sm:$0xff] %v585_v19  ;;  %v587_v20 = vld [vmem:[%s17067_s25 + $0x540] sm:$0xff]  ;;  %v589_v21 = vld [vmem:[%s17067_s25 + $0x550] sm:$0xff] }
  0x3c   : > { %v591_v22 = vld [vmem:[%s17067_s25 + $0x560] sm:$0xff]  ;;  %588 = vst [vmem:[%s17072_s26 + $0x2a0] sm:$0xff] %v587_v20  ;;  %590 = vst [vmem:[%s17072_s26 + $0x2a8] sm:$0xff] %v589_v21  ;;  %v593_v23 = vld [vmem:[%s17067_s25 + $0x570] sm:$0xff] }
  0x3d   : > { %592 = vst [vmem:[%s17072_s26 + $0x2b0] sm:$0xff] %v591_v22  ;;  %v595_v24 = vld [vmem:[%s17067_s25 + $0x580] sm:$0xff]  ;;  %v597_v25 = vld [vmem:[%s17067_s25 + $0x590] sm:$0xff]  ;;  %594 = vst [vmem:[%s17072_s26 + $0x2b8] sm:$0xff] %v593_v23 }
  0x3e   : > { %596 = vst [vmem:[%s17072_s26 + $0x2c0] sm:$0xff] %v595_v24  ;;  %598 = vst [vmem:[%s17072_s26 + $0x2c8] sm:$0xff] %v597_v25  ;;  %v599_v26 = vld [vmem:[%s17067_s25 + $0x5a0] sm:$0xff]  ;;  %v601_v27 = vld [vmem:[%s17067_s25 + $0x5b0] sm:$0xff] }
  0x3f   : > { %v603_v28 = vld [vmem:[%s17067_s25 + $0x5c0] sm:$0xff]  ;;  %600 = vst [vmem:[%s17072_s26 + $0x2d0] sm:$0xff] %v599_v26  ;;  %602 = vst [vmem:[%s17072_s26 + $0x2d8] sm:$0xff] %v601_v27  ;;  %v605_v29 = vld [vmem:[%s17067_s25 + $0x5d0] sm:$0xff] }
  0x40   : > { %604 = vst [vmem:[%s17072_s26 + $0x2e0] sm:$0xff] %v603_v28  ;;  %v607_v30 = vld [vmem:[%s17067_s25 + $0x5e0] sm:$0xff]  ;;  %v609_v31 = vld [vmem:[%s17067_s25 + $0x5f0] sm:$0xff]  ;;  %606 = vst [vmem:[%s17072_s26 + $0x2e8] sm:$0xff] %v605_v29 }
  0x41   : > { %608 = vst [vmem:[%s17072_s26 + $0x2f0] sm:$0xff] %v607_v30  ;;  %610 = vst [vmem:[%s17072_s26 + $0x2f8] sm:$0xff] %v609_v31  ;;  %v611_v32 = vld [vmem:[%s17067_s25 + $0x600] sm:$0xff]  ;;  %v613_v33 = vld [vmem:[%s17067_s25 + $0x610] sm:$0xff] }
  0x42   : > { %v615_v34 = vld [vmem:[%s17067_s25 + $0x620] sm:$0xff]  ;;  %612 = vst [vmem:[%s17072_s26 + $0x300] sm:$0xff] %v611_v32  ;;  %614 = vst [vmem:[%s17072_s26 + $0x308] sm:$0xff] %v613_v33  ;;  %v617_v35 = vld [vmem:[%s17067_s25 + $0x630] sm:$0xff] }
  0x43   : > { %616 = vst [vmem:[%s17072_s26 + $0x310] sm:$0xff] %v615_v34  ;;  %v619_v36 = vld [vmem:[%s17067_s25 + $0x640] sm:$0xff]  ;;  %v621_v37 = vld [vmem:[%s17067_s25 + $0x650] sm:$0xff]  ;;  %618 = vst [vmem:[%s17072_s26 + $0x318] sm:$0xff] %v617_v35 }
  0x44   : > { %620 = vst [vmem:[%s17072_s26 + $0x320] sm:$0xff] %v619_v36  ;;  %622 = vst [vmem:[%s17072_s26 + $0x328] sm:$0xff] %v621_v37  ;;  %v623_v38 = vld [vmem:[%s17067_s25 + $0x660] sm:$0xff]  ;;  %v625_v39 = vld [vmem:[%s17067_s25 + $0x670] sm:$0xff] }
  0x45   : > { %v627_v40 = vld [vmem:[%s17067_s25 + $0x680] sm:$0xff]  ;;  %624 = vst [vmem:[%s17072_s26 + $0x330] sm:$0xff] %v623_v38  ;;  %626 = vst [vmem:[%s17072_s26 + $0x338] sm:$0xff] %v625_v39  ;;  %v629_v41 = vld [vmem:[%s17067_s25 + $0x690] sm:$0xff] }
  0x46   : > { %628 = vst [vmem:[%s17072_s26 + $0x340] sm:$0xff] %v627_v40  ;;  %v631_v42 = vld [vmem:[%s17067_s25 + $0x6a0] sm:$0xff]  ;;  %v633_v43 = vld [vmem:[%s17067_s25 + $0x6b0] sm:$0xff]  ;;  %630 = vst [vmem:[%s17072_s26 + $0x348] sm:$0xff] %v629_v41 }
  0x47   : > { %632 = vst [vmem:[%s17072_s26 + $0x350] sm:$0xff] %v631_v42  ;;  %634 = vst [vmem:[%s17072_s26 + $0x358] sm:$0xff] %v633_v43  ;;  %v635_v44 = vld [vmem:[%s17067_s25 + $0x6c0] sm:$0xff]  ;;  %v637_v45 = vld [vmem:[%s17067_s25 + $0x6d0] sm:$0xff] }
  0x48   : > { %v639_v46 = vld [vmem:[%s17067_s25 + $0x6e0] sm:$0xff]  ;;  %636 = vst [vmem:[%s17072_s26 + $0x360] sm:$0xff] %v635_v44  ;;  %638 = vst [vmem:[%s17072_s26 + $0x368] sm:$0xff] %v637_v45  ;;  %v641_v47 = vld [vmem:[%s17067_s25 + $0x6f0] sm:$0xff] }
  0x49   : > { %640 = vst [vmem:[%s17072_s26 + $0x370] sm:$0xff] %v639_v46  ;;  %v643_v48 = vld [vmem:[%s17067_s25 + $0x700] sm:$0xff]  ;;  %v645_v49 = vld [vmem:[%s17067_s25 + $0x710] sm:$0xff]  ;;  %642 = vst [vmem:[%s17072_s26 + $0x378] sm:$0xff] %v641_v47 }
  0x4a   : > { %644 = vst [vmem:[%s17072_s26 + $0x380] sm:$0xff] %v643_v48  ;;  %646 = vst [vmem:[%s17072_s26 + $0x388] sm:$0xff] %v645_v49  ;;  %v647_v50 = vld [vmem:[%s17067_s25 + $0x720] sm:$0xff]  ;;  %v649_v51 = vld [vmem:[%s17067_s25 + $0x730] sm:$0xff] }
  0x4b   : > { %v651_v52 = vld [vmem:[%s17067_s25 + $0x740] sm:$0xff]  ;;  %648 = vst [vmem:[%s17072_s26 + $0x390] sm:$0xff] %v647_v50  ;;  %650 = vst [vmem:[%s17072_s26 + $0x398] sm:$0xff] %v649_v51  ;;  %v653_v53 = vld [vmem:[%s17067_s25 + $0x750] sm:$0xff] }
  0x4c   : > { %652 = vst [vmem:[%s17072_s26 + $0x3a0] sm:$0xff] %v651_v52  ;;  %v655_v54 = vld [vmem:[%s17067_s25 + $0x760] sm:$0xff]  ;;  %v657_v55 = vld [vmem:[%s17067_s25 + $0x770] sm:$0xff]  ;;  %654 = vst [vmem:[%s17072_s26 + $0x3a8] sm:$0xff] %v653_v53 }
  0x4d   : > { %656 = vst [vmem:[%s17072_s26 + $0x3b0] sm:$0xff] %v655_v54  ;;  %658 = vst [vmem:[%s17072_s26 + $0x3b8] sm:$0xff] %v657_v55  ;;  %v659_v56 = vld [vmem:[%s17067_s25 + $0x780] sm:$0xff]  ;;  %v661_v57 = vld [vmem:[%s17067_s25 + $0x790] sm:$0xff] }
  0x4e   : > { %v663_v58 = vld [vmem:[%s17067_s25 + $0x7a0] sm:$0xff]  ;;  %660 = vst [vmem:[%s17072_s26 + $0x3c0] sm:$0xff] %v659_v56  ;;  %662 = vst [vmem:[%s17072_s26 + $0x3c8] sm:$0xff] %v661_v57  ;;  %v665_v59 = vld [vmem:[%s17067_s25 + $0x7b0] sm:$0xff] }
  0x4f   : > { %664 = vst [vmem:[%s17072_s26 + $0x3d0] sm:$0xff] %v663_v58  ;;  %v667_v60 = vld [vmem:[%s17067_s25 + $0x7c0] sm:$0xff]  ;;  %v669_v61 = vld [vmem:[%s17067_s25 + $0x7d0] sm:$0xff]  ;;  %666 = vst [vmem:[%s17072_s26 + $0x3d8] sm:$0xff] %v665_v59 }
  0x50   : > { %668 = vst [vmem:[%s17072_s26 + $0x3e0] sm:$0xff] %v667_v60  ;;  %670 = vst [vmem:[%s17072_s26 + $0x3e8] sm:$0xff] %v669_v61  ;;  %v671_v62 = vld [vmem:[%s17067_s25 + $0x7e0] sm:$0xff]  ;;  %v673_v63 = vld [vmem:[%s17067_s25 + $0x7f0] sm:$0xff] }
  0x51   : > { %672 = vst [vmem:[%s17072_s26 + $0x3f0] sm:$0xff] %v671_v62  ;;  %674 = vst [vmem:[%s17072_s26 + $0x3f8] sm:$0xff] %v673_v63 }
  0x52 PF: > { %p14067_p5 = scmp.ge.s32.totalorder %s17004_s14, 1  ;;  %p679_p6 = scmp.lt.s32.totalorder %s17004_s14, 3 }
  0x54   : > { %p680_p7 = pnand %p14067_p5, %p679_p6 }
  0x56   : > { %683 = sbr.rel (%p680_p7) target bundleno = 4038 (0xfc6), region = 66 }
  0x5d   : > { %s686_s27 = sand.u32 1, %s16996_s12   ;;  %v17333_v0 = vld [vmem:[%s21806_s1] sm:$0xff]  ;;  %vm13933_vm0 = vcmask 261120   ;;  %p709_p8 = scmp.lt.s32.totalorder %s14060_s15, 1 }
  0x5e   : > { %v17338_v1 = vld [vmem:[%s21806_s1 + $0x20] sm:$0xff]  ;;  %s14068_s5 = sshll.u32 %s686_s27, 10 }
  0x5f   : > { %v14070_v2 = vcombine.low %v17333_v0, %v17338_v1  ;;  %v14071_v3 = vcombine.high %v17333_v0, %v17338_v1  ;;  %s17344_s6 = scalar_lea.vmem [#allocation2], %s14068_s5  ;;  %v850_v36 = vld [vmem:[%s21806_s1 + $0x40] sm:$0xff]  ;;  %s22137_s15 = smov (!%p709_p8, %s14060_s15), 1 }
  0x60   : > { %v16790_v4 = vld [vmem:[%s17344_s6 + $0x4] ss:$8 sps:$4 sm:$0xff]   ;;  %v16792_v5 = vld [vmem:[%s17344_s6] ss:$8 sps:$4 sm:$0xff]   ;;  %v16793_v6 = vld [vmem:[%s17344_s6 + $0x14] ss:$8 sps:$4 sm:$0xff]  }
  0x61   : > { %5354 = vmatprep.mubr.bf16.mxu0 %v14071_v3  ;;  %5322 = vmatprep.subr.bf16.mxu0 %v16790_v4  ;;  %v16795_v7 = vld [vmem:[%s17344_s6 + $0x10] ss:$8 sps:$4 sm:$0xff]   ;;  %v16796_v8 = vld [vmem:[%s17344_s6 + $0x24] ss:$8 sps:$4 sm:$0xff]   ;;  %v16798_v9 = vld [vmem:[%s17344_s6 + $0x20] ss:$8 sps:$4 sm:$0xff]  }
  0x62   : > { %15052 = vmatprep.subr.bf16.mxu1 %v16790_v4  ;;  %5323 = vmatpush1.bf16.msra.mxu0 %v16792_v5  ;;  %v16799_v10 = vld [vmem:[%s17344_s6 + $0x34] ss:$8 sps:$4 sm:$0xff]   ;;  %v16801_v11 = vld [vmem:[%s17344_s6 + $0x30] ss:$8 sps:$4 sm:$0xff]   ;;  %v16802_v12 = vld [vmem:[%s17344_s6 + $0x44] ss:$8 sps:$4 sm:$0xff]  }
  0x63   : > { %15068 = vmatpush1.bf16.msra.mxu1 %v16792_v5  ;;  %5324 = vmatprep.subr.bf16.mxu0 %v16793_v6  ;;  %v16804_v13 = vld [vmem:[%s17344_s6 + $0x40] ss:$8 sps:$4 sm:$0xff]   ;;  %v16805_v14 = vld [vmem:[%s17344_s6 + $0x54] ss:$8 sps:$4 sm:$0xff]   ;;  %v16807_v15 = vld [vmem:[%s17344_s6 + $0x50] ss:$8 sps:$4 sm:$0xff]  }
  0x64   : > { %15053 = vmatprep.subr.bf16.mxu1 %v16793_v6  ;;  %v16808_v16 = vld [vmem:[%s17344_s6 + $0x64] ss:$8 sps:$4 sm:$0xff]   ;;  %v16810_v17 = vld [vmem:[%s17344_s6 + $0x60] ss:$8 sps:$4 sm:$0xff]   ;;  %v16811_v18 = vld [vmem:[%s17344_s6 + $0x74] ss:$8 sps:$4 sm:$0xff]  }
  0x65   : > { %v16813_v19 = vld [vmem:[%s17344_s6 + $0x70] ss:$8 sps:$4 sm:$0xff]   ;;  %v16814_v20 = vld [vmem:[%s17344_s6 + $0x84] ss:$8 sps:$4 sm:$0xff]   ;;  %v16816_v21 = vld [vmem:[%s17344_s6 + $0x80] ss:$8 sps:$4 sm:$0xff]  }
  0x66   : > { %5325 = vmatpush1.bf16.msra.mxu0 %v16795_v7  ;;  %v16817_v22 = vld [vmem:[%s17344_s6 + $0x94] ss:$8 sps:$4 sm:$0xff]   ;;  %v16819_v23 = vld [vmem:[%s17344_s6 + $0x90] ss:$8 sps:$4 sm:$0xff]   ;;  %v16820_v24 = vld [vmem:[%s17344_s6 + $0xa4] ss:$8 sps:$4 sm:$0xff]  }
  0x67   : > { %15069 = vmatpush1.bf16.msra.mxu1 %v16795_v7  ;;  %5326 = vmatprep.subr.bf16.mxu0 %v16796_v8  ;;  %v16822_v25 = vld [vmem:[%s17344_s6 + $0xa0] ss:$8 sps:$4 sm:$0xff]   ;;  %v16823_v26 = vld [vmem:[%s17344_s6 + $0xb4] ss:$8 sps:$4 sm:$0xff]   ;;  %v16825_v27 = vld [vmem:[%s17344_s6 + $0xb0] ss:$8 sps:$4 sm:$0xff]  }
  0x68   : > { %15054 = vmatprep.subr.bf16.mxu1 %v16796_v8  ;;  %v16826_v28 = vld [vmem:[%s17344_s6 + $0xc4] ss:$8 sps:$4 sm:$0xff]   ;;  %v16828_v29 = vld [vmem:[%s17344_s6 + $0xc0] ss:$8 sps:$4 sm:$0xff]   ;;  %v16829_v30 = vld [vmem:[%s17344_s6 + $0xd4] ss:$8 sps:$4 sm:$0xff]  }
  0x69   : > { %v16831_v31 = vld [vmem:[%s17344_s6 + $0xd0] ss:$8 sps:$4 sm:$0xff]   ;;  %v16832_v32 = vld [vmem:[%s17344_s6 + $0xe4] ss:$8 sps:$4 sm:$0xff]   ;;  %v16834_v33 = vld [vmem:[%s17344_s6 + $0xe0] ss:$8 sps:$4 sm:$0xff]  }
  0x6a   : > { %5327 = vmatpush1.bf16.msra.mxu0 %v16798_v9  ;;  %v16835_v34 = vld [vmem:[%s17344_s6 + $0xf4] ss:$8 sps:$4 sm:$0xff]   ;;  %v16837_v35 = vld [vmem:[%s17344_s6 + $0xf0] ss:$8 sps:$4 sm:$0xff]   ;;  %v854_v37 = vld [vmem:[%s21806_s1 + $0x60] sm:$0xff]  ;;  %s14069_s8 = sshll.u32 %s22137_s15, 1 }
  0x6b   : > { %15070 = vmatpush1.bf16.msra.mxu1 %v16798_v9  ;;  %5328 = vmatprep.subr.bf16.mxu0 %v16799_v10  ;;  %v16840_v38 = vld [vmem:[%s17344_s6 + $0x104] ss:$8 sps:$4 sm:$0xff]   ;;  %v16838_v39 = vld [vmem:[%s17344_s6 + $0x100] ss:$8 sps:$4 sm:$0xff]   ;;  %v14079_v40 = vcombine.high %v850_v36, %v854_v37  ;;  %v16843_v41 = vld [vmem:[%s17344_s6 + $0x114] ss:$8 sps:$4 sm:$0xff]   ;;  %v14078_v46 = vcombine.low %v850_v36, %v854_v37  ;;  %s712_s11 = scalar_lea.vmem %s21808_s3, %s14069_s8 }
  0x6c   : > { %15055 = vmatprep.subr.bf16.mxu1 %v16799_v10  ;;  %v16841_v42 = vld [vmem:[%s17344_s6 + $0x110] ss:$8 sps:$4 sm:$0xff]   ;;  %v858_v43 = vld [vmem:[%s21806_s1 + $0x80] sm:$0xff]  ;;  %v16849_v49 = vld [vmem:[%s17344_s6 + $0x134] ss:$8 sps:$4 sm:$0xff]  }
  0x6d   : > { %v862_v44 = vld [vmem:[%s21806_s1 + $0xa0] sm:$0xff]  ;;  %v16847_v50 = vld [vmem:[%s17344_s6 + $0x130] ss:$8 sps:$4 sm:$0xff]   ;;  %v16855_v57 = vld [vmem:[%s17344_s6 + $0x154] ss:$8 sps:$4 sm:$0xff]  }
  0x6e   : > { %5329 = vmatpush1.bf16.msra.mxu0 %v16801_v11  ;;  %v16846_v45 = vld [vmem:[%s17344_s6 + $0x124] ss:$8 sps:$4 sm:$0xff]   ;;  %v14087_v47 = vcombine.high %v858_v43, %v862_v44  ;;  %v16844_v48 = vld [vmem:[%s17344_s6 + $0x120] ss:$8 sps:$4 sm:$0xff]   ;;  %v14086_v54 = vcombine.low %v858_v43, %v862_v44  ;;  %v16853_v58 = vld [vmem:[%s17344_s6 + $0x150] ss:$8 sps:$4 sm:$0xff]  }
  0x6f   : > { %15071 = vmatpush1.bf16.msra.mxu1 %v16801_v11  ;;  %5330 = vmatprep.subr.bf16.mxu0 %v16802_v12  ;;  %v866_v51 = vld [vmem:[%s21806_s1 + $0xc0] sm:$0xff]  ;;  %v16861_v1 = vld [vmem:[%s17344_s6 + $0x174] ss:$8 sps:$4 sm:$0xff]   ;;  %v16865_v10 = vld [vmem:[%s17344_s6 + $0x190] ss:$8 sps:$4 sm:$0xff]  }
  0x70   : > { %15056 = vmatprep.subr.bf16.mxu1 %v16802_v12  ;;  %v870_v52 = vld [vmem:[%s21806_s1 + $0xe0] sm:$0xff]  ;;  %v16867_v9 = vld [vmem:[%s17344_s6 + $0x194] ss:$8 sps:$4 sm:$0xff]  }
  0x71   : > { %v16852_v53 = vld [vmem:[%s17344_s6 + $0x144] ss:$8 sps:$4 sm:$0xff]   ;;  %v14095_v55 = vcombine.high %v866_v51, %v870_v52  ;;  %v16850_v56 = vld [vmem:[%s17344_s6 + $0x140] ss:$8 sps:$4 sm:$0xff]   ;;  %v14094_v62 = vcombine.low %v866_v51, %v870_v52 }
  0x72   : > { %5331 = vmatpush1.bf16.msra.mxu0 %v16804_v13  ;;  %v874_v59 = vld [vmem:[%s21806_s1 + $0x100] sm:$0xff] }
  0x73   : > { %15072 = vmatpush1.bf16.msra.mxu1 %v16804_v13  ;;  %5332 = vmatprep.subr.bf16.mxu0 %v16805_v14  ;;  %v878_v60 = vld [vmem:[%s21806_s1 + $0x120] sm:$0xff] }
  0x74   : > { %15057 = vmatprep.subr.bf16.mxu1 %v16805_v14  ;;  %v16858_v61 = vld [vmem:[%s17344_s6 + $0x164] ss:$8 sps:$4 sm:$0xff]   ;;  %v14103_v63 = vcombine.high %v874_v59, %v878_v60  ;;  %v16856_v0 = vld [vmem:[%s17344_s6 + $0x160] ss:$8 sps:$4 sm:$0xff]   ;;  %v14102_v6 = vcombine.low %v874_v59, %v878_v60 }
  0x75   : > { %v882_v3 = vld [vmem:[%s21806_s1 + $0x140] sm:$0xff] }
  0x76   : > { %5333 = vmatpush1.bf16.msra.mxu0 %v16807_v15  ;;  %v886_v4 = vld [vmem:[%s21806_s1 + $0x160] sm:$0xff] }
  0x77   : > { %5334 = vmatprep.subr.bf16.mxu0 %v16808_v16  ;;  %15073 = vmatpush1.bf16.msra.mxu1 %v16807_v15  ;;  %v16864_v5 = vld [vmem:[%s17344_s6 + $0x184] ss:$8 sps:$4 sm:$0xff]   ;;  %v14111_v7 = vcombine.high %v882_v3, %v886_v4  ;;  %v16862_v8 = vld [vmem:[%s17344_s6 + $0x180] ss:$8 sps:$4 sm:$0xff]   ;;  %v14110_v14 = vcombine.low %v882_v3, %v886_v4 }
  0x78   : > { %15058 = vmatprep.subr.bf16.mxu1 %v16808_v16  ;;  %v890_v11 = vld [vmem:[%s21806_s1 + $0x180] sm:$0xff] }
  0x79   : > { %v894_v12 = vld [vmem:[%s21806_s1 + $0x1a0] sm:$0xff] }
  0x7a   : > { %5335 = vmatpush1.bf16.msra.mxu0 %v16810_v17  ;;  %v16870_v13 = vld [vmem:[%s17344_s6 + $0x1a4] ss:$8 sps:$4 sm:$0xff]   ;;  %v14119_v15 = vcombine.high %v890_v11, %v894_v12  ;;  %v16868_v16 = vld [vmem:[%s17344_s6 + $0x1a0] ss:$8 sps:$4 sm:$0xff]  }
  0x7b   : > { %5336 = vmatprep.subr.bf16.mxu0 %v16811_v18  ;;  %15074 = vmatpush1.bf16.msra.mxu1 %v16810_v17  ;;  %v16873_v17 = vld [vmem:[%s17344_s6 + $0x1b4] ss:$8 sps:$4 sm:$0xff]   ;;  %v918_v36 = vld [vmem:[%s21806_s1 + $0x260] sm:$0xff] }
  0x7c   : > { %15059 = vmatprep.subr.bf16.mxu1 %v16811_v18  ;;  %v16871_v18 = vld [vmem:[%s17344_s6 + $0x1b0] ss:$8 sps:$4 sm:$0xff]   ;;  %v930_v43 = vld [vmem:[%s21806_s1 + $0x2c0] sm:$0xff] }
  0x7d   : > { %v934_v44 = vld [vmem:[%s21806_s1 + $0x2e0] sm:$0xff] }
  0x7e   : > { %5337 = vmatpush1.bf16.msra.mxu0 %v16813_v19  ;;  %v946_v51 = vld [vmem:[%s21806_s1 + $0x340] sm:$0xff] }
  0x7f   : > { %5338 = vmatprep.subr.bf16.mxu0 %v16814_v20  ;;  %15075 = vmatpush1.bf16.msra.mxu1 %v16813_v19  ;;  %v898_v19 = vld [vmem:[%s21806_s1 + $0x1c0] sm:$0xff] }
  0x80   : > { %15060 = vmatprep.subr.bf16.mxu1 %v16814_v20  ;;  %v902_v20 = vld [vmem:[%s21806_s1 + $0x1e0] sm:$0xff] }
  0x81   : > { %v950_v52 = vld [vmem:[%s21806_s1 + $0x360] sm:$0xff] }
  0x82   : > { %5339 = vmatpush1.bf16.msra.mxu0 %v16816_v21  ;;  %v962_v59 = vld [vmem:[%s21806_s1 + $0x3c0] sm:$0xff] }
  0x83   : > { %5340 = vmatprep.subr.bf16.mxu0 %v16817_v22  ;;  %15076 = vmatpush1.bf16.msra.mxu1 %v16816_v21  ;;  %v16876_v21 = vld [vmem:[%s17344_s6 + $0x1c4] ss:$8 sps:$4 sm:$0xff]  }
  0x84   : > { %15061 = vmatprep.subr.bf16.mxu1 %v16817_v22  ;;  %v14118_v22 = vcombine.low %v890_v11, %v894_v12  ;;  %v966_v60 = vld [vmem:[%s21806_s1 + $0x3e0] sm:$0xff] }
  0x85   : > { %v978_v3 = vld [vmem:[%s21806_s1 + $0x440] sm:$0xff] }
  0x86   : > { %5341 = vmatpush1.bf16.msra.mxu0 %v16819_v23  ;;  %v982_v4 = vld [vmem:[%s21806_s1 + $0x460] sm:$0xff] }
  0x87   : > { %5342 = vmatprep.subr.bf16.mxu0 %v16820_v24  ;;  %15077 = vmatpush1.bf16.msra.mxu1 %v16819_v23  ;;  %v14127_v23 = vcombine.high %v898_v19, %v902_v20  ;;  %v994_v11 = vld [vmem:[%s21806_s1 + $0x4c0] sm:$0xff] }
  0x88   : > { %15062 = vmatprep.subr.bf16.mxu1 %v16820_v24  ;;  %v16874_v24 = vld [vmem:[%s17344_s6 + $0x1c0] ss:$8 sps:$4 sm:$0xff]  }
  0x89   : > { %v998_v12 = vld [vmem:[%s21806_s1 + $0x4e0] sm:$0xff] }
  0x8a   : > { %5343 = vmatpush1.bf16.msra.mxu0 %v16822_v25 }
  0x8b   : > { %5344 = vmatprep.subr.bf16.mxu0 %v16823_v26  ;;  %15078 = vmatpush1.bf16.msra.mxu1 %v16822_v25  ;;  %v16879_v25 = vld [vmem:[%s17344_s6 + $0x1d4] ss:$8 sps:$4 sm:$0xff]  }
  0x8c   : > { %15063 = vmatprep.subr.bf16.mxu1 %v16823_v26  ;;  %v16877_v26 = vld [vmem:[%s17344_s6 + $0x1d0] ss:$8 sps:$4 sm:$0xff]  }
  0x8e   : > { %5345 = vmatpush1.bf16.msra.mxu0 %v16825_v27 }
  0x8f   : > { %5346 = vmatprep.subr.bf16.mxu0 %v16826_v28  ;;  %15079 = vmatpush1.bf16.msra.mxu1 %v16825_v27  ;;  %v906_v27 = vld [vmem:[%s21806_s1 + $0x200] sm:$0xff] }
  0x90   : > { %15064 = vmatprep.subr.bf16.mxu1 %v16826_v28  ;;  %v910_v28 = vld [vmem:[%s21806_s1 + $0x220] sm:$0xff] }
  0x91   : > { %v14134_v37 = vcombine.low %v906_v27, %v910_v28 }
  0x92   : > { %5347 = vmatpush1.bf16.msra.mxu0 %v16828_v29 }
  0x93   : > { %5348 = vmatprep.subr.bf16.mxu0 %v16829_v30  ;;  %15080 = vmatpush1.bf16.msra.mxu1 %v16828_v29  ;;  %v16882_v29 = vld [vmem:[%s17344_s6 + $0x1e4] ss:$8 sps:$4 sm:$0xff]  }
  0x94   : > { %15065 = vmatprep.subr.bf16.mxu1 %v16829_v30  ;;  %v14126_v30 = vcombine.low %v898_v19, %v902_v20  ;;  %v1010_v19 = vld [vmem:[%s21806_s1 + $0x540] sm:$0xff] }
  0x95   : > { %v1014_v20 = vld [vmem:[%s21806_s1 + $0x560] sm:$0xff] }
  0x96   : > { %5349 = vmatpush1.bf16.msra.mxu0 %v16831_v31 }
  0x97   : > { %5350 = vmatprep.subr.bf16.mxu0 %v16832_v32  ;;  %15081 = vmatpush1.bf16.msra.mxu1 %v16831_v31  ;;  %v14135_v31 = vcombine.high %v906_v27, %v910_v28  ;;  %v851_v27 = vld [vmem:[%s21806_s1 + $0x48] sm:$0xff] }
  0x98   : > { %15066 = vmatprep.subr.bf16.mxu1 %v16832_v32  ;;  %v16880_v32 = vld [vmem:[%s17344_s6 + $0x1e0] ss:$8 sps:$4 sm:$0xff]  }
  0x99   : > { %v855_v28 = vld [vmem:[%s21806_s1 + $0x68] sm:$0xff] }
  0x9a   : > { %5351 = vmatpush1.bf16.msra.mxu0 %v16834_v33 }
  0x9b   : > { %5352 = vmatprep.subr.bf16.mxu0 %v16835_v34  ;;  %15082 = vmatpush1.bf16.msra.mxu1 %v16834_v33  ;;  %v16885_v33 = vld [vmem:[%s17344_s6 + $0x1f4] ss:$8 sps:$4 sm:$0xff]  }
  0x9c   : > { %15067 = vmatprep.subr.bf16.mxu1 %v16835_v34  ;;  %v16883_v34 = vld [vmem:[%s17344_s6 + $0x1f0] ss:$8 sps:$4 sm:$0xff]  }
  0x9e   : > { %5353 = vmatpush1.bf16.msra.mxu0 %v16837_v35 }
  0x9f   : > { %5995 = vmatprep.subr.bf16.mxu0 %v16840_v38  ;;  %15083 = vmatpush1.bf16.msra.mxu1 %v16837_v35  ;;  %v914_v35 = vld [vmem:[%s21806_s1 + $0x240] sm:$0xff] }
  0xa0   : > { %v14143_v38 = vcombine.high %v914_v35, %v918_v36 }
  0xa1   : > { %5355 = vmatmul.mubr.bf16.vlgmr.msra.gmra.mrb[0].mxu0 %v14070_v2  ;;  %v16859_v2 = vld [vmem:[%s17344_s6 + $0x170] ss:$8 sps:$4 sm:$0xff]  }
  0xa2   : > { %5364 = vmatprep.mubr.bf16.mxu0 %v14079_v40  ;;  %5996 = vmatpush1.bf16.msra.mxu0 %v16838_v39  ;;  %v922_v39 = vld [vmem:[%s21806_s1 + $0x280] sm:$0xff] }
  0xa3   : > { %5997 = vmatprep.subr.bf16.mxu0 %v16843_v41  ;;  %v926_v40 = vld [vmem:[%s21806_s1 + $0x2a0] sm:$0xff]  ;;  %v14142_v41 = vcombine.low %v914_v35, %v918_v36  ;;  %v867_v35 = vld [vmem:[%s21806_s1 + $0xc8] sm:$0xff] }
  0xa4   : > { %v871_v36 = vld [vmem:[%s21806_s1 + $0xe8] sm:$0xff] }
  0xa6   : > { %5998 = vmatpush1.bf16.msra.mxu0 %v16841_v42  ;;  %v14151_v42 = vcombine.high %v922_v39, %v926_v40 }
  0xa7   : > { %5999 = vmatprep.subr.bf16.mxu0 %v16846_v45  ;;  %v14150_v45 = vcombine.low %v922_v39, %v926_v40  ;;  %v875_v39 = vld [vmem:[%s21806_s1 + $0x108] sm:$0xff] }
  0xa8   : > { %v879_v40 = vld [vmem:[%s21806_s1 + $0x128] sm:$0xff] }
  0xa9   : > { %5365 = vmatmul.mubr.bf16.gmra.mrb[4].mxu0 %v14078_v46  ;;  %v14159_v46 = vcombine.high %v930_v43, %v934_v44 }
  0xaa   : > { %5374 = vmatprep.mubr.bf16.mxu0 %v14087_v47  ;;  %6000 = vmatpush1.bf16.msra.mxu0 %v16844_v48  ;;  %v938_v47 = vld [vmem:[%s21806_s1 + $0x300] sm:$0xff] }
  0xab   : > { %6001 = vmatprep.subr.bf16.mxu0 %v16849_v49  ;;  %v942_v48 = vld [vmem:[%s21806_s1 + $0x320] sm:$0xff]  ;;  %v14158_v49 = vcombine.low %v930_v43, %v934_v44  ;;  %v883_v43 = vld [vmem:[%s21806_s1 + $0x148] sm:$0xff] }
  0xac   : > { %v887_v44 = vld [vmem:[%s21806_s1 + $0x168] sm:$0xff] }
  0xae   : > { %6002 = vmatpush1.bf16.msra.mxu0 %v16847_v50  ;;  %v14167_v50 = vcombine.high %v938_v47, %v942_v48 }
  0xaf   : > { %6003 = vmatprep.subr.bf16.mxu0 %v16852_v53  ;;  %v14166_v53 = vcombine.low %v938_v47, %v942_v48  ;;  %v891_v47 = vld [vmem:[%s21806_s1 + $0x188] sm:$0xff] }
  0xb0   : > { %v895_v48 = vld [vmem:[%s21806_s1 + $0x1a8] sm:$0xff] }
  0xb1   : > { %5375 = vmatmul.mubr.bf16.gmra.mrb[8].mxu0 %v14086_v54  ;;  %v14175_v54 = vcombine.high %v946_v51, %v950_v52 }
  0xb2   : > { %5384 = vmatprep.mubr.bf16.mxu0 %v14095_v55  ;;  %6004 = vmatpush1.bf16.msra.mxu0 %v16850_v56  ;;  %v954_v55 = vld [vmem:[%s21806_s1 + $0x380] sm:$0xff] }
  0xb3   : > { %6005 = vmatprep.subr.bf16.mxu0 %v16855_v57  ;;  %v958_v56 = vld [vmem:[%s21806_s1 + $0x3a0] sm:$0xff]  ;;  %v14174_v57 = vcombine.low %v946_v51, %v950_v52  ;;  %v899_v51 = vld [vmem:[%s21806_s1 + $0x1c8] sm:$0xff] }
  0xb4   : > { %v903_v52 = vld [vmem:[%s21806_s1 + $0x1e8] sm:$0xff] }
  0xb6   : > { %6006 = vmatpush1.bf16.msra.mxu0 %v16853_v58  ;;  %v14183_v58 = vcombine.high %v954_v55, %v958_v56 }
  0xb7   : > { %6007 = vmatprep.subr.bf16.mxu0 %v16858_v61  ;;  %v14182_v61 = vcombine.low %v954_v55, %v958_v56  ;;  %v907_v55 = vld [vmem:[%s21806_s1 + $0x208] sm:$0xff] }
  0xb8   : > { %v911_v56 = vld [vmem:[%s21806_s1 + $0x228] sm:$0xff] }
  0xb9   : > { %5385 = vmatmul.mubr.bf16.gmra.mrb[12].mxu0 %v14094_v62  ;;  %v14191_v62 = vcombine.high %v962_v59, %v966_v60 }
  0xba   : > { %5394 = vmatprep.mubr.bf16.mxu0 %v14103_v63  ;;  %6008 = vmatpush1.bf16.msra.mxu0 %v16856_v0  ;;  %v970_v63 = vld [vmem:[%s21806_s1 + $0x400] sm:$0xff] }
  0xbb   : > { %6009 = vmatprep.subr.bf16.mxu0 %v16861_v1  ;;  %v974_v0 = vld [vmem:[%s21806_s1 + $0x420] sm:$0xff]  ;;  %v14190_v1 = vcombine.low %v962_v59, %v966_v60  ;;  %v915_v59 = vld [vmem:[%s21806_s1 + $0x248] sm:$0xff] }
  0xbc   : > { %v919_v60 = vld [vmem:[%s21806_s1 + $0x268] sm:$0xff] }
  0xbe   : > { %6010 = vmatpush1.bf16.msra.mxu0 %v16859_v2  ;;  %v14199_v2 = vcombine.high %v970_v63, %v974_v0 }
  0xbf   : > { %6011 = vmatprep.subr.bf16.mxu0 %v16864_v5  ;;  %v14198_v5 = vcombine.low %v970_v63, %v974_v0  ;;  %v923_v63 = vld [vmem:[%s21806_s1 + $0x288] sm:$0xff] }
  0xc0   : > { %v927_v0 = vld [vmem:[%s21806_s1 + $0x2a8] sm:$0xff] }
  0xc1   : > { %5395 = vmatmul.mubr.bf16.gmra.mrb[16].mxu0 %v14102_v6  ;;  %v14207_v6 = vcombine.high %v978_v3, %v982_v4 }
  0xc2   : > { %5404 = vmatprep.mubr.bf16.mxu0 %v14111_v7  ;;  %6012 = vmatpush1.bf16.msra.mxu0 %v16862_v8  ;;  %v986_v7 = vld [vmem:[%s21806_s1 + $0x480] sm:$0xff] }
  0xc3   : > { %6013 = vmatprep.subr.bf16.mxu0 %v16867_v9  ;;  %v990_v8 = vld [vmem:[%s21806_s1 + $0x4a0] sm:$0xff]  ;;  %v14206_v9 = vcombine.low %v978_v3, %v982_v4  ;;  %v931_v3 = vld [vmem:[%s21806_s1 + $0x2c8] sm:$0xff] }
  0xc4   : > { %v935_v4 = vld [vmem:[%s21806_s1 + $0x2e8] sm:$0xff] }
  0xc6   : > { %6014 = vmatpush1.bf16.msra.mxu0 %v16865_v10  ;;  %v14215_v10 = vcombine.high %v986_v7, %v990_v8 }
  0xc7   : > { %6015 = vmatprep.subr.bf16.mxu0 %v16870_v13  ;;  %v14214_v13 = vcombine.low %v986_v7, %v990_v8  ;;  %v16886_v7 = vld [vmem:[%s17344_s6 + $0x200] ss:$8 sps:$4 sm:$0xff]   ;;  %v16888_v8 = vld [vmem:[%s17344_s6 + $0x204] ss:$8 sps:$4 sm:$0xff]  }
  0xc9   : > { %5405 = vmatmul.mubr.bf16.gmra.mrb[20].mxu0 %v14110_v14  ;;  %v14223_v14 = vcombine.high %v994_v11, %v998_v12 }
  0xca   : > { %5414 = vmatprep.mubr.bf16.mxu0 %v14119_v15  ;;  %6016 = vmatpush1.bf16.msra.mxu0 %v16868_v16  ;;  %v1002_v15 = vld [vmem:[%s21806_s1 + $0x500] sm:$0xff] }
  0xcb   : > { %6017 = vmatprep.subr.bf16.mxu0 %v16873_v17  ;;  %v1006_v16 = vld [vmem:[%s21806_s1 + $0x520] sm:$0xff]  ;;  %v14222_v17 = vcombine.low %v994_v11, %v998_v12  ;;  %v14160_v11 = vcombine.low %v931_v3, %v935_v4 }
  0xce   : > { %6018 = vmatpush1.bf16.msra.mxu0 %v16871_v18  ;;  %v14231_v18 = vcombine.high %v1002_v15, %v1006_v16 }
  0xcf   : > { %6019 = vmatprep.subr.bf16.mxu0 %v16876_v21  ;;  %v14230_v21 = vcombine.low %v1002_v15, %v1006_v16 }
  0xd1   : > { %5415 = vmatmul.mubr.bf16.gmra.mrb[24].mxu0 %v14118_v22  ;;  %v14239_v22 = vcombine.high %v1010_v19, %v1014_v20 }
  0xd2   : > { %5424 = vmatprep.mubr.bf16.mxu0 %v14127_v23  ;;  %6020 = vmatpush1.bf16.msra.mxu0 %v16874_v24  ;;  %v843_v23 = vld [vmem:[%s21806_s1 + $0x8] sm:$0xff] }
  0xd3   : > { %6021 = vmatprep.subr.bf16.mxu0 %v16879_v25  ;;  %v847_v24 = vld [vmem:[%s21806_s1 + $0x28] sm:$0xff]  ;;  %v14238_v25 = vcombine.low %v1010_v19, %v1014_v20 }
  0xd6   : > { %6022 = vmatpush1.bf16.msra.mxu0 %v16877_v26  ;;  %v14073_v26 = vcombine.high %v843_v23, %v847_v24 }
  0xd7   : > { %6023 = vmatprep.subr.bf16.mxu0 %v16882_v29  ;;  %v14072_v29 = vcombine.low %v843_v23, %v847_v24 }
  0xd9   : > { %5425 = vmatmul.mubr.bf16.gmra.mrb[28].mxu0 %v14126_v30  ;;  %v14081_v30 = vcombine.high %v851_v27, %v855_v28 }
  0xda   : > { %5434 = vmatprep.mubr.bf16.mxu0 %v14135_v31  ;;  %6024 = vmatpush1.bf16.msra.mxu0 %v16880_v32  ;;  %v859_v31 = vld [vmem:[%s21806_s1 + $0x88] sm:$0xff] }
  0xdb   : > { %6025 = vmatprep.subr.bf16.mxu0 %v16885_v33  ;;  %v863_v32 = vld [vmem:[%s21806_s1 + $0xa8] sm:$0xff]  ;;  %v14080_v33 = vcombine.low %v851_v27, %v855_v28 }
  0xdc   : > { %v971_v27 = vld [vmem:[%s21806_s1 + $0x408] sm:$0xff] }
  0xdd   : > { %v975_v28 = vld [vmem:[%s21806_s1 + $0x428] sm:$0xff] }
  0xde   : > { %6026 = vmatpush1.bf16.msra.mxu0 %v16883_v34  ;;  %v14089_v34 = vcombine.high %v859_v31, %v863_v32 }
  0xdf   : > { %6668 = vmatprep.subr.bf16.mxu0 %v16888_v8  ;;  %v1055_v8 = vld [vmem:[%s21806_s1 + $0x6a8] sm:$0xff] }
  0xe1   : > { %5435 = vmatmul.mubr.bf16.gmra.mrb[32].mxu0 %v14134_v37  ;;  %v14088_v37 = vcombine.low %v859_v31, %v863_v32  ;;  %v979_v31 = vld [vmem:[%s21806_s1 + $0x448] sm:$0xff] }
  0xe2   : > { %5444 = vmatprep.mubr.bf16.mxu0 %v14143_v38  ;;  %v14097_v38 = vcombine.high %v867_v35, %v871_v36  ;;  %v983_v32 = vld [vmem:[%s21806_s1 + $0x468] sm:$0xff] }
  0xe9   : > { %5445 = vmatmul.mubr.bf16.gmra.mrb[36].mxu0 %v14142_v41  ;;  %v14096_v41 = vcombine.low %v867_v35, %v871_v36  ;;  %v987_v35 = vld [vmem:[%s21806_s1 + $0x488] sm:$0xff] }
  0xea   : > { %5454 = vmatprep.mubr.bf16.mxu0 %v14151_v42  ;;  %v14105_v42 = vcombine.high %v875_v39, %v879_v40  ;;  %v991_v36 = vld [vmem:[%s21806_s1 + $0x4a8] sm:$0xff] }
  0xf1   : > { %5455 = vmatmul.mubr.bf16.gmra.mrb[40].mxu0 %v14150_v45  ;;  %v14104_v45 = vcombine.low %v875_v39, %v879_v40  ;;  %v995_v39 = vld [vmem:[%s21806_s1 + $0x4c8] sm:$0xff] }
  0xf2   : > { %5464 = vmatprep.mubr.bf16.mxu0 %v14159_v46  ;;  %v14113_v46 = vcombine.high %v883_v43, %v887_v44  ;;  %v999_v40 = vld [vmem:[%s21806_s1 + $0x4e8] sm:$0xff] }
  0xf9   : > { %5465 = vmatmul.mubr.bf16.gmra.mrb[44].mxu0 %v14158_v49  ;;  %v14112_v49 = vcombine.low %v883_v43, %v887_v44  ;;  %v16892_v43 = vld [vmem:[%s17344_s6 + $0x220] ss:$8 sps:$4 sm:$0xff]   ;;  %v16894_v44 = vld [vmem:[%s17344_s6 + $0x224] ss:$8 sps:$4 sm:$0xff]  }
  0xfa   : > { %5474 = vmatprep.mubr.bf16.mxu0 %v14167_v50  ;;  %v14121_v50 = vcombine.high %v891_v47, %v895_v48 }
 0x101   : > { %5475 = vmatmul.mubr.bf16.gmra.mrb[48].mxu0 %v14166_v53  ;;  %v14120_v53 = vcombine.low %v891_v47, %v895_v48  ;;  %v14224_v47 = vcombine.low %v995_v39, %v999_v40 }
 0x102   : > { %5484 = vmatprep.mubr.bf16.mxu0 %v14175_v54  ;;  %v14129_v54 = vcombine.high %v899_v51, %v903_v52 }
 0x109   : > { %5485 = vmatmul.mubr.bf16.gmra.mrb[52].mxu0 %v14174_v57  ;;  %v14128_v57 = vcombine.low %v899_v51, %v903_v52 }
 0x10a   : > { %5494 = vmatprep.mubr.bf16.mxu0 %v14183_v58  ;;  %v14137_v58 = vcombine.high %v907_v55, %v911_v56 }
 0x111   : > { %5495 = vmatmul.mubr.bf16.gmra.mrb[56].mxu0 %v14182_v61  ;;  %v14136_v61 = vcombine.low %v907_v55, %v911_v56 }
 0x112   : > { %5504 = vmatprep.mubr.bf16.mxu0 %v14191_v62  ;;  %v14145_v62 = vcombine.high %v915_v59, %v919_v60 }
 0x119   : > { %5505 = vmatmul.mubr.bf16.gmra.mrb[60].mxu0 %v14190_v1  ;;  %v14144_v1 = vcombine.low %v915_v59, %v919_v60 }
 0x11a   : > { %5514 = vmatprep.mubr.bf16.mxu0 %v14199_v2  ;;  %v14153_v2 = vcombine.high %v923_v63, %v927_v0 }
 0x121   : > { %5515 = vmatmul.mubr.bf16.gmra.mrb[64].mxu0 %v14198_v5  ;;  %v14152_v5 = vcombine.low %v923_v63, %v927_v0  ;;  %v1035_v63 = vld [vmem:[%s21806_s1 + $0x608] sm:$0xff] }
 0x122   : > { %5524 = vmatprep.mubr.bf16.mxu0 %v14207_v6  ;;  %v14161_v6 = vcombine.high %v931_v3, %v935_v4  ;;  %v1039_v0 = vld [vmem:[%s21806_s1 + $0x628] sm:$0xff] }
 0x123   : > { %v1043_v3 = vld [vmem:[%s21806_s1 + $0x648] sm:$0xff] }
 0x124   : > { %v1047_v4 = vld [vmem:[%s21806_s1 + $0x668] sm:$0xff] }
 0x129   : > { %5525 = vmatmul.mubr.bf16.gmra.mrb[68].mxu0 %v14206_v9  ;;  %v939_v9 = vld [vmem:[%s21806_s1 + $0x308] sm:$0xff] }
 0x12a   : > { %5534 = vmatprep.mubr.bf16.mxu0 %v14215_v10  ;;  %v943_v10 = vld [vmem:[%s21806_s1 + $0x328] sm:$0xff] }
 0x12b   : > { %v14169_v12 = vcombine.high %v939_v9, %v943_v10  ;;  %v14168_v15 = vcombine.low %v939_v9, %v943_v10  ;;  %v14272_v9 = vcombine.low %v1043_v3, %v1047_v4 }
 0x131   : > { %5535 = vmatmul.mubr.bf16.gmra.mrb[72].mxu0 %v14214_v13  ;;  %v947_v13 = vld [vmem:[%s21806_s1 + $0x348] sm:$0xff] }
 0x132   : > { %5544 = vmatprep.mubr.bf16.mxu0 %v14223_v14  ;;  %v951_v14 = vld [vmem:[%s21806_s1 + $0x368] sm:$0xff] }
 0x133   : > { %v14177_v16 = vcombine.high %v947_v13, %v951_v14  ;;  %v14176_v19 = vcombine.low %v947_v13, %v951_v14 }
 0x139   : > { %5545 = vmatmul.mubr.bf16.gmra.mrb[76].mxu0 %v14222_v17  ;;  %v955_v17 = vld [vmem:[%s21806_s1 + $0x388] sm:$0xff] }
 0x13a   : > { %5554 = vmatprep.mubr.bf16.mxu0 %v14231_v18  ;;  %v959_v18 = vld [vmem:[%s21806_s1 + $0x3a8] sm:$0xff] }
 0x13b   : > { %v14185_v20 = vcombine.high %v955_v17, %v959_v18  ;;  %v14184_v23 = vcombine.low %v955_v17, %v959_v18  ;;  %v1067_v17 = vld [vmem:[%s21806_s1 + $0x708] sm:$0xff] }
 0x13c   : > { %v1071_v18 = vld [vmem:[%s21806_s1 + $0x728] sm:$0xff] }
 0x141   : > { %5555 = vmatmul.mubr.bf16.gmra.mrb[80].mxu0 %v14230_v21  ;;  %v963_v21 = vld [vmem:[%s21806_s1 + $0x3c8] sm:$0xff] }
 0x142   : > { %5564 = vmatprep.mubr.bf16.mxu0 %v14239_v22  ;;  %v967_v22 = vld [vmem:[%s21806_s1 + $0x3e8] sm:$0xff] }
 0x143   : > { %v14193_v24 = vcombine.high %v963_v21, %v967_v22 }
 0x149   : > { %5565 = vmatmul.mubr.bf16.gmra.mrb[84].mxu0 %v14238_v25  ;;  %v16889_v25 = vld [vmem:[%s17344_s6 + $0x210] ss:$8 sps:$4 sm:$0xff]  }
 0x14a   : > { %6027 = vmatprep.mubr.bf16.mxu0 %v14073_v26  ;;  %v16891_v26 = vld [vmem:[%s17344_s6 + $0x214] ss:$8 sps:$4 sm:$0xff]  }
 0x151   : > { %6028 = vmatmul.mubr.bf16.vlgmr.msra.gmra.mrb[0].mxu0 %v14072_v29  ;;  %v14192_v29 = vcombine.low %v963_v21, %v967_v22  ;;  %v1075_v21 = vld [vmem:[%s21806_s1 + $0x748] sm:$0xff] }
 0x152   : > { %6037 = vmatprep.mubr.bf16.mxu0 %v14081_v30  ;;  %6669 = vmatpush1.bf16.msra.mxu0 %v16886_v7  ;;  %v14201_v30 = vcombine.high %v971_v27, %v975_v28  ;;  %v1051_v7 = vld [vmem:[%s21806_s1 + $0x688] sm:$0xff] }
 0x153   : > { %6670 = vmatprep.subr.bf16.mxu0 %v16891_v26  ;;  %v14281_v10 = vcombine.high %v1051_v7, %v1055_v8  ;;  %v14280_v13 = vcombine.low %v1051_v7, %v1055_v8  ;;  %v1079_v22 = vld [vmem:[%s21806_s1 + $0x768] sm:$0xff] }
 0x154   : > { %v1087_v26 = vld [vmem:[%s21806_s1 + $0x7a8] sm:$0xff] }
 0x155   : > { %v1163_v7 = vld [vmem:[%s21806_s1 + $0xa08] sm:$0xff] }
 0x156   : > { %6671 = vmatpush1.bf16.msra.mxu0 %v16889_v25  ;;  %v1083_v25 = vld [vmem:[%s21806_s1 + $0x788] sm:$0xff] }
 0x157   : > { %6672 = vmatprep.subr.bf16.mxu0 %v16894_v44  ;;  %v1119_v44 = vld [vmem:[%s21806_s1 + $0x8a8] sm:$0xff] }
 0x158   : > { %v1167_v8 = vld [vmem:[%s21806_s1 + $0xa28] sm:$0xff] }
 0x159   : > { %6038 = vmatmul.mubr.bf16.gmra.mrb[4].mxu0 %v14080_v33  ;;  %v14200_v33 = vcombine.low %v971_v27, %v975_v28  ;;  %v14304_v27 = vcombine.low %v1075_v21, %v1079_v22  ;;  %v14313_v28 = vcombine.high %v1083_v25, %v1087_v26 }
 0x15a   : > { %6047 = vmatprep.mubr.bf16.mxu0 %v14089_v34  ;;  %v14209_v34 = vcombine.high %v979_v31, %v983_v32  ;;  %6673 = vmatpush1.bf16.msra.mxu0 %v16892_v43  ;;  %v1115_v43 = vld [vmem:[%s21806_s1 + $0x888] sm:$0xff] }
 0x161   : > { %6048 = vmatmul.mubr.bf16.gmra.mrb[8].mxu0 %v14088_v37  ;;  %v14208_v37 = vcombine.low %v979_v31, %v983_v32  ;;  %v14312_v31 = vcombine.low %v1083_v25, %v1087_v26  ;;  %v1195_v25 = vld [vmem:[%s21806_s1 + $0xb08] sm:$0xff] }
 0x162   : > { %6057 = vmatprep.mubr.bf16.mxu0 %v14097_v38  ;;  %v14217_v38 = vcombine.high %v987_v35, %v991_v36  ;;  %v1199_v26 = vld [vmem:[%s21806_s1 + $0xb28] sm:$0xff] }
 0x169   : > { %6058 = vmatmul.mubr.bf16.gmra.mrb[12].mxu0 %v14096_v41  ;;  %v14216_v41 = vcombine.low %v987_v35, %v991_v36  ;;  %v1099_v35 = vld [vmem:[%s21806_s1 + $0x808] sm:$0xff] }
 0x16a   : > { %6067 = vmatprep.mubr.bf16.mxu0 %v14105_v42  ;;  %v14225_v42 = vcombine.high %v995_v39, %v999_v40  ;;  %v1103_v36 = vld [vmem:[%s21806_s1 + $0x828] sm:$0xff] }
 0x16b   : > { %v1107_v39 = vld [vmem:[%s21806_s1 + $0x848] sm:$0xff] }
 0x16c   : > { %v1111_v40 = vld [vmem:[%s21806_s1 + $0x868] sm:$0xff] }
 0x171   : > { %6068 = vmatmul.mubr.bf16.gmra.mrb[16].mxu0 %v14104_v45  ;;  %v1003_v45 = vld [vmem:[%s21806_s1 + $0x508] sm:$0xff] }
 0x172   : > { %6077 = vmatprep.mubr.bf16.mxu0 %v14113_v46  ;;  %v1007_v46 = vld [vmem:[%s21806_s1 + $0x528] sm:$0xff] }
 0x173   : > { %v14233_v48 = vcombine.high %v1003_v45, %v1007_v46  ;;  %v14232_v51 = vcombine.low %v1003_v45, %v1007_v46  ;;  %v14336_v45 = vcombine.low %v1107_v39, %v1111_v40  ;;  %v14345_v46 = vcombine.high %v1115_v43, %v1119_v44 }
 0x179   : > { %6078 = vmatmul.mubr.bf16.gmra.mrb[20].mxu0 %v14112_v49  ;;  %v1011_v49 = vld [vmem:[%s21806_s1 + $0x548] sm:$0xff] }
 0x17a   : > { %6087 = vmatprep.mubr.bf16.mxu0 %v14121_v50  ;;  %v1015_v50 = vld [vmem:[%s21806_s1 + $0x568] sm:$0xff] }
 0x17b   : > { %v14241_v52 = vcombine.high %v1011_v49, %v1015_v50  ;;  %v14240_v55 = vcombine.low %v1011_v49, %v1015_v50  ;;  %v14344_v49 = vcombine.low %v1115_v43, %v1119_v44  ;;  %v1219_v43 = vld [vmem:[%s21806_s1 + $0xbc8] sm:$0xff] }
 0x17c   : > { %v1223_v44 = vld [vmem:[%s21806_s1 + $0xbe8] sm:$0xff] }
 0x181   : > { %6088 = vmatmul.mubr.bf16.gmra.mrb[24].mxu0 %v14120_v53  ;;  %v1019_v53 = vld [vmem:[%s21806_s1 + $0x588] sm:$0xff] }
 0x182   : > { %6097 = vmatprep.mubr.bf16.mxu0 %v14129_v54  ;;  %v1023_v54 = vld [vmem:[%s21806_s1 + $0x5a8] sm:$0xff] }
 0x183   : > { %v14249_v56 = vcombine.high %v1019_v53, %v1023_v54  ;;  %v14248_v59 = vcombine.low %v1019_v53, %v1023_v54  ;;  %v1131_v53 = vld [vmem:[%s21806_s1 + $0x908] sm:$0xff] }
 0x184   : > { %v1135_v54 = vld [vmem:[%s21806_s1 + $0x928] sm:$0xff] }
 0x189   : > { %6098 = vmatmul.mubr.bf16.gmra.mrb[28].mxu0 %v14128_v57  ;;  %v1027_v57 = vld [vmem:[%s21806_s1 + $0x5c8] sm:$0xff] }
 0x18a   : > { %6107 = vmatprep.mubr.bf16.mxu0 %v14137_v58  ;;  %v1031_v58 = vld [vmem:[%s21806_s1 + $0x5e8] sm:$0xff] }
 0x18b   : > { %v14257_v60 = vcombine.high %v1027_v57, %v1031_v58 }
 0x191   : > { %6108 = vmatmul.mubr.bf16.gmra.mrb[32].mxu0 %v14136_v61  ;;  %v16895_v61 = vld [vmem:[%s17344_s6 + $0x230] ss:$8 sps:$4 sm:$0xff]  }
 0x192   : > { %6117 = vmatprep.mubr.bf16.mxu0 %v14145_v62  ;;  %v16897_v62 = vld [vmem:[%s17344_s6 + $0x234] ss:$8 sps:$4 sm:$0xff]  }
 0x193   : > { %6674 = vmatprep.subr.bf16.mxu0 %v16897_v62  ;;  %v1151_v62 = vld [vmem:[%s21806_s1 + $0x9a8] sm:$0xff] }
 0x194   : > { %6675 = vmatpush1.bf16.msra.mxu0 %v16895_v61  ;;  %v1147_v61 = vld [vmem:[%s21806_s1 + $0x988] sm:$0xff] }
 0x199   : > { %6118 = vmatmul.mubr.bf16.gmra.mrb[36].mxu0 %v14144_v1  ;;  %v14256_v1 = vcombine.low %v1027_v57, %v1031_v58  ;;  %v1139_v57 = vld [vmem:[%s21806_s1 + $0x948] sm:$0xff] }
 0x19a   : > { %6127 = vmatprep.mubr.bf16.mxu0 %v14153_v2  ;;  %v14265_v2 = vcombine.high %v1035_v63, %v1039_v0  ;;  %v1143_v58 = vld [vmem:[%s21806_s1 + $0x968] sm:$0xff] }
 0x1a1   : > { %6128 = vmatmul.mubr.bf16.gmra.mrb[40].mxu0 %v14152_v5  ;;  %v14264_v5 = vcombine.low %v1035_v63, %v1039_v0  ;;  %v14368_v63 = vcombine.low %v1139_v57, %v1143_v58  ;;  %v14377_v0 = vcombine.high %v1147_v61, %v1151_v62 }
 0x1a2   : > { %6137 = vmatprep.mubr.bf16.mxu0 %v14161_v6  ;;  %v14273_v6 = vcombine.high %v1043_v3, %v1047_v4  ;;  %v14376_v3 = vcombine.low %v1147_v61, %v1151_v62 }
 0x1a9   : > { %6138 = vmatmul.mubr.bf16.gmra.mrb[44].mxu0 %v14160_v11  ;;  %v1059_v11 = vld [vmem:[%s21806_s1 + $0x6c8] sm:$0xff] }
 0x1aa   : > { %6147 = vmatprep.mubr.bf16.mxu0 %v14169_v12  ;;  %v1063_v12 = vld [vmem:[%s21806_s1 + $0x6e8] sm:$0xff] }
 0x1ab   : > { %v14289_v14 = vcombine.high %v1059_v11, %v1063_v12 }
 0x1b1   : > { %6148 = vmatmul.mubr.bf16.gmra.mrb[48].mxu0 %v14168_v15  ;;  %v16898_v15 = vld [vmem:[%s17344_s6 + $0x240] ss:$8 sps:$4 sm:$0xff]  }
 0x1b2   : > { %6157 = vmatprep.mubr.bf16.mxu0 %v14177_v16  ;;  %v16900_v16 = vld [vmem:[%s17344_s6 + $0x244] ss:$8 sps:$4 sm:$0xff]  }
 0x1b3   : > { %6676 = vmatprep.subr.bf16.mxu0 %v16900_v16  ;;  %v1183_v16 = vld [vmem:[%s21806_s1 + $0xaa8] sm:$0xff] }
 0x1b4   : > { %6677 = vmatpush1.bf16.msra.mxu0 %v16898_v15  ;;  %v1179_v15 = vld [vmem:[%s21806_s1 + $0xa88] sm:$0xff] }
 0x1b9   : > { %6158 = vmatmul.mubr.bf16.gmra.mrb[52].mxu0 %v14176_v19  ;;  %v14288_v19 = vcombine.low %v1059_v11, %v1063_v12  ;;  %v1171_v11 = vld [vmem:[%s21806_s1 + $0xa48] sm:$0xff] }
 0x1ba   : > { %6167 = vmatprep.mubr.bf16.mxu0 %v14185_v20  ;;  %v14297_v20 = vcombine.high %v1067_v17, %v1071_v18  ;;  %v1175_v12 = vld [vmem:[%s21806_s1 + $0xa68] sm:$0xff] }
 0x1c1   : > { %6168 = vmatmul.mubr.bf16.gmra.mrb[56].mxu0 %v14184_v23  ;;  %v14296_v23 = vcombine.low %v1067_v17, %v1071_v18  ;;  %v14400_v17 = vcombine.low %v1171_v11, %v1175_v12  ;;  %v14409_v18 = vcombine.high %v1179_v15, %v1183_v16 }
 0x1c2   : > { %6177 = vmatprep.mubr.bf16.mxu0 %v14193_v24  ;;  %v14305_v24 = vcombine.high %v1075_v21, %v1079_v22  ;;  %v14408_v21 = vcombine.low %v1179_v15, %v1183_v16  ;;  %v1275_v15 = vld [vmem:[%s21806_s1 + $0xd88] sm:$0xff] }
 0x1c3   : > { %v1279_v16 = vld [vmem:[%s21806_s1 + $0xda8] sm:$0xff] }
 0x1c9   : > { %6178 = vmatmul.mubr.bf16.gmra.mrb[60].mxu0 %v14192_v29  ;;  %v1091_v29 = vld [vmem:[%s21806_s1 + $0x7c8] sm:$0xff] }
 0x1ca   : > { %6187 = vmatprep.mubr.bf16.mxu0 %v14201_v30  ;;  %v1095_v30 = vld [vmem:[%s21806_s1 + $0x7e8] sm:$0xff] }
 0x1cb   : > { %v14321_v32 = vcombine.high %v1091_v29, %v1095_v30 }
 0x1d1   : > { %6188 = vmatmul.mubr.bf16.gmra.mrb[64].mxu0 %v14200_v33  ;;  %v16901_v33 = vld [vmem:[%s17344_s6 + $0x250] ss:$8 sps:$4 sm:$0xff]  }
 0x1d2   : > { %6197 = vmatprep.mubr.bf16.mxu0 %v14209_v34  ;;  %v16903_v34 = vld [vmem:[%s17344_s6 + $0x254] ss:$8 sps:$4 sm:$0xff]  }
 0x1d3   : > { %6678 = vmatprep.subr.bf16.mxu0 %v16903_v34  ;;  %v16915_v34 = vld [vmem:[%s17344_s6 + $0x294] ss:$8 sps:$4 sm:$0xff]  }
 0x1d4   : > { %6679 = vmatpush1.bf16.msra.mxu0 %v16901_v33  ;;  %v16913_v33 = vld [vmem:[%s17344_s6 + $0x290] ss:$8 sps:$4 sm:$0xff]  }
 0x1d9   : > { %6198 = vmatmul.mubr.bf16.gmra.mrb[68].mxu0 %v14208_v37  ;;  %v14320_v37 = vcombine.low %v1091_v29, %v1095_v30  ;;  %v1203_v29 = vld [vmem:[%s21806_s1 + $0xb48] sm:$0xff] }
 0x1da   : > { %6207 = vmatprep.mubr.bf16.mxu0 %v14217_v38  ;;  %v14329_v38 = vcombine.high %v1099_v35, %v1103_v36  ;;  %v1207_v30 = vld [vmem:[%s21806_s1 + $0xb68] sm:$0xff] }
 0x1e1   : > { %6208 = vmatmul.mubr.bf16.gmra.mrb[72].mxu0 %v14216_v41  ;;  %v14328_v41 = vcombine.low %v1099_v35, %v1103_v36  ;;  %v1211_v35 = vld [vmem:[%s21806_s1 + $0xb88] sm:$0xff] }
 0x1e2   : > { %6217 = vmatprep.mubr.bf16.mxu0 %v14225_v42  ;;  %v14337_v42 = vcombine.high %v1107_v39, %v1111_v40  ;;  %v1215_v36 = vld [vmem:[%s21806_s1 + $0xba8] sm:$0xff] }
 0x1e3   : > { %v16918_v39 = vld [vmem:[%s17344_s6 + $0x2a4] ss:$8 sps:$4 sm:$0xff]   ;;  %v16916_v40 = vld [vmem:[%s17344_s6 + $0x2a0] ss:$8 sps:$4 sm:$0xff]  }
 0x1e9   : > { %6218 = vmatmul.mubr.bf16.gmra.mrb[76].mxu0 %v14224_v47  ;;  %v1123_v47 = vld [vmem:[%s21806_s1 + $0x8c8] sm:$0xff] }
 0x1ea   : > { %6227 = vmatprep.mubr.bf16.mxu0 %v14233_v48  ;;  %v1127_v48 = vld [vmem:[%s21806_s1 + $0x8e8] sm:$0xff] }
 0x1eb   : > { %v14353_v50 = vcombine.high %v1123_v47, %v1127_v48 }
 0x1f1   : > { %6228 = vmatmul.mubr.bf16.gmra.mrb[80].mxu0 %v14232_v51  ;;  %v16904_v51 = vld [vmem:[%s17344_s6 + $0x260] ss:$8 sps:$4 sm:$0xff]  }
 0x1f2   : > { %6237 = vmatprep.mubr.bf16.mxu0 %v14241_v52  ;;  %v16906_v52 = vld [vmem:[%s17344_s6 + $0x264] ss:$8 sps:$4 sm:$0xff]  }
 0x1f3   : > { %6680 = vmatprep.subr.bf16.mxu0 %v16906_v52  ;;  %v1231_v52 = vld [vmem:[%s21806_s1 + $0xc28] sm:$0xff] }
 0x1f4   : > { %6681 = vmatpush1.bf16.msra.mxu0 %v16904_v51  ;;  %v1227_v51 = vld [vmem:[%s21806_s1 + $0xc08] sm:$0xff] }
 0x1f5   : > { %v14456_v61 = vcombine.low %v1227_v51, %v1231_v52 }
 0x1f9   : > { %6238 = vmatmul.mubr.bf16.gmra.mrb[84].mxu0 %v14240_v55  ;;  %v14352_v55 = vcombine.low %v1123_v47, %v1127_v48  ;;  %v16924_v47 = vld [vmem:[%s17344_s6 + $0x2c4] ss:$8 sps:$4 sm:$0xff]   ;;  %v16922_v48 = vld [vmem:[%s17344_s6 + $0x2c0] ss:$8 sps:$4 sm:$0xff]  }
 0x1fa   : > { %6247 = vmatprep.mubr.bf16.mxu0 %v14249_v56  ;;  %v14361_v56 = vcombine.high %v1131_v53, %v1135_v54 }
 0x201   : > { %6248 = vmatmul.mubr.bf16.gmra.mrb[88].mxu0 %v14248_v59  ;;  %v14360_v59 = vcombine.low %v1131_v53, %v1135_v54  ;;  %v14448_v53 = vcombine.low %v1219_v43, %v1223_v44  ;;  %v14457_v54 = vcombine.high %v1227_v51, %v1231_v52  ;;  %v1347_v51 = vld [vmem:[%s21806_s1 + $0xfc8] sm:$0xff] }
 0x202   : > { %6257 = vmatprep.mubr.bf16.mxu0 %v14257_v60  ;;  %v14369_v60 = vcombine.high %v1139_v57, %v1143_v58  ;;  %v16933_v57 = vld [vmem:[%s17344_s6 + $0x2f4] ss:$8 sps:$4 sm:$0xff]   ;;  %v16931_v58 = vld [vmem:[%s17344_s6 + $0x2f0] ss:$8 sps:$4 sm:$0xff]   ;;  %v1351_v52 = vld [vmem:[%s21806_s1 + $0xfe8] sm:$0xff] }
 0x209   : > { %6258 = vmatmul.mubr.bf16.gmra.mrb[92].mxu0 %v14256_v1  ;;  %v1155_v1 = vld [vmem:[%s21806_s1 + $0x9c8] sm:$0xff] }
 0x20a   : > { %6267 = vmatprep.mubr.bf16.mxu0 %v14265_v2  ;;  %v1159_v2 = vld [vmem:[%s21806_s1 + $0x9e8] sm:$0xff] }
 0x20b   : > { %v14385_v4 = vcombine.high %v1155_v1, %v1159_v2 }
 0x211   : > { %6268 = vmatmul.mubr.bf16.gmra.mrb[96].mxu0 %v14264_v5  ;;  %v16907_v5 = vld [vmem:[%s17344_s6 + $0x270] ss:$8 sps:$4 sm:$0xff]  }
 0x212   : > { %6277 = vmatprep.mubr.bf16.mxu0 %v14273_v6  ;;  %v16909_v6 = vld [vmem:[%s17344_s6 + $0x274] ss:$8 sps:$4 sm:$0xff]  }
 0x213   : > { %6682 = vmatprep.subr.bf16.mxu0 %v16909_v6 }
 0x214   : > { %6683 = vmatpush1.bf16.msra.mxu0 %v16907_v5 }
 0x219   : > { %6278 = vmatmul.mubr.bf16.gmra.mrb[100].mxu0 %v14272_v9  ;;  %v14384_v9 = vcombine.low %v1155_v1, %v1159_v2 }
 0x21a   : > { %6287 = vmatprep.mubr.bf16.mxu0 %v14281_v10  ;;  %v14393_v10 = vcombine.high %v1163_v7, %v1167_v8 }
 0x221   : > { %6288 = vmatmul.mubr.bf16.gmra.mrb[104].mxu0 %v14280_v13  ;;  %v14392_v13 = vcombine.low %v1163_v7, %v1167_v8  ;;  %v1259_v7 = vld [vmem:[%s21806_s1 + $0xd08] sm:$0xff] }
 0x222   : > { %6297 = vmatprep.mubr.bf16.mxu0 %v14289_v14  ;;  %v14401_v14 = vcombine.high %v1171_v11, %v1175_v12  ;;  %v1263_v8 = vld [vmem:[%s21806_s1 + $0xd28] sm:$0xff] }
 0x223   : > { %v1267_v11 = vld [vmem:[%s21806_s1 + $0xd48] sm:$0xff] }
 0x224   : > { %v1271_v12 = vld [vmem:[%s21806_s1 + $0xd68] sm:$0xff] }
 0x229   : > { %6298 = vmatmul.mubr.bf16.gmra.mrb[108].mxu0 %v14288_v19  ;;  %v1187_v19 = vld [vmem:[%s21806_s1 + $0xac8] sm:$0xff] }
 0x22a   : > { %6307 = vmatprep.mubr.bf16.mxu0 %v14297_v20  ;;  %v1191_v20 = vld [vmem:[%s21806_s1 + $0xae8] sm:$0xff] }
 0x22b   : > { %v14417_v22 = vcombine.high %v1187_v19, %v1191_v20 }
 0x231   : > { %6308 = vmatmul.mubr.bf16.gmra.mrb[112].mxu0 %v14296_v23  ;;  %v16910_v23 = vld [vmem:[%s17344_s6 + $0x280] ss:$8 sps:$4 sm:$0xff]  }
 0x232   : > { %6317 = vmatprep.mubr.bf16.mxu0 %v14305_v24  ;;  %v16912_v24 = vld [vmem:[%s17344_s6 + $0x284] ss:$8 sps:$4 sm:$0xff]  }
 0x233   : > { %6684 = vmatprep.subr.bf16.mxu0 %v16912_v24  ;;  %v1295_v24 = vld [vmem:[%s21806_s1 + $0xe28] sm:$0xff] }
 0x234   : > { %6685 = vmatpush1.bf16.msra.mxu0 %v16910_v23  ;;  %v1291_v23 = vld [vmem:[%s21806_s1 + $0xe08] sm:$0xff] }
 0x235   : > { %6686 = vmatprep.subr.bf16.mxu0 %v16915_v34 }
 0x238   : > { %6687 = vmatpush1.bf16.msra.mxu0 %v16913_v33 }
 0x239   : > { %6318 = vmatmul.mubr.bf16.gmra.mrb[116].mxu0 %v14304_v27  ;;  %v14416_v27 = vcombine.low %v1187_v19, %v1191_v20  ;;  %6688 = vmatprep.subr.bf16.mxu0 %v16918_v39  ;;  %v1283_v19 = vld [vmem:[%s21806_s1 + $0xdc8] sm:$0xff] }
 0x23a   : > { %6327 = vmatprep.mubr.bf16.mxu0 %v14313_v28  ;;  %v14425_v28 = vcombine.high %v1195_v25, %v1199_v26  ;;  %v1287_v20 = vld [vmem:[%s21806_s1 + $0xde8] sm:$0xff] }
 0x23b   : > { %v1323_v39 = vld [vmem:[%s21806_s1 + $0xf08] sm:$0xff] }
 0x23c   : > { %6689 = vmatpush1.bf16.msra.mxu0 %v16916_v40  ;;  %v1327_v40 = vld [vmem:[%s21806_s1 + $0xf28] sm:$0xff] }
 0x241   : > { %6328 = vmatmul.mubr.bf16.gmra.mrb[120].mxu0 %v14312_v31  ;;  %v14424_v31 = vcombine.low %v1195_v25, %v1199_v26  ;;  %v14512_v25 = vcombine.low %v1283_v19, %v1287_v20  ;;  %v14521_v26 = vcombine.high %v1291_v23, %v1295_v24 }
 0x242   : > { %6337 = vmatprep.mubr.bf16.mxu0 %v14321_v32  ;;  %v14433_v32 = vcombine.high %v1203_v29, %v1207_v30 }
 0x249   : > { %6338 = vmatmul.mubr.bf16.gmra.mrb[124].mxu0 %v14320_v37  ;;  %v14432_v37 = vcombine.low %v1203_v29, %v1207_v30  ;;  %v14520_v29 = vcombine.low %v1291_v23, %v1295_v24  ;;  %v1018_v23 = vld [vmem:[%s21806_s1 + $0x580] sm:$0xff] }
 0x24a   : > { %6347 = vmatprep.mubr.bf16.mxu0 %v14329_v38  ;;  %v14441_v38 = vcombine.high %v1211_v35, %v1215_v36  ;;  %v1022_v24 = vld [vmem:[%s21806_s1 + $0x5a0] sm:$0xff] }
 0x251   : > { %6348 = vmatmul.mubr.bf16.gmra.mrb[128].mxu0 %v14328_v41  ;;  %v16921_v41 = vld [vmem:[%s17344_s6 + $0x2b4] ss:$8 sps:$4 sm:$0xff]  }
 0x252   : > { %6357 = vmatprep.mubr.bf16.mxu0 %v14337_v42  ;;  %v16919_v42 = vld [vmem:[%s17344_s6 + $0x2b0] ss:$8 sps:$4 sm:$0xff]   ;;  %6690 = vmatprep.subr.bf16.mxu0 %v16921_v41 }
 0x253   : > { %6691 = vmatpush1.bf16.msra.mxu0 %v16919_v42  ;;  %v14553_v42 = vcombine.high %v1323_v39, %v1327_v40 }
 0x254   : > { %6692 = vmatprep.subr.bf16.mxu0 %v16924_v47  ;;  %v1339_v47 = vld [vmem:[%s21806_s1 + $0xf88] sm:$0xff] }
 0x257   : > { %6693 = vmatpush1.bf16.msra.mxu0 %v16922_v48  ;;  %v1343_v48 = vld [vmem:[%s21806_s1 + $0xfa8] sm:$0xff] }
 0x259   : > { %6358 = vmatmul.mubr.bf16.gmra.mrb[132].mxu0 %v14336_v45  ;;  %v14440_v45 = vcombine.low %v1211_v35, %v1215_v36  ;;  %v1315_v35 = vld [vmem:[%s21806_s1 + $0xec8] sm:$0xff] }
 0x25a   : > { %6367 = vmatprep.mubr.bf16.mxu0 %v14345_v46  ;;  %v14449_v46 = vcombine.high %v1219_v43, %v1223_v44  ;;  %v1319_v36 = vld [vmem:[%s21806_s1 + $0xee8] sm:$0xff] }
 0x25b   : > { %v14544_v41 = vcombine.low %v1315_v35, %v1319_v36  ;;  %v1331_v43 = vld [vmem:[%s21806_s1 + $0xf48] sm:$0xff] }
 0x25c   : > { %v1335_v44 = vld [vmem:[%s21806_s1 + $0xf68] sm:$0xff] }
 0x261   : > { %6368 = vmatmul.mubr.bf16.gmra.mrb[136].mxu0 %v14344_v49  ;;  %v16927_v49 = vld [vmem:[%s17344_s6 + $0x2d4] ss:$8 sps:$4 sm:$0xff]  }
 0x262   : > { %6377 = vmatprep.mubr.bf16.mxu0 %v14353_v50  ;;  %v16925_v50 = vld [vmem:[%s17344_s6 + $0x2d0] ss:$8 sps:$4 sm:$0xff]   ;;  %6694 = vmatprep.subr.bf16.mxu0 %v16927_v49  ;;  %v14560_v49 = vcombine.low %v1331_v43, %v1335_v44 }
 0x263   : > { %6695 = vmatpush1.bf16.msra.mxu0 %v16925_v50  ;;  %v14569_v50 = vcombine.high %v1339_v47, %v1343_v48 }
 0x269   : > { %6378 = vmatmul.mubr.bf16.gmra.mrb[140].mxu0 %v14352_v55  ;;  %v16930_v55 = vld [vmem:[%s17344_s6 + $0x2e4] ss:$8 sps:$4 sm:$0xff]  }
 0x26a   : > { %6387 = vmatprep.mubr.bf16.mxu0 %v14361_v56  ;;  %v16928_v56 = vld [vmem:[%s17344_s6 + $0x2e0] ss:$8 sps:$4 sm:$0xff]   ;;  %6696 = vmatprep.subr.bf16.mxu0 %v16930_v55  ;;  %v844_v55 = vld [vmem:[%s21806_s1 + $0x10] sm:$0xff] }
 0x26b   : > { %6697 = vmatpush1.bf16.msra.mxu0 %v16928_v56  ;;  %v848_v56 = vld [vmem:[%s21806_s1 + $0x30] sm:$0xff] }
 0x26c   : > { %6698 = vmatprep.subr.bf16.mxu0 %v16933_v57  ;;  %v14576_v57 = vcombine.low %v1347_v51, %v1351_v52 }
 0x26f   : > { %6699 = vmatpush1.bf16.msra.mxu0 %v16931_v58  ;;  %v14075_v58 = vcombine.high %v844_v55, %v848_v56 }
 0x271   : > { %6388 = vmatmul.mubr.bf16.gmra.mrb[144].mxu0 %v14360_v59  ;;  %v1235_v59 = vld [vmem:[%s21806_s1 + $0xc48] sm:$0xff] }
 0x272   : > { %6397 = vmatprep.mubr.bf16.mxu0 %v14369_v60  ;;  %v1239_v60 = vld [vmem:[%s21806_s1 + $0xc68] sm:$0xff] }
 0x273   : > { %v14465_v62 = vcombine.high %v1235_v59, %v1239_v60  ;;  %v14464_v1 = vcombine.low %v1235_v59, %v1239_v60  ;;  %v852_v59 = vld [vmem:[%s21806_s1 + $0x50] sm:$0xff] }
 0x274   : > { %v856_v60 = vld [vmem:[%s21806_s1 + $0x70] sm:$0xff] }
 0x279   : > { %6398 = vmatmul.mubr.bf16.gmra.mrb[148].mxu0 %v14368_v63  ;;  %v1243_v63 = vld [vmem:[%s21806_s1 + $0xc88] sm:$0xff] }
 0x27a   : > { %6407 = vmatprep.mubr.bf16.mxu0 %v14377_v0  ;;  %v1247_v0 = vld [vmem:[%s21806_s1 + $0xca8] sm:$0xff] }
 0x27b   : > { %v14473_v2 = vcombine.high %v1243_v63, %v1247_v0  ;;  %v14472_v5 = vcombine.low %v1243_v63, %v1247_v0  ;;  %v860_v63 = vld [vmem:[%s21806_s1 + $0x90] sm:$0xff] }
 0x27c   : > { %v864_v0 = vld [vmem:[%s21806_s1 + $0xb0] sm:$0xff] }
 0x281   : > { %6408 = vmatmul.mubr.bf16.gmra.mrb[152].mxu0 %v14376_v3  ;;  %v1251_v3 = vld [vmem:[%s21806_s1 + $0xcc8] sm:$0xff] }
 0x282   : > { %6417 = vmatprep.mubr.bf16.mxu0 %v14385_v4  ;;  %v1255_v4 = vld [vmem:[%s21806_s1 + $0xce8] sm:$0xff] }
 0x283   : > { %v14481_v6 = vcombine.high %v1251_v3, %v1255_v4 }
 0x289   : > { %6418 = vmatmul.mubr.bf16.gmra.mrb[156].mxu0 %v14384_v9  ;;  %v14480_v9 = vcombine.low %v1251_v3, %v1255_v4  ;;  %v868_v3 = vld [vmem:[%s21806_s1 + $0xd0] sm:$0xff] }
 0x28a   : > { %6427 = vmatprep.mubr.bf16.mxu0 %v14393_v10  ;;  %v14489_v10 = vcombine.high %v1259_v7, %v1263_v8  ;;  %v872_v4 = vld [vmem:[%s21806_s1 + $0xf0] sm:$0xff] }
 0x291   : > { %6428 = vmatmul.mubr.bf16.gmra.mrb[160].mxu0 %v14392_v13  ;;  %v14488_v13 = vcombine.low %v1259_v7, %v1263_v8  ;;  %v876_v7 = vld [vmem:[%s21806_s1 + $0x110] sm:$0xff] }
 0x292   : > { %6437 = vmatprep.mubr.bf16.mxu0 %v14401_v14  ;;  %v14497_v14 = vcombine.high %v1267_v11, %v1271_v12  ;;  %v880_v8 = vld [vmem:[%s21806_s1 + $0x130] sm:$0xff] }
 0x299   : > { %6438 = vmatmul.mubr.bf16.gmra.mrb[164].mxu0 %v14400_v17  ;;  %v14496_v17 = vcombine.low %v1267_v11, %v1271_v12  ;;  %v884_v11 = vld [vmem:[%s21806_s1 + $0x150] sm:$0xff] }
 0x29a   : > { %6447 = vmatprep.mubr.bf16.mxu0 %v14409_v18  ;;  %v14505_v18 = vcombine.high %v1275_v15, %v1279_v16  ;;  %v888_v12 = vld [vmem:[%s21806_s1 + $0x170] sm:$0xff] }
 0x2a1   : > { %6448 = vmatmul.mubr.bf16.gmra.mrb[168].mxu0 %v14408_v21  ;;  %v14504_v21 = vcombine.low %v1275_v15, %v1279_v16  ;;  %v892_v15 = vld [vmem:[%s21806_s1 + $0x190] sm:$0xff] }
 0x2a2   : > { %6457 = vmatprep.mubr.bf16.mxu0 %v14417_v22  ;;  %v14513_v22 = vcombine.high %v1283_v19, %v1287_v20  ;;  %v896_v16 = vld [vmem:[%s21806_s1 + $0x1b0] sm:$0xff] }
 0x2a3   : > { %v900_v19 = vld [vmem:[%s21806_s1 + $0x1d0] sm:$0xff] }
 0x2a4   : > { %v904_v20 = vld [vmem:[%s21806_s1 + $0x1f0] sm:$0xff] }
 0x2a9   : > { %6458 = vmatmul.mubr.bf16.gmra.mrb[172].mxu0 %v14416_v27  ;;  %v1299_v27 = vld [vmem:[%s21806_s1 + $0xe48] sm:$0xff] }
 0x2aa   : > { %6467 = vmatprep.mubr.bf16.mxu0 %v14425_v28  ;;  %v1303_v28 = vld [vmem:[%s21806_s1 + $0xe68] sm:$0xff] }
 0x2ab   : > { %v14529_v30 = vcombine.high %v1299_v27, %v1303_v28  ;;  %v14528_v33 = vcombine.low %v1299_v27, %v1303_v28  ;;  %v908_v27 = vld [vmem:[%s21806_s1 + $0x210] sm:$0xff] }
 0x2ac   : > { %v912_v28 = vld [vmem:[%s21806_s1 + $0x230] sm:$0xff] }
 0x2b1   : > { %6468 = vmatmul.mubr.bf16.gmra.mrb[176].mxu0 %v14424_v31  ;;  %v1307_v31 = vld [vmem:[%s21806_s1 + $0xe88] sm:$0xff] }
 0x2b2   : > { %6477 = vmatprep.mubr.bf16.mxu0 %v14433_v32  ;;  %v1311_v32 = vld [vmem:[%s21806_s1 + $0xea8] sm:$0xff] }
 0x2b3   : > { %v14537_v34 = vcombine.high %v1307_v31, %v1311_v32 }
 0x2b9   : > { %6478 = vmatmul.mubr.bf16.gmra.mrb[180].mxu0 %v14432_v37  ;;  %v14536_v37 = vcombine.low %v1307_v31, %v1311_v32  ;;  %v1026_v31 = vld [vmem:[%s21806_s1 + $0x5c0] sm:$0xff] }
 0x2ba   : > { %6487 = vmatprep.mubr.bf16.mxu0 %v14441_v38  ;;  %v14545_v38 = vcombine.high %v1315_v35, %v1319_v36  ;;  %v1030_v32 = vld [vmem:[%s21806_s1 + $0x5e0] sm:$0xff]  ;;  %v916_v35 = vld [vmem:[%s21806_s1 + $0x250] sm:$0xff] }
 0x2bb   : > { %v920_v36 = vld [vmem:[%s21806_s1 + $0x270] sm:$0xff] }
 0x2c1   : > { %6488 = vmatmul.mubr.bf16.gmra.mrb[184].mxu0 %v14440_v45  ;;  %v14552_v45 = vcombine.low %v1323_v39, %v1327_v40  ;;  %v1034_v39 = vld [vmem:[%s21806_s1 + $0x600] sm:$0xff] }
 0x2c2   : > { %6497 = vmatprep.mubr.bf16.mxu0 %v14449_v46  ;;  %v14561_v46 = vcombine.high %v1331_v43, %v1335_v44  ;;  %v1038_v40 = vld [vmem:[%s21806_s1 + $0x620] sm:$0xff]  ;;  %v924_v43 = vld [vmem:[%s21806_s1 + $0x290] sm:$0xff] }
 0x2c3   : > { %v928_v44 = vld [vmem:[%s21806_s1 + $0x2b0] sm:$0xff] }
 0x2c9   : > { %6498 = vmatmul.mubr.bf16.gmra.mrb[188].mxu0 %v14448_v53  ;;  %v14568_v53 = vcombine.low %v1339_v47, %v1343_v48  ;;  %v1042_v47 = vld [vmem:[%s21806_s1 + $0x640] sm:$0xff] }
 0x2ca   : > { %6507 = vmatprep.mubr.bf16.mxu0 %v14457_v54  ;;  %v14577_v54 = vcombine.high %v1347_v51, %v1351_v52  ;;  %v1046_v48 = vld [vmem:[%s21806_s1 + $0x660] sm:$0xff]  ;;  %v932_v51 = vld [vmem:[%s21806_s1 + $0x2d0] sm:$0xff] }
 0x2cb   : > { %v936_v52 = vld [vmem:[%s21806_s1 + $0x2f0] sm:$0xff] }
 0x2d1   : > { %6508 = vmatmul.mubr.bf16.gmra.mrb[192].mxu0 %v14456_v61  ;;  %v14074_v61 = vcombine.low %v844_v55, %v848_v56  ;;  %v16934_v55 = vld [vmem:[%s17344_s6 + $0x300] ss:$8 sps:$4 sm:$0xff]   ;;  %v16936_v56 = vld [vmem:[%s17344_s6 + $0x304] ss:$8 sps:$4 sm:$0xff]  }
 0x2d2   : > { %6517 = vmatprep.mubr.bf16.mxu0 %v14465_v62  ;;  %v14083_v62 = vcombine.high %v852_v59, %v856_v60  ;;  %7341 = vmatprep.subr.bf16.mxu0 %v16936_v56  ;;  %v1000_v56 = vld [vmem:[%s21806_s1 + $0x4f0] sm:$0xff] }
 0x2d9   : > { %6518 = vmatmul.mubr.bf16.gmra.mrb[196].mxu0 %v14464_v1  ;;  %v14082_v1 = vcombine.low %v852_v59, %v856_v60  ;;  %v940_v59 = vld [vmem:[%s21806_s1 + $0x310] sm:$0xff] }
 0x2da   : > { %6527 = vmatprep.mubr.bf16.mxu0 %v14473_v2  ;;  %v14091_v2 = vcombine.high %v860_v63, %v864_v0  ;;  %v944_v60 = vld [vmem:[%s21806_s1 + $0x330] sm:$0xff] }
 0x2e1   : > { %6528 = vmatmul.mubr.bf16.gmra.mrb[200].mxu0 %v14472_v5  ;;  %v14090_v5 = vcombine.low %v860_v63, %v864_v0  ;;  %v14162_v63 = vcombine.low %v932_v51, %v936_v52  ;;  %v14171_v0 = vcombine.high %v940_v59, %v944_v60 }
 0x2e2   : > { %6537 = vmatprep.mubr.bf16.mxu0 %v14481_v6  ;;  %v14099_v6 = vcombine.high %v868_v3, %v872_v4 }
 0x2e9   : > { %6538 = vmatmul.mubr.bf16.gmra.mrb[204].mxu0 %v14480_v9  ;;  %v14098_v9 = vcombine.low %v868_v3, %v872_v4 }
 0x2ea   : > { %6547 = vmatprep.mubr.bf16.mxu0 %v14489_v10  ;;  %v14107_v10 = vcombine.high %v876_v7, %v880_v8 }
 0x2f1   : > { %6548 = vmatmul.mubr.bf16.gmra.mrb[208].mxu0 %v14488_v13  ;;  %v14106_v13 = vcombine.low %v876_v7, %v880_v8  ;;  %v14170_v7 = vcombine.low %v940_v59, %v944_v60  ;;  %v16940_v59 = vld [vmem:[%s17344_s6 + $0x320] ss:$8 sps:$4 sm:$0xff]   ;;  %v16942_v60 = vld [vmem:[%s17344_s6 + $0x324] ss:$8 sps:$4 sm:$0xff]  }
 0x2f2   : > { %6557 = vmatprep.mubr.bf16.mxu0 %v14497_v14  ;;  %v14115_v14 = vcombine.high %v884_v11, %v888_v12 }
 0x2f9   : > { %6558 = vmatmul.mubr.bf16.gmra.mrb[212].mxu0 %v14496_v17  ;;  %v14114_v17 = vcombine.low %v884_v11, %v888_v12 }
 0x2fa   : > { %6567 = vmatprep.mubr.bf16.mxu0 %v14505_v18  ;;  %v14123_v18 = vcombine.high %v892_v15, %v896_v16 }
 0x301   : > { %6568 = vmatmul.mubr.bf16.gmra.mrb[216].mxu0 %v14504_v21  ;;  %v14122_v21 = vcombine.low %v892_v15, %v896_v16 }
 0x302   : > { %6577 = vmatprep.mubr.bf16.mxu0 %v14513_v22  ;;  %v14131_v22 = vcombine.high %v900_v19, %v904_v20 }
 0x309   : > { %6578 = vmatmul.mubr.bf16.gmra.mrb[220].mxu0 %v14512_v25  ;;  %v14246_v25 = vcombine.low %v1018_v23, %v1022_v24 }
 0x30a   : > { %6587 = vmatprep.mubr.bf16.mxu0 %v14521_v26  ;;  %v14247_v26 = vcombine.high %v1018_v23, %v1022_v24 }
 0x30c   : > { %5574 = vmatprep.mubr.bf16.mxu1 %v14247_v26  ;;  %v16939_v26 = vld [vmem:[%s17344_s6 + $0x314] ss:$8 sps:$4 sm:$0xff]  }
 0x30d   : > { %5575 = vmatmul.mubr.bf16.vlgmr.msra.gmra.mrb[0].mxu1 %v14246_v25  ;;  %v16937_v25 = vld [vmem:[%s17344_s6 + $0x310] ss:$8 sps:$4 sm:$0xff]  }
 0x311   : > { %6588 = vmatmul.mubr.bf16.gmra.mrb[224].mxu0 %v14520_v29  ;;  %v14130_v29 = vcombine.low %v900_v19, %v904_v20 }
 0x312   : > { %6597 = vmatprep.mubr.bf16.mxu0 %v14529_v30  ;;  %v14139_v30 = vcombine.high %v908_v27, %v912_v28 }
 0x319   : > { %6598 = vmatmul.mubr.bf16.gmra.mrb[228].mxu0 %v14528_v33  ;;  %v14255_v33 = vcombine.high %v1026_v31, %v1030_v32 }
 0x31a   : > { %6607 = vmatprep.mubr.bf16.mxu0 %v14537_v34  ;;  %v14254_v34 = vcombine.low %v1026_v31, %v1030_v32 }
 0x31b   : > { %5584 = vmatprep.mubr.bf16.mxu1 %v14255_v33 }
 0x31c   : > { %5585 = vmatmul.mubr.bf16.gmra.mrb[4].mxu1 %v14254_v34 }
 0x321   : > { %6608 = vmatmul.mubr.bf16.gmra.mrb[232].mxu0 %v14536_v37  ;;  %v14138_v37 = vcombine.low %v908_v27, %v912_v28  ;;  %v1082_v27 = vld [vmem:[%s21806_s1 + $0x780] sm:$0xff] }
 0x322   : > { %6617 = vmatprep.mubr.bf16.mxu0 %v14545_v38  ;;  %v14147_v38 = vcombine.high %v916_v35, %v920_v36  ;;  %v1086_v28 = vld [vmem:[%s21806_s1 + $0x7a0] sm:$0xff] }
 0x323   : > { %v14311_v31 = vcombine.high %v1082_v27, %v1086_v28  ;;  %v14310_v32 = vcombine.low %v1082_v27, %v1086_v28 }
 0x329   : > { %6618 = vmatmul.mubr.bf16.gmra.mrb[236].mxu0 %v14544_v41  ;;  %v14263_v41 = vcombine.high %v1034_v39, %v1038_v40 }
 0x32a   : > { %6627 = vmatprep.mubr.bf16.mxu0 %v14553_v42  ;;  %v14262_v42 = vcombine.low %v1034_v39, %v1038_v40  ;;  %v980_v39 = vld [vmem:[%s21806_s1 + $0x450] sm:$0xff] }
 0x32b   : > { %5594 = vmatprep.mubr.bf16.mxu1 %v14263_v41  ;;  %v984_v40 = vld [vmem:[%s21806_s1 + $0x470] sm:$0xff] }
 0x32c   : > { %5595 = vmatmul.mubr.bf16.gmra.mrb[8].mxu1 %v14262_v42  ;;  %v14211_v42 = vcombine.high %v980_v39, %v984_v40 }
 0x331   : > { %6628 = vmatmul.mubr.bf16.gmra.mrb[240].mxu0 %v14552_v45  ;;  %v14146_v45 = vcombine.low %v916_v35, %v920_v36  ;;  %v1090_v35 = vld [vmem:[%s21806_s1 + $0x7c0] sm:$0xff] }
 0x332   : > { %6637 = vmatprep.mubr.bf16.mxu0 %v14561_v46  ;;  %v14155_v46 = vcombine.high %v924_v43, %v928_v44  ;;  %v1094_v36 = vld [vmem:[%s21806_s1 + $0x7e0] sm:$0xff] }
 0x339   : > { %6638 = vmatmul.mubr.bf16.gmra.mrb[244].mxu0 %v14560_v49  ;;  %v14271_v49 = vcombine.high %v1042_v47, %v1046_v48 }
 0x33a   : > { %6647 = vmatprep.mubr.bf16.mxu0 %v14569_v50  ;;  %v14270_v50 = vcombine.low %v1042_v47, %v1046_v48  ;;  %v988_v47 = vld [vmem:[%s21806_s1 + $0x490] sm:$0xff] }
 0x33b   : > { %5604 = vmatprep.mubr.bf16.mxu1 %v14271_v49  ;;  %v992_v48 = vld [vmem:[%s21806_s1 + $0x4b0] sm:$0xff]  ;;  %v14210_v49 = vcombine.low %v980_v39, %v984_v40  ;;  %v1154_v39 = vld [vmem:[%s21806_s1 + $0x9c0] sm:$0xff] }
 0x33c   : > { %5605 = vmatmul.mubr.bf16.gmra.mrb[12].mxu1 %v14270_v50  ;;  %v14219_v50 = vcombine.high %v988_v47, %v992_v48  ;;  %v1158_v40 = vld [vmem:[%s21806_s1 + $0x9e0] sm:$0xff] }
 0x341   : > { %6648 = vmatmul.mubr.bf16.gmra.mrb[248].mxu0 %v14568_v53  ;;  %v14154_v53 = vcombine.low %v924_v43, %v928_v44  ;;  %v1098_v43 = vld [vmem:[%s21806_s1 + $0x800] sm:$0xff] }
 0x342   : > { %6657 = vmatprep.mubr.bf16.mxu0 %v14577_v54  ;;  %v14163_v54 = vcombine.high %v932_v51, %v936_v52  ;;  %v1102_v44 = vld [vmem:[%s21806_s1 + $0x820] sm:$0xff] }
 0x343   : > { %v1106_v51 = vld [vmem:[%s21806_s1 + $0x840] sm:$0xff] }
 0x344   : > { %v1110_v52 = vld [vmem:[%s21806_s1 + $0x860] sm:$0xff] }
 0x349   : > { %6658 = vmatmul.mubr.bf16.gmra.mrb[252].mxu0 %v14576_v57  ;;  %v1050_v57 = vld [vmem:[%s21806_s1 + $0x680] sm:$0xff] }
 0x34a   : > { %6700 = vmatprep.mubr.bf16.mxu0 %v14075_v58  ;;  %v1054_v58 = vld [vmem:[%s21806_s1 + $0x6a0] sm:$0xff] }
 0x351   : > { %6701 = vmatmul.mubr.bf16.vlgmr.msra.gmra.mrb[0].mxu0 %v14074_v61  ;;  %v14279_v61 = vcombine.high %v1050_v57, %v1054_v58 }
 0x352   : > { %6710 = vmatprep.mubr.bf16.mxu0 %v14083_v62  ;;  %v14278_v62 = vcombine.low %v1050_v57, %v1054_v58  ;;  %7342 = vmatpush1.bf16.msra.mxu0 %v16934_v55  ;;  %v996_v55 = vld [vmem:[%s21806_s1 + $0x4d0] sm:$0xff]  ;;  %v14218_v57 = vcombine.low %v988_v47, %v992_v48  ;;  %v1162_v47 = vld [vmem:[%s21806_s1 + $0xa00] sm:$0xff] }
 0x353   : > { %5614 = vmatprep.mubr.bf16.mxu1 %v14279_v61  ;;  %7343 = vmatprep.subr.bf16.mxu0 %v16939_v26  ;;  %v14227_v58 = vcombine.high %v996_v55, %v1000_v56  ;;  %v1114_v61 = vld [vmem:[%s21806_s1 + $0x880] sm:$0xff]  ;;  %v1032_v26 = vld [vmem:[%s21806_s1 + $0x5f0] sm:$0xff] }
 0x354   : > { %5615 = vmatmul.mubr.bf16.gmra.mrb[16].mxu1 %v14278_v62  ;;  %v1118_v62 = vld [vmem:[%s21806_s1 + $0x8a0] sm:$0xff] }
 0x355   : > { %v1166_v48 = vld [vmem:[%s21806_s1 + $0xa20] sm:$0xff] }
 0x356   : > { %7344 = vmatpush1.bf16.msra.mxu0 %v16937_v25  ;;  %v1028_v25 = vld [vmem:[%s21806_s1 + $0x5d0] sm:$0xff] }
 0x357   : > { %7345 = vmatprep.subr.bf16.mxu0 %v16942_v60  ;;  %v14259_v28 = vcombine.high %v1028_v25, %v1032_v26  ;;  %v1064_v60 = vld [vmem:[%s21806_s1 + $0x6f0] sm:$0xff] }
 0x359   : > { %6711 = vmatmul.mubr.bf16.gmra.mrb[4].mxu0 %v14082_v1  ;;  %v1058_v1 = vld [vmem:[%s21806_s1 + $0x6c0] sm:$0xff] }
 0x35a   : > { %6720 = vmatprep.mubr.bf16.mxu0 %v14091_v2  ;;  %v1062_v2 = vld [vmem:[%s21806_s1 + $0x6e0] sm:$0xff]  ;;  %7346 = vmatpush1.bf16.msra.mxu0 %v16940_v59  ;;  %v1060_v59 = vld [vmem:[%s21806_s1 + $0x6d0] sm:$0xff] }
 0x35b   : > { %v14287_v3 = vcombine.high %v1058_v1, %v1062_v2  ;;  %v14286_v4 = vcombine.low %v1058_v1, %v1062_v2  ;;  %v14343_v1 = vcombine.high %v1114_v61, %v1118_v62  ;;  %v14342_v2 = vcombine.low %v1114_v61, %v1118_v62 }
 0x35c   : > { %v14291_v62 = vcombine.high %v1060_v59, %v1064_v60 }
 0x35d   : > { %5624 = vmatprep.mubr.bf16.mxu1 %v14287_v3  ;;  %v14226_v3 = vcombine.low %v996_v55, %v1000_v56  ;;  %v1170_v55 = vld [vmem:[%s21806_s1 + $0xa40] sm:$0xff] }
 0x35e   : > { %5625 = vmatmul.mubr.bf16.gmra.mrb[20].mxu1 %v14286_v4  ;;  %v1174_v56 = vld [vmem:[%s21806_s1 + $0xa60] sm:$0xff] }
 0x361   : > { %6721 = vmatmul.mubr.bf16.gmra.mrb[8].mxu0 %v14090_v5  ;;  %v948_v5 = vld [vmem:[%s21806_s1 + $0x350] sm:$0xff] }
 0x362   : > { %6730 = vmatprep.mubr.bf16.mxu0 %v14099_v6  ;;  %v952_v6 = vld [vmem:[%s21806_s1 + $0x370] sm:$0xff] }
 0x363   : > { %v14179_v8 = vcombine.high %v948_v5, %v952_v6  ;;  %v14178_v15 = vcombine.low %v948_v5, %v952_v6  ;;  %v1122_v5 = vld [vmem:[%s21806_s1 + $0x8c0] sm:$0xff] }
 0x364   : > { %v1126_v6 = vld [vmem:[%s21806_s1 + $0x8e0] sm:$0xff] }
 0x369   : > { %6731 = vmatmul.mubr.bf16.gmra.mrb[12].mxu0 %v14098_v9  ;;  %v1066_v9 = vld [vmem:[%s21806_s1 + $0x700] sm:$0xff] }
 0x36a   : > { %6740 = vmatprep.mubr.bf16.mxu0 %v14107_v10  ;;  %v1070_v10 = vld [vmem:[%s21806_s1 + $0x720] sm:$0xff] }
 0x36b   : > { %v14295_v11 = vcombine.high %v1066_v9, %v1070_v10  ;;  %v14294_v12 = vcombine.low %v1066_v9, %v1070_v10  ;;  %v1012_v9 = vld [vmem:[%s21806_s1 + $0x550] sm:$0xff] }
 0x36c   : > { %v1016_v10 = vld [vmem:[%s21806_s1 + $0x570] sm:$0xff] }
 0x36d   : > { %5634 = vmatprep.mubr.bf16.mxu1 %v14295_v11 }
 0x36e   : > { %5635 = vmatmul.mubr.bf16.gmra.mrb[24].mxu1 %v14294_v12  ;;  %v14243_v12 = vcombine.high %v1012_v9, %v1016_v10 }
 0x371   : > { %6741 = vmatmul.mubr.bf16.gmra.mrb[16].mxu0 %v14106_v13  ;;  %v956_v13 = vld [vmem:[%s21806_s1 + $0x390] sm:$0xff] }
 0x372   : > { %6750 = vmatprep.mubr.bf16.mxu0 %v14115_v14  ;;  %v960_v14 = vld [vmem:[%s21806_s1 + $0x3b0] sm:$0xff] }
 0x373   : > { %v14187_v16 = vcombine.high %v956_v13, %v960_v14  ;;  %v14186_v23 = vcombine.low %v956_v13, %v960_v14  ;;  %v1130_v13 = vld [vmem:[%s21806_s1 + $0x900] sm:$0xff] }
 0x374   : > { %v1134_v14 = vld [vmem:[%s21806_s1 + $0x920] sm:$0xff] }
 0x379   : > { %6751 = vmatmul.mubr.bf16.gmra.mrb[20].mxu0 %v14114_v17  ;;  %v1074_v17 = vld [vmem:[%s21806_s1 + $0x740] sm:$0xff] }
 0x37a   : > { %6760 = vmatprep.mubr.bf16.mxu0 %v14123_v18  ;;  %v1078_v18 = vld [vmem:[%s21806_s1 + $0x760] sm:$0xff] }
 0x37b   : > { %v14303_v19 = vcombine.high %v1074_v17, %v1078_v18  ;;  %v14302_v20 = vcombine.low %v1074_v17, %v1078_v18  ;;  %v1020_v17 = vld [vmem:[%s21806_s1 + $0x590] sm:$0xff] }
 0x37c   : > { %v1024_v18 = vld [vmem:[%s21806_s1 + $0x5b0] sm:$0xff] }
 0x37d   : > { %5644 = vmatprep.mubr.bf16.mxu1 %v14303_v19  ;;  %v14242_v19 = vcombine.low %v1012_v9, %v1016_v10  ;;  %v14250_v27 = vcombine.low %v1020_v17, %v1024_v18  ;;  %v14290_v9 = vcombine.low %v1060_v59, %v1064_v60  ;;  %v1218_v59 = vld [vmem:[%s21806_s1 + $0xbc0] sm:$0xff] }
 0x37e   : > { %5645 = vmatmul.mubr.bf16.gmra.mrb[28].mxu1 %v14302_v20  ;;  %v14251_v20 = vcombine.high %v1020_v17, %v1024_v18  ;;  %v1080_v17 = vld [vmem:[%s21806_s1 + $0x770] sm:$0xff]  ;;  %v1358_v18 = vld [vmem:[%s21807_s2 + $0x20] sm:$0xff] }
 0x37f   : > { %5654 = vmatprep.mubr.bf16.mxu1 %v14311_v31  ;;  %v1146_v31 = vld [vmem:[%s21806_s1 + $0x980] sm:$0xff] }
 0x380   : > { %v1222_v60 = vld [vmem:[%s21806_s1 + $0xbe0] sm:$0xff] }
 0x381   : > { %6761 = vmatmul.mubr.bf16.gmra.mrb[24].mxu0 %v14122_v21  ;;  %v964_v21 = vld [vmem:[%s21806_s1 + $0x3d0] sm:$0xff] }
 0x382   : > { %6770 = vmatprep.mubr.bf16.mxu0 %v14131_v22  ;;  %v968_v22 = vld [vmem:[%s21806_s1 + $0x3f0] sm:$0xff] }
 0x383   : > { %v14195_v24 = vcombine.high %v964_v21, %v968_v22  ;;  %v14194_v33 = vcombine.low %v964_v21, %v968_v22  ;;  %v1138_v21 = vld [vmem:[%s21806_s1 + $0x940] sm:$0xff] }
 0x384   : > { %v1142_v22 = vld [vmem:[%s21806_s1 + $0x960] sm:$0xff] }
 0x386   : > { %5655 = vmatmul.mubr.bf16.gmra.mrb[32].mxu1 %v14310_v32  ;;  %v1150_v32 = vld [vmem:[%s21806_s1 + $0x9a0] sm:$0xff] }
 0x389   : > { %6771 = vmatmul.mubr.bf16.gmra.mrb[28].mxu0 %v14130_v29  ;;  %v972_v29 = vld [vmem:[%s21806_s1 + $0x410] sm:$0xff] }
 0x38a   : > { %6780 = vmatprep.mubr.bf16.mxu0 %v14139_v30  ;;  %v976_v30 = vld [vmem:[%s21806_s1 + $0x430] sm:$0xff] }
 0x38b   : > { %v14203_v34 = vcombine.high %v972_v29, %v976_v30  ;;  %v14202_v41 = vcombine.low %v972_v29, %v976_v30  ;;  %v16943_v29 = vld [vmem:[%s17344_s6 + $0x330] ss:$8 sps:$4 sm:$0xff]   ;;  %v16945_v30 = vld [vmem:[%s17344_s6 + $0x334] ss:$8 sps:$4 sm:$0xff]  }
 0x38c   : > { %7347 = vmatprep.subr.bf16.mxu0 %v16945_v30 }
 0x38d   : > { %7348 = vmatpush1.bf16.msra.mxu0 %v16943_v29 }
 0x391   : > { %6781 = vmatmul.mubr.bf16.gmra.mrb[32].mxu0 %v14138_v37  ;;  %v14319_v37 = vcombine.high %v1090_v35, %v1094_v36 }
 0x392   : > { %6790 = vmatprep.mubr.bf16.mxu0 %v14147_v38  ;;  %v14318_v38 = vcombine.low %v1090_v35, %v1094_v36  ;;  %v14375_v35 = vcombine.high %v1146_v31, %v1150_v32  ;;  %v14374_v36 = vcombine.low %v1146_v31, %v1150_v32  ;;  %v1364_v31 = vld [vmem:[%s21807_s2 + $0x50] sm:$0xff] }
 0x393   : > { %5664 = vmatprep.mubr.bf16.mxu1 %v14319_v37  ;;  %v14258_v37 = vcombine.low %v1028_v25, %v1032_v26  ;;  %v1084_v26 = vld [vmem:[%s21806_s1 + $0x790] sm:$0xff] }
 0x394   : > { %5665 = vmatmul.mubr.bf16.gmra.mrb[36].mxu1 %v14318_v38  ;;  %v1356_v32 = vld [vmem:[%s21807_s2 + $0x10] sm:$0xff] }
 0x399   : > { %6791 = vmatmul.mubr.bf16.gmra.mrb[36].mxu0 %v14146_v45  ;;  %v14327_v45 = vcombine.high %v1098_v43, %v1102_v44 }
 0x39a   : > { %6800 = vmatprep.mubr.bf16.mxu0 %v14155_v46  ;;  %v14326_v46 = vcombine.low %v1098_v43, %v1102_v44  ;;  %v1044_v43 = vld [vmem:[%s21806_s1 + $0x650] sm:$0xff] }
 0x39b   : > { %5674 = vmatprep.mubr.bf16.mxu1 %v14327_v45  ;;  %v1048_v44 = vld [vmem:[%s21806_s1 + $0x670] sm:$0xff] }
 0x39c   : > { %5675 = vmatmul.mubr.bf16.gmra.mrb[40].mxu1 %v14326_v46  ;;  %v14275_v46 = vcombine.high %v1044_v43, %v1048_v44 }
 0x3a1   : > { %6801 = vmatmul.mubr.bf16.gmra.mrb[40].mxu0 %v14154_v53  ;;  %v14335_v53 = vcombine.high %v1106_v51, %v1110_v52 }
 0x3a2   : > { %6810 = vmatprep.mubr.bf16.mxu0 %v14163_v54  ;;  %v14334_v54 = vcombine.low %v1106_v51, %v1110_v52  ;;  %v1052_v51 = vld [vmem:[%s21806_s1 + $0x690] sm:$0xff] }
 0x3a3   : > { %5684 = vmatprep.mubr.bf16.mxu1 %v14335_v53  ;;  %v1056_v52 = vld [vmem:[%s21806_s1 + $0x6b0] sm:$0xff]  ;;  %v14274_v53 = vcombine.low %v1044_v43, %v1048_v44  ;;  %v1359_v44 = vld [vmem:[%s21807_s2 + $0x28] sm:$0xff] }
 0x3a4   : > { %5685 = vmatmul.mubr.bf16.gmra.mrb[44].mxu1 %v14334_v54  ;;  %v14283_v54 = vcombine.high %v1052_v51, %v1056_v52  ;;  %v14282_v61 = vcombine.low %v1052_v51, %v1056_v52  ;;  %v1368_v43 = vld [vmem:[%s21807_s2 + $0x70] sm:$0xff] }
 0x3a5   : > { %5694 = vmatprep.mubr.bf16.mxu1 %v14343_v1  ;;  %v1178_v1 = vld [vmem:[%s21806_s1 + $0xa80] sm:$0xff] }
 0x3a9   : > { %6811 = vmatmul.mubr.bf16.gmra.mrb[44].mxu0 %v14162_v63  ;;  %v1004_v63 = vld [vmem:[%s21806_s1 + $0x510] sm:$0xff] }
 0x3aa   : > { %6820 = vmatprep.mubr.bf16.mxu0 %v14171_v0  ;;  %v1008_v0 = vld [vmem:[%s21806_s1 + $0x530] sm:$0xff] }
 0x3ab   : > { %v14235_v4 = vcombine.high %v1004_v63, %v1008_v0  ;;  %v14234_v11 = vcombine.low %v1004_v63, %v1008_v0  ;;  %v16946_v63 = vld [vmem:[%s17344_s6 + $0x340] ss:$8 sps:$4 sm:$0xff]   ;;  %v16948_v0 = vld [vmem:[%s17344_s6 + $0x344] ss:$8 sps:$4 sm:$0xff]  }
 0x3ac   : > { %5695 = vmatmul.mubr.bf16.gmra.mrb[48].mxu1 %v14342_v2  ;;  %v1182_v2 = vld [vmem:[%s21806_s1 + $0xaa0] sm:$0xff]  ;;  %7349 = vmatprep.subr.bf16.mxu0 %v16948_v0  ;;  %v14446_v0 = vcombine.low %v1218_v59, %v1222_v60 }
 0x3ad   : > { %7350 = vmatpush1.bf16.msra.mxu0 %v16946_v63  ;;  %v14447_v63 = vcombine.high %v1218_v59, %v1222_v60  ;;  %v1262_v59 = vld [vmem:[%s21806_s1 + $0xd20] sm:$0xff]  ;;  %v1148_v60 = vld [vmem:[%s21806_s1 + $0x990] sm:$0xff] }
 0x3b1   : > { %6821 = vmatmul.mubr.bf16.gmra.mrb[48].mxu0 %v14170_v7  ;;  %v14351_v7 = vcombine.high %v1122_v5, %v1126_v6 }
 0x3b2   : > { %6830 = vmatprep.mubr.bf16.mxu0 %v14179_v8  ;;  %v14350_v8 = vcombine.low %v1122_v5, %v1126_v6  ;;  %v1068_v5 = vld [vmem:[%s21806_s1 + $0x710] sm:$0xff] }
 0x3b3   : > { %5704 = vmatprep.mubr.bf16.mxu1 %v14351_v7  ;;  %v1072_v6 = vld [vmem:[%s21806_s1 + $0x730] sm:$0xff]  ;;  %v14407_v7 = vcombine.high %v1178_v1, %v1182_v2 }
 0x3b4   : > { %5705 = vmatmul.mubr.bf16.gmra.mrb[52].mxu1 %v14350_v8  ;;  %v14406_v8 = vcombine.low %v1178_v1, %v1182_v2  ;;  %v14299_v10 = vcombine.high %v1068_v5, %v1072_v6  ;;  %v1374_v1 = vld [vmem:[%s21807_s2 + $0xa0] sm:$0xff]  ;;  %v1365_v2 = vld [vmem:[%s21807_s2 + $0x58] sm:$0xff] }
 0x3b9   : > { %6831 = vmatmul.mubr.bf16.gmra.mrb[52].mxu0 %v14178_v15  ;;  %v14359_v15 = vcombine.high %v1130_v13, %v1134_v14 }
 0x3ba   : > { %6840 = vmatprep.mubr.bf16.mxu0 %v14187_v16  ;;  %v14358_v16 = vcombine.low %v1130_v13, %v1134_v14  ;;  %v1190_v13 = vld [vmem:[%s21806_s1 + $0xae0] sm:$0xff] }
 0x3bb   : > { %5714 = vmatprep.mubr.bf16.mxu1 %v14359_v15 }
 0x3bc   : > { %5715 = vmatmul.mubr.bf16.gmra.mrb[56].mxu1 %v14358_v16  ;;  %v1076_v16 = vld [vmem:[%s21806_s1 + $0x750] sm:$0xff] }
 0x3bd   : > { %v14306_v29 = vcombine.low %v1076_v16, %v1080_v17 }
 0x3c1   : > { %6841 = vmatmul.mubr.bf16.gmra.mrb[56].mxu0 %v14186_v23  ;;  %v14367_v23 = vcombine.high %v1138_v21, %v1142_v22 }
 0x3c2   : > { %6850 = vmatprep.mubr.bf16.mxu0 %v14195_v24  ;;  %v14366_v24 = vcombine.low %v1138_v21, %v1142_v22  ;;  %v1360_v21 = vld [vmem:[%s21807_s2 + $0x30] sm:$0xff]  ;;  %v1194_v22 = vld [vmem:[%s21806_s1 + $0xb00] sm:$0xff] }
 0x3c3   : > { %5724 = vmatprep.mubr.bf16.mxu1 %v14367_v23  ;;  %v1198_v23 = vld [vmem:[%s21806_s1 + $0xb20] sm:$0xff] }
 0x3c4   : > { %5725 = vmatmul.mubr.bf16.gmra.mrb[60].mxu1 %v14366_v24  ;;  %v14423_v24 = vcombine.high %v1194_v22, %v1198_v23  ;;  %v14422_v25 = vcombine.low %v1194_v22, %v1198_v23  ;;  %v1124_v22 = vld [vmem:[%s21806_s1 + $0x8d0] sm:$0xff] }
 0x3c5   : > { %5734 = vmatprep.mubr.bf16.mxu1 %v14375_v35  ;;  %v1092_v35 = vld [vmem:[%s21806_s1 + $0x7d0] sm:$0xff] }
 0x3c6   : > { %v1128_v23 = vld [vmem:[%s21806_s1 + $0x8f0] sm:$0xff] }
 0x3c9   : > { %6851 = vmatmul.mubr.bf16.gmra.mrb[60].mxu0 %v14194_v33  ;;  %v1036_v33 = vld [vmem:[%s21806_s1 + $0x610] sm:$0xff] }
 0x3ca   : > { %6860 = vmatprep.mubr.bf16.mxu0 %v14203_v34  ;;  %v1040_v34 = vld [vmem:[%s21806_s1 + $0x630] sm:$0xff] }
 0x3cb   : > { %v14267_v38 = vcombine.high %v1036_v33, %v1040_v34  ;;  %v14266_v45 = vcombine.low %v1036_v33, %v1040_v34  ;;  %v1202_v33 = vld [vmem:[%s21806_s1 + $0xb40] sm:$0xff] }
 0x3cc   : > { %5735 = vmatmul.mubr.bf16.gmra.mrb[64].mxu1 %v14374_v36  ;;  %v1206_v34 = vld [vmem:[%s21806_s1 + $0xb60] sm:$0xff]  ;;  %v1096_v36 = vld [vmem:[%s21806_s1 + $0x7f0] sm:$0xff] }
 0x3d1   : > { %6861 = vmatmul.mubr.bf16.gmra.mrb[64].mxu0 %v14202_v41  ;;  %v14383_v41 = vcombine.high %v1154_v39, %v1158_v40 }
 0x3d2   : > { %6870 = vmatprep.mubr.bf16.mxu0 %v14211_v42  ;;  %v14382_v42 = vcombine.low %v1154_v39, %v1158_v40  ;;  %v1366_v39 = vld [vmem:[%s21807_s2 + $0x60] sm:$0xff]  ;;  %v1357_v40 = vld [vmem:[%s21807_s2 + $0x18] sm:$0xff] }
 0x3d3   : > { %5744 = vmatprep.mubr.bf16.mxu1 %v14383_v41 }
 0x3d4   : > { %5745 = vmatmul.mubr.bf16.gmra.mrb[68].mxu1 %v14382_v42  ;;  %v14323_v42 = vcombine.high %v1092_v35, %v1096_v36 }
 0x3d9   : > { %6871 = vmatmul.mubr.bf16.gmra.mrb[68].mxu0 %v14210_v49  ;;  %v14391_v49 = vcombine.high %v1162_v47, %v1166_v48 }
 0x3da   : > { %6880 = vmatprep.mubr.bf16.mxu0 %v14219_v50  ;;  %v14390_v50 = vcombine.low %v1162_v47, %v1166_v48  ;;  %v1210_v47 = vld [vmem:[%s21806_s1 + $0xb80] sm:$0xff] }
 0x3db   : > { %5754 = vmatprep.mubr.bf16.mxu1 %v14391_v49  ;;  %v1214_v48 = vld [vmem:[%s21806_s1 + $0xba0] sm:$0xff]  ;;  %v1100_v49 = vld [vmem:[%s21806_s1 + $0x810] sm:$0xff] }
 0x3dc   : > { %5755 = vmatmul.mubr.bf16.gmra.mrb[72].mxu1 %v14390_v50  ;;  %v1104_v50 = vld [vmem:[%s21806_s1 + $0x830] sm:$0xff]  ;;  %v14439_v51 = vcombine.high %v1210_v47, %v1214_v48  ;;  %v14438_v52 = vcombine.low %v1210_v47, %v1214_v48  ;;  %v1254_v47 = vld [vmem:[%s21806_s1 + $0xce0] sm:$0xff] }
 0x3dd   : > { %v1140_v48 = vld [vmem:[%s21806_s1 + $0x950] sm:$0xff] }
 0x3e1   : > { %6881 = vmatmul.mubr.bf16.gmra.mrb[72].mxu0 %v14218_v57  ;;  %v14399_v57 = vcombine.high %v1170_v55, %v1174_v56 }
 0x3e2   : > { %6890 = vmatprep.mubr.bf16.mxu0 %v14227_v58  ;;  %v14398_v58 = vcombine.low %v1170_v55, %v1174_v56  ;;  %v14322_v55 = vcombine.low %v1092_v35, %v1096_v36  ;;  %v14331_v56 = vcombine.high %v1100_v49, %v1104_v50  ;;  %v1246_v35 = vld [vmem:[%s21806_s1 + $0xca0] sm:$0xff]  ;;  %v1132_v36 = vld [vmem:[%s21806_s1 + $0x910] sm:$0xff] }
 0x3e3   : > { %5764 = vmatprep.mubr.bf16.mxu1 %v14399_v57  ;;  %v1372_v57 = vld [vmem:[%s21807_s2 + $0x90] sm:$0xff] }
 0x3e4   : > { %5765 = vmatmul.mubr.bf16.gmra.mrb[76].mxu1 %v14398_v58  ;;  %v1363_v58 = vld [vmem:[%s21807_s2 + $0x48] sm:$0xff] }
 0x3e5   : > { %5774 = vmatprep.mubr.bf16.mxu1 %v14407_v7  ;;  %v1367_v7 = vld [vmem:[%s21807_s2 + $0x68] sm:$0xff] }
 0x3e9   : > { %6891 = vmatmul.mubr.bf16.gmra.mrb[76].mxu0 %v14226_v3  ;;  %v21809_v3 = vmov 0  }
 0x3ea   : > { %6900 = vmatprep.mubr.bf16.mxu0 %v14235_v4  ;;  %16779 = vset.pattern.permute.xlu0 %v21809_v3  ;;  %v1354_v4 = vld [vmem:[%s21807_s2] sm:$0xff] }
 0x3eb   : > { %1484 = vperm.xlu0 %16779, %v1354_v4   ;;  %16780 = vset.pattern.permute.xlu1 %v21809_v3  ;;  %v14330_v4 = vcombine.low %v1100_v49, %v1104_v50  ;;  %v1144_v49 = vld [vmem:[%s21806_s1 + $0x970] sm:$0xff] }
 0x3ec   : > { %5775 = vmatmul.mubr.bf16.gmra.mrb[80].mxu1 %v14406_v8  ;;  %1494 = vperm.xlu1 %16780, %v1356_v32   ;;  %v1226_v8 = vld [vmem:[%s21806_s1 + $0xc00] sm:$0xff] }
 0x3ed   : > { %v16952_v32 = vld [vmem:[%s17344_s6 + $0x360] ss:$8 sps:$4 sm:$0xff]  }
 0x3f0   : > { %1499 = vperm.xlu1 %16780, %v1357_v40   ;;  %v1386_v40 = vld [vmem:[%s21807_s2 + $0x100] sm:$0xff] }
 0x3f1   : > { %6901 = vmatmul.mubr.bf16.gmra.mrb[80].mxu0 %v14234_v11  ;;  %v1355_v11 = vld [vmem:[%s21807_s2 + $0x8] sm:$0xff] }
 0x3f2   : > { %6910 = vmatprep.mubr.bf16.mxu0 %v14243_v12  ;;  %v1186_v12 = vld [vmem:[%s21806_s1 + $0xac0] sm:$0xff]  ;;  %1489 = vperm.xlu0 %16779, %v1355_v11   ;;  %v1120_v11 = vld [vmem:[%s21806_s1 + $0x8b0] sm:$0xff] }
 0x3f3   : > { %v14415_v14 = vcombine.high %v1186_v12, %v1190_v13  ;;  %v14414_v15 = vcombine.low %v1186_v12, %v1190_v13 }
 0x3f4   : > { %1509 = vperm.xlu1 %16780, %v1359_v44   ;;  %v1388_v44 = vld [vmem:[%s21807_s2 + $0x110] sm:$0xff] }
 0x3f5   : > { %5784 = vmatprep.mubr.bf16.mxu1 %v14415_v14  ;;  %v1378_v14 = vld [vmem:[%s21807_s2 + $0xc0] sm:$0xff] }
 0x3f6   : > { %5785 = vmatmul.mubr.bf16.gmra.mrb[84].mxu1 %v14414_v15  ;;  %1504 = vperm.xlu0 %16779, %v1358_v18   ;;  %v1369_v15 = vld [vmem:[%s21807_s2 + $0x78] sm:$0xff]  ;;  %v1380_v18 = vld [vmem:[%s21807_s2 + $0xd0] sm:$0xff] }
 0x3f7   : > { %5794 = vmatprep.mubr.bf16.mxu1 %v14423_v24 }
 0x3f9   : > { %6911 = vmatmul.mubr.bf16.gmra.mrb[84].mxu0 %v14242_v19  ;;  %v14298_v19 = vcombine.low %v1068_v5, %v1072_v6  ;;  %v1376_v6 = vld [vmem:[%s21807_s2 + $0xb0] sm:$0xff] }
 0x3fa   : > { %6920 = vmatprep.mubr.bf16.mxu0 %v14251_v20  ;;  %v14307_v20 = vcombine.high %v1076_v16, %v1080_v17  ;;  %1514 = vperm.xlu0 %16779, %v1360_v21   ;;  %v1238_v21 = vld [vmem:[%s21806_s1 + $0xc60] sm:$0xff] }
 0x3fe   : > { %5795 = vmatmul.mubr.bf16.gmra.mrb[88].mxu1 %v14422_v25 }
 0x401   : > { %6921 = vmatmul.mubr.bf16.gmra.mrb[88].mxu0 %v14250_v27  ;;  %v1088_v27 = vld [vmem:[%s21806_s1 + $0x7b0] sm:$0xff] }
 0x402   : > { %6930 = vmatprep.mubr.bf16.mxu0 %v14259_v28  ;;  %v1362_v28 = vld [vmem:[%s21807_s2 + $0x40] sm:$0xff]  ;;  %v14315_v30 = vcombine.high %v1084_v26, %v1088_v27  ;;  %v14314_v41 = vcombine.low %v1084_v26, %v1088_v27  ;;  %v1373_v27 = vld [vmem:[%s21807_s2 + $0x98] sm:$0xff] }
 0x403   : > { %1524 = vperm.xlu0 %16779, %v1362_v28   ;;  %v1382_v26 = vld [vmem:[%s21807_s2 + $0xe0] sm:$0xff] }
 0x407   : > { %1534 = vperm.xlu0 %16779, %v1364_v31   ;;  %v1375_v31 = vld [vmem:[%s21807_s2 + $0xa8] sm:$0xff] }
 0x409   : > { %6931 = vmatmul.mubr.bf16.gmra.mrb[92].mxu0 %v14258_v37  ;;  %v14431_v37 = vcombine.high %v1202_v33, %v1206_v34 }
 0x40a   : > { %6940 = vmatprep.mubr.bf16.mxu0 %v14267_v38  ;;  %v14430_v38 = vcombine.low %v1202_v33, %v1206_v34  ;;  %v16954_v33 = vld [vmem:[%s17344_s6 + $0x364] ss:$8 sps:$4 sm:$0xff]  }
 0x40b   : > { %5804 = vmatprep.mubr.bf16.mxu1 %v14431_v37  ;;  %1544 = vperm.xlu0 %16779, %v1366_v39   ;;  %v1242_v34 = vld [vmem:[%s21806_s1 + $0xc80] sm:$0xff]  ;;  %v1136_v37 = vld [vmem:[%s21806_s1 + $0x930] sm:$0xff] }
 0x40c   : > { %5805 = vmatmul.mubr.bf16.gmra.mrb[92].mxu1 %v14430_v38  ;;  %v14471_v38 = vcombine.high %v1242_v34, %v1246_v35  ;;  %v14470_v39 = vcombine.low %v1242_v34, %v1246_v35  ;;  %v1286_v34 = vld [vmem:[%s21806_s1 + $0xde0] sm:$0xff]  ;;  %v1172_v35 = vld [vmem:[%s21806_s1 + $0xa50] sm:$0xff] }
 0x40d   : > { %5814 = vmatprep.mubr.bf16.mxu1 %v14439_v51 }
 0x40f   : > { %1554 = vperm.xlu0 %16779, %v1368_v43   ;;  %v14363_v43 = vcombine.high %v1132_v36, %v1136_v37 }
 0x411   : > { %6941 = vmatmul.mubr.bf16.gmra.mrb[96].mxu0 %v14266_v45  ;;  %v16949_v45 = vld [vmem:[%s17344_s6 + $0x350] ss:$8 sps:$4 sm:$0xff]  }
 0x412   : > { %6950 = vmatprep.mubr.bf16.mxu0 %v14275_v46  ;;  %v16951_v46 = vld [vmem:[%s17344_s6 + $0x354] ss:$8 sps:$4 sm:$0xff]  }
 0x413   : > { %7351 = vmatprep.subr.bf16.mxu0 %v16951_v46  ;;  %v1250_v46 = vld [vmem:[%s21806_s1 + $0xcc0] sm:$0xff] }
 0x414   : > { %7352 = vmatpush1.bf16.msra.mxu0 %v16949_v45  ;;  %5815 = vmatmul.mubr.bf16.gmra.mrb[96].mxu1 %v14438_v52  ;;  %v1379_v45 = vld [vmem:[%s21807_s2 + $0xc8] sm:$0xff]  ;;  %v14479_v50 = vcombine.high %v1250_v46, %v1254_v47  ;;  %v14478_v51 = vcombine.low %v1250_v46, %v1254_v47  ;;  %v1390_v52 = vld [vmem:[%s21807_s2 + $0x120] sm:$0xff]  ;;  %v1180_v47 = vld [vmem:[%s21806_s1 + $0xa90] sm:$0xff] }
 0x415   : > { %5824 = vmatprep.mubr.bf16.mxu1 %v14447_v63  ;;  %7353 = vmatprep.subr.bf16.mxu0 %v16954_v33  ;;  %v1282_v33 = vld [vmem:[%s21806_s1 + $0xdc0] sm:$0xff] }
 0x416   : > { %v1294_v46 = vld [vmem:[%s21806_s1 + $0xe20] sm:$0xff] }
 0x418   : > { %7354 = vmatpush1.bf16.msra.mxu0 %v16952_v32  ;;  %v1395_v32 = vld [vmem:[%s21807_s2 + $0x148] sm:$0xff] }
 0x419   : > { %6951 = vmatmul.mubr.bf16.gmra.mrb[100].mxu0 %v14274_v53  ;;  %v1370_v53 = vld [vmem:[%s21807_s2 + $0x80] sm:$0xff] }
 0x41a   : > { %6960 = vmatprep.mubr.bf16.mxu0 %v14283_v54  ;;  %v1361_v54 = vld [vmem:[%s21807_s2 + $0x38] sm:$0xff]  ;;  %1564 = vperm.xlu0 %16779, %v1370_v53  }
 0x41b   : > { %1519 = vperm.xlu1 %16780, %v1361_v54   ;;  %v1381_v53 = vld [vmem:[%s21807_s2 + $0xd8] sm:$0xff]  ;;  %v14362_v54 = vcombine.low %v1132_v36, %v1136_v37  ;;  %v1176_v36 = vld [vmem:[%s21806_s1 + $0xa70] sm:$0xff]  ;;  %v14511_v37 = vcombine.high %v1282_v33, %v1286_v34 }
 0x41c   : > { %5825 = vmatmul.mubr.bf16.gmra.mrb[100].mxu1 %v14446_v0  ;;  %v1394_v0 = vld [vmem:[%s21807_s2 + $0x140] sm:$0xff] }
 0x41e   : > { %1574 = vperm.xlu0 %16779, %v1372_v57   ;;  %v1383_v57 = vld [vmem:[%s21807_s2 + $0xe8] sm:$0xff] }
 0x41f   : > { %1529 = vperm.xlu1 %16780, %v1363_v58   ;;  %v1258_v58 = vld [vmem:[%s21806_s1 + $0xd00] sm:$0xff] }
 0x420   : > { %v14486_v63 = vcombine.low %v1258_v58, %v1262_v59 }
 0x421   : > { %6961 = vmatmul.mubr.bf16.gmra.mrb[104].mxu0 %v14282_v61  ;;  %v1108_v61 = vld [vmem:[%s21806_s1 + $0x850] sm:$0xff] }
 0x422   : > { %6970 = vmatprep.mubr.bf16.mxu0 %v14291_v62  ;;  %v1112_v62 = vld [vmem:[%s21806_s1 + $0x870] sm:$0xff]  ;;  %1584 = vperm.xlu0 %16779, %v1374_v1   ;;  %v1385_v1 = vld [vmem:[%s21807_s2 + $0xf8] sm:$0xff] }
 0x423   : > { %v14339_v5 = vcombine.high %v1108_v61, %v1112_v62  ;;  %1539 = vperm.xlu1 %16780, %v1365_v2   ;;  %v14338_v16 = vcombine.low %v1108_v61, %v1112_v62  ;;  %v1152_v61 = vld [vmem:[%s21806_s1 + $0x9b0] sm:$0xff]  ;;  %v14487_v62 = vcombine.high %v1258_v58, %v1262_v59  ;;  %v14370_v2 = vcombine.low %v1140_v48, %v1144_v49  ;;  %v1302_v58 = vld [vmem:[%s21806_s1 + $0xe60] sm:$0xff] }
 0x424   : > { %v1188_v59 = vld [vmem:[%s21806_s1 + $0xad0] sm:$0xff] }
 0x426   : > { %1594 = vperm.xlu0 %16779, %v1376_v6   ;;  %v1387_v6 = vld [vmem:[%s21807_s2 + $0x108] sm:$0xff] }
 0x427   : > { %1549 = vperm.xlu1 %16780, %v1367_v7   ;;  %v1266_v7 = vld [vmem:[%s21806_s1 + $0xd40] sm:$0xff] }
 0x429   : > { %6971 = vmatmul.mubr.bf16.gmra.mrb[108].mxu0 %v14290_v9  ;;  %v1230_v9 = vld [vmem:[%s21806_s1 + $0xc20] sm:$0xff] }
 0x42a   : > { %6980 = vmatprep.mubr.bf16.mxu0 %v14299_v10  ;;  %v1116_v10 = vld [vmem:[%s21806_s1 + $0x890] sm:$0xff]  ;;  %v14455_v12 = vcombine.high %v1226_v8, %v1230_v9  ;;  %v14454_v13 = vcombine.low %v1226_v8, %v1230_v9  ;;  %1604 = vperm.xlu0 %16779, %v1378_v14   ;;  %v1270_v8 = vld [vmem:[%s21806_s1 + $0xd60] sm:$0xff]  ;;  %v1389_v14 = vld [vmem:[%s21807_s2 + $0x118] sm:$0xff] }
 0x42b   : > { %v14347_v17 = vcombine.high %v1116_v10, %v1120_v11  ;;  %1559 = vperm.xlu1 %16780, %v1369_v15   ;;  %v14346_v28 = vcombine.low %v1116_v10, %v1120_v11  ;;  %v1156_v9 = vld [vmem:[%s21806_s1 + $0x9d0] sm:$0xff]  ;;  %v14495_v11 = vcombine.high %v1266_v7, %v1270_v8  ;;  %v14378_v15 = vcombine.low %v1148_v60, %v1152_v61 }
 0x42c   : > { %5834 = vmatprep.mubr.bf16.mxu1 %v14455_v12  ;;  %v1160_v10 = vld [vmem:[%s21806_s1 + $0x9f0] sm:$0xff]  ;;  %v14494_v12 = vcombine.low %v1266_v7, %v1270_v8  ;;  %v16960_v7 = vld [vmem:[%s17344_s6 + $0x384] ss:$8 sps:$4 sm:$0xff]  }
 0x42d   : > { %5835 = vmatmul.mubr.bf16.gmra.mrb[104].mxu1 %v14454_v13  ;;  %v1398_v13 = vld [vmem:[%s21807_s2 + $0x160] sm:$0xff] }
 0x42e   : > { %1614 = vperm.xlu0 %16779, %v1380_v18   ;;  %v1391_v18 = vld [vmem:[%s21807_s2 + $0x128] sm:$0xff]  ;;  %v1306_v8 = vld [vmem:[%s21806_s1 + $0xe80] sm:$0xff] }
 0x431   : > { %6981 = vmatmul.mubr.bf16.gmra.mrb[112].mxu0 %v14298_v19  ;;  %v1371_v19 = vld [vmem:[%s21807_s2 + $0x88] sm:$0xff] }
 0x432   : > { %6990 = vmatprep.mubr.bf16.mxu0 %v14307_v20  ;;  %v1234_v20 = vld [vmem:[%s21806_s1 + $0xc40] sm:$0xff]  ;;  %1569 = vperm.xlu1 %16780, %v1371_v19   ;;  %v16955_v19 = vld [vmem:[%s17344_s6 + $0x370] ss:$8 sps:$4 sm:$0xff]  }
 0x433   : > { %v14463_v24 = vcombine.high %v1234_v20, %v1238_v21  ;;  %v14462_v25 = vcombine.low %v1234_v20, %v1238_v21  ;;  %1624 = vperm.xlu0 %16779, %v1382_v26   ;;  %v16957_v20 = vld [vmem:[%s17344_s6 + $0x374] ss:$8 sps:$4 sm:$0xff]   ;;  %v1274_v21 = vld [vmem:[%s21806_s1 + $0xd80] sm:$0xff] }
 0x434   : > { %7355 = vmatprep.subr.bf16.mxu0 %v16957_v20  ;;  %v1314_v20 = vld [vmem:[%s21806_s1 + $0xec0] sm:$0xff] }
 0x435   : > { %5844 = vmatprep.mubr.bf16.mxu1 %v14463_v24  ;;  %v1168_v24 = vld [vmem:[%s21806_s1 + $0xa30] sm:$0xff]  ;;  %7356 = vmatpush1.bf16.msra.mxu0 %v16955_v19  ;;  %v1411_v19 = vld [vmem:[%s21807_s2 + $0x1c8] sm:$0xff] }
 0x436   : > { %5845 = vmatmul.mubr.bf16.gmra.mrb[108].mxu1 %v14462_v25  ;;  %1579 = vperm.xlu1 %16780, %v1373_v27   ;;  %v1402_v27 = vld [vmem:[%s21807_s2 + $0x180] sm:$0xff] }
 0x437   : > { %5854 = vmatprep.mubr.bf16.mxu1 %v14471_v38  ;;  %v14510_v38 = vcombine.low %v1282_v33, %v1286_v34  ;;  %7357 = vmatprep.subr.bf16.mxu0 %v16960_v7  ;;  %v16963_v33 = vld [vmem:[%s17344_s6 + $0x394] ss:$8 sps:$4 sm:$0xff]   ;;  %v1322_v34 = vld [vmem:[%s21806_s1 + $0xf00] sm:$0xff] }
 0x439   : > { %6991 = vmatmul.mubr.bf16.gmra.mrb[116].mxu0 %v14306_v29  ;;  %v14355_v29 = vcombine.high %v1124_v22, %v1128_v23 }
 0x43a   : > { %7000 = vmatprep.mubr.bf16.mxu0 %v14315_v30  ;;  %v1384_v30 = vld [vmem:[%s21807_s2 + $0xf0] sm:$0xff]  ;;  %1589 = vperm.xlu1 %16780, %v1375_v31  }
 0x43b   : > { %1634 = vperm.xlu0 %16779, %v1384_v30   ;;  %v1404_v31 = vld [vmem:[%s21807_s2 + $0x190] sm:$0xff] }
 0x43e   : > { %5855 = vmatmul.mubr.bf16.gmra.mrb[112].mxu1 %v14470_v39  ;;  %v1406_v39 = vld [vmem:[%s21807_s2 + $0x1a0] sm:$0xff] }
 0x43f   : > { %1644 = vperm.xlu0 %16779, %v1386_v40   ;;  %5864 = vmatprep.mubr.bf16.mxu1 %v14479_v50  ;;  %v1397_v40 = vld [vmem:[%s21807_s2 + $0x158] sm:$0xff] }
 0x441   : > { %7001 = vmatmul.mubr.bf16.gmra.mrb[120].mxu0 %v14314_v41  ;;  %v1377_v41 = vld [vmem:[%s21807_s2 + $0xb8] sm:$0xff] }
 0x442   : > { %7010 = vmatprep.mubr.bf16.mxu0 %v14323_v42  ;;  %v14354_v42 = vcombine.low %v1124_v22, %v1128_v23  ;;  %1599 = vperm.xlu1 %16780, %v1377_v41   ;;  %v1278_v22 = vld [vmem:[%s21806_s1 + $0xda0] sm:$0xff]  ;;  %v1164_v23 = vld [vmem:[%s21806_s1 + $0xa10] sm:$0xff] }
 0x443   : > { %1654 = vperm.xlu0 %16779, %v1388_v44   ;;  %v14503_v25 = vcombine.high %v1274_v21, %v1278_v22  ;;  %v14502_v26 = vcombine.low %v1274_v21, %v1278_v22  ;;  %v14395_v30 = vcombine.high %v1164_v23, %v1168_v24  ;;  %v14394_v41 = vcombine.low %v1164_v23, %v1168_v24  ;;  %v1399_v44 = vld [vmem:[%s21807_s2 + $0x168] sm:$0xff]  ;;  %v1318_v21 = vld [vmem:[%s21806_s1 + $0xee0] sm:$0xff]  ;;  %v1204_v22 = vld [vmem:[%s21806_s1 + $0xb50] sm:$0xff] }
 0x444   : > { %v1208_v23 = vld [vmem:[%s21806_s1 + $0xb70] sm:$0xff]  ;;  %v14543_v24 = vcombine.high %v1314_v20, %v1318_v21 }
 0x446   : > { %1609 = vperm.xlu1 %16780, %v1379_v45   ;;  %5865 = vmatmul.mubr.bf16.gmra.mrb[116].mxu1 %v14478_v51  ;;  %v1290_v45 = vld [vmem:[%s21806_s1 + $0xe00] sm:$0xff] }
 0x447   : > { %1664 = vperm.xlu0 %16779, %v1390_v52   ;;  %5874 = vmatprep.mubr.bf16.mxu1 %v14487_v62  ;;  %v14518_v50 = vcombine.low %v1290_v45, %v1294_v46  ;;  %v1410_v51 = vld [vmem:[%s21807_s2 + $0x1c0] sm:$0xff]  ;;  %v1401_v52 = vld [vmem:[%s21807_s2 + $0x178] sm:$0xff] }
 0x449   : > { %7011 = vmatmul.mubr.bf16.gmra.mrb[124].mxu0 %v14322_v55  ;;  %v14371_v55 = vcombine.high %v1140_v48, %v1144_v49  ;;  %v1184_v48 = vld [vmem:[%s21806_s1 + $0xab0] sm:$0xff]  ;;  %v14519_v49 = vcombine.high %v1290_v45, %v1294_v46  ;;  %v16964_v45 = vld [vmem:[%s17344_s6 + $0x3a0] ss:$8 sps:$4 sm:$0xff]  }
 0x44a   : > { %7020 = vmatprep.mubr.bf16.mxu0 %v14331_v56  ;;  %1619 = vperm.xlu1 %16780, %v1381_v53   ;;  %v1392_v56 = vld [vmem:[%s21807_s2 + $0x130] sm:$0xff]  ;;  %v14402_v53 = vcombine.low %v1172_v35, %v1176_v36 }
 0x44b   : > { %1674 = vperm.xlu0 %16779, %v1392_v56   ;;  %v1403_v56 = vld [vmem:[%s21807_s2 + $0x188] sm:$0xff]  ;;  %v1428_v46 = vld [vmem:[%s21807_s2 + $0x250] sm:$0xff] }
 0x44e   : > { %1629 = vperm.xlu1 %16780, %v1383_v57   ;;  %5875 = vmatmul.mubr.bf16.gmra.mrb[120].mxu1 %v14486_v63  ;;  %v1298_v57 = vld [vmem:[%s21806_s1 + $0xe40] sm:$0xff] }
 0x44f   : > { %1684 = vperm.xlu0 %16779, %v1394_v0   ;;  %5884 = vmatprep.mubr.bf16.mxu1 %v14495_v11  ;;  %v14526_v62 = vcombine.low %v1298_v57, %v1302_v58  ;;  %v1414_v63 = vld [vmem:[%s21807_s2 + $0x1e0] sm:$0xff]  ;;  %v1405_v0 = vld [vmem:[%s21807_s2 + $0x198] sm:$0xff]  ;;  %v1200_v11 = vld [vmem:[%s21806_s1 + $0xb30] sm:$0xff] }
 0x451   : > { %7021 = vmatmul.mubr.bf16.gmra.mrb[128].mxu0 %v14330_v4  ;;  %v14379_v4 = vcombine.high %v1148_v60, %v1152_v61  ;;  %v1192_v60 = vld [vmem:[%s21806_s1 + $0xaf0] sm:$0xff]  ;;  %v14527_v61 = vcombine.high %v1298_v57, %v1302_v58  ;;  %v1421_v57 = vld [vmem:[%s21807_s2 + $0x218] sm:$0xff] }
 0x452   : > { %7030 = vmatprep.mubr.bf16.mxu0 %v14339_v5  ;;  %1639 = vperm.xlu1 %16780, %v1385_v1   ;;  %v1396_v5 = vld [vmem:[%s21807_s2 + $0x150] sm:$0xff]  ;;  %v14410_v1 = vcombine.low %v1180_v47, %v1184_v48 }
 0x453   : > { %1694 = vperm.xlu0 %16779, %v1396_v5   ;;  %v1407_v5 = vld [vmem:[%s21807_s2 + $0x1a8] sm:$0xff] }
 0x456   : > { %1649 = vperm.xlu1 %16780, %v1387_v6   ;;  %5885 = vmatmul.mubr.bf16.gmra.mrb[124].mxu1 %v14494_v12  ;;  %v16958_v6 = vld [vmem:[%s17344_s6 + $0x380] ss:$8 sps:$4 sm:$0xff]  }
 0x457   : > { %1704 = vperm.xlu0 %16779, %v1398_v13   ;;  %5894 = vmatprep.mubr.bf16.mxu1 %v14503_v25  ;;  %v14542_v25 = vcombine.low %v1314_v20, %v1318_v21  ;;  %v1350_v20 = vld [vmem:[%s21806_s1 + $0xfe0] sm:$0xff]  ;;  %v1236_v21 = vld [vmem:[%s21806_s1 + $0xc50] sm:$0xff] }
 0x458   : > { %7358 = vmatpush1.bf16.msra.mxu0 %v16958_v6  ;;  %v1232_v6 = vld [vmem:[%s21806_s1 + $0xc30] sm:$0xff] }
 0x459   : > { %7031 = vmatmul.mubr.bf16.gmra.mrb[132].mxu0 %v14338_v16  ;;  %v14387_v16 = vcombine.high %v1156_v9, %v1160_v10  ;;  %7359 = vmatprep.subr.bf16.mxu0 %v16963_v33  ;;  %v1248_v33 = vld [vmem:[%s21806_s1 + $0xcb0] sm:$0xff] }
 0x45a   : > { %7040 = vmatprep.mubr.bf16.mxu0 %v14347_v17  ;;  %1659 = vperm.xlu1 %16780, %v1389_v14   ;;  %v1400_v17 = vld [vmem:[%s21807_s2 + $0x170] sm:$0xff]  ;;  %v1418_v14 = vld [vmem:[%s21807_s2 + $0x200] sm:$0xff] }
 0x45b   : > { %1714 = vperm.xlu0 %16779, %v1400_v17  }
 0x45e   : > { %1669 = vperm.xlu1 %16780, %v1391_v18   ;;  %5895 = vmatmul.mubr.bf16.gmra.mrb[128].mxu1 %v14502_v26  ;;  %v1420_v18 = vld [vmem:[%s21807_s2 + $0x210] sm:$0xff]  ;;  %v1422_v26 = vld [vmem:[%s21807_s2 + $0x220] sm:$0xff] }
 0x45f   : > { %1724 = vperm.xlu0 %16779, %v1402_v27   ;;  %5904 = vmatprep.mubr.bf16.mxu1 %v14511_v37  ;;  %v1413_v27 = vld [vmem:[%s21807_s2 + $0x1d8] sm:$0xff]  ;;  %v1216_v37 = vld [vmem:[%s21806_s1 + $0xbb0] sm:$0xff] }
 0x461   : > { %7041 = vmatmul.mubr.bf16.gmra.mrb[136].mxu0 %v14346_v28  ;;  %v1393_v28 = vld [vmem:[%s21807_s2 + $0x138] sm:$0xff] }
 0x462   : > { %7050 = vmatprep.mubr.bf16.mxu0 %v14355_v29  ;;  %v14386_v29 = vcombine.low %v1156_v9, %v1160_v10  ;;  %1679 = vperm.xlu1 %16780, %v1393_v28   ;;  %v1310_v9 = vld [vmem:[%s21806_s1 + $0xea0] sm:$0xff]  ;;  %v1196_v10 = vld [vmem:[%s21806_s1 + $0xb10] sm:$0xff] }
 0x463   : > { %1734 = vperm.xlu0 %16779, %v1404_v31   ;;  %v14535_v12 = vcombine.high %v1306_v8, %v1310_v9  ;;  %v14534_v13 = vcombine.low %v1306_v8, %v1310_v9  ;;  %v14427_v17 = vcombine.high %v1196_v10, %v1200_v11  ;;  %v14426_v28 = vcombine.low %v1196_v10, %v1200_v11  ;;  %v1415_v31 = vld [vmem:[%s21807_s2 + $0x1e8] sm:$0xff]  ;;  %v1434_v9 = vld [vmem:[%s21807_s2 + $0x280] sm:$0xff]  ;;  %v1425_v10 = vld [vmem:[%s21807_s2 + $0x238] sm:$0xff] }
 0x466   : > { %1689 = vperm.xlu1 %16780, %v1395_v32   ;;  %5905 = vmatmul.mubr.bf16.gmra.mrb[132].mxu1 %v14510_v38  ;;  %v16961_v32 = vld [vmem:[%s17344_s6 + $0x390] ss:$8 sps:$4 sm:$0xff]  }
 0x467   : > { %1744 = vperm.xlu0 %16779, %v1406_v39   ;;  %5914 = vmatprep.mubr.bf16.mxu1 %v14519_v49  ;;  %v16969_v49 = vld [vmem:[%s17344_s6 + $0x3b4] ss:$8 sps:$4 sm:$0xff]  }
 0x468   : > { %7360 = vmatpush1.bf16.msra.mxu0 %v16961_v32  ;;  %v1244_v32 = vld [vmem:[%s21806_s1 + $0xc90] sm:$0xff] }
 0x469   : > { %7051 = vmatmul.mubr.bf16.gmra.mrb[140].mxu0 %v14354_v42  ;;  %v14403_v42 = vcombine.high %v1172_v35, %v1176_v36  ;;  %v1326_v35 = vld [vmem:[%s21806_s1 + $0xf20] sm:$0xff]  ;;  %v1212_v36 = vld [vmem:[%s21806_s1 + $0xb90] sm:$0xff] }
 0x46a   : > { %7060 = vmatprep.mubr.bf16.mxu0 %v14363_v43  ;;  %1699 = vperm.xlu1 %16780, %v1397_v40   ;;  %v1408_v43 = vld [vmem:[%s21807_s2 + $0x1b0] sm:$0xff]  ;;  %v14551_v38 = vcombine.high %v1322_v34, %v1326_v35  ;;  %v14550_v39 = vcombine.low %v1322_v34, %v1326_v35  ;;  %v1426_v40 = vld [vmem:[%s21807_s2 + $0x240] sm:$0xff]  ;;  %v14442_v58 = vcombine.low %v1212_v36, %v1216_v37  ;;  %v1433_v35 = vld [vmem:[%s21807_s2 + $0x278] sm:$0xff] }
 0x46b   : > { %1754 = vperm.xlu0 %16779, %v1408_v43   ;;  %v14443_v43 = vcombine.high %v1212_v36, %v1216_v37  ;;  %v1442_v34 = vld [vmem:[%s21807_s2 + $0x2c0] sm:$0xff] }
 0x46e   : > { %1709 = vperm.xlu1 %16780, %v1399_v44   ;;  %5915 = vmatmul.mubr.bf16.gmra.mrb[136].mxu1 %v14518_v50  ;;  %v16966_v44 = vld [vmem:[%s17344_s6 + $0x3a4] ss:$8 sps:$4 sm:$0xff]  }
 0x46f   : > { %1764 = vperm.xlu0 %16779, %v1410_v51   ;;  %5924 = vmatprep.mubr.bf16.mxu1 %v14527_v61  ;;  %v1330_v50 = vld [vmem:[%s21806_s1 + $0xf40] sm:$0xff] }
 0x470   : > { %7361 = vmatprep.subr.bf16.mxu0 %v16966_v44  ;;  %v1334_v51 = vld [vmem:[%s21806_s1 + $0xf60] sm:$0xff] }
 0x471   : > { %7061 = vmatmul.mubr.bf16.gmra.mrb[144].mxu0 %v14362_v54  ;;  %v14411_v54 = vcombine.high %v1180_v47, %v1184_v48  ;;  %v1419_v47 = vld [vmem:[%s21807_s2 + $0x208] sm:$0xff]  ;;  %v16967_v48 = vld [vmem:[%s17344_s6 + $0x3b0] ss:$8 sps:$4 sm:$0xff]   ;;  %v1446_v44 = vld [vmem:[%s21807_s2 + $0x2e0] sm:$0xff] }
 0x472   : > { %7070 = vmatprep.mubr.bf16.mxu0 %v14371_v55  ;;  %1719 = vperm.xlu1 %16780, %v1401_v52   ;;  %v1412_v55 = vld [vmem:[%s21807_s2 + $0x1d0] sm:$0xff]  ;;  %v16970_v61 = vld [vmem:[%s17344_s6 + $0x3c0] ss:$8 sps:$4 sm:$0xff]  }
 0x473   : > { %1774 = vperm.xlu0 %16779, %v1412_v55   ;;  %7362 = vmatpush1.bf16.msra.mxu0 %v16964_v45  ;;  %v1220_v52 = vld [vmem:[%s21806_s1 + $0xbd0] sm:$0xff]  ;;  %v14558_v55 = vcombine.low %v1330_v50, %v1334_v51  ;;  %v1437_v45 = vld [vmem:[%s21807_s2 + $0x298] sm:$0xff] }
 0x474   : > { %7363 = vmatprep.subr.bf16.mxu0 %v16969_v49  ;;  %v1448_v49 = vld [vmem:[%s21807_s2 + $0x2f0] sm:$0xff] }
 0x476   : > { %1729 = vperm.xlu1 %16780, %v1403_v56   ;;  %5925 = vmatmul.mubr.bf16.gmra.mrb[140].mxu1 %v14526_v62  ;;  %v1430_v56 = vld [vmem:[%s21807_s2 + $0x260] sm:$0xff]  ;;  %v1432_v62 = vld [vmem:[%s21807_s2 + $0x270] sm:$0xff] }
 0x477   : > { %1784 = vperm.xlu0 %16779, %v1414_v63   ;;  %5934 = vmatprep.mubr.bf16.mxu1 %v14535_v12  ;;  %v1423_v63 = vld [vmem:[%s21807_s2 + $0x228] sm:$0xff] }
 0x478   : > { %7364 = vmatpush1.bf16.msra.mxu0 %v16967_v48 }
 0x479   : > { %7071 = vmatmul.mubr.bf16.gmra.mrb[148].mxu0 %v14370_v2  ;;  %v14419_v2 = vcombine.high %v1188_v59, %v1192_v60 }
 0x47a   : > { %7080 = vmatprep.mubr.bf16.mxu0 %v14379_v4  ;;  %1739 = vperm.xlu1 %16780, %v1405_v0   ;;  %v1416_v4 = vld [vmem:[%s21807_s2 + $0x1f0] sm:$0xff] }
 0x47b   : > { %1794 = vperm.xlu0 %16779, %v1416_v4   ;;  %v16973_v0 = vld [vmem:[%s17344_s6 + $0x3d0] ss:$8 sps:$4 sm:$0xff]   ;;  %v1342_v4 = vld [vmem:[%s21806_s1 + $0xfa0] sm:$0xff] }
 0x47e   : > { %1749 = vperm.xlu1 %16780, %v1407_v5   ;;  %5935 = vmatmul.mubr.bf16.gmra.mrb[144].mxu1 %v14534_v13  ;;  %v1228_v5 = vld [vmem:[%s21806_s1 + $0xc10] sm:$0xff]  ;;  %v16978_v13 = vld [vmem:[%s17344_s6 + $0x3e4] ss:$8 sps:$4 sm:$0xff]  }
 0x47f   : > { %1804 = vperm.xlu0 %16779, %v1418_v14   ;;  %5944 = vmatprep.mubr.bf16.mxu1 %v14543_v24  ;;  %v14459_v12 = vcombine.high %v1228_v5, %v1232_v6  ;;  %v16976_v14 = vld [vmem:[%s17344_s6 + $0x3e0] ss:$8 sps:$4 sm:$0xff]  }
 0x481   : > { %7081 = vmatmul.mubr.bf16.gmra.mrb[152].mxu0 %v14378_v15  ;;  %v1409_v15 = vld [vmem:[%s21807_s2 + $0x1b8] sm:$0xff] }
 0x482   : > { %7090 = vmatprep.mubr.bf16.mxu0 %v14387_v16  ;;  %v14418_v16 = vcombine.low %v1188_v59, %v1192_v60  ;;  %1759 = vperm.xlu1 %16780, %v1409_v15   ;;  %v16972_v60 = vld [vmem:[%s17344_s6 + $0x3c4] ss:$8 sps:$4 sm:$0xff]   ;;  %v1436_v15 = vld [vmem:[%s21807_s2 + $0x290] sm:$0xff] }
 0x483   : > { %1814 = vperm.xlu0 %16779, %v1420_v18   ;;  %7365 = vmatprep.subr.bf16.mxu0 %v16972_v60  ;;  %v16981_v18 = vld [vmem:[%s17344_s6 + $0x3f4] ss:$8 sps:$4 sm:$0xff]  }
 0x484   : > { %7366 = vmatpush1.bf16.msra.mxu0 %v16970_v61  ;;  %v1452_v60 = vld [vmem:[%s21807_s2 + $0x310] sm:$0xff]  ;;  %v1443_v61 = vld [vmem:[%s21807_s2 + $0x2c8] sm:$0xff] }
 0x486   : > { %1769 = vperm.xlu1 %16780, %v1411_v19   ;;  %5945 = vmatmul.mubr.bf16.gmra.mrb[148].mxu1 %v14542_v25  ;;  %v1346_v19 = vld [vmem:[%s21806_s1 + $0xfc0] sm:$0xff] }
 0x487   : > { %1824 = vperm.xlu0 %16779, %v1422_v26   ;;  %5954 = vmatprep.mubr.bf16.mxu1 %v14551_v38  ;;  %v14574_v24 = vcombine.low %v1346_v19, %v1350_v20  ;;  %v1438_v25 = vld [vmem:[%s21807_s2 + $0x2a0] sm:$0xff]  ;;  %v1429_v26 = vld [vmem:[%s21807_s2 + $0x258] sm:$0xff]  ;;  %v14475_v38 = vcombine.high %v1244_v32, %v1248_v33 }
 0x489   : > { %7091 = vmatmul.mubr.bf16.gmra.mrb[156].mxu0 %v14386_v29  ;;  %v14435_v29 = vcombine.high %v1204_v22, %v1208_v23 }
 0x48a   : > { %7100 = vmatprep.mubr.bf16.mxu0 %v14395_v30  ;;  %1779 = vperm.xlu1 %16780, %v1413_v27   ;;  %v1424_v30 = vld [vmem:[%s21807_s2 + $0x230] sm:$0xff]  ;;  %v14458_v27 = vcombine.low %v1228_v5, %v1232_v6 }
 0x48b   : > { %1834 = vperm.xlu0 %16779, %v1424_v30   ;;  %v1440_v30 = vld [vmem:[%s21807_s2 + $0x2b0] sm:$0xff] }
 0x48e   : > { %1789 = vperm.xlu1 %16780, %v1415_v31   ;;  %5955 = vmatmul.mubr.bf16.gmra.mrb[152].mxu1 %v14550_v39  ;;  %v1431_v31 = vld [vmem:[%s21807_s2 + $0x268] sm:$0xff]  ;;  %v1444_v39 = vld [vmem:[%s21807_s2 + $0x2d0] sm:$0xff] }
 0x48f   : > { %1844 = vperm.xlu0 %16779, %v1426_v40   ;;  %v1435_v40 = vld [vmem:[%s21807_s2 + $0x288] sm:$0xff] }
 0x491   : > { %7101 = vmatmul.mubr.bf16.gmra.mrb[160].mxu0 %v14394_v41  ;;  %v1417_v41 = vld [vmem:[%s21807_s2 + $0x1f8] sm:$0xff] }
 0x492   : > { %7110 = vmatprep.mubr.bf16.mxu0 %v14403_v42  ;;  %v14434_v42 = vcombine.low %v1204_v22, %v1208_v23  ;;  %1799 = vperm.xlu1 %16780, %v1417_v41   ;;  %v1240_v22 = vld [vmem:[%s21806_s1 + $0xc70] sm:$0xff]  ;;  %v14575_v23 = vcombine.high %v1346_v19, %v1350_v20  ;;  %v1451_v19 = vld [vmem:[%s21807_s2 + $0x308] sm:$0xff]  ;;  %v18904_v20 = vpop.f32.mrb[0].mxu1 }
 0x493   : > { %1854 = vperm.xlu0 %16779, %v1428_v46   ;;  %v14466_v36 = vcombine.low %v1236_v21, %v1240_v22  ;;  %v1252_v41 = vld [vmem:[%s21806_s1 + $0xcd0] sm:$0xff]  ;;  %v14474_v46 = vcombine.low %v1244_v32, %v1248_v33 }
 0x496   : > { %1809 = vperm.xlu1 %16780, %v1419_v47  }
 0x497   : > { %1864 = vperm.xlu0 %16779, %v1430_v56  }
 0x499   : > { %7111 = vmatmul.mubr.bf16.gmra.mrb[164].mxu0 %v14402_v53  ;;  %v1224_v53 = vld [vmem:[%s21806_s1 + $0xbf0] sm:$0xff] }
 0x49a   : > { %7120 = vmatprep.mubr.bf16.mxu0 %v14411_v54  ;;  %v14559_v54 = vcombine.high %v1330_v50, %v1334_v51  ;;  %v14451_v59 = vcombine.high %v1220_v52, %v1224_v53  ;;  %1819 = vperm.xlu1 %16780, %v1421_v57   ;;  %v14450_v11 = vcombine.low %v1220_v52, %v1224_v53  ;;  %v1439_v50 = vld [vmem:[%s21807_s2 + $0x2a8] sm:$0xff]  ;;  %v1260_v51 = vld [vmem:[%s21806_s1 + $0xd10] sm:$0xff]  ;;  %v18840_v53 = vpop.permute.xlu1 %1494 }
 0x49b   : > { %1874 = vperm.xlu0 %16779, %v1432_v62   ;;  %v1264_v52 = vld [vmem:[%s21806_s1 + $0xd30] sm:$0xff] }
 0x49c   : > { %5964 = vmatprep.mubr.bf16.mxu1 %v14559_v54  ;;  %v1450_v54 = vld [vmem:[%s21807_s2 + $0x300] sm:$0xff]  ;;  %v14491_v57 = vcombine.high %v1260_v51, %v1264_v52  ;;  %v1268_v62 = vld [vmem:[%s21806_s1 + $0xd50] sm:$0xff] }
 0x49d   : > { %5965 = vmatmul.mubr.bf16.gmra.mrb[156].mxu1 %v14558_v55  ;;  %v1441_v55 = vld [vmem:[%s21807_s2 + $0x2b8] sm:$0xff] }
 0x49e   : > { %1829 = vperm.xlu1 %16780, %v1423_v63   ;;  %v1272_v63 = vld [vmem:[%s21806_s1 + $0xd70] sm:$0xff] }
 0x49f   : > { %1884 = vperm.xlu0 %16779, %v1434_v9   ;;  %v14499_v5 = vcombine.high %v1268_v62, %v1272_v63  ;;  %v1276_v9 = vld [vmem:[%s21806_s1 + $0xd90] sm:$0xff] }
 0x4a1   : > { %7121 = vmatmul.mubr.bf16.gmra.mrb[168].mxu0 %v14410_v1  ;;  %v16975_v1 = vld [vmem:[%s17344_s6 + $0x3d4] ss:$8 sps:$4 sm:$0xff]  }
 0x4a2   : > { %7130 = vmatprep.mubr.bf16.mxu0 %v14419_v2  ;;  %v1338_v2 = vld [vmem:[%s21806_s1 + $0xf80] sm:$0xff]  ;;  %7367 = vmatprep.subr.bf16.mxu0 %v16975_v1  ;;  %v1445_v1 = vld [vmem:[%s21807_s2 + $0x2d8] sm:$0xff] }
 0x4a3   : > { %v14567_v7 = vcombine.high %v1338_v2, %v1342_v4  ;;  %v14566_v8 = vcombine.low %v1338_v2, %v1342_v4  ;;  %7368 = vmatpush1.bf16.msra.mxu0 %v16973_v0  ;;  %1839 = vperm.xlu1 %16780, %v1425_v10   ;;  %v1454_v0 = vld [vmem:[%s21807_s2 + $0x320] sm:$0xff]  ;;  %v14490_v2 = vcombine.low %v1260_v51, %v1264_v52  ;;  %v1280_v10 = vld [vmem:[%s21806_s1 + $0xdb0] sm:$0xff] }
 0x4a4   : > { %7369 = vmatprep.subr.bf16.mxu0 %v16978_v13  ;;  %1894 = vperm.xlu0 %16779, %v1436_v15   ;;  %v1449_v13 = vld [vmem:[%s21807_s2 + $0x2f8] sm:$0xff] }
 0x4a5   : > { %5974 = vmatprep.mubr.bf16.mxu1 %v14567_v7  ;;  %v1456_v7 = vld [vmem:[%s21807_s2 + $0x330] sm:$0xff] }
 0x4a6   : > { %5975 = vmatmul.mubr.bf16.gmra.mrb[160].mxu1 %v14566_v8  ;;  %v1447_v8 = vld [vmem:[%s21807_s2 + $0x2e8] sm:$0xff] }
 0x4a7   : > { %7370 = vmatpush1.bf16.msra.mxu0 %v16976_v14  ;;  %5984 = vmatprep.mubr.bf16.mxu1 %v14575_v23  ;;  %v14498_v14 = vcombine.low %v1268_v62, %v1272_v63  ;;  %v1288_v23 = vld [vmem:[%s21806_s1 + $0xdf0] sm:$0xff] }
 0x4a8   : > { %7371 = vmatprep.subr.bf16.mxu0 %v16981_v18  ;;  %1904 = vperm.xlu0 %16779, %v1438_v25   ;;  %v1460_v18 = vld [vmem:[%s21807_s2 + $0x350] sm:$0xff] }
 0x4a9   : > { %7131 = vmatmul.mubr.bf16.gmra.mrb[172].mxu0 %v14418_v16  ;;  %v1427_v16 = vld [vmem:[%s21807_s2 + $0x248] sm:$0xff]  ;;  %v1300_v62 = vld [vmem:[%s21806_s1 + $0xe50] sm:$0xff] }
 0x4aa   : > { %7140 = vmatprep.mubr.bf16.mxu0 %v14427_v17  ;;  %v16979_v17 = vld [vmem:[%s17344_s6 + $0x3f0] ss:$8 sps:$4 sm:$0xff]   ;;  %1849 = vperm.xlu1 %16780, %v1427_v16   ;;  %v14507_v16 = vcombine.high %v1276_v9, %v1280_v10 }
 0x4ab   : > { %7372 = vmatpush1.bf16.msra.mxu0 %v16979_v17  ;;  %v1304_v63 = vld [vmem:[%s21806_s1 + $0xe70] sm:$0xff] }
 0x4ac   : > { %1914 = vperm.xlu0 %16779, %v1440_v30   ;;  %v14506_v30 = vcombine.low %v1276_v9, %v1280_v10 }
 0x4ae   : > { %5985 = vmatmul.mubr.bf16.gmra.mrb[164].mxu1 %v14574_v24  ;;  %1859 = vperm.xlu1 %16780, %v1429_v26   ;;  %v1462_v26 = vld [vmem:[%s21807_s2 + $0x360] sm:$0xff] }
 0x4b0   : > { %1924 = vperm.xlu0 %16779, %v1442_v34  }
 0x4b1   : > { %7141 = vmatmul.mubr.bf16.gmra.mrb[176].mxu0 %v14426_v28  ;;  %v14467_v28 = vcombine.high %v1236_v21, %v1240_v22  ;;  %v18906_v21 = vpop.f32.mrb[1].mxu1  ;;  %v1284_v22 = vld [vmem:[%s21806_s1 + $0xdd0] sm:$0xff] }
 0x4b2   : > { %7150 = vmatprep.mubr.bf16.mxu0 %v14435_v29  ;;  %v18784_v29 = vpop.permute.xlu0 %1484  ;;  %1869 = vperm.xlu1 %16780, %v1431_v31   ;;  %v18916_v25 = vpop.f32.mrb[2].mxu1  ;;  %v14515_v31 = vcombine.high %v1284_v22, %v1288_v23 }
 0x4b4   : > { %1934 = vperm.xlu0 %16779, %v1444_v39   ;;  %v1292_v39 = vld [vmem:[%s21806_s1 + $0xe10] sm:$0xff] }
 0x4b6   : > { %v18804_v37 = vpop.permute.xlu0 %1489  ;;  %1879 = vperm.xlu1 %16780, %v1433_v35   ;;  %v1464_v35 = vld [vmem:[%s21807_s2 + $0x370] sm:$0xff] }
 0x4b8   : > { %1944 = vperm.xlu0 %16779, %v1446_v44   ;;  %v1466_v44 = vld [vmem:[%s21807_s2 + $0x380] sm:$0xff] }
 0x4b9   : > { %7151 = vmatmul.mubr.bf16.gmra.mrb[180].mxu0 %v14434_v42  ;;  %v1256_v42 = vld [vmem:[%s21806_s1 + $0xcf0] sm:$0xff] }
 0x4ba   : > { %7160 = vmatprep.mubr.bf16.mxu0 %v14443_v43  ;;  %v18818_v43 = vpop.permute.xlu0 %1504  ;;  %1889 = vperm.xlu1 %16780, %v1435_v40   ;;  %v14483_v47 = vcombine.high %v1252_v41, %v1256_v42  ;;  %v14482_v56 = vcombine.low %v1252_v41, %v1256_v42  ;;  %v1296_v40 = vld [vmem:[%s21806_s1 + $0xe30] sm:$0xff] }
 0x4bc   : > { %1954 = vperm.xlu0 %16779, %v1448_v49  }
 0x4be   : > { %1899 = vperm.xlu1 %16780, %v1437_v45   ;;  %v18826_v48 = vpop.permute.xlu0 %1514  ;;  %v1457_v45 = vld [vmem:[%s21807_s2 + $0x338] sm:$0xff] }
 0x4c0   : > { %1964 = vperm.xlu0 %16779, %v1450_v54  }
 0x4c1   : > { %7161 = vmatmul.mubr.bf16.gmra.mrb[184].mxu0 %v14442_v58 }
 0x4c2   : > { %7170 = vmatprep.mubr.bf16.mxu0 %v14451_v59  ;;  %1909 = vperm.xlu1 %16780, %v1439_v50   ;;  %v18848_v58 = vpop.permute.xlu0 %1524  ;;  %v18850_v59 = vpop.permute.xlu1 %1499  ;;  %v14523_v50 = vcombine.high %v1292_v39, %v1296_v40 }
 0x4c4   : > { %1974 = vperm.xlu0 %16779, %v1452_v60   ;;  %v1459_v60 = vld [vmem:[%s21807_s2 + $0x348] sm:$0xff] }
 0x4c6   : > { %1919 = vperm.xlu1 %16780, %v1441_v55   ;;  %v18870_v4 = vpop.permute.xlu0 %1534  ;;  %v18872_v6 = vpop.permute.xlu1 %1509 }
 0x4c8   : > { %1984 = vperm.xlu0 %16779, %v1454_v0  }
 0x4c9   : > { %7171 = vmatmul.mubr.bf16.gmra.mrb[188].mxu0 %v14450_v11 }
 0x4ca   : > { %7180 = vmatprep.mubr.bf16.mxu0 %v14459_v12  ;;  %1929 = vperm.xlu1 %16780, %v1443_v61   ;;  %v18886_v11 = vpop.permute.xlu0 %1544  ;;  %v1458_v12 = vld [vmem:[%s21807_s2 + $0x340] sm:$0xff]  ;;  %v18894_v15 = vpop.permute.xlu1 %1519 }
 0x4cc   : > { %1994 = vperm.xlu0 %16779, %v1456_v7   ;;  %v1461_v7 = vld [vmem:[%s21807_s2 + $0x358] sm:$0xff] }
 0x4ce   : > { %1939 = vperm.xlu1 %16780, %v1445_v1   ;;  %v18896_v17 = vpop.permute.xlu0 %1554  ;;  %v18914_v24 = vpop.permute.xlu1 %1529 }
 0x4d0   : > { %2004 = vperm.xlu0 %16779, %v1458_v12   ;;  %v14531_v12 = vcombine.high %v1300_v62, %v1304_v63 }
 0x4d1   : > { %7181 = vmatmul.mubr.bf16.gmra.mrb[192].mxu0 %v14458_v27  ;;  %v1453_v27 = vld [vmem:[%s21807_s2 + $0x318] sm:$0xff] }
 0x4d2   : > { %7190 = vmatprep.mubr.bf16.mxu0 %v14467_v28  ;;  %1949 = vperm.xlu1 %16780, %v1447_v8   ;;  %v18924_v28 = vpop.f32.mrb[3].mxu1  ;;  %v18926_v32 = vpop.permute.xlu0 %1564  ;;  %v14522_v8 = vcombine.low %v1292_v39, %v1296_v40  ;;  %v1474_v39 = vld [vmem:[%s21807_s2 + $0x3c0] sm:$0xff]  ;;  %v1465_v40 = vld [vmem:[%s21807_s2 + $0x378] sm:$0xff] }
 0x4d3   : > { %v18928_v33 = vpop.permute.xlu1 %1539  ;;  %v18930_v34 = vpop.f32.mrb[4].mxu1 }
 0x4d4   : > { %2014 = vperm.xlu0 %16779, %v1460_v18  }
 0x4d6   : > { %1959 = vperm.xlu1 %16780, %v1449_v13  }
 0x4d7   : > { %v18962_v52 = vpop.permute.xlu1 %1549 }
 0x4d8   : > { %2024 = vperm.xlu0 %16779, %v1462_v26  }
 0x4d9   : > { %7191 = vmatmul.mubr.bf16.gmra.mrb[196].mxu0 %v14466_v36  ;;  %v1455_v36 = vld [vmem:[%s21807_s2 + $0x328] sm:$0xff] }
 0x4da   : > { %7200 = vmatprep.mubr.bf16.mxu0 %v14475_v38  ;;  %1969 = vperm.xlu1 %16780, %v1451_v19   ;;  %v18938_v38 = vpop.f32.mrb[5].mxu1 }
 0x4db   : > { %v18946_v41 = vpop.f32.mrb[6].mxu1  ;;  %v18996_v9 = vpop.permute.xlu1 %1559 }
 0x4dc   : > { %2034 = vperm.xlu0 %16779, %v1464_v35   ;;  %v18948_v42 = vpop.f32.mrb[7].mxu1 }
 0x4dd   : > { %v18958_v49 = vpop.f32.mrb[8].mxu1 }
 0x4de   : > { %1979 = vperm.xlu1 %16780, %v1453_v27   ;;  %21811 = vst [vmem:[#allocation3_spill] sm:$0xff] %v18958_v49  ;;  %v18960_v51 = vpop.f32.mrb[9].mxu1  ;;  %v1308_v27 = vld [vmem:[%s21806_s1 + $0xe90] sm:$0xff] }
 0x4df   : > { %21812 = vst [vmem:[#allocation4_spill] sm:$0xff] %v18960_v51  ;;  %v18964_v54 = vpop.f32.mrb[10].mxu1 }
 0x4e0   : > { %2044 = vperm.xlu0 %16779, %v1466_v44   ;;  %21813 = vst [vmem:[#allocation5_spill] sm:$0xff] %v18964_v54  ;;  %v18966_v55 = vpop.f32.mrb[11].mxu1  ;;  %v14530_v44 = vcombine.low %v1300_v62, %v1304_v63  ;;  %v1476_v62 = vld [vmem:[%s21807_s2 + $0x3d0] sm:$0xff]  ;;  %v1467_v63 = vld [vmem:[%s21807_s2 + $0x388] sm:$0xff] }
 0x4e1   : > { %7201 = vmatmul.mubr.bf16.gmra.mrb[200].mxu0 %v14474_v46  ;;  %v14514_v46 = vcombine.low %v1284_v22, %v1288_v23  ;;  %21814 = vst [vmem:[#allocation6_spill] sm:$0xff] %v18966_v55  ;;  %v1472_v22 = vld [vmem:[%s21807_s2 + $0x3b0] sm:$0xff]  ;;  %v1463_v23 = vld [vmem:[%s21807_s2 + $0x368] sm:$0xff] }
 0x4e2   : > { %7210 = vmatprep.mubr.bf16.mxu0 %v14483_v47  ;;  %1989 = vperm.xlu1 %16780, %v1455_v36   ;;  %v18956_v47 = vpop.permute.xlu0 %1574 }
 0x4e6   : > { %1999 = vperm.xlu1 %16780, %v1457_v45   ;;  %v18984_v0 = vpop.permute.xlu0 %1584 }
 0x4e9   : > { %7211 = vmatmul.mubr.bf16.gmra.mrb[204].mxu0 %v14482_v56  ;;  %v18968_v56 = vpop.f32.mrb[12].mxu1 }
 0x4ea   : > { %7220 = vmatprep.mubr.bf16.mxu0 %v14491_v57  ;;  %21815 = vst [vmem:[#allocation7_spill] sm:$0xff] %v18968_v56  ;;  %v1468_v57 = vld [vmem:[%s21807_s2 + $0x390] sm:$0xff]  ;;  %v18976_v61 = vpop.f32.mrb[13].mxu1  ;;  %2009 = vperm.xlu1 %16780, %v1459_v60   ;;  %v19006_v18 = vpop.permute.xlu0 %1594 }
 0x4eb   : > { %21816 = vst [vmem:[#allocation8_spill] sm:$0xff] %v18976_v61  ;;  %2054 = vperm.xlu0 %16779, %v1468_v57   ;;  %v18986_v1 = vpop.f32.mrb[14].mxu1 }
 0x4ec   : > { %21817 = vst [vmem:[#allocation9_spill] sm:$0xff] %v18986_v1 }
 0x4ee   : > { %2019 = vperm.xlu1 %16780, %v1461_v7   ;;  %v19040_v57 = vpop.permute.xlu0 %1604 }
 0x4f1   : > { %7221 = vmatmul.mubr.bf16.gmra.mrb[208].mxu0 %v14490_v2  ;;  %v18988_v2 = vpop.f32.mrb[15].mxu1 }
 0x4f2   : > { %7230 = vmatprep.mubr.bf16.mxu0 %v14499_v5  ;;  %21818 = vst [vmem:[#allocation10_spill] sm:$0xff] %v18988_v2  ;;  %v1470_v5 = vld [vmem:[%s21807_s2 + $0x3a0] sm:$0xff]  ;;  %v18998_v10 = vpop.f32.mrb[16].mxu1  ;;  %2029 = vperm.xlu1 %16780, %v1463_v23   ;;  %v1320_v23 = vld [vmem:[%s21806_s1 + $0xef0] sm:$0xff] }
 0x4f3   : > { %21819 = vst [vmem:[#allocation11_spill] sm:$0xff] %v18998_v10  ;;  %v19000_v13 = vpop.f32.mrb[17].mxu1  ;;  %2064 = vperm.xlu0 %16779, %v1470_v5   ;;  %v1081_v10 = vld [vmem:[%s21806_s1 + $0x778] sm:$0xff] }
 0x4f4   : > { %21820 = vst [vmem:[#allocation12_spill] sm:$0xff] %v19000_v13  ;;  %v19586_v13 = vld [vmem:[%s21806_s1 + $0x1000] sm:$0xff] }
 0x4f6   : > { %2039 = vperm.xlu1 %16780, %v1465_v40  }
 0x4f7   : > { %2074 = vperm.xlu0 %16779, %v1472_v22   ;;  %v1316_v22 = vld [vmem:[%s21806_s1 + $0xed0] sm:$0xff] }
 0x4f9   : > { %7231 = vmatmul.mubr.bf16.gmra.mrb[212].mxu0 %v14498_v14  ;;  %v19002_v14 = vpop.f32.mrb[18].mxu1 }
 0x4fa   : > { %7240 = vmatprep.mubr.bf16.mxu0 %v14507_v16  ;;  %21821 = vst [vmem:[#allocation13_spill] sm:$0xff] %v19002_v14  ;;  %v19004_v16 = vpop.f32.mrb[19].mxu1  ;;  %2049 = vperm.xlu1 %16780, %v1467_v63  }
 0x4fb   : > { %21822 = vst [vmem:[#allocation14_spill] sm:$0xff] %v19004_v16  ;;  %v19008_v19 = vpop.f32.mrb[20].mxu1  ;;  %2084 = vperm.xlu0 %16779, %v1474_v39  }
 0x4fc   : > { %21823 = vst [vmem:[#allocation15_spill] sm:$0xff] %v19008_v19  ;;  %v19016_v26 = vpop.f32.mrb[21].mxu1 }
 0x4fd   : > { %21824 = vst [vmem:[#allocation16_spill] sm:$0xff] %v19016_v26  ;;  %v19026_v35 = vpop.f32.mrb[22].mxu1 }
 0x4fe   : > { %21825 = vst [vmem:[#allocation17_spill] sm:$0xff] %v19026_v35  ;;  %v19028_v36 = vpop.f32.mrb[23].mxu1 }
 0x4ff   : > { %21826 = vst [vmem:[#allocation18_spill] sm:$0xff] %v19028_v36  ;;  %v19036_v45 = vpop.f32.mrb[24].mxu1  ;;  %2094 = vperm.xlu0 %16779, %v1476_v62  }
 0x500   : > { %21827 = vst [vmem:[#allocation19_spill] sm:$0xff] %v19036_v45 }
 0x501   : > { %7241 = vmatmul.mubr.bf16.gmra.mrb[216].mxu0 %v14506_v30  ;;  %v1312_v30 = vld [vmem:[%s21806_s1 + $0xeb0] sm:$0xff] }
 0x502   : > { %7250 = vmatprep.mubr.bf16.mxu0 %v14515_v31  ;;  %v19024_v31 = vpop.permute.xlu1 %1569  ;;  %v14538_v3 = vcombine.low %v1308_v27, %v1312_v30 }
 0x506   : > { %v19046_v7 = vpop.permute.xlu1 %1579 }
 0x509   : > { %7251 = vmatmul.mubr.bf16.gmra.mrb[220].mxu0 %v14514_v46  ;;  %v14539_v46 = vcombine.high %v1308_v27, %v1312_v30  ;;  %v1480_v27 = vld [vmem:[%s21807_s2 + $0x3f0] sm:$0xff]  ;;  %v1471_v30 = vld [vmem:[%s21807_s2 + $0x3a8] sm:$0xff] }
 0x50a   : > { %7260 = vmatprep.mubr.bf16.mxu0 %v14523_v50  ;;  %v19038_v50 = vpop.f32.mrb[25].mxu1 }
 0x50b   : > { %21828 = vst [vmem:[#allocation20_spill] sm:$0xff] %v19038_v50  ;;  %v19042_v60 = vpop.f32.mrb[26].mxu1 }
 0x50c   : > { %21829 = vst [vmem:[#allocation21_spill] sm:$0xff] %v19042_v60  ;;  %v19044_v5 = vpop.f32.mrb[27].mxu1 }
 0x50d   : > { %21830 = vst [vmem:[#allocation22_spill] sm:$0xff] %v19044_v5  ;;  %v14547_v5 = vcombine.high %v1316_v22, %v1320_v23 }
 0x511   : > { %7261 = vmatmul.mubr.bf16.gmra.mrb[224].mxu0 %v14522_v8  ;;  %v19048_v8 = vpop.f32.mrb[28].mxu1 }
 0x512   : > { %7270 = vmatprep.mubr.bf16.mxu0 %v14531_v12  ;;  %21831 = vst [vmem:[#allocation23_spill] sm:$0xff] %v19048_v8  ;;  %v19056_v12 = vpop.f32.mrb[29].mxu1 }
 0x513   : > { %21832 = vst [vmem:[#allocation24_spill] sm:$0xff] %v19056_v12  ;;  %v19064_v39 = vpop.f32.mrb[30].mxu1  ;;  %v19074_v12 = vpop.permute.xlu0 %1614 }
 0x514   : > { %21833 = vst [vmem:[#allocation25_spill] sm:$0xff] %v19064_v39  ;;  %v19066_v40 = vpop.f32.mrb[31].mxu1  ;;  %v19080_v39 = vpop.permute.xlu1 %1589 }
 0x515   : > { %21834 = vst [vmem:[#allocation26_spill] sm:$0xff] %v19066_v40  ;;  %v19076_v8 = vpop.f32.mrb[32].mxu1 }
 0x516   : > { %21835 = vst [vmem:[#allocation27_spill] sm:$0xff] %v19076_v8  ;;  %v19078_v62 = vpop.f32.mrb[33].mxu1 }
 0x517   : > { %21836 = vst [vmem:[#allocation28_spill] sm:$0xff] %v19078_v62  ;;  %v19082_v63 = vpop.f32.mrb[34].mxu1 }
 0x518   : > { %21837 = vst [vmem:[#allocation29_spill] sm:$0xff] %v19082_v63  ;;  %v19084_v40 = vpop.f32.mrb[35].mxu1  ;;  %v19111_v63 = vpop.permute.xlu1 %1599 }
 0x519   : > { %7271 = vmatmul.mubr.bf16.gmra.mrb[228].mxu0 %v14530_v44  ;;  %v1478_v44 = vld [vmem:[%s21807_s2 + $0x3e0] sm:$0xff]  ;;  %21838 = vst [vmem:[#allocation30_spill] sm:$0xff] %v19084_v40  ;;  %v19086_v60 = vpop.f32.mrb[36].mxu1 }
 0x51a   : > { %7280 = vmatprep.mubr.bf16.mxu0 %v14539_v46  ;;  %v1469_v46 = vld [vmem:[%s21807_s2 + $0x398] sm:$0xff]  ;;  %2104 = vperm.xlu0 %16779, %v1478_v44   ;;  %21839 = vst [vmem:[#allocation31_spill] sm:$0xff] %v19086_v60  ;;  %v19094_v62 = vpop.f32.mrb[37].mxu1  ;;  %v1324_v44 = vld [vmem:[%s21806_s1 + $0xf10] sm:$0xff] }
 0x51b   : > { %2059 = vperm.xlu1 %16780, %v1469_v46   ;;  %21840 = vst [vmem:[#allocation32_spill] sm:$0xff] %v19094_v62  ;;  %v19102_v46 = vpop.permute.xlu0 %1624  ;;  %v19104_v60 = vpop.f32.mrb[38].mxu1  ;;  %v14546_v62 = vcombine.low %v1316_v22, %v1320_v23  ;;  %v1332_v23 = vld [vmem:[%s21806_s1 + $0xf50] sm:$0xff] }
 0x51c   : > { %21841 = vst [vmem:[#allocation33_spill] sm:$0xff] %v19104_v60  ;;  %v19106_v40 = vpop.f32.mrb[39].mxu1 }
 0x51d   : > { %21842 = vst [vmem:[#allocation34_spill] sm:$0xff] %v19106_v40  ;;  %v19113_v8 = vpop.f32.mrb[40].mxu1  ;;  %v1475_v40 = vld [vmem:[%s21807_s2 + $0x3c8] sm:$0xff] }
 0x51e   : > { %2114 = vperm.xlu0 %16779, %v1480_v27   ;;  %21843 = vst [vmem:[#allocation35_spill] sm:$0xff] %v19113_v8  ;;  %v19115_v45 = vpop.f32.mrb[41].mxu1 }
 0x51f   : > { %2069 = vperm.xlu1 %16780, %v1471_v30   ;;  %21844 = vst [vmem:[#allocation36_spill] sm:$0xff] %v19115_v45  ;;  %v19117_v36 = vpop.f32.mrb[42].mxu1 }
 0x520   : > { %21845 = vst [vmem:[#allocation37_spill] sm:$0xff] %v19117_v36  ;;  %v19119_v27 = vpop.f32.mrb[43].mxu1  ;;  %v19134_v36 = vpop.permute.xlu1 %1609 }
 0x521   : > { %7281 = vmatmul.mubr.bf16.gmra.mrb[232].mxu0 %v14538_v3  ;;  %v1328_v3 = vld [vmem:[%s21806_s1 + $0xf30] sm:$0xff]  ;;  %21846 = vst [vmem:[#allocation38_spill] sm:$0xff] %v19119_v27  ;;  %v19121_v30 = vpop.f32.mrb[44].mxu1 }
 0x522   : > { %7290 = vmatprep.mubr.bf16.mxu0 %v14547_v5  ;;  %v1473_v5 = vld [vmem:[%s21807_s2 + $0x3b8] sm:$0xff]  ;;  %v14555_v50 = vcombine.high %v1324_v44, %v1328_v3  ;;  %21847 = vst [vmem:[#allocation39_spill] sm:$0xff] %v19121_v30  ;;  %v19126_v22 = vpop.f32.mrb[45].mxu1 }
 0x523   : > { %2079 = vperm.xlu1 %16780, %v1473_v5   ;;  %21848 = vst [vmem:[#allocation40_spill] sm:$0xff] %v19126_v22  ;;  %v1336_v5 = vld [vmem:[%s21806_s1 + $0xf70] sm:$0xff]  ;;  %v14554_v22 = vcombine.low %v1324_v44, %v1328_v3 }
 0x524   : > { %v14563_v45 = vcombine.high %v1332_v23, %v1336_v5  ;;  %v1340_v3 = vld [vmem:[%s21806_s1 + $0xf90] sm:$0xff] }
 0x527   : > { %2089 = vperm.xlu1 %16780, %v1475_v40  }
 0x529   : > { %7291 = vmatmul.mubr.bf16.gmra.mrb[236].mxu0 %v14546_v62  ;;  %v19136_v62 = vpop.f32.mrb[46].mxu1 }
 0x52a   : > { %7300 = vmatprep.mubr.bf16.mxu0 %v14555_v50  ;;  %21849 = vst [vmem:[#allocation41_spill] sm:$0xff] %v19136_v62  ;;  %v19138_v30 = vpop.f32.mrb[47].mxu1  ;;  %v1477_v50 = vld [vmem:[%s21807_s2 + $0x3d8] sm:$0xff]  ;;  %v19151_v62 = vpop.permute.xlu1 %1619 }
 0x52b   : > { %21850 = vst [vmem:[#allocation42_spill] sm:$0xff] %v19138_v30  ;;  %v19143_v27 = vpop.f32.mrb[48].mxu1  ;;  %2099 = vperm.xlu1 %16780, %v1477_v50   ;;  %v1479_v30 = vld [vmem:[%s21807_s2 + $0x3e8] sm:$0xff]  ;;  %v1344_v50 = vld [vmem:[%s21806_s1 + $0xfb0] sm:$0xff] }
 0x52c   : > { %21851 = vst [vmem:[#allocation43_spill] sm:$0xff] %v19143_v27  ;;  %v19145_v8 = vpop.f32.mrb[49].mxu1 }
 0x52d   : > { %21852 = vst [vmem:[#allocation44_spill] sm:$0xff] %v19145_v8  ;;  %v19147_v60 = vpop.f32.mrb[50].mxu1 }
 0x52e   : > { %21853 = vst [vmem:[#allocation45_spill] sm:$0xff] %v19147_v60  ;;  %v19149_v35 = vpop.f32.mrb[51].mxu1  ;;  %v19177_v27 = vpop.permute.xlu1 %1629 }
 0x52f   : > { %21854 = vst [vmem:[#allocation46_spill] sm:$0xff] %v19149_v35  ;;  %v19153_v40 = vpop.f32.mrb[52].mxu1  ;;  %2109 = vperm.xlu1 %16780, %v1479_v30  }
 0x530   : > { %21855 = vst [vmem:[#allocation47_spill] sm:$0xff] %v19153_v40  ;;  %v19158_v44 = vpop.f32.mrb[53].mxu1  ;;  %v1481_v40 = vld [vmem:[%s21807_s2 + $0x3f8] sm:$0xff] }
 0x531   : > { %7301 = vmatmul.mubr.bf16.gmra.mrb[240].mxu0 %v14554_v22  ;;  %21856 = vst [vmem:[#allocation48_spill] sm:$0xff] %v19158_v44  ;;  %v19166_v22 = vpop.f32.mrb[54].mxu1  ;;  %v14571_v44 = vcombine.high %v1340_v3, %v1344_v50 }
 0x532   : > { %7310 = vmatprep.mubr.bf16.mxu0 %v14563_v45  ;;  %21857 = vst [vmem:[#allocation49_spill] sm:$0xff] %v19166_v22  ;;  %v19168_v35 = vpop.f32.mrb[55].mxu1  ;;  %v14562_v45 = vcombine.low %v1332_v23, %v1336_v5  ;;  %v1348_v23 = vld [vmem:[%s21806_s1 + $0xfd0] sm:$0xff] }
 0x533   : > { %21858 = vst [vmem:[#allocation50_spill] sm:$0xff] %v19168_v35  ;;  %v19173_v60 = vpop.f32.mrb[56].mxu1  ;;  %2119 = vperm.xlu1 %16780, %v1481_v40   ;;  %v1352_v5 = vld [vmem:[%s21806_s1 + $0xff0] sm:$0xff]  ;;  %v14570_v40 = vcombine.low %v1340_v3, %v1344_v50  ;;  %v849_v3 = vld [vmem:[%s21806_s1 + $0x38] sm:$0xff] }
 0x534   : > { %21859 = vst [vmem:[#allocation51_spill] sm:$0xff] %v19173_v60  ;;  %v19175_v8 = vpop.f32.mrb[57].mxu1 }
 0x535   : > { %21860 = vst [vmem:[#allocation52_spill] sm:$0xff] %v19175_v8  ;;  %v19179_v26 = vpop.f32.mrb[58].mxu1 }
 0x536   : > { %21861 = vst [vmem:[#allocation53_spill] sm:$0xff] %v19179_v26  ;;  %v19181_v19 = vpop.f32.mrb[59].mxu1 }
 0x537   : > { %21862 = vst [vmem:[#allocation54_spill] sm:$0xff] %v19181_v19  ;;  %v19183_v30 = vpop.f32.mrb[60].mxu1 }
 0x538   : > { %21863 = vst [vmem:[#allocation55_spill] sm:$0xff] %v19183_v30  ;;  %v19185_v35 = vpop.f32.mrb[61].mxu1 }
 0x539   : > { %7311 = vmatmul.mubr.bf16.gmra.mrb[244].mxu0 %v14562_v45  ;;  %21864 = vst [vmem:[#allocation56_spill] sm:$0xff] %v19185_v35  ;;  %v19193_v8 = vpop.f32.mrb[62].mxu1  ;;  %v14579_v45 = vcombine.high %v1348_v23, %v1352_v5 }
 0x53a   : > { %7320 = vmatprep.mubr.bf16.mxu0 %v14571_v44  ;;  %21865 = vst [vmem:[#allocation57_spill] sm:$0xff] %v19193_v8  ;;  %v19195_v26 = vpop.f32.mrb[63].mxu1 }
 0x53b   : > { %21866 = vst [vmem:[#allocation58_spill] sm:$0xff] %v19195_v26  ;;  %v19197_v19 = vpop.f32.mrb[64].mxu1  ;;  %v845_v26 = vld [vmem:[%s21806_s1 + $0x18] sm:$0xff] }
 0x53c   : > { %21867 = vst [vmem:[#allocation59_spill] sm:$0xff] %v19197_v19  ;;  %v19199_v30 = vpop.f32.mrb[65].mxu1 }
 0x53d   : > { %21868 = vst [vmem:[#allocation60_spill] sm:$0xff] %v19199_v30  ;;  %v19201_v44 = vpop.f32.mrb[66].mxu1 }
 0x53e   : > { %21869 = vst [vmem:[#allocation61_spill] sm:$0xff] %v19201_v44  ;;  %v19203_v35 = vpop.f32.mrb[67].mxu1  ;;  %v14578_v44 = vcombine.low %v1348_v23, %v1352_v5  ;;  %v857_v23 = vld [vmem:[%s21806_s1 + $0x78] sm:$0xff] }
 0x53f   : > { %21870 = vst [vmem:[#allocation62_spill] sm:$0xff] %v19203_v35  ;;  %v19205_v60 = vpop.f32.mrb[68].mxu1 }
 0x540   : > { %21871 = vst [vmem:[#allocation63_spill] sm:$0xff] %v19205_v60  ;;  %v19207_v22 = vpop.f32.mrb[69].mxu1 }
 0x541   : > { %7321 = vmatmul.mubr.bf16.gmra.mrb[248].mxu0 %v14570_v40  ;;  %21872 = vst [vmem:[#allocation64_spill] sm:$0xff] %v19207_v22  ;;  %v19215_v50 = vpop.f32.mrb[70].mxu1  ;;  %v14077_v40 = vcombine.high %v845_v26, %v849_v3 }
 0x542   : > { %7330 = vmatprep.mubr.bf16.mxu0 %v14579_v45  ;;  %21873 = vst [vmem:[#allocation65_spill] sm:$0xff] %v19215_v50  ;;  %v19217_v30 = vpop.f32.mrb[71].mxu1 }
 0x543   : > { %21874 = vst [vmem:[#allocation66_spill] sm:$0xff] %v19217_v30  ;;  %v19219_v35 = vpop.f32.mrb[72].mxu1  ;;  %v853_v30 = vld [vmem:[%s21806_s1 + $0x58] sm:$0xff] }
 0x544   : > { %21875 = vst [vmem:[#allocation67_spill] sm:$0xff] %v19219_v35  ;;  %v19221_v60 = vpop.f32.mrb[73].mxu1 }
 0x545   : > { %21876 = vst [vmem:[#allocation68_spill] sm:$0xff] %v19221_v60  ;;  %v19223_v45 = vpop.f32.mrb[74].mxu1 }
 0x546   : > { %21877 = vst [vmem:[#allocation69_spill] sm:$0xff] %v19223_v45  ;;  %v19225_v22 = vpop.f32.mrb[75].mxu1  ;;  %v14076_v45 = vcombine.low %v845_v26, %v849_v3  ;;  %v865_v26 = vld [vmem:[%s21806_s1 + $0xb8] sm:$0xff] }
 0x547   : > { %21878 = vst [vmem:[#allocation70_spill] sm:$0xff] %v19225_v22  ;;  %v19227_v19 = vpop.f32.mrb[76].mxu1 }
 0x548   : > { %21879 = vst [vmem:[#allocation71_spill] sm:$0xff] %v19227_v19  ;;  %v19229_v8 = vpop.f32.mrb[77].mxu1 }
 0x549   : > { %7331 = vmatmul.mubr.bf16.gmra.mrb[252].mxu0 %v14578_v44  ;;  %21880 = vst [vmem:[#allocation72_spill] sm:$0xff] %v19229_v8  ;;  %v19237_v5 = vpop.f32.mrb[78].mxu1  ;;  %v14085_v44 = vcombine.high %v853_v30, %v857_v23 }
 0x54a   : > { %7373 = vmatprep.mubr.bf16.mxu0 %v14077_v40  ;;  %21881 = vst [vmem:[#allocation73_spill] sm:$0xff] %v19237_v5  ;;  %v19239_v60 = vpop.f32.mrb[79].mxu1 }
 0x54b   : > { %21882 = vst [vmem:[#allocation74_spill] sm:$0xff] %v19239_v60  ;;  %v19241_v22 = vpop.f32.mrb[80].mxu1  ;;  %v861_v60 = vld [vmem:[%s21806_s1 + $0x98] sm:$0xff] }
 0x54c   : > { %21883 = vst [vmem:[#allocation75_spill] sm:$0xff] %v19241_v22  ;;  %v19243_v19 = vpop.f32.mrb[81].mxu1 }
 0x54d   : > { %21884 = vst [vmem:[#allocation76_spill] sm:$0xff] %v19243_v19  ;;  %v19245_v40 = vpop.f32.mrb[82].mxu1 }
 0x54e   : > { %21885 = vst [vmem:[#allocation77_spill] sm:$0xff] %v19245_v40  ;;  %v19247_v8 = vpop.f32.mrb[83].mxu1  ;;  %v14084_v40 = vcombine.low %v853_v30, %v857_v23  ;;  %v873_v30 = vld [vmem:[%s21806_s1 + $0xf8] sm:$0xff] }
 0x54f   : > { %21886 = vst [vmem:[#allocation78_spill] sm:$0xff] %v19247_v8  ;;  %v19249_v35 = vpop.f32.mrb[84].mxu1 }
 0x550   : > { %21887 = vst [vmem:[#allocation79_spill] sm:$0xff] %v19249_v35  ;;  %v19251_v50 = vpop.f32.mrb[85].mxu1 }
 0x551   : > { %7374 = vmatmul.mubr.bf16.vlgmr.msra.gmra.mrb[0].mxu0 %v14076_v45  ;;  %21888 = vst [vmem:[#allocation80_spill] sm:$0xff] %v19251_v50  ;;  %v19259_v3 = vpop.f32.mrb[86].mxu1  ;;  %v14093_v45 = vcombine.high %v861_v60, %v865_v26 }
 0x552   : > { %7383 = vmatprep.mubr.bf16.mxu0 %v14085_v44  ;;  %21889 = vst [vmem:[#allocation81_spill] sm:$0xff] %v19259_v3  ;;  %v19261_v19 = vpop.f32.mrb[87].mxu1 }
 0x553   : > { %21890 = vst [vmem:[#allocation82_spill] sm:$0xff] %v19261_v19  ;;  %v19263_v8 = vpop.f32.mrb[88].mxu1  ;;  %v869_v19 = vld [vmem:[%s21806_s1 + $0xd8] sm:$0xff] }
 0x554   : > { %21891 = vst [vmem:[#allocation83_spill] sm:$0xff] %v19263_v8  ;;  %v19265_v35 = vpop.f32.mrb[89].mxu1 }
 0x555   : > { %21892 = vst [vmem:[#allocation84_spill] sm:$0xff] %v19265_v35  ;;  %v19267_v44 = vpop.f32.mrb[90].mxu1 }
 0x556   : > { %21893 = vst [vmem:[#allocation85_spill] sm:$0xff] %v19267_v44  ;;  %v19269_v50 = vpop.f32.mrb[91].mxu1  ;;  %v14092_v44 = vcombine.low %v861_v60, %v865_v26  ;;  %v881_v60 = vld [vmem:[%s21806_s1 + $0x138] sm:$0xff] }
 0x557   : > { %21894 = vst [vmem:[#allocation86_spill] sm:$0xff] %v19269_v50  ;;  %v19271_v22 = vpop.f32.mrb[92].mxu1 }
 0x558   : > { %21895 = vst [vmem:[#allocation87_spill] sm:$0xff] %v19271_v22  ;;  %v19273_v5 = vpop.f32.mrb[93].mxu1 }
 0x559   : > { %7384 = vmatmul.mubr.bf16.gmra.mrb[4].mxu0 %v14084_v40  ;;  %21896 = vst [vmem:[#allocation88_spill] sm:$0xff] %v19273_v5  ;;  %v19281_v23 = vpop.f32.mrb[94].mxu1  ;;  %v14101_v40 = vcombine.high %v869_v19, %v873_v30 }
 0x55a   : > { %7393 = vmatprep.mubr.bf16.mxu0 %v14093_v45  ;;  %21897 = vst [vmem:[#allocation89_spill] sm:$0xff] %v19281_v23  ;;  %v19283_v35 = vpop.f32.mrb[95].mxu1 }
 0x55b   : > { %21898 = vst [vmem:[#allocation90_spill] sm:$0xff] %v19283_v35  ;;  %v19285_v50 = vpop.f32.mrb[96].mxu1  ;;  %v877_v35 = vld [vmem:[%s21806_s1 + $0x118] sm:$0xff] }
 0x55c   : > { %21899 = vst [vmem:[#allocation91_spill] sm:$0xff] %v19285_v50  ;;  %v19287_v22 = vpop.f32.mrb[97].mxu1 }
 0x55d   : > { %21900 = vst [vmem:[#allocation92_spill] sm:$0xff] %v19287_v22  ;;  %v19289_v45 = vpop.f32.mrb[98].mxu1 }
 0x55e   : > { %21901 = vst [vmem:[#allocation93_spill] sm:$0xff] %v19289_v45  ;;  %v19291_v5 = vpop.f32.mrb[99].mxu1  ;;  %v14100_v45 = vcombine.low %v869_v19, %v873_v30  ;;  %v889_v19 = vld [vmem:[%s21806_s1 + $0x178] sm:$0xff] }
 0x55f   : > { %21902 = vst [vmem:[#allocation94_spill] sm:$0xff] %v19291_v5  ;;  %v19293_v8 = vpop.f32.mrb[100].mxu1 }
 0x560   : > { %21903 = vst [vmem:[#allocation95_spill] sm:$0xff] %v19293_v8  ;;  %v19295_v3 = vpop.f32.mrb[101].mxu1 }
 0x561   : > { %7394 = vmatmul.mubr.bf16.gmra.mrb[8].mxu0 %v14092_v44  ;;  %21904 = vst [vmem:[#allocation96_spill] sm:$0xff] %v19295_v3  ;;  %v19303_v26 = vpop.f32.mrb[102].mxu1  ;;  %v14109_v44 = vcombine.high %v877_v35, %v881_v60 }
 0x562   : > { %7403 = vmatprep.mubr.bf16.mxu0 %v14101_v40  ;;  %21905 = vst [vmem:[#allocation97_spill] sm:$0xff] %v19303_v26  ;;  %v19305_v22 = vpop.f32.mrb[103].mxu1 }
 0x563   : > { %21906 = vst [vmem:[#allocation98_spill] sm:$0xff] %v19305_v22  ;;  %v19307_v5 = vpop.f32.mrb[104].mxu1  ;;  %v885_v22 = vld [vmem:[%s21806_s1 + $0x158] sm:$0xff] }
 0x564   : > { %21907 = vst [vmem:[#allocation99_spill] sm:$0xff] %v19307_v5  ;;  %v19309_v8 = vpop.f32.mrb[105].mxu1 }
 0x565   : > { %21908 = vst [vmem:[#allocation100_spill] sm:$0xff] %v19309_v8  ;;  %v19311_v40 = vpop.f32.mrb[106].mxu1 }
 0x566   : > { %21909 = vst [vmem:[#allocation101_spill] sm:$0xff] %v19311_v40  ;;  %v19313_v3 = vpop.f32.mrb[107].mxu1  ;;  %v14108_v40 = vcombine.low %v877_v35, %v881_v60  ;;  %v897_v35 = vld [vmem:[%s21806_s1 + $0x1b8] sm:$0xff] }
 0x567   : > { %21910 = vst [vmem:[#allocation102_spill] sm:$0xff] %v19313_v3  ;;  %v19315_v50 = vpop.f32.mrb[108].mxu1 }
 0x568   : > { %21911 = vst [vmem:[#allocation103_spill] sm:$0xff] %v19315_v50  ;;  %v19317_v23 = vpop.f32.mrb[109].mxu1 }
 0x569   : > { %7404 = vmatmul.mubr.bf16.gmra.mrb[12].mxu0 %v14100_v45  ;;  %21912 = vst [vmem:[#allocation104_spill] sm:$0xff] %v19317_v23  ;;  %v19325_v30 = vpop.f32.mrb[110].mxu1  ;;  %v14117_v45 = vcombine.high %v885_v22, %v889_v19 }
 0x56a   : > { %7413 = vmatprep.mubr.bf16.mxu0 %v14109_v44  ;;  %21913 = vst [vmem:[#allocation105_spill] sm:$0xff] %v19325_v30  ;;  %v19327_v8 = vpop.f32.mrb[111].mxu1 }
 0x56b   : > { %21914 = vst [vmem:[#allocation106_spill] sm:$0xff] %v19327_v8  ;;  %v19329_v3 = vpop.f32.mrb[112].mxu1  ;;  %v893_v8 = vld [vmem:[%s21806_s1 + $0x198] sm:$0xff] }
 0x56c   : > { %21915 = vst [vmem:[#allocation107_spill] sm:$0xff] %v19329_v3  ;;  %v19331_v50 = vpop.f32.mrb[113].mxu1 }
 0x56d   : > { %21916 = vst [vmem:[#allocation108_spill] sm:$0xff] %v19331_v50  ;;  %v19333_v44 = vpop.f32.mrb[114].mxu1 }
 0x56e   : > { %21917 = vst [vmem:[#allocation109_spill] sm:$0xff] %v19333_v44  ;;  %v19335_v23 = vpop.f32.mrb[115].mxu1  ;;  %v14116_v44 = vcombine.low %v885_v22, %v889_v19  ;;  %v905_v22 = vld [vmem:[%s21806_s1 + $0x1f8] sm:$0xff] }
 0x56f   : > { %21918 = vst [vmem:[#allocation110_spill] sm:$0xff] %v19335_v23  ;;  %v19337_v5 = vpop.f32.mrb[116].mxu1 }
 0x570   : > { %21919 = vst [vmem:[#allocation111_spill] sm:$0xff] %v19337_v5  ;;  %v19339_v26 = vpop.f32.mrb[117].mxu1 }
 0x571   : > { %7414 = vmatmul.mubr.bf16.gmra.mrb[16].mxu0 %v14108_v40  ;;  %21920 = vst [vmem:[#allocation112_spill] sm:$0xff] %v19339_v26  ;;  %v19347_v60 = vpop.f32.mrb[118].mxu1  ;;  %v14125_v40 = vcombine.high %v893_v8, %v897_v35 }
 0x572   : > { %7423 = vmatprep.mubr.bf16.mxu0 %v14117_v45  ;;  %21921 = vst [vmem:[#allocation113_spill] sm:$0xff] %v19347_v60  ;;  %v19349_v50 = vpop.f32.mrb[119].mxu1 }
 0x573   : > { %21922 = vst [vmem:[#allocation114_spill] sm:$0xff] %v19349_v50  ;;  %v19351_v23 = vpop.f32.mrb[120].mxu1  ;;  %v901_v50 = vld [vmem:[%s21806_s1 + $0x1d8] sm:$0xff] }
 0x574   : > { %21923 = vst [vmem:[#allocation115_spill] sm:$0xff] %v19351_v23  ;;  %v19353_v5 = vpop.f32.mrb[121].mxu1 }
 0x575   : > { %21924 = vst [vmem:[#allocation116_spill] sm:$0xff] %v19353_v5  ;;  %v19355_v45 = vpop.f32.mrb[122].mxu1 }
 0x576   : > { %21925 = vst [vmem:[#allocation117_spill] sm:$0xff] %v19355_v45  ;;  %v19357_v26 = vpop.f32.mrb[123].mxu1  ;;  %v14124_v45 = vcombine.low %v893_v8, %v897_v35  ;;  %v913_v8 = vld [vmem:[%s21806_s1 + $0x238] sm:$0xff] }
 0x577   : > { %21926 = vst [vmem:[#allocation118_spill] sm:$0xff] %v19357_v26  ;;  %v19359_v3 = vpop.f32.mrb[124].mxu1 }
 0x578   : > { %21927 = vst [vmem:[#allocation119_spill] sm:$0xff] %v19359_v3  ;;  %v19361_v30 = vpop.f32.mrb[125].mxu1 }
 0x579   : > { %7424 = vmatmul.mubr.bf16.gmra.mrb[20].mxu0 %v14116_v44  ;;  %21928 = vst [vmem:[#allocation120_spill] sm:$0xff] %v19361_v30  ;;  %v19369_v19 = vpop.f32.mrb[126].mxu1  ;;  %v14133_v44 = vcombine.high %v901_v50, %v905_v22 }
 0x57a   : > { %7433 = vmatprep.mubr.bf16.mxu0 %v14125_v40  ;;  %21929 = vst [vmem:[#allocation121_spill] sm:$0xff] %v19369_v19  ;;  %v19371_v5 = vpop.f32.mrb[127].mxu1 }
 0x57b   : > { %21930 = vst [vmem:[#allocation122_spill] sm:$0xff] %v19371_v5  ;;  %v19373_v26 = vpop.f32.mrb[128].mxu1  ;;  %v909_v5 = vld [vmem:[%s21806_s1 + $0x218] sm:$0xff] }
 0x57c   : > { %21931 = vst [vmem:[#allocation123_spill] sm:$0xff] %v19373_v26  ;;  %v19375_v3 = vpop.f32.mrb[129].mxu1 }
 0x57d   : > { %21932 = vst [vmem:[#allocation124_spill] sm:$0xff] %v19375_v3  ;;  %v19377_v40 = vpop.f32.mrb[130].mxu1 }
 0x57e   : > { %21933 = vst [vmem:[#allocation125_spill] sm:$0xff] %v19377_v40  ;;  %v19379_v30 = vpop.f32.mrb[131].mxu1  ;;  %v14132_v40 = vcombine.low %v901_v50, %v905_v22  ;;  %v921_v50 = vld [vmem:[%s21806_s1 + $0x278] sm:$0xff] }
 0x57f   : > { %21934 = vst [vmem:[#allocation126_spill] sm:$0xff] %v19379_v30  ;;  %v19381_v23 = vpop.f32.mrb[132].mxu1 }
 0x580   : > { %21935 = vst [vmem:[#allocation127_spill] sm:$0xff] %v19381_v23  ;;  %v19383_v60 = vpop.f32.mrb[133].mxu1 }
 0x581   : > { %7434 = vmatmul.mubr.bf16.gmra.mrb[24].mxu0 %v14124_v45  ;;  %21936 = vst [vmem:[#allocation128_spill] sm:$0xff] %v19383_v60  ;;  %v19391_v35 = vpop.f32.mrb[134].mxu1  ;;  %v14141_v45 = vcombine.high %v909_v5, %v913_v8 }
 0x582   : > { %7443 = vmatprep.mubr.bf16.mxu0 %v14133_v44  ;;  %21937 = vst [vmem:[#allocation129_spill] sm:$0xff] %v19391_v35  ;;  %v19393_v3 = vpop.f32.mrb[135].mxu1 }
 0x583   : > { %21938 = vst [vmem:[#allocation130_spill] sm:$0xff] %v19393_v3  ;;  %v19395_v30 = vpop.f32.mrb[136].mxu1  ;;  %v917_v3 = vld [vmem:[%s21806_s1 + $0x258] sm:$0xff] }
 0x584   : > { %21939 = vst [vmem:[#allocation131_spill] sm:$0xff] %v19395_v30  ;;  %v19397_v23 = vpop.f32.mrb[137].mxu1 }
 0x585   : > { %21940 = vst [vmem:[#allocation132_spill] sm:$0xff] %v19397_v23  ;;  %v19399_v44 = vpop.f32.mrb[138].mxu1 }
 0x586   : > { %21941 = vst [vmem:[#allocation133_spill] sm:$0xff] %v19399_v44  ;;  %v19401_v60 = vpop.f32.mrb[139].mxu1  ;;  %v14140_v44 = vcombine.low %v909_v5, %v913_v8  ;;  %v929_v5 = vld [vmem:[%s21806_s1 + $0x2b8] sm:$0xff] }
 0x587   : > { %21942 = vst [vmem:[#allocation134_spill] sm:$0xff] %v19401_v60  ;;  %v19403_v26 = vpop.f32.mrb[140].mxu1 }
 0x588   : > { %21943 = vst [vmem:[#allocation135_spill] sm:$0xff] %v19403_v26  ;;  %v19405_v19 = vpop.f32.mrb[141].mxu1 }
 0x589   : > { %7444 = vmatmul.mubr.bf16.gmra.mrb[28].mxu0 %v14132_v40  ;;  %21944 = vst [vmem:[#allocation136_spill] sm:$0xff] %v19405_v19  ;;  %v19413_v22 = vpop.f32.mrb[142].mxu1  ;;  %v14149_v40 = vcombine.high %v917_v3, %v921_v50 }
 0x58a   : > { %7453 = vmatprep.mubr.bf16.mxu0 %v14141_v45  ;;  %21945 = vst [vmem:[#allocation137_spill] sm:$0xff] %v19413_v22  ;;  %v19415_v23 = vpop.f32.mrb[143].mxu1 }
 0x58b   : > { %21946 = vst [vmem:[#allocation138_spill] sm:$0xff] %v19415_v23  ;;  %v19417_v60 = vpop.f32.mrb[144].mxu1  ;;  %v925_v23 = vld [vmem:[%s21806_s1 + $0x298] sm:$0xff] }
 0x58c   : > { %21947 = vst [vmem:[#allocation139_spill] sm:$0xff] %v19417_v60  ;;  %v19419_v26 = vpop.f32.mrb[145].mxu1 }
 0x58d   : > { %21948 = vst [vmem:[#allocation140_spill] sm:$0xff] %v19419_v26  ;;  %v19421_v45 = vpop.f32.mrb[146].mxu1 }
 0x58e   : > { %21949 = vst [vmem:[#allocation141_spill] sm:$0xff] %v19421_v45  ;;  %v19423_v19 = vpop.f32.mrb[147].mxu1  ;;  %v14148_v45 = vcombine.low %v917_v3, %v921_v50  ;;  %v937_v3 = vld [vmem:[%s21806_s1 + $0x2f8] sm:$0xff] }
 0x58f   : > { %21950 = vst [vmem:[#allocation142_spill] sm:$0xff] %v19423_v19  ;;  %v19425_v30 = vpop.f32.mrb[148].mxu1 }
 0x590   : > { %21951 = vst [vmem:[#allocation143_spill] sm:$0xff] %v19425_v30  ;;  %v19427_v35 = vpop.f32.mrb[149].mxu1 }
 0x591   : > { %7454 = vmatmul.mubr.bf16.gmra.mrb[32].mxu0 %v14140_v44  ;;  %21952 = vst [vmem:[#allocation144_spill] sm:$0xff] %v19427_v35  ;;  %v19435_v8 = vpop.f32.mrb[150].mxu1  ;;  %v14157_v44 = vcombine.high %v925_v23, %v929_v5 }
 0x592   : > { %7463 = vmatprep.mubr.bf16.mxu0 %v14149_v40  ;;  %21953 = vst [vmem:[#allocation145_spill] sm:$0xff] %v19435_v8  ;;  %v19437_v26 = vpop.f32.mrb[151].mxu1 }
 0x593   : > { %21954 = vst [vmem:[#allocation146_spill] sm:$0xff] %v19437_v26  ;;  %v19439_v19 = vpop.f32.mrb[152].mxu1  ;;  %v933_v26 = vld [vmem:[%s21806_s1 + $0x2d8] sm:$0xff] }
 0x594   : > { %21955 = vst [vmem:[#allocation147_spill] sm:$0xff] %v19439_v19  ;;  %v19441_v30 = vpop.f32.mrb[153].mxu1 }
 0x595   : > { %21956 = vst [vmem:[#allocation148_spill] sm:$0xff] %v19441_v30  ;;  %v19443_v40 = vpop.f32.mrb[154].mxu1 }
 0x596   : > { %21957 = vst [vmem:[#allocation149_spill] sm:$0xff] %v19443_v40  ;;  %v19445_v35 = vpop.f32.mrb[155].mxu1  ;;  %v14156_v40 = vcombine.low %v925_v23, %v929_v5  ;;  %v945_v23 = vld [vmem:[%s21806_s1 + $0x338] sm:$0xff]  ;;  %v14164_v5 = vcombine.low %v933_v26, %v937_v3 }
 0x597   : > { %21958 = vst [vmem:[#allocation150_spill] sm:$0xff] %v19445_v35  ;;  %v19447_v60 = vpop.f32.mrb[156].mxu1 }
 0x598   : > { %21959 = vst [vmem:[#allocation151_spill] sm:$0xff] %v19447_v60  ;;  %v19449_v22 = vpop.f32.mrb[157].mxu1 }
 0x599   : > { %7464 = vmatmul.mubr.bf16.gmra.mrb[36].mxu0 %v14148_v45  ;;  %21960 = vst [vmem:[#allocation152_spill] sm:$0xff] %v19449_v22  ;;  %v19457_v50 = vpop.f32.mrb[158].mxu1  ;;  %v14165_v45 = vcombine.high %v933_v26, %v937_v3  ;;  %v961_v26 = vld [vmem:[%s21806_s1 + $0x3b8] sm:$0xff] }
 0x59a   : > { %7473 = vmatprep.mubr.bf16.mxu0 %v14157_v44  ;;  %21961 = vst [vmem:[#allocation153_spill] sm:$0xff] %v19457_v50  ;;  %v19459_v30 = vpop.f32.mrb[159].mxu1 }
 0x59b   : > { %21962 = vst [vmem:[#allocation154_spill] sm:$0xff] %v19459_v30  ;;  %v19461_v35 = vpop.f32.mrb[160].mxu1  ;;  %v941_v30 = vld [vmem:[%s21806_s1 + $0x318] sm:$0xff] }
 0x59c   : > { %21963 = vst [vmem:[#allocation155_spill] sm:$0xff] %v19461_v35  ;;  %v19463_v60 = vpop.f32.mrb[161].mxu1 }
 0x59d   : > { %21964 = vst [vmem:[#allocation156_spill] sm:$0xff] %v19463_v60  ;;  %v19465_v44 = vpop.f32.mrb[162].mxu1  ;;  %v14173_v60 = vcombine.high %v941_v30, %v945_v23 }
 0x59e   : > { %21965 = vst [vmem:[#allocation157_spill] sm:$0xff] %v19465_v44  ;;  %v19467_v22 = vpop.f32.mrb[163].mxu1 }
 0x59f   : > { %21966 = vst [vmem:[#allocation158_spill] sm:$0xff] %v19467_v22  ;;  %v19469_v19 = vpop.f32.mrb[164].mxu1  ;;  %v957_v22 = vld [vmem:[%s21806_s1 + $0x398] sm:$0xff] }
 0x5a0   : > { %21967 = vst [vmem:[#allocation159_spill] sm:$0xff] %v19469_v19  ;;  %v19471_v8 = vpop.f32.mrb[165].mxu1  ;;  %v14189_v3 = vcombine.high %v957_v22, %v961_v26 }
 0x5a1   : > { %7474 = vmatmul.mubr.bf16.gmra.mrb[40].mxu0 %v14156_v40  ;;  %21968 = vst [vmem:[#allocation160_spill] sm:$0xff] %v19471_v8  ;;  %v949_v40 = vld [vmem:[%s21806_s1 + $0x358] sm:$0xff]  ;;  %v14172_v8 = vcombine.low %v941_v30, %v945_v23 }
 0x5a2   : > { %7483 = vmatprep.mubr.bf16.mxu0 %v14165_v45  ;;  %v953_v45 = vld [vmem:[%s21806_s1 + $0x378] sm:$0xff] }
 0x5a3   : > { %v14181_v19 = vcombine.high %v949_v40, %v953_v45  ;;  %v969_v30 = vld [vmem:[%s21806_s1 + $0x3f8] sm:$0xff] }
 0x5a9   : > { %7484 = vmatmul.mubr.bf16.gmra.mrb[44].mxu0 %v14164_v5  ;;  %v965_v5 = vld [vmem:[%s21806_s1 + $0x3d8] sm:$0xff] }
 0x5aa   : > { %7493 = vmatprep.mubr.bf16.mxu0 %v14173_v60  ;;  %v14180_v60 = vcombine.low %v949_v40, %v953_v45  ;;  %v14197_v23 = vcombine.high %v965_v5, %v969_v30  ;;  %v973_v40 = vld [vmem:[%s21806_s1 + $0x418] sm:$0xff] }
 0x5ab   : > { %v977_v45 = vld [vmem:[%s21806_s1 + $0x438] sm:$0xff] }
 0x5b1   : > { %7494 = vmatmul.mubr.bf16.gmra.mrb[48].mxu0 %v14172_v8  ;;  %v19497_v8 = vpop.f32.mrb[166].mxu1 }
 0x5b2   : > { %7503 = vmatprep.mubr.bf16.mxu0 %v14181_v19  ;;  %v14188_v19 = vcombine.low %v957_v22, %v961_v26  ;;  %21969 = vst [vmem:[#allocation161_spill] sm:$0xff] %v19497_v8  ;;  %v19499_v44 = vpop.f32.mrb[167].mxu1  ;;  %v981_v22 = vld [vmem:[%s21806_s1 + $0x458] sm:$0xff] }
 0x5b3   : > { %21970 = vst [vmem:[#allocation162_spill] sm:$0xff] %v19499_v44  ;;  %v985_v26 = vld [vmem:[%s21806_s1 + $0x478] sm:$0xff] }
 0x5b4   : > { %v989_v44 = vld [vmem:[%s21806_s1 + $0x498] sm:$0xff] }
 0x5b9   : > { %7504 = vmatmul.mubr.bf16.gmra.mrb[52].mxu0 %v14180_v60  ;;  %v14196_v60 = vcombine.low %v965_v5, %v969_v30  ;;  %v993_v5 = vld [vmem:[%s21806_s1 + $0x4b8] sm:$0xff]  ;;  %v14212_v30 = vcombine.low %v981_v22, %v985_v26 }
 0x5ba   : > { %7513 = vmatprep.mubr.bf16.mxu0 %v14189_v3  ;;  %v14205_v3 = vcombine.high %v973_v40, %v977_v45 }
 0x5c1   : > { %7514 = vmatmul.mubr.bf16.gmra.mrb[56].mxu0 %v14188_v19  ;;  %v14204_v19 = vcombine.low %v973_v40, %v977_v45  ;;  %v1001_v40 = vld [vmem:[%s21806_s1 + $0x4f8] sm:$0xff]  ;;  %v14220_v45 = vcombine.low %v989_v44, %v993_v5 }
 0x5c2   : > { %7523 = vmatprep.mubr.bf16.mxu0 %v14197_v23  ;;  %v14213_v23 = vcombine.high %v981_v22, %v985_v26  ;;  %v1009_v22 = vld [vmem:[%s21806_s1 + $0x538] sm:$0xff] }
 0x5c9   : > { %7524 = vmatmul.mubr.bf16.gmra.mrb[60].mxu0 %v14196_v60  ;;  %v14221_v60 = vcombine.high %v989_v44, %v993_v5  ;;  %v1017_v44 = vld [vmem:[%s21806_s1 + $0x578] sm:$0xff] }
 0x5ca   : > { %7533 = vmatprep.mubr.bf16.mxu0 %v14205_v3  ;;  %v997_v3 = vld [vmem:[%s21806_s1 + $0x4d8] sm:$0xff] }
 0x5cb   : > { %v14228_v26 = vcombine.low %v997_v3, %v1001_v40 }
 0x5d1   : > { %7534 = vmatmul.mubr.bf16.gmra.mrb[64].mxu0 %v14204_v19  ;;  %v14229_v19 = vcombine.high %v997_v3, %v1001_v40  ;;  %v1025_v3 = vld [vmem:[%s21806_s1 + $0x5b8] sm:$0xff] }
 0x5d2   : > { %7543 = vmatprep.mubr.bf16.mxu0 %v14213_v23  ;;  %v1005_v23 = vld [vmem:[%s21806_s1 + $0x518] sm:$0xff] }
 0x5d3   : > { %v14236_v5 = vcombine.low %v1005_v23, %v1009_v22 }
 0x5d9   : > { %7544 = vmatmul.mubr.bf16.gmra.mrb[68].mxu0 %v14212_v30  ;;  %v14237_v30 = vcombine.high %v1005_v23, %v1009_v22  ;;  %v1033_v23 = vld [vmem:[%s21806_s1 + $0x5f8] sm:$0xff] }
 0x5da   : > { %7553 = vmatprep.mubr.bf16.mxu0 %v14221_v60  ;;  %v1013_v60 = vld [vmem:[%s21806_s1 + $0x558] sm:$0xff] }
 0x5db   : > { %v14244_v40 = vcombine.low %v1013_v60, %v1017_v44 }
 0x5e1   : > { %7554 = vmatmul.mubr.bf16.gmra.mrb[72].mxu0 %v14220_v45  ;;  %v14245_v45 = vcombine.high %v1013_v60, %v1017_v44  ;;  %v1041_v60 = vld [vmem:[%s21806_s1 + $0x638] sm:$0xff] }
 0x5e2   : > { %7563 = vmatprep.mubr.bf16.mxu0 %v14229_v19  ;;  %v1021_v19 = vld [vmem:[%s21806_s1 + $0x598] sm:$0xff] }
 0x5e3   : > { %v14252_v22 = vcombine.low %v1021_v19, %v1025_v3 }
 0x5e9   : > { %7564 = vmatmul.mubr.bf16.gmra.mrb[76].mxu0 %v14228_v26  ;;  %v14253_v26 = vcombine.high %v1021_v19, %v1025_v3  ;;  %v1049_v19 = vld [vmem:[%s21806_s1 + $0x678] sm:$0xff] }
 0x5ea   : > { %7573 = vmatprep.mubr.bf16.mxu0 %v14237_v30  ;;  %v1029_v30 = vld [vmem:[%s21806_s1 + $0x5d8] sm:$0xff] }
 0x5eb   : > { %v14260_v44 = vcombine.low %v1029_v30, %v1033_v23 }
 0x5f1   : > { %7574 = vmatmul.mubr.bf16.gmra.mrb[80].mxu0 %v14236_v5  ;;  %v14261_v5 = vcombine.high %v1029_v30, %v1033_v23  ;;  %v1057_v30 = vld [vmem:[%s21806_s1 + $0x6b8] sm:$0xff] }
 0x5f2   : > { %7583 = vmatprep.mubr.bf16.mxu0 %v14245_v45  ;;  %v1037_v45 = vld [vmem:[%s21806_s1 + $0x618] sm:$0xff] }
 0x5f3   : > { %v14268_v3 = vcombine.low %v1037_v45, %v1041_v60 }
 0x5f9   : > { %7584 = vmatmul.mubr.bf16.gmra.mrb[84].mxu0 %v14244_v40  ;;  %v14269_v40 = vcombine.high %v1037_v45, %v1041_v60  ;;  %v1065_v45 = vld [vmem:[%s21806_s1 + $0x6f8] sm:$0xff] }
 0x5fa   : > { %7593 = vmatprep.mubr.bf16.mxu0 %v14253_v26  ;;  %v1045_v26 = vld [vmem:[%s21806_s1 + $0x658] sm:$0xff] }
 0x5fb   : > { %v14276_v23 = vcombine.low %v1045_v26, %v1049_v19 }
 0x601   : > { %7594 = vmatmul.mubr.bf16.gmra.mrb[88].mxu0 %v14252_v22  ;;  %v14277_v22 = vcombine.high %v1045_v26, %v1049_v19  ;;  %v1073_v26 = vld [vmem:[%s21806_s1 + $0x738] sm:$0xff] }
 0x602   : > { %7603 = vmatprep.mubr.bf16.mxu0 %v14261_v5  ;;  %v1053_v5 = vld [vmem:[%s21806_s1 + $0x698] sm:$0xff] }
 0x603   : > { %v14284_v60 = vcombine.low %v1053_v5, %v1057_v30 }
 0x609   : > { %7604 = vmatmul.mubr.bf16.gmra.mrb[92].mxu0 %v14260_v44  ;;  %v14285_v44 = vcombine.high %v1053_v5, %v1057_v30 }
 0x60a   : > { %7613 = vmatprep.mubr.bf16.mxu0 %v14269_v40  ;;  %v1061_v40 = vld [vmem:[%s21806_s1 + $0x6d8] sm:$0xff] }
 0x60b   : > { %v14292_v8 = vcombine.low %v1061_v40, %v1065_v45 }
 0x611   : > { %7614 = vmatmul.mubr.bf16.gmra.mrb[96].mxu0 %v14268_v3  ;;  %v14293_v3 = vcombine.high %v1061_v40, %v1065_v45  ;;  %v19591_v40 = vld [vmem:[%s21806_s1 + $0x1020] sm:$0xff] }
 0x612   : > { %7623 = vmatprep.mubr.bf16.mxu0 %v14277_v22  ;;  %v1069_v22 = vld [vmem:[%s21806_s1 + $0x718] sm:$0xff]  ;;  %v14711_v45 = vcombine.high %v19586_v13, %v19591_v40 }
 0x613   : > { %v14301_v5 = vcombine.high %v1069_v22, %v1073_v26  ;;  %v14300_v55 = vcombine.low %v1069_v22, %v1073_v26 }
 0x614   : > { %10606 = vmatprep.mubr.bf16.mxu1 %v14711_v45 }
 0x619   : > { %7624 = vmatmul.mubr.bf16.gmra.mrb[100].mxu0 %v14276_v23 }
 0x61a   : > { %7633 = vmatprep.mubr.bf16.mxu0 %v14285_v44 }
 0x621   : > { %7634 = vmatmul.mubr.bf16.gmra.mrb[104].mxu0 %v14284_v60 }
 0x622   : > { %7643 = vmatprep.mubr.bf16.mxu0 %v14293_v3 }
 0x624   : > { %v7375_v19 = vpop.f32.mrb[0].mxu0 }
 0x625   : > { %v15084_v23 = vadd.f32 %v7375_v19, %v18784_v29  ;;  %v7377_v44 = vpop.f32.mrb[1].mxu0 }
 0x626   : > { %v15085_v35 = vadd.f32 %v7377_v44, %v18784_v29  ;;  %v7379_v50 = vpop.f32.mrb[2].mxu0 }
 0x627   : > { %v8014_v30 = vmul.f32 0.2, %v15084_v23  ;;  %v15086_v60 = vadd.f32 %v7379_v50, %v18804_v37  ;;  %v7381_v3 = vpop.f32.mrb[3].mxu0 }
 0x628   : > { %v8015_v16 = vmul.f32 0.2, %v15085_v35  ;;  %v15087_v14 = vadd.f32 %v7381_v3, %v18804_v37  ;;  %v1077_v3 = vld [vmem:[%s21806_s1 + $0x758] sm:$0xff] }
 0x629   : > { %v8016_v29 = vmul.f32 0.2, %v15086_v60  ;;  %7644 = vmatmul.mubr.bf16.gmra.mrb[108].mxu0 %v14292_v8  ;;  %v8270_v19 = vmax.f32 %v15084_v23, %v8014_v30 }
 0x62a   : > { %v8017_v50 = vmul.f32 0.2, %v15087_v14  ;;  %7653 = vmatprep.mubr.bf16.mxu0 %v14301_v5  ;;  %v8271_v8 = vmax.f32 %v15085_v35, %v8015_v16 }
 0x62b   : > { %v8272_v44 = vmax.f32 %v15086_v60, %v8016_v29  ;;  %v14309_v29 = vcombine.high %v1077_v3, %v1081_v10 }
 0x62c   : > { %v8273_v2 = vmax.f32 %v15087_v14, %v8017_v50  ;;  %v7385_v1 = vpop.f32.mrb[4].mxu0 }
 0x62d   : > { %v8526_v61 = vpack.c.bf16 %v8272_v44, %v8270_v19  ;;  %v15088_v5 = vadd.f32 %v7385_v1, %v18840_v53  ;;  %v7387_v56 = vpop.f32.mrb[5].mxu0 }
 0x62e   : > { %v15089_v23 = vadd.f32 %v7387_v56, %v18840_v53  ;;  %v7389_v30 = vpop.f32.mrb[6].mxu0  ;;  %v8527_v60 = vpack.c.bf16 %v8273_v2, %v8271_v8  ;;  %v1085_v53 = vld [vmem:[%s21806_s1 + $0x798] sm:$0xff] }
 0x62f   : > { %v8018_v37 = vmul.f32 0.2, %v15088_v5  ;;  %v15090_v54 = vadd.f32 %v7389_v30, %v18850_v59  ;;  %v7391_v51 = vpop.f32.mrb[7].mxu0  ;;  %v1089_v56 = vld [vmem:[%s21806_s1 + $0x7b8] sm:$0xff] }
 0x630   : > { %v8019_v49 = vmul.f32 0.2, %v15089_v23  ;;  %v15091_v45 = vadd.f32 %v7391_v51, %v18850_v59  ;;  %10574 = vmatprep.subr.bf16.mxu1 %v8527_v60  ;;  %v14317_v19 = vcombine.high %v1085_v53, %v1089_v56 }
 0x631   : > { %v8020_v14 = vmul.f32 0.2, %v15090_v54  ;;  %7654 = vmatmul.mubr.bf16.gmra.mrb[112].mxu0 %v14300_v55  ;;  %10575 = vmatpush1.bf16.msra.mxu1 %v8526_v61  ;;  %v8274_v1 = vmax.f32 %v15088_v5, %v8018_v37  ;;  %v14308_v61 = vcombine.low %v1077_v3, %v1081_v10  ;;  %v1097_v3 = vld [vmem:[%s21806_s1 + $0x7f8] sm:$0xff] }
 0x632   : > { %v8021_v16 = vmul.f32 0.2, %v15091_v45  ;;  %7663 = vmatprep.mubr.bf16.mxu0 %v14309_v29  ;;  %v8275_v2 = vmax.f32 %v15089_v23, %v8019_v49 }
 0x633   : > { %v8276_v35 = vmax.f32 %v15090_v54, %v8020_v14 }
 0x634   : > { %v8277_v22 = vmax.f32 %v15091_v45, %v8021_v16  ;;  %v7395_v26 = vpop.f32.mrb[8].mxu0 }
 0x635   : > { %v8528_v59 = vpack.c.bf16 %v8276_v35, %v8274_v1  ;;  %v15092_v51 = vadd.f32 %v7395_v26, %v18818_v43  ;;  %v7397_v55 = vpop.f32.mrb[9].mxu0 }
 0x636   : > { %v15093_v50 = vadd.f32 %v7397_v55, %v18818_v43  ;;  %v7399_v37 = vpop.f32.mrb[10].mxu0  ;;  %v8529_v54 = vpack.c.bf16 %v8277_v22, %v8275_v2  ;;  %v1093_v43 = vld [vmem:[%s21806_s1 + $0x7d8] sm:$0xff]  ;;  %v14316_v2 = vcombine.low %v1085_v53, %v1089_v56 }
 0x637   : > { %v8022_v44 = vmul.f32 0.2, %v15092_v51  ;;  %v15094_v8 = vadd.f32 %v7399_v37, %v18872_v6  ;;  %v7401_v5 = vpop.f32.mrb[11].mxu0  ;;  %v1105_v56 = vld [vmem:[%s21806_s1 + $0x838] sm:$0xff] }
 0x638   : > { %v8023_v30 = vmul.f32 0.2, %v15093_v50  ;;  %v15095_v60 = vadd.f32 %v7401_v5, %v18872_v6  ;;  %10576 = vmatprep.subr.bf16.mxu1 %v8529_v54 }
 0x639   : > { %v8024_v49 = vmul.f32 0.2, %v15094_v8  ;;  %7664 = vmatmul.mubr.bf16.gmra.mrb[116].mxu0 %v14308_v61  ;;  %10577 = vmatpush1.bf16.msra.mxu1 %v8528_v59  ;;  %v8278_v29 = vmax.f32 %v15092_v51, %v8022_v44  ;;  %v14325_v51 = vcombine.high %v1093_v43, %v1097_v3 }
 0x63a   : > { %v8025_v23 = vmul.f32 0.2, %v15095_v60  ;;  %7673 = vmatprep.mubr.bf16.mxu0 %v14317_v19  ;;  %v8279_v45 = vmax.f32 %v15093_v50, %v8023_v30 }
 0x63b   : > { %v8280_v10 = vmax.f32 %v15094_v8, %v8024_v49 }
 0x63c   : > { %v8281_v14 = vmax.f32 %v15095_v60, %v8025_v23  ;;  %v7405_v16 = vpop.f32.mrb[12].mxu0 }
 0x63d   : > { %v8530_v6 = vpack.c.bf16 %v8280_v10, %v8278_v29  ;;  %v15096_v1 = vadd.f32 %v7405_v16, %v18826_v48  ;;  %v7407_v35 = vpop.f32.mrb[13].mxu0  ;;  %v14324_v29 = vcombine.low %v1093_v43, %v1097_v3  ;;  %v1113_v3 = vld [vmem:[%s21806_s1 + $0x878] sm:$0xff] }
 0x63e   : > { %v15097_v22 = vadd.f32 %v7407_v35, %v18826_v48  ;;  %v7409_v26 = vpop.f32.mrb[14].mxu0  ;;  %v8531_v59 = vpack.c.bf16 %v8281_v14, %v8279_v45  ;;  %v1101_v48 = vld [vmem:[%s21806_s1 + $0x818] sm:$0xff] }
 0x63f   : > { %v8026_v55 = vmul.f32 0.2, %v15096_v1  ;;  %v15098_v61 = vadd.f32 %v7409_v26, %v18894_v15  ;;  %v7411_v37 = vpop.f32.mrb[15].mxu0  ;;  %v14333_v16 = vcombine.high %v1101_v48, %v1105_v56 }
 0x640   : > { %v8027_v54 = vmul.f32 0.2, %v15097_v22  ;;  %v15099_v19 = vadd.f32 %v7411_v37, %v18894_v15  ;;  %10578 = vmatprep.subr.bf16.mxu1 %v8531_v59 }
 0x641   : > { %v8028_v50 = vmul.f32 0.2, %v15098_v61  ;;  %7674 = vmatmul.mubr.bf16.gmra.mrb[120].mxu0 %v14316_v2  ;;  %10579 = vmatpush1.bf16.msra.mxu1 %v8530_v6  ;;  %v8282_v8 = vmax.f32 %v15096_v1, %v8026_v55 }
 0x642   : > { %v8029_v44 = vmul.f32 0.2, %v15099_v19  ;;  %7683 = vmatprep.mubr.bf16.mxu0 %v14325_v51  ;;  %v8283_v5 = vmax.f32 %v15097_v22, %v8027_v54 }
 0x643   : > { %v8284_v53 = vmax.f32 %v15098_v61, %v8028_v50  ;;  %v14332_v50 = vcombine.low %v1101_v48, %v1105_v56  ;;  %v1121_v56 = vld [vmem:[%s21806_s1 + $0x8b8] sm:$0xff] }
 0x644   : > { %v8285_v30 = vmax.f32 %v15099_v19, %v8029_v44  ;;  %v7415_v60 = vpop.f32.mrb[16].mxu0 }
 0x645   : > { %v8532_v15 = vpack.c.bf16 %v8284_v53, %v8282_v8  ;;  %v15100_v49 = vadd.f32 %v7415_v60, %v18848_v58  ;;  %v7417_v23 = vpop.f32.mrb[17].mxu0 }
 0x646   : > { %v15101_v10 = vadd.f32 %v7417_v23, %v18848_v58  ;;  %v7419_v45 = vpop.f32.mrb[18].mxu0  ;;  %v8533_v14 = vpack.c.bf16 %v8285_v30, %v8283_v5  ;;  %v1109_v58 = vld [vmem:[%s21806_s1 + $0x858] sm:$0xff] }
 0x647   : > { %v8030_v6 = vmul.f32 0.2, %v15100_v49  ;;  %v15102_v1 = vadd.f32 %v7419_v45, %v18914_v24  ;;  %v7421_v35 = vpop.f32.mrb[19].mxu0  ;;  %v14341_v5 = vcombine.high %v1109_v58, %v1113_v3 }
 0x648   : > { %v8031_v2 = vmul.f32 0.2, %v15101_v10  ;;  %v15103_v26 = vadd.f32 %v7421_v35, %v18914_v24  ;;  %10580 = vmatprep.subr.bf16.mxu1 %v8533_v14 }
 0x649   : > { %v8032_v22 = vmul.f32 0.2, %v15102_v1  ;;  %7684 = vmatmul.mubr.bf16.gmra.mrb[124].mxu0 %v14324_v29  ;;  %10581 = vmatpush1.bf16.msra.mxu1 %v8532_v15  ;;  %v8286_v51 = vmax.f32 %v15100_v49, %v8030_v6 }
 0x64a   : > { %v8033_v59 = vmul.f32 0.2, %v15103_v26  ;;  %7693 = vmatprep.mubr.bf16.mxu0 %v14333_v16  ;;  %v8287_v55 = vmax.f32 %v15101_v10, %v8031_v2  ;;  %v14340_v2 = vcombine.low %v1109_v58, %v1113_v3  ;;  %v1129_v3 = vld [vmem:[%s21806_s1 + $0x8f8] sm:$0xff] }
 0x64b   : > { %v8288_v43 = vmax.f32 %v15102_v1, %v8032_v22 }
 0x64c   : > { %v8289_v61 = vmax.f32 %v15103_v26, %v8033_v59  ;;  %v7425_v37 = vpop.f32.mrb[20].mxu0 }
 0x64d   : > { %v8534_v24 = vpack.c.bf16 %v8288_v43, %v8286_v51  ;;  %v15104_v54 = vadd.f32 %v7425_v37, %v18870_v4  ;;  %v7427_v19 = vpop.f32.mrb[21].mxu0 }
 0x64e   : > { %v15105_v44 = vadd.f32 %v7427_v19, %v18870_v4  ;;  %v7429_v8 = vpop.f32.mrb[22].mxu0  ;;  %v8535_v53 = vpack.c.bf16 %v8289_v61, %v8287_v55  ;;  %v1117_v4 = vld [vmem:[%s21806_s1 + $0x898] sm:$0xff] }
 0x64f   : > { %v8034_v30 = vmul.f32 0.2, %v15104_v54  ;;  %v15106_v60 = vadd.f32 %v7429_v8, %v18928_v33  ;;  %v7431_v15 = vpop.f32.mrb[23].mxu0  ;;  %v14349_v51 = vcombine.high %v1117_v4, %v1121_v56 }
 0x650   : > { %v8035_v49 = vmul.f32 0.2, %v15105_v44  ;;  %v15107_v23 = vadd.f32 %v7431_v15, %v18928_v33  ;;  %10582 = vmatprep.subr.bf16.mxu1 %v8535_v53 }
 0x651   : > { %v8036_v29 = vmul.f32 0.2, %v15106_v60  ;;  %7694 = vmatmul.mubr.bf16.gmra.mrb[128].mxu0 %v14332_v50  ;;  %10583 = vmatpush1.bf16.msra.mxu1 %v8534_v24  ;;  %v8290_v45 = vmax.f32 %v15104_v54, %v8034_v30 }
 0x652   : > { %v8037_v10 = vmul.f32 0.2, %v15107_v23  ;;  %7703 = vmatprep.mubr.bf16.mxu0 %v14341_v5  ;;  %v8291_v14 = vmax.f32 %v15105_v44, %v8035_v49 }
 0x653   : > { %v8292_v48 = vmax.f32 %v15106_v60, %v8036_v29  ;;  %v14348_v60 = vcombine.low %v1117_v4, %v1121_v56  ;;  %v1137_v56 = vld [vmem:[%s21806_s1 + $0x938] sm:$0xff] }
 0x654   : > { %v8293_v16 = vmax.f32 %v15107_v23, %v8037_v10  ;;  %v7435_v6 = vpop.f32.mrb[24].mxu0 }
 0x655   : > { %v8536_v33 = vpack.c.bf16 %v8292_v48, %v8290_v45  ;;  %v15108_v1 = vadd.f32 %v7435_v6, %v18886_v11  ;;  %v7437_v35 = vpop.f32.mrb[25].mxu0 }
 0x656   : > { %v15109_v26 = vadd.f32 %v7437_v35, %v18886_v11  ;;  %v7439_v22 = vpop.f32.mrb[26].mxu0  ;;  %v8537_v59 = vpack.c.bf16 %v8293_v16, %v8291_v14  ;;  %v1125_v11 = vld [vmem:[%s21806_s1 + $0x8d8] sm:$0xff] }
 0x657   : > { %v8038_v43 = vmul.f32 0.2, %v15108_v1  ;;  %v15110_v55 = vadd.f32 %v7439_v22, %v18962_v52  ;;  %v7441_v61 = vpop.f32.mrb[27].mxu0  ;;  %v14357_v29 = vcombine.high %v1125_v11, %v1129_v3 }
 0x658   : > { %v8039_v37 = vmul.f32 0.2, %v15109_v26  ;;  %v15111_v24 = vadd.f32 %v7441_v61, %v18962_v52  ;;  %10584 = vmatprep.subr.bf16.mxu1 %v8537_v59 }
 0x659   : > { %v8040_v54 = vmul.f32 0.2, %v15110_v55  ;;  %7704 = vmatmul.mubr.bf16.gmra.mrb[132].mxu0 %v14340_v2  ;;  %10585 = vmatpush1.bf16.msra.mxu1 %v8536_v33  ;;  %v8294_v50 = vmax.f32 %v15108_v1, %v8038_v43 }
 0x65a   : > { %v8041_v19 = vmul.f32 0.2, %v15111_v24  ;;  %7713 = vmatprep.mubr.bf16.mxu0 %v14349_v51  ;;  %v8295_v44 = vmax.f32 %v15109_v26, %v8039_v37  ;;  %v14356_v51 = vcombine.low %v1125_v11, %v1129_v3  ;;  %v1145_v3 = vld [vmem:[%s21806_s1 + $0x978] sm:$0xff] }
 0x65b   : > { %v8296_v58 = vmax.f32 %v15110_v55, %v8040_v54 }
 0x65c   : > { %v8297_v8 = vmax.f32 %v15111_v24, %v8041_v19  ;;  %v7445_v53 = vpop.f32.mrb[28].mxu0 }
 0x65d   : > { %v8538_v52 = vpack.c.bf16 %v8296_v58, %v8294_v50  ;;  %v15112_v5 = vadd.f32 %v7445_v53, %v18896_v17  ;;  %v7447_v30 = vpop.f32.mrb[29].mxu0 }
 0x65e   : > { %v15113_v15 = vadd.f32 %v7447_v30, %v18896_v17  ;;  %v7449_v49 = vpop.f32.mrb[30].mxu0  ;;  %v8539_v23 = vpack.c.bf16 %v8297_v8, %v8295_v44  ;;  %v1133_v17 = vld [vmem:[%s21806_s1 + $0x918] sm:$0xff] }
 0x65f   : > { %v8042_v10 = vmul.f32 0.2, %v15112_v5  ;;  %v15114_v45 = vadd.f32 %v7449_v49, %v18996_v9  ;;  %v7451_v48 = vpop.f32.mrb[31].mxu0  ;;  %v14365_v37 = vcombine.high %v1133_v17, %v1137_v56  ;;  %v14364_v49 = vcombine.low %v1133_v17, %v1137_v56  ;;  %v1153_v56 = vld [vmem:[%s21806_s1 + $0x9b8] sm:$0xff] }
 0x660   : > { %v8043_v14 = vmul.f32 0.2, %v15113_v15  ;;  %v15115_v16 = vadd.f32 %v7451_v48, %v18996_v9  ;;  %10586 = vmatprep.subr.bf16.mxu1 %v8539_v23 }
 0x661   : > { %v8044_v6 = vmul.f32 0.2, %v15114_v45  ;;  %7714 = vmatmul.mubr.bf16.gmra.mrb[136].mxu0 %v14348_v60  ;;  %10587 = vmatpush1.bf16.msra.mxu1 %v8538_v52  ;;  %v8298_v1 = vmax.f32 %v15112_v5, %v8042_v10 }
 0x662   : > { %v8045_v33 = vmul.f32 0.2, %v15115_v16  ;;  %7723 = vmatprep.mubr.bf16.mxu0 %v14357_v29  ;;  %v8299_v35 = vmax.f32 %v15113_v15, %v8043_v14 }
 0x663   : > { %v8300_v4 = vmax.f32 %v15114_v45, %v8044_v6 }
 0x664   : > { %v8301_v2 = vmax.f32 %v15115_v16, %v8045_v33  ;;  %v7455_v26 = vpop.f32.mrb[32].mxu0 }
 0x665   : > { %v8540_v9 = vpack.c.bf16 %v8300_v4, %v8298_v1  ;;  %v15116_v22 = vadd.f32 %v7455_v26, %v18926_v32  ;;  %v7457_v59 = vpop.f32.mrb[33].mxu0 }
 0x666   : > { %v15117_v43 = vadd.f32 %v7457_v59, %v18926_v32  ;;  %v7459_v55 = vpop.f32.mrb[34].mxu0  ;;  %v8541_v61 = vpack.c.bf16 %v8301_v2, %v8299_v35  ;;  %v1141_v32 = vld [vmem:[%s21806_s1 + $0x958] sm:$0xff] }
 0x667   : > { %v8046_v24 = vmul.f32 0.2, %v15116_v22  ;;  %v15118_v54 = vadd.f32 %v7459_v55, %v19024_v31  ;;  %v7461_v19 = vpop.f32.mrb[35].mxu0  ;;  %v14373_v45 = vcombine.high %v1141_v32, %v1145_v3 }
 0x668   : > { %v8047_v50 = vmul.f32 0.2, %v15117_v43  ;;  %v15119_v58 = vadd.f32 %v7461_v19, %v19024_v31  ;;  %10588 = vmatprep.subr.bf16.mxu1 %v8541_v61 }
 0x669   : > { %v8048_v44 = vmul.f32 0.2, %v15118_v54  ;;  %7724 = vmatmul.mubr.bf16.gmra.mrb[140].mxu0 %v14356_v51  ;;  %10589 = vmatpush1.bf16.msra.mxu1 %v8540_v9  ;;  %v8302_v53 = vmax.f32 %v15116_v22, %v8046_v24  ;;  %v14372_v51 = vcombine.low %v1141_v32, %v1145_v3  ;;  %v1161_v32 = vld [vmem:[%s21806_s1 + $0x9f8] sm:$0xff] }
 0x66a   : > { %v8049_v8 = vmul.f32 0.2, %v15119_v58  ;;  %7733 = vmatprep.mubr.bf16.mxu0 %v14365_v37  ;;  %v8303_v52 = vmax.f32 %v15117_v43, %v8047_v50 }
 0x66b   : > { %v8304_v11 = vmax.f32 %v15118_v54, %v8048_v44 }
 0x66c   : > { %v8305_v5 = vmax.f32 %v15119_v58, %v8049_v8  ;;  %v7465_v30 = vpop.f32.mrb[36].mxu0 }
 0x66d   : > { %v8542_v31 = vpack.c.bf16 %v8304_v11, %v8302_v53  ;;  %v15120_v60 = vadd.f32 %v7465_v30, %v18956_v47  ;;  %v7467_v15 = vpop.f32.mrb[37].mxu0 }
 0x66e   : > { %v15121_v23 = vadd.f32 %v7467_v15, %v18956_v47  ;;  %v7469_v29 = vpop.f32.mrb[38].mxu0  ;;  %v8543_v10 = vpack.c.bf16 %v8305_v5, %v8303_v52  ;;  %v1149_v47 = vld [vmem:[%s21806_s1 + $0x998] sm:$0xff] }
 0x66f   : > { %v8050_v48 = vmul.f32 0.2, %v15120_v60  ;;  %v15122_v14 = vadd.f32 %v7469_v29, %v19046_v7  ;;  %v7471_v16 = vpop.f32.mrb[39].mxu0  ;;  %v14381_v37 = vcombine.high %v1149_v47, %v1153_v56 }
 0x670   : > { %v8051_v6 = vmul.f32 0.2, %v15121_v23  ;;  %v15123_v33 = vadd.f32 %v7471_v16, %v19046_v7  ;;  %10590 = vmatprep.subr.bf16.mxu1 %v8543_v10 }
 0x671   : > { %v8052_v1 = vmul.f32 0.2, %v15122_v14  ;;  %7734 = vmatmul.mubr.bf16.gmra.mrb[144].mxu0 %v14364_v49  ;;  %10591 = vmatpush1.bf16.msra.mxu1 %v8542_v31  ;;  %v8306_v35 = vmax.f32 %v15120_v60, %v8050_v48  ;;  %v14380_v60 = vcombine.low %v1149_v47, %v1153_v56 }
 0x672   : > { %v8053_v4 = vmul.f32 0.2, %v15123_v33  ;;  %7743 = vmatprep.mubr.bf16.mxu0 %v14373_v45  ;;  %v8307_v2 = vmax.f32 %v15121_v23, %v8051_v6 }
 0x673   : > { %v8308_v17 = vmax.f32 %v15122_v14, %v8052_v1 }
 0x674   : > { %v8309_v26 = vmax.f32 %v15123_v33, %v8053_v4  ;;  %v7475_v9 = vpop.f32.mrb[40].mxu0 }
 0x675   : > { %v8544_v7 = vpack.c.bf16 %v8308_v17, %v8306_v35  ;;  %v15124_v22 = vadd.f32 %v7475_v9, %v18984_v0  ;;  %v7477_v59 = vpop.f32.mrb[41].mxu0  ;;  %v1169_v35 = vld [vmem:[%s21806_s1 + $0xa38] sm:$0xff] }
 0x676   : > { %v15125_v43 = vadd.f32 %v7477_v59, %v18984_v0  ;;  %v7479_v55 = vpop.f32.mrb[42].mxu0  ;;  %v8545_v61 = vpack.c.bf16 %v8309_v26, %v8307_v2  ;;  %v1157_v0 = vld [vmem:[%s21806_s1 + $0x9d8] sm:$0xff] }
 0x677   : > { %v8054_v24 = vmul.f32 0.2, %v15124_v22  ;;  %v15126_v54 = vadd.f32 %v7479_v55, %v19080_v39  ;;  %v7481_v19 = vpop.f32.mrb[43].mxu0  ;;  %v14389_v29 = vcombine.high %v1157_v0, %v1161_v32  ;;  %v14388_v9 = vcombine.low %v1157_v0, %v1161_v32 }
 0x678   : > { %v8055_v50 = vmul.f32 0.2, %v15125_v43  ;;  %v15127_v58 = vadd.f32 %v7481_v19, %v19080_v39  ;;  %10592 = vmatprep.subr.bf16.mxu1 %v8545_v61 }
 0x679   : > { %v8056_v44 = vmul.f32 0.2, %v15126_v54  ;;  %7744 = vmatmul.mubr.bf16.gmra.mrb[148].mxu0 %v14372_v51  ;;  %10593 = vmatpush1.bf16.msra.mxu1 %v8544_v7  ;;  %v8310_v53 = vmax.f32 %v15124_v22, %v8054_v24 }
 0x67a   : > { %v8057_v8 = vmul.f32 0.2, %v15127_v58  ;;  %7753 = vmatprep.mubr.bf16.mxu0 %v14381_v37  ;;  %v8311_v3 = vmax.f32 %v15125_v43, %v8055_v50 }
 0x67b   : > { %v8312_v11 = vmax.f32 %v15126_v54, %v8056_v44  ;;  %v1177_v44 = vld [vmem:[%s21806_s1 + $0xa78] sm:$0xff] }
 0x67c   : > { %v8313_v52 = vmax.f32 %v15127_v58, %v8057_v8  ;;  %v7485_v5 = vpop.f32.mrb[44].mxu0 }
 0x67d   : > { %v8546_v39 = vpack.c.bf16 %v8312_v11, %v8310_v53  ;;  %v15128_v30 = vadd.f32 %v7485_v5, %v19006_v18  ;;  %v7487_v31 = vpop.f32.mrb[45].mxu0 }
 0x67e   : > { %v15129_v15 = vadd.f32 %v7487_v31, %v19006_v18  ;;  %v7489_v49 = vpop.f32.mrb[46].mxu0  ;;  %v8547_v23 = vpack.c.bf16 %v8313_v52, %v8311_v3  ;;  %v1165_v18 = vld [vmem:[%s21806_s1 + $0xa18] sm:$0xff] }
 0x67f   : > { %v8058_v10 = vmul.f32 0.2, %v15128_v30  ;;  %v15130_v45 = vadd.f32 %v7489_v49, %v19111_v63  ;;  %v7491_v48 = vpop.f32.mrb[47].mxu0  ;;  %v14397_v51 = vcombine.high %v1165_v18, %v1169_v35  ;;  %v14396_v3 = vcombine.low %v1165_v18, %v1169_v35 }
 0x680   : > { %v8059_v14 = vmul.f32 0.2, %v15129_v15  ;;  %v15131_v16 = vadd.f32 %v7491_v48, %v19111_v63  ;;  %10594 = vmatprep.subr.bf16.mxu1 %v8547_v23 }
 0x681   : > { %v8060_v6 = vmul.f32 0.2, %v15130_v45  ;;  %7754 = vmatmul.mubr.bf16.gmra.mrb[152].mxu0 %v14380_v60  ;;  %10595 = vmatpush1.bf16.msra.mxu1 %v8546_v39  ;;  %v8314_v1 = vmax.f32 %v15128_v30, %v8058_v10 }
 0x682   : > { %v8061_v33 = vmul.f32 0.2, %v15131_v16  ;;  %7763 = vmatprep.mubr.bf16.mxu0 %v14389_v29  ;;  %v8315_v17 = vmax.f32 %v15129_v15, %v8059_v14  ;;  %v1185_v14 = vld [vmem:[%s21806_s1 + $0xab8] sm:$0xff] }
 0x683   : > { %v8316_v4 = vmax.f32 %v15130_v45, %v8060_v6 }
 0x684   : > { %v8317_v47 = vmax.f32 %v15131_v16, %v8061_v33  ;;  %v7495_v56 = vpop.f32.mrb[48].mxu0 }
 0x685   : > { %v8548_v63 = vpack.c.bf16 %v8316_v4, %v8314_v1  ;;  %v15132_v2 = vadd.f32 %v7495_v56, %v19040_v57  ;;  %v7497_v26 = vpop.f32.mrb[49].mxu0 }
 0x686   : > { %v15133_v7 = vadd.f32 %v7497_v26, %v19040_v57  ;;  %v7499_v22 = vpop.f32.mrb[50].mxu0  ;;  %v8549_v59 = vpack.c.bf16 %v8317_v47, %v8315_v17  ;;  %v1173_v57 = vld [vmem:[%s21806_s1 + $0xa58] sm:$0xff] }
 0x687   : > { %v8062_v43 = vmul.f32 0.2, %v15132_v2  ;;  %v15134_v55 = vadd.f32 %v7499_v22, %v19134_v36  ;;  %v7501_v61 = vpop.f32.mrb[51].mxu0  ;;  %v14405_v30 = vcombine.high %v1173_v57, %v1177_v44  ;;  %v14404_v18 = vcombine.low %v1173_v57, %v1177_v44  ;;  %v1640_v57 = vpop.permute.xlu1 %1639 }
 0x688   : > { %v8063_v37 = vmul.f32 0.2, %v15133_v7  ;;  %v15135_v24 = vadd.f32 %v7501_v61, %v19134_v36  ;;  %10596 = vmatprep.subr.bf16.mxu1 %v8549_v59  ;;  %v1635_v61 = vpop.permute.xlu0 %1634 }
 0x689   : > { %v8064_v54 = vmul.f32 0.2, %v15134_v55  ;;  %7764 = vmatmul.mubr.bf16.gmra.mrb[156].mxu0 %v14388_v9  ;;  %10597 = vmatpush1.bf16.msra.mxu1 %v8548_v63  ;;  %v8318_v50 = vmax.f32 %v15132_v2, %v8062_v43 }
 0x68a   : > { %v8065_v19 = vmul.f32 0.2, %v15135_v24  ;;  %7773 = vmatprep.mubr.bf16.mxu0 %v14397_v51  ;;  %v8319_v8 = vmax.f32 %v15133_v7, %v8063_v37 }
 0x68b   : > { %v8320_v58 = vmax.f32 %v15134_v55, %v8064_v54  ;;  %v1193_v55 = vld [vmem:[%s21806_s1 + $0xaf8] sm:$0xff] }
 0x68c   : > { %v8321_v53 = vmax.f32 %v15135_v24, %v8065_v19  ;;  %v7505_v11 = vpop.f32.mrb[52].mxu0 }
 0x68d   : > { %v8550_v36 = vpack.c.bf16 %v8320_v58, %v8318_v50  ;;  %v15136_v0 = vadd.f32 %v7505_v11, %v19074_v12  ;;  %v7507_v32 = vpop.f32.mrb[53].mxu0 }
 0x68e   : > { %v15137_v52 = vadd.f32 %v7507_v32, %v19074_v12  ;;  %v7509_v5 = vpop.f32.mrb[54].mxu0  ;;  %v8551_v39 = vpack.c.bf16 %v8321_v53, %v8319_v8  ;;  %v1181_v12 = vld [vmem:[%s21806_s1 + $0xa98] sm:$0xff] }
 0x68f   : > { %v8066_v31 = vmul.f32 0.2, %v15136_v0  ;;  %v15138_v60 = vadd.f32 %v7509_v5, %v19151_v62  ;;  %v7511_v15 = vpop.f32.mrb[55].mxu0  ;;  %v14413_v56 = vcombine.high %v1181_v12, %v1185_v14  ;;  %v14412_v58 = vcombine.low %v1181_v12, %v1185_v14 }
 0x690   : > { %v8067_v49 = vmul.f32 0.2, %v15137_v52  ;;  %v15139_v23 = vadd.f32 %v7511_v15, %v19151_v62  ;;  %10598 = vmatprep.subr.bf16.mxu1 %v8551_v39  ;;  %v1201_v15 = vld [vmem:[%s21806_s1 + $0xb38] sm:$0xff] }
 0x691   : > { %v8068_v29 = vmul.f32 0.2, %v15138_v60  ;;  %7774 = vmatmul.mubr.bf16.gmra.mrb[160].mxu0 %v14396_v3  ;;  %10599 = vmatpush1.bf16.msra.mxu1 %v8550_v36  ;;  %v8322_v45 = vmax.f32 %v15136_v0, %v8066_v31 }
 0x692   : > { %v8069_v10 = vmul.f32 0.2, %v15139_v23  ;;  %7783 = vmatprep.mubr.bf16.mxu0 %v14405_v30  ;;  %v8323_v16 = vmax.f32 %v15137_v52, %v8067_v49  ;;  %v1645_v49 = vpop.permute.xlu0 %1644 }
 0x693   : > { %v8324_v48 = vmax.f32 %v15138_v60, %v8068_v29  ;;  %v1197_v60 = vld [vmem:[%s21806_s1 + $0xb18] sm:$0xff] }
 0x694   : > { %v8325_v6 = vmax.f32 %v15139_v23, %v8069_v10  ;;  %v7515_v33 = vpop.f32.mrb[56].mxu0 }
 0x695   : > { %v8552_v62 = vpack.c.bf16 %v8324_v48, %v8322_v45  ;;  %v15140_v1 = vadd.f32 %v7515_v33, %v19102_v46  ;;  %v7517_v4 = vpop.f32.mrb[57].mxu0 }
 0x696   : > { %v15141_v35 = vadd.f32 %v7517_v4, %v19102_v46  ;;  %v7519_v17 = vpop.f32.mrb[58].mxu0  ;;  %v8553_v47 = vpack.c.bf16 %v8325_v6, %v8323_v16  ;;  %v1189_v46 = vld [vmem:[%s21806_s1 + $0xad8] sm:$0xff]  ;;  %v1650_v16 = vpop.permute.xlu1 %1649  ;;  %v8662_v4 = vld [vmem:[%s21806_s1 + $0x1040] sm:$0xff] }
 0x697   : > { %v8070_v63 = vmul.f32 0.2, %v15140_v1  ;;  %v15142_v2 = vadd.f32 %v7519_v17, %v19177_v27  ;;  %v7521_v26 = vpop.f32.mrb[59].mxu0  ;;  %v14421_v11 = vcombine.high %v1189_v46, %v1193_v55  ;;  %v14420_v14 = vcombine.low %v1189_v46, %v1193_v55 }
 0x698   : > { %v8071_v9 = vmul.f32 0.2, %v15141_v35  ;;  %v15143_v7 = vadd.f32 %v7521_v26, %v19177_v27  ;;  %10600 = vmatprep.subr.bf16.mxu1 %v8553_v47 }
 0x699   : > { %v8072_v22 = vmul.f32 0.2, %v15142_v2  ;;  %7784 = vmatmul.mubr.bf16.gmra.mrb[164].mxu0 %v14404_v18  ;;  %10601 = vmatpush1.bf16.msra.mxu1 %v8552_v62  ;;  %v8326_v51 = vmax.f32 %v15140_v1, %v8070_v63  ;;  %v14429_v1 = vcombine.high %v1197_v60, %v1201_v15  ;;  %v8666_v18 = vld [vmem:[%s21806_s1 + $0x1060] sm:$0xff] }
 0x69a   : > { %v8073_v59 = vmul.f32 0.2, %v15143_v7  ;;  %7793 = vmatprep.mubr.bf16.mxu0 %v14413_v56  ;;  %v8327_v37 = vmax.f32 %v15141_v35, %v8071_v9  ;;  %v14719_v26 = vcombine.high %v8662_v4, %v8666_v18 }
 0x69b   : > { %v8328_v43 = vmax.f32 %v15142_v2, %v8072_v22 }
 0x69c   : > { %v8329_v24 = vmax.f32 %v15143_v7, %v8073_v59  ;;  %v7525_v27 = vpop.f32.mrb[60].mxu0  ;;  %v1205_v59 = vld [vmem:[%s21806_s1 + $0xb58] sm:$0xff] }
 0x69d   : > { %v8554_v54 = vpack.c.bf16 %v8328_v43, %v8326_v51  ;;  %v15144_v19 = vadd.f32 %v7525_v27, %v1635_v61  ;;  %v7527_v50 = vpop.f32.mrb[61].mxu0  ;;  %v1209_v51 = vld [vmem:[%s21806_s1 + $0xb78] sm:$0xff]  ;;  %v1655_v43 = vpop.permute.xlu0 %1654 }
 0x69e   : > { %v15145_v44 = vadd.f32 %v7527_v50, %v1635_v61  ;;  %v7529_v8 = vpop.f32.mrb[62].mxu0  ;;  %v8555_v53 = vpack.c.bf16 %v8329_v24, %v8327_v37  ;;  %v21971_v37 = vcombine.low %v19586_v13, %v19591_v40  ;;  %v1660_v50 = vpop.permute.xlu1 %1659 }
 0x69f   : > { %v8074_v36 = vmul.f32 0.2, %v15144_v19  ;;  %v15146_v0 = vadd.f32 %v7529_v8, %v1640_v57  ;;  %v7531_v32 = vpop.f32.mrb[63].mxu0  ;;  %v14437_v8 = vcombine.high %v1205_v59, %v1209_v51 }
 0x6a0   : > { %v8075_v3 = vmul.f32 0.2, %v15145_v44  ;;  %v15147_v52 = vadd.f32 %v7531_v32, %v1640_v57  ;;  %10602 = vmatprep.subr.bf16.mxu1 %v8555_v53  ;;  %v8670_v53 = vld [vmem:[%s21806_s1 + $0x1080] sm:$0xff] }
 0x6a1   : > { %v8076_v5 = vmul.f32 0.2, %v15146_v0  ;;  %7794 = vmatmul.mubr.bf16.gmra.mrb[168].mxu0 %v14412_v58  ;;  %10603 = vmatpush1.bf16.msra.mxu1 %v8554_v54  ;;  %v8330_v30 = vmax.f32 %v15144_v19, %v8074_v36  ;;  %v14428_v19 = vcombine.low %v1197_v60, %v1201_v15  ;;  %v1213_v60 = vld [vmem:[%s21806_s1 + $0xb98] sm:$0xff] }
 0x6a2   : > { %v8077_v39 = vmul.f32 0.2, %v15147_v52  ;;  %7803 = vmatprep.mubr.bf16.mxu0 %v14421_v11  ;;  %v8331_v23 = vmax.f32 %v15145_v44, %v8075_v3  ;;  %v8674_v11 = vld [vmem:[%s21806_s1 + $0x10a0] sm:$0xff]  ;;  %v14718_v3 = vcombine.low %v8662_v4, %v8666_v18  ;;  %v1217_v15 = vld [vmem:[%s21806_s1 + $0xbb8] sm:$0xff] }
 0x6a3   : > { %v8332_v31 = vmax.f32 %v15146_v0, %v8076_v5  ;;  %v14727_v5 = vcombine.high %v8670_v53, %v8674_v11  ;;  %v8678_v4 = vld [vmem:[%s21806_s1 + $0x10c0] sm:$0xff] }
 0x6a4   : > { %v8333_v29 = vmax.f32 %v15147_v52, %v8077_v39  ;;  %v7535_v10 = vpop.f32.mrb[64].mxu0  ;;  %v8682_v18 = vld [vmem:[%s21806_s1 + $0x10e0] sm:$0xff] }
 0x6a5   : > { %v8556_v45 = vpack.c.bf16 %v8332_v31, %v8330_v30  ;;  %v15148_v48 = vadd.f32 %v7535_v10, %v1645_v49  ;;  %v7537_v12 = vpop.f32.mrb[65].mxu0 }
 0x6a6   : > { %v15149_v6 = vadd.f32 %v7537_v12, %v1645_v49  ;;  %v7539_v33 = vpop.f32.mrb[66].mxu0  ;;  %v8557_v62 = vpack.c.bf16 %v8333_v29, %v8331_v23  ;;  %v1665_v49 = vpop.permute.xlu0 %1664 }
 0x6a7   : > { %v8078_v35 = vmul.f32 0.2, %v15148_v48  ;;  %v15150_v17 = vadd.f32 %v7539_v33, %v1650_v16  ;;  %v7541_v47 = vpop.f32.mrb[67].mxu0 }
 0x6a8   : > { %v8079_v56 = vmul.f32 0.2, %v15149_v6  ;;  %v15151_v63 = vadd.f32 %v7541_v47, %v1650_v16  ;;  %10604 = vmatprep.subr.bf16.mxu1 %v8557_v62  ;;  %v1670_v16 = vpop.permute.xlu1 %1669 }
 0x6a9   : > { %v8080_v2 = vmul.f32 0.2, %v15150_v17  ;;  %7804 = vmatmul.mubr.bf16.gmra.mrb[172].mxu0 %v14420_v14  ;;  %10605 = vmatpush1.bf16.msra.mxu1 %v8556_v45  ;;  %v8334_v7 = vmax.f32 %v15148_v48, %v8078_v35  ;;  %v14436_v14 = vcombine.low %v1205_v59, %v1209_v51  ;;  %v1221_v51 = vld [vmem:[%s21806_s1 + $0xbd8] sm:$0xff] }
 0x6aa   : > { %v8081_v9 = vmul.f32 0.2, %v15151_v63  ;;  %7813 = vmatprep.mubr.bf16.mxu0 %v14429_v1  ;;  %v8335_v46 = vmax.f32 %v15149_v6, %v8079_v56  ;;  %v14445_v1 = vcombine.high %v1213_v60, %v1217_v15 }
 0x6ab   : > { %v8336_v22 = vmax.f32 %v15150_v17, %v8080_v2  ;;  %v14726_v2 = vcombine.low %v8670_v53, %v8674_v11  ;;  %v8686_v53 = vld [vmem:[%s21806_s1 + $0x1100] sm:$0xff] }
 0x6ac   : > { %v8337_v55 = vmax.f32 %v15151_v63, %v8081_v9  ;;  %v7545_v61 = vpop.f32.mrb[68].mxu0  ;;  %10607 = vmatmul.mubr.bf16.vlgmr.msra.gmra.mrb[168].mxu1 %v21971_v37  ;;  %v14735_v9 = vcombine.high %v8678_v4, %v8682_v18  ;;  %v8690_v11 = vld [vmem:[%s21806_s1 + $0x1120] sm:$0xff] }
 0x6ad   : > { %v8558_v24 = vpack.c.bf16 %v8336_v22, %v8334_v7  ;;  %v15152_v27 = vadd.f32 %v7545_v61, %v1655_v43  ;;  %v7547_v54 = vpop.f32.mrb[69].mxu0  ;;  %10616 = vmatprep.mubr.bf16.mxu1 %v14719_v26 }
 0x6ae   : > { %v15153_v58 = vadd.f32 %v7547_v54, %v1655_v43  ;;  %v7549_v57 = vpop.f32.mrb[70].mxu0  ;;  %v8559_v44 = vpack.c.bf16 %v8337_v55, %v8335_v46  ;;  %v1225_v43 = vld [vmem:[%s21806_s1 + $0xbf8] sm:$0xff]  ;;  %v1675_v46 = vpop.permute.xlu0 %1674 }
 0x6af   : > { %v8082_v13 = vmul.f32 0.2, %v15152_v27  ;;  %v15154_v40 = vadd.f32 %v7549_v57, %v1660_v50  ;;  %v7551_v36 = vpop.f32.mrb[71].mxu0 }
 0x6b0   : > { %v8083_v0 = vmul.f32 0.2, %v15153_v58  ;;  %v15155_v32 = vadd.f32 %v7551_v36, %v1660_v50  ;;  %10927 = vmatprep.subr.bf16.mxu1 %v8559_v44  ;;  %v1680_v50 = vpop.permute.xlu1 %1679 }
 0x6b1   : > { %v8084_v52 = vmul.f32 0.2, %v15154_v40  ;;  %7814 = vmatmul.mubr.bf16.gmra.mrb[176].mxu0 %v14428_v19  ;;  %10928 = vmatpush1.bf16.msra.mxu1 %v8558_v24  ;;  %v8338_v30 = vmax.f32 %v15152_v27, %v8082_v13  ;;  %v14444_v19 = vcombine.low %v1213_v60, %v1217_v15  ;;  %v1229_v60 = vld [vmem:[%s21806_s1 + $0xc18] sm:$0xff] }
 0x6b2   : > { %v8085_v39 = vmul.f32 0.2, %v15155_v32  ;;  %7823 = vmatprep.mubr.bf16.mxu0 %v14437_v8  ;;  %v8339_v23 = vmax.f32 %v15153_v58, %v8083_v0  ;;  %v14453_v8 = vcombine.high %v1221_v51, %v1225_v43  ;;  %v1233_v15 = vld [vmem:[%s21806_s1 + $0xc38] sm:$0xff] }
 0x6b3   : > { %v8340_v31 = vmax.f32 %v15154_v40, %v8084_v52 }
 0x6b4   : > { %v8341_v29 = vmax.f32 %v15155_v32, %v8085_v39  ;;  %v7555_v10 = vpop.f32.mrb[72].mxu0  ;;  %10617 = vmatmul.mubr.bf16.gmra.mrb[172].mxu1 %v14718_v3  ;;  %v14734_v3 = vcombine.low %v8678_v4, %v8682_v18  ;;  %v8694_v4 = vld [vmem:[%s21806_s1 + $0x1140] sm:$0xff] }
 0x6b5   : > { %v8560_v45 = vpack.c.bf16 %v8340_v31, %v8338_v30  ;;  %v15156_v48 = vadd.f32 %v7555_v10, %v1665_v49  ;;  %v7557_v12 = vpop.f32.mrb[73].mxu0  ;;  %10626 = vmatprep.mubr.bf16.mxu1 %v14727_v5  ;;  %v14743_v5 = vcombine.high %v8686_v53, %v8690_v11  ;;  %v8698_v18 = vld [vmem:[%s21806_s1 + $0x1160] sm:$0xff] }
 0x6b6   : > { %v15157_v6 = vadd.f32 %v7557_v12, %v1665_v49  ;;  %v7559_v33 = vpop.f32.mrb[74].mxu0  ;;  %v8561_v62 = vpack.c.bf16 %v8341_v29, %v8339_v23  ;;  %v1685_v49 = vpop.permute.xlu0 %1684 }
 0x6b7   : > { %v8086_v35 = vmul.f32 0.2, %v15156_v48  ;;  %v15158_v17 = vadd.f32 %v7559_v33, %v1670_v16  ;;  %v7561_v47 = vpop.f32.mrb[75].mxu0 }
 0x6b8   : > { %v8087_v56 = vmul.f32 0.2, %v15157_v6  ;;  %v15159_v63 = vadd.f32 %v7561_v47, %v1670_v16  ;;  %10929 = vmatprep.subr.bf16.mxu1 %v8561_v62  ;;  %v1690_v16 = vpop.permute.xlu1 %1689 }
 0x6b9   : > { %v8088_v26 = vmul.f32 0.2, %v15158_v17  ;;  %7824 = vmatmul.mubr.bf16.gmra.mrb[180].mxu0 %v14436_v14  ;;  %10930 = vmatpush1.bf16.msra.mxu1 %v8560_v45  ;;  %v8342_v22 = vmax.f32 %v15156_v48, %v8086_v35  ;;  %v14452_v14 = vcombine.low %v1221_v51, %v1225_v43  ;;  %v19809_v51 = vld [vmem:[%s21806_s1 + $0xc58] sm:$0xff] }
 0x6ba   : > { %v8089_v7 = vmul.f32 0.2, %v15159_v63  ;;  %7833 = vmatprep.mubr.bf16.mxu0 %v14445_v1  ;;  %v8343_v55 = vmax.f32 %v15157_v6, %v8087_v56  ;;  %v14461_v1 = vcombine.high %v1229_v60, %v1233_v15  ;;  %v19814_v43 = vld [vmem:[%s21806_s1 + $0xc78] sm:$0xff] }
 0x6bb   : > { %v8344_v59 = vmax.f32 %v15158_v17, %v8088_v26 }
 0x6bc   : > { %v8345_v61 = vmax.f32 %v15159_v63, %v8089_v7  ;;  %v7565_v37 = vpop.f32.mrb[76].mxu0  ;;  %10627 = vmatmul.mubr.bf16.gmra.mrb[176].mxu1 %v14726_v2  ;;  %v14742_v2 = vcombine.low %v8686_v53, %v8690_v11  ;;  %v19821_v53 = vld [vmem:[%s21806_s1 + $0x1180] sm:$0xff] }
 0x6bd   : > { %v8562_v24 = vpack.c.bf16 %v8344_v59, %v8342_v22  ;;  %v15160_v27 = vadd.f32 %v7565_v37, %v1675_v46  ;;  %v7567_v54 = vpop.f32.mrb[77].mxu0  ;;  %10636 = vmatprep.mubr.bf16.mxu1 %v14735_v9  ;;  %v14751_v9 = vcombine.high %v8694_v4, %v8698_v18  ;;  %v8706_v11 = vld [vmem:[%s21806_s1 + $0x11a0] sm:$0xff] }
 0x6be   : > { %v15161_v58 = vadd.f32 %v7567_v54, %v1675_v46  ;;  %v7569_v57 = vpop.f32.mrb[78].mxu0  ;;  %v8563_v44 = vpack.c.bf16 %v8345_v61, %v8343_v55  ;;  %v1695_v46 = vpop.permute.xlu0 %1694 }
 0x6bf   : > { %v8090_v13 = vmul.f32 0.2, %v15160_v27  ;;  %v15162_v40 = vadd.f32 %v7569_v57, %v1680_v50  ;;  %v7571_v36 = vpop.f32.mrb[79].mxu0 }
 0x6c0   : > { %v8091_v0 = vmul.f32 0.2, %v15161_v58  ;;  %v15163_v32 = vadd.f32 %v7571_v36, %v1680_v50  ;;  %10931 = vmatprep.subr.bf16.mxu1 %v8563_v44  ;;  %v1700_v50 = vpop.permute.xlu1 %1699 }
 0x6c1   : > { %v8092_v52 = vmul.f32 0.2, %v15162_v40  ;;  %7834 = vmatmul.mubr.bf16.gmra.mrb[184].mxu0 %v14444_v19  ;;  %10932 = vmatpush1.bf16.msra.mxu1 %v8562_v24  ;;  %v8346_v30 = vmax.f32 %v15160_v27, %v8090_v13  ;;  %v14460_v19 = vcombine.low %v1229_v60, %v1233_v15 }
 0x6c2   : > { %v8093_v39 = vmul.f32 0.2, %v15163_v32  ;;  %7843 = vmatprep.mubr.bf16.mxu0 %v14453_v8  ;;  %v8347_v23 = vmax.f32 %v15161_v58, %v8091_v0  ;;  %v14469_v8 = vcombine.high %v19809_v51, %v19814_v43 }
 0x6c3   : > { %v8348_v31 = vmax.f32 %v15162_v40, %v8092_v52 }
 0x6c4   : > { %v8349_v29 = vmax.f32 %v15163_v32, %v8093_v39  ;;  %v7575_v10 = vpop.f32.mrb[80].mxu0  ;;  %10637 = vmatmul.mubr.bf16.gmra.mrb[180].mxu1 %v14734_v3  ;;  %v14750_v3 = vcombine.low %v8694_v4, %v8698_v18  ;;  %v1705_v39 = vpop.permute.xlu0 %1704 }
 0x6c5   : > { %v8564_v45 = vpack.c.bf16 %v8348_v31, %v8346_v30  ;;  %v15164_v48 = vadd.f32 %v7575_v10, %v1685_v49  ;;  %v7577_v12 = vpop.f32.mrb[81].mxu0  ;;  %10646 = vmatprep.mubr.bf16.mxu1 %v14743_v5  ;;  %v14759_v5 = vcombine.high %v19821_v53, %v8706_v11  ;;  %v5577_v15 = vadd.f32 %v18904_v20, %v1705_v39 }
 0x6c6   : > { %v15165_v6 = vadd.f32 %v7577_v12, %v1685_v49  ;;  %v7579_v33 = vpop.f32.mrb[82].mxu0  ;;  %v8565_v62 = vpack.c.bf16 %v8349_v29, %v8347_v23  ;;  %v19831_v49 = vld [vmem:[%s21806_s1 + $0xc98] sm:$0xff]  ;;  %v1710_v29 = vpop.permute.xlu1 %1709  ;;  %v5579_v12 = vadd.f32 %v18906_v21, %v1705_v39  ;;  %v19848_v21 = vld [vmem:[%s21806_s1 + $0x11c0] sm:$0xff] }
 0x6c7   : > { %v8094_v35 = vmul.f32 0.2, %v15164_v48  ;;  %v15166_v17 = vadd.f32 %v7579_v33, %v1690_v16  ;;  %v7581_v47 = vpop.f32.mrb[83].mxu0  ;;  %v19836_v23 = vld [vmem:[%s21806_s1 + $0xcb8] sm:$0xff]  ;;  %v14468_v33 = vcombine.low %v19809_v51, %v19814_v43  ;;  %v5583_v4 = vadd.f32 %v18924_v28, %v1710_v29 }
 0x6c8   : > { %v8095_v56 = vmul.f32 0.2, %v15165_v6  ;;  %v15167_v63 = vadd.f32 %v7581_v47, %v1690_v16  ;;  %10933 = vmatprep.subr.bf16.mxu1 %v8565_v62  ;;  %v14758_v28 = vcombine.low %v19821_v53, %v8706_v11 }
 0x6c9   : > { %v8096_v26 = vmul.f32 0.2, %v15166_v17  ;;  %7844 = vmatmul.mubr.bf16.gmra.mrb[188].mxu0 %v14452_v14  ;;  %10934 = vmatpush1.bf16.msra.mxu1 %v8564_v45  ;;  %v8350_v22 = vmax.f32 %v15164_v48, %v8094_v35  ;;  %v14477_v35 = vcombine.high %v19831_v49, %v19836_v23 }
 0x6ca   : > { %v8097_v7 = vmul.f32 0.2, %v15167_v63  ;;  %7853 = vmatprep.mubr.bf16.mxu0 %v14461_v1  ;;  %v8351_v55 = vmax.f32 %v15165_v6, %v8095_v56  ;;  %v5581_v6 = vadd.f32 %v18916_v25, %v1710_v29  ;;  %v8714_v25 = vld [vmem:[%s21806_s1 + $0x11e0] sm:$0xff]  ;;  %v19892_v29 = vld [vmem:[%s21806_s1 + $0xd38] sm:$0xff] }
 0x6cb   : > { %v8352_v59 = vmax.f32 %v15166_v17, %v8096_v26 }
 0x6cc   : > { %v8353_v61 = vmax.f32 %v15167_v63, %v8097_v7  ;;  %v7585_v37 = vpop.f32.mrb[84].mxu0  ;;  %10647 = vmatmul.mubr.bf16.gmra.mrb[184].mxu1 %v14742_v2  ;;  %v1715_v7 = vpop.permute.xlu0 %1714 }
 0x6cd   : > { %v8566_v24 = vpack.c.bf16 %v8352_v59, %v8350_v22  ;;  %v15168_v27 = vadd.f32 %v7585_v37, %v1695_v46  ;;  %v7587_v54 = vpop.f32.mrb[85].mxu0  ;;  %10656 = vmatprep.mubr.bf16.mxu1 %v14751_v9  ;;  %v14767_v9 = vcombine.high %v19848_v21, %v8714_v25  ;;  %v5587_v43 = vadd.f32 %v18930_v34, %v1715_v7 }
 0x6ce   : > { %v15169_v58 = vadd.f32 %v7587_v54, %v1695_v46  ;;  %v7589_v57 = vpop.f32.mrb[86].mxu0  ;;  %v8567_v44 = vpack.c.bf16 %v8353_v61, %v8351_v55  ;;  %v19859_v46 = vld [vmem:[%s21806_s1 + $0xcd8] sm:$0xff]  ;;  %v1720_v61 = vpop.permute.xlu1 %1719  ;;  %v5589_v54 = vadd.f32 %v18938_v38, %v1715_v7  ;;  %v19876_v38 = vld [vmem:[%s21806_s1 + $0x1200] sm:$0xff] }
 0x6cf   : > { %v8098_v13 = vmul.f32 0.2, %v15168_v27  ;;  %v15170_v40 = vadd.f32 %v7589_v57, %v1700_v50  ;;  %v7591_v36 = vpop.f32.mrb[87].mxu0  ;;  %v19864_v55 = vld [vmem:[%s21806_s1 + $0xcf8] sm:$0xff]  ;;  %v14476_v57 = vcombine.low %v19831_v49, %v19836_v23  ;;  %v5593_v53 = vadd.f32 %v18948_v42, %v1720_v61 }
 0x6d0   : > { %v8099_v0 = vmul.f32 0.2, %v15169_v58  ;;  %v15171_v32 = vadd.f32 %v7591_v36, %v1700_v50  ;;  %10935 = vmatprep.subr.bf16.mxu1 %v8567_v44  ;;  %v14766_v42 = vcombine.low %v19848_v21, %v8714_v25  ;;  %v1725_v39 = vpop.permute.xlu0 %1724  ;;  %v19887_v23 = vld [vmem:[%s21806_s1 + $0xd18] sm:$0xff] }
 0x6d1   : > { %v8100_v52 = vmul.f32 0.2, %v15170_v40  ;;  %7854 = vmatmul.mubr.bf16.gmra.mrb[192].mxu0 %v14460_v19  ;;  %10936 = vmatpush1.bf16.msra.mxu1 %v8566_v24  ;;  %v8354_v31 = vmax.f32 %v15168_v27, %v8098_v13  ;;  %v14485_v13 = vcombine.high %v19859_v46, %v19864_v55  ;;  %v21975_v21 = vld [vmem:[#allocation6_spill] sm:$0xff] }
 0x6d2   : > { %v8101_v30 = vmul.f32 0.2, %v15171_v32  ;;  %7863 = vmatprep.mubr.bf16.mxu0 %v14469_v8  ;;  %v8355_v10 = vmax.f32 %v15169_v58, %v8099_v0  ;;  %v5591_v58 = vadd.f32 %v18946_v41, %v1720_v61  ;;  %v8722_v41 = vld [vmem:[%s21806_s1 + $0x1220] sm:$0xff] }
 0x6d3   : > { %v8356_v60 = vmax.f32 %v15170_v40, %v8100_v52 }
 0x6d4   : > { %v8357_v45 = vmax.f32 %v15171_v32, %v8101_v30  ;;  %v7595_v48 = vpop.f32.mrb[88].mxu0  ;;  %10657 = vmatmul.mubr.bf16.gmra.mrb[188].mxu1 %v14750_v3 }
 0x6d5   : > { %v8568_v14 = vpack.c.bf16 %v8356_v60, %v8354_v31  ;;  %v15173_v16 = vadd.f32 %v7595_v48, %v5577_v15  ;;  %v7597_v20 = vpop.f32.mrb[89].mxu0  ;;  %10666 = vmatprep.mubr.bf16.mxu1 %v14759_v5  ;;  %v14775_v5 = vcombine.high %v19876_v38, %v8722_v41  ;;  %v21972_v15 = vld [vmem:[#allocation3_spill] sm:$0xff] }
 0x6d6   : > { %v15175_v62 = vadd.f32 %v7597_v20, %v5579_v12  ;;  %v7599_v1 = vpop.f32.mrb[90].mxu0  ;;  %v8569_v18 = vpack.c.bf16 %v8357_v45, %v8355_v10  ;;  %v5597_v49 = vadd.f32 %v21972_v15, %v1725_v39  ;;  %v1730_v10 = vpop.permute.xlu1 %1729 }
 0x6d7   : > { %v8102_v17 = vmul.f32 0.2, %v15173_v16  ;;  %v15177_v47 = vadd.f32 %v7599_v1, %v5581_v6  ;;  %v7601_v56 = vpop.f32.mrb[91].mxu0  ;;  %v5603_v25 = vadd.f32 %v21975_v21, %v1730_v10 }
 0x6d8   : > { %v8103_v63 = vmul.f32 0.2, %v15175_v62  ;;  %v15179_v2 = vadd.f32 %v7601_v56, %v5583_v4  ;;  %10937 = vmatprep.subr.bf16.mxu1 %v8569_v18  ;;  %v14484_v4 = vcombine.low %v19859_v46, %v19864_v55  ;;  %v19904_v56 = vld [vmem:[%s21806_s1 + $0x1240] sm:$0xff] }
 0x6d9   : > { %v8104_v26 = vmul.f32 0.2, %v15177_v47  ;;  %7864 = vmatmul.mubr.bf16.gmra.mrb[196].mxu0 %v14468_v33  ;;  %10938 = vmatpush1.bf16.msra.mxu1 %v8568_v14  ;;  %v8358_v59 = vmax.f32 %v15173_v16, %v8102_v17  ;;  %v21973_v14 = vld [vmem:[#allocation4_spill] sm:$0xff] }
 0x6da   : > { %v8105_v22 = vmul.f32 0.2, %v15179_v2  ;;  %7873 = vmatprep.mubr.bf16.mxu0 %v14477_v35  ;;  %v8359_v37 = vmax.f32 %v15175_v62, %v8103_v63  ;;  %v5599_v16 = vadd.f32 %v21973_v14, %v1725_v39  ;;  %v21974_v62 = vld [vmem:[#allocation5_spill] sm:$0xff]  ;;  %v8730_v63 = vld [vmem:[%s21806_s1 + $0x1260] sm:$0xff] }
 0x6db   : > { %v8360_v51 = vmax.f32 %v15177_v47, %v8104_v26  ;;  %v5601_v1 = vadd.f32 %v21974_v62, %v1730_v10  ;;  %v14493_v47 = vcombine.high %v19887_v23, %v19892_v29  ;;  %v21980_v14 = vld [vmem:[#allocation11_spill] sm:$0xff] }
 0x6dc   : > { %v8361_v24 = vmax.f32 %v15179_v2, %v8105_v22  ;;  %v7605_v27 = vpop.f32.mrb[92].mxu0  ;;  %10667 = vmatmul.mubr.bf16.gmra.mrb[192].mxu1 %v14758_v28  ;;  %v14774_v22 = vcombine.low %v19876_v38, %v8722_v41  ;;  %v14492_v41 = vcombine.low %v19887_v23, %v19892_v29 }
 0x6dd   : > { %v8570_v19 = vpack.c.bf16 %v8360_v51, %v8358_v59  ;;  %v15181_v50 = vadd.f32 %v7605_v27, %v5587_v43  ;;  %v7607_v34 = vpop.f32.mrb[93].mxu0  ;;  %10676 = vmatprep.mubr.bf16.mxu1 %v14767_v9  ;;  %v14783_v51 = vcombine.high %v19904_v56, %v8730_v63  ;;  %v1735_v43 = vpop.permute.xlu0 %1734  ;;  %v19915_v27 = vld [vmem:[%s21806_s1 + $0xd58] sm:$0xff] }
 0x6de   : > { %v15183_v44 = vadd.f32 %v7607_v34, %v5589_v54  ;;  %v7609_v8 = vpop.f32.mrb[94].mxu0  ;;  %v8571_v11 = vpack.c.bf16 %v8361_v24, %v8359_v37  ;;  %v21976_v37 = vld [vmem:[#allocation7_spill] sm:$0xff]  ;;  %v19920_v54 = vld [vmem:[%s21806_s1 + $0xd78] sm:$0xff] }
 0x6df   : > { %v8106_v40 = vmul.f32 0.2, %v15181_v50  ;;  %v15185_v36 = vadd.f32 %v7609_v8, %v5591_v58  ;;  %v7611_v0 = vpop.f32.mrb[95].mxu0  ;;  %v5607_v24 = vadd.f32 %v21976_v37, %v1735_v43 }
 0x6e0   : > { %v8107_v32 = vmul.f32 0.2, %v15183_v44  ;;  %v15187_v3 = vadd.f32 %v7611_v0, %v5593_v53  ;;  %10939 = vmatprep.subr.bf16.mxu1 %v8571_v11  ;;  %v21979_v0 = vld [vmem:[#allocation10_spill] sm:$0xff] }
 0x6e1   : > { %v8108_v52 = vmul.f32 0.2, %v15185_v36  ;;  %7874 = vmatmul.mubr.bf16.gmra.mrb[200].mxu0 %v14476_v57  ;;  %10940 = vmatpush1.bf16.msra.mxu1 %v8570_v19  ;;  %v8362_v31 = vmax.f32 %v15181_v50, %v8106_v40  ;;  %v1740_v19 = vpop.permute.xlu1 %1739  ;;  %v21977_v57 = vld [vmem:[#allocation8_spill] sm:$0xff]  ;;  %v1745_v10 = vpop.permute.xlu0 %1744 }
 0x6e2   : > { %v8109_v30 = vmul.f32 0.2, %v15187_v3  ;;  %7883 = vmatprep.mubr.bf16.mxu0 %v14485_v13  ;;  %v8363_v45 = vmax.f32 %v15183_v44, %v8107_v32  ;;  %v5609_v44 = vadd.f32 %v21977_v57, %v1735_v43  ;;  %v21978_v13 = vld [vmem:[#allocation9_spill] sm:$0xff]  ;;  %v5613_v32 = vadd.f32 %v21979_v0, %v1740_v19  ;;  %v21984_v57 = vld [vmem:[#allocation15_spill] sm:$0xff] }
 0x6e3   : > { %v8364_v60 = vmax.f32 %v15185_v36, %v8108_v52  ;;  %v5611_v38 = vadd.f32 %v21978_v13, %v1740_v19  ;;  %v19932_v52 = vld [vmem:[%s21806_s1 + $0x1280] sm:$0xff] }
 0x6e4   : > { %v8365_v48 = vmax.f32 %v15187_v3, %v8109_v30  ;;  %v7615_v12 = vpop.f32.mrb[96].mxu0  ;;  %10677 = vmatmul.mubr.bf16.gmra.mrb[196].mxu1 %v14766_v42  ;;  %v14501_v42 = vcombine.high %v19915_v27, %v19920_v54 }
 0x6e5   : > { %v8572_v20 = vpack.c.bf16 %v8364_v60, %v8362_v31  ;;  %v15189_v6 = vadd.f32 %v7615_v12, %v5597_v49  ;;  %v7617_v33 = vpop.f32.mrb[97].mxu0  ;;  %10686 = vmatprep.mubr.bf16.mxu1 %v14775_v5  ;;  %v8738_v5 = vld [vmem:[%s21806_s1 + $0x12a0] sm:$0xff]  ;;  %v14782_v49 = vcombine.low %v19904_v56, %v8730_v63  ;;  %v14500_v63 = vcombine.low %v19915_v27, %v19920_v54  ;;  %v1755_v19 = vpop.permute.xlu0 %1754 }
 0x6e6   : > { %v15191_v18 = vadd.f32 %v7617_v33, %v5599_v16  ;;  %v7619_v35 = vpop.f32.mrb[98].mxu0  ;;  %v8573_v17 = vpack.c.bf16 %v8365_v48, %v8363_v45  ;;  %v14791_v29 = vcombine.high %v19932_v52, %v8738_v5  ;;  %v5617_v16 = vadd.f32 %v21980_v14, %v1745_v10  ;;  %v1750_v33 = vpop.permute.xlu1 %1749 }
 0x6e7   : > { %v8110_v2 = vmul.f32 0.2, %v15189_v6  ;;  %v15193_v28 = vadd.f32 %v7619_v35, %v5601_v1  ;;  %v7621_v26 = vpop.f32.mrb[99].mxu0 }
 0x6e8   : > { %v8111_v9 = vmul.f32 0.2, %v15191_v18  ;;  %v15195_v7 = vadd.f32 %v7621_v26, %v5603_v25  ;;  %10941 = vmatprep.subr.bf16.mxu1 %v8573_v17  ;;  %v21983_v26 = vld [vmem:[#allocation14_spill] sm:$0xff] }
 0x6e9   : > { %v8112_v59 = vmul.f32 0.2, %v15193_v28  ;;  %7884 = vmatmul.mubr.bf16.gmra.mrb[204].mxu0 %v14484_v4  ;;  %10942 = vmatpush1.bf16.msra.mxu1 %v8572_v20  ;;  %v8366_v55 = vmax.f32 %v15189_v6, %v8110_v2  ;;  %v19943_v20 = vld [vmem:[%s21806_s1 + $0xd98] sm:$0xff] }
 0x6ea   : > { %v8113_v46 = vmul.f32 0.2, %v15195_v7  ;;  %7893 = vmatprep.mubr.bf16.mxu0 %v14493_v47  ;;  %v8367_v50 = vmax.f32 %v15191_v18, %v8111_v9  ;;  %v19948_v6 = vld [vmem:[%s21806_s1 + $0xdb8] sm:$0xff]  ;;  %v21981_v18 = vld [vmem:[#allocation12_spill] sm:$0xff]  ;;  %v21982_v47 = vld [vmem:[#allocation13_spill] sm:$0xff]  ;;  %v5623_v9 = vadd.f32 %v21983_v26, %v1750_v33 }
 0x6eb   : > { %v8368_v61 = vmax.f32 %v15193_v28, %v8112_v59  ;;  %v5619_v35 = vadd.f32 %v21981_v18, %v1745_v10  ;;  %v5621_v56 = vadd.f32 %v21982_v47, %v1750_v33  ;;  %v19960_v59 = vld [vmem:[%s21806_s1 + $0x12c0] sm:$0xff]  ;;  %v1765_v33 = vpop.permute.xlu0 %1764 }
 0x6ec   : > { %v8369_v34 = vmax.f32 %v15195_v7, %v8113_v46  ;;  %v7625_v58 = vpop.f32.mrb[100].mxu0  ;;  %10687 = vmatmul.mubr.bf16.gmra.mrb[200].mxu1 %v14774_v22  ;;  %v14509_v22 = vcombine.high %v19943_v20, %v19948_v6  ;;  %v21988_v18 = vld [vmem:[#allocation19_spill] sm:$0xff] }
 0x6ed   : > { %v8574_v8 = vpack.c.bf16 %v8368_v61, %v8366_v55  ;;  %v15197_v53 = vadd.f32 %v7625_v58, %v5607_v24  ;;  %v7627_v11 = vpop.f32.mrb[101].mxu0  ;;  %10696 = vmatprep.mubr.bf16.mxu1 %v14783_v51  ;;  %v8746_v51 = vld [vmem:[%s21806_s1 + $0x12e0] sm:$0xff]  ;;  %v14790_v24 = vcombine.low %v19932_v52, %v8738_v5  ;;  %v14508_v5 = vcombine.low %v19943_v20, %v19948_v6 }
 0x6ee   : > { %v15199_v40 = vadd.f32 %v7627_v11, %v5609_v44  ;;  %v7629_v36 = vpop.f32.mrb[102].mxu0  ;;  %v8575_v3 = vpack.c.bf16 %v8369_v34, %v8367_v50  ;;  %v14799_v54 = vcombine.high %v19960_v59, %v8746_v51  ;;  %v5627_v44 = vadd.f32 %v21984_v57, %v1755_v19  ;;  %v1760_v11 = vpop.permute.xlu1 %1759 }
 0x6ef   : > { %v8114_v39 = vmul.f32 0.2, %v15197_v53  ;;  %v15201_v30 = vadd.f32 %v7629_v36, %v5611_v38  ;;  %v7631_v31 = vpop.f32.mrb[103].mxu0 }
 0x6f0   : > { %v8115_v60 = vmul.f32 0.2, %v15199_v40  ;;  %v15203_v15 = vadd.f32 %v7631_v31, %v5613_v32  ;;  %10943 = vmatprep.subr.bf16.mxu1 %v8575_v3  ;;  %v21987_v31 = vld [vmem:[#allocation18_spill] sm:$0xff] }
 0x6f1   : > { %v8116_v23 = vmul.f32 0.2, %v15201_v30  ;;  %7894 = vmatmul.mubr.bf16.gmra.mrb[208].mxu0 %v14492_v41  ;;  %10944 = vmatpush1.bf16.msra.mxu1 %v8574_v8  ;;  %v8370_v48 = vmax.f32 %v15197_v53, %v8114_v39  ;;  %v19971_v8 = vld [vmem:[%s21806_s1 + $0xdd8] sm:$0xff] }
 0x6f2   : > { %v8117_v45 = vmul.f32 0.2, %v15203_v15  ;;  %7903 = vmatprep.mubr.bf16.mxu0 %v14501_v42  ;;  %v8371_v62 = vmax.f32 %v15199_v40, %v8115_v60  ;;  %v19976_v53 = vld [vmem:[%s21806_s1 + $0xdf8] sm:$0xff]  ;;  %v21985_v40 = vld [vmem:[#allocation16_spill] sm:$0xff]  ;;  %v21986_v42 = vld [vmem:[#allocation17_spill] sm:$0xff]  ;;  %v5633_v60 = vadd.f32 %v21987_v31, %v1760_v11 }
 0x6f3   : > { %v8372_v12 = vmax.f32 %v15201_v30, %v8116_v23  ;;  %v5629_v36 = vadd.f32 %v21985_v40, %v1755_v19  ;;  %v5631_v52 = vadd.f32 %v21986_v42, %v1760_v11  ;;  %v19988_v23 = vld [vmem:[%s21806_s1 + $0x1300] sm:$0xff]  ;;  %v1775_v11 = vpop.permute.xlu0 %1774 }
 0x6f4   : > { %v8373_v1 = vmax.f32 %v15203_v15, %v8117_v45  ;;  %v7635_v4 = vpop.f32.mrb[104].mxu0  ;;  %10697 = vmatmul.mubr.bf16.gmra.mrb[204].mxu1 %v14782_v49  ;;  %v14517_v49 = vcombine.high %v19971_v8, %v19976_v53  ;;  %v21992_v40 = vld [vmem:[#allocation23_spill] sm:$0xff] }
 0x6f5   : > { %v8576_v21 = vpack.c.bf16 %v8372_v12, %v8370_v48  ;;  %v15205_v25 = vadd.f32 %v7635_v4, %v5617_v16  ;;  %v7637_v17 = vpop.f32.mrb[105].mxu0  ;;  %10706 = vmatprep.mubr.bf16.mxu1 %v14791_v29  ;;  %v8754_v29 = vld [vmem:[%s21806_s1 + $0x1320] sm:$0xff]  ;;  %v14798_v16 = vcombine.low %v19960_v59, %v8746_v51  ;;  %v14516_v51 = vcombine.low %v19971_v8, %v19976_v53 }
 0x6f6   : > { %v15207_v2 = vadd.f32 %v7637_v17, %v5619_v35  ;;  %v7639_v28 = vpop.f32.mrb[106].mxu0  ;;  %v8577_v7 = vpack.c.bf16 %v8373_v1, %v8371_v62  ;;  %v14807_v6 = vcombine.high %v19988_v23, %v8754_v29  ;;  %v5637_v35 = vadd.f32 %v21988_v18, %v1765_v33  ;;  %v1770_v17 = vpop.permute.xlu1 %1769 }
 0x6f7   : > { %v8118_v43 = vmul.f32 0.2, %v15205_v25  ;;  %v15209_v46 = vadd.f32 %v7639_v28, %v5621_v56  ;;  %v7641_v55 = vpop.f32.mrb[107].mxu0 }
 0x6f8   : > { %v8119_v61 = vmul.f32 0.2, %v15207_v2  ;;  %v15211_v37 = vadd.f32 %v7641_v55, %v5623_v9  ;;  %10945 = vmatprep.subr.bf16.mxu1 %v8577_v7  ;;  %v21991_v55 = vld [vmem:[#allocation22_spill] sm:$0xff] }
 0x6f9   : > { %v8120_v27 = vmul.f32 0.2, %v15209_v46  ;;  %7904 = vmatmul.mubr.bf16.gmra.mrb[212].mxu0 %v14500_v63  ;;  %10946 = vmatpush1.bf16.msra.mxu1 %v8576_v21  ;;  %v8374_v34 = vmax.f32 %v15205_v25, %v8118_v43  ;;  %v19999_v21 = vld [vmem:[%s21806_s1 + $0xe18] sm:$0xff] }
 0x6fa   : > { %v8121_v50 = vmul.f32 0.2, %v15211_v37  ;;  %7913 = vmatprep.mubr.bf16.mxu0 %v14509_v22  ;;  %v8375_v13 = vmax.f32 %v15207_v2, %v8119_v61  ;;  %v20004_v25 = vld [vmem:[%s21806_s1 + $0xe38] sm:$0xff]  ;;  %v21989_v2 = vld [vmem:[#allocation20_spill] sm:$0xff]  ;;  %v21990_v22 = vld [vmem:[#allocation21_spill] sm:$0xff]  ;;  %v5643_v61 = vadd.f32 %v21991_v55, %v1770_v17 }
 0x6fb   : > { %v8376_v58 = vmax.f32 %v15209_v46, %v8120_v27  ;;  %v5639_v28 = vadd.f32 %v21989_v2, %v1765_v33  ;;  %v5641_v59 = vadd.f32 %v21990_v22, %v1770_v17  ;;  %v20016_v27 = vld [vmem:[%s21806_s1 + $0x1340] sm:$0xff]  ;;  %v1785_v17 = vpop.permute.xlu0 %1784 }
 0x6fc   : > { %v8377_v38 = vmax.f32 %v15211_v37, %v8121_v50  ;;  %v7645_v41 = vpop.f32.mrb[108].mxu0  ;;  %10707 = vmatmul.mubr.bf16.gmra.mrb[208].mxu1 %v14790_v24  ;;  %v14525_v24 = vcombine.high %v19999_v21, %v20004_v25  ;;  %v21996_v2 = vld [vmem:[#allocation27_spill] sm:$0xff] }
 0x6fd   : > { %v8578_v0 = vpack.c.bf16 %v8376_v58, %v8374_v34  ;;  %v15213_v32 = vadd.f32 %v7645_v41, %v5627_v44  ;;  %v7647_v3 = vpop.f32.mrb[109].mxu0  ;;  %10716 = vmatprep.mubr.bf16.mxu1 %v14799_v54  ;;  %v8762_v54 = vld [vmem:[%s21806_s1 + $0x1360] sm:$0xff]  ;;  %v14806_v44 = vcombine.low %v19988_v23, %v8754_v29  ;;  %v14524_v29 = vcombine.low %v19999_v21, %v20004_v25 }
 0x6fe   : > { %v15215_v39 = vadd.f32 %v7647_v3, %v5629_v36  ;;  %v7649_v30 = vpop.f32.mrb[110].mxu0  ;;  %v8579_v15 = vpack.c.bf16 %v8377_v38, %v8375_v13  ;;  %v14815_v53 = vcombine.high %v20016_v27, %v8762_v54  ;;  %v5647_v36 = vadd.f32 %v21992_v40, %v1775_v11  ;;  %v1780_v3 = vpop.permute.xlu1 %1779 }
 0x6ff   : > { %v8122_v10 = vmul.f32 0.2, %v15213_v32  ;;  %v15217_v45 = vadd.f32 %v7649_v30, %v5631_v52  ;;  %v7651_v48 = vpop.f32.mrb[111].mxu0 }
 0x700   : > { %v8123_v12 = vmul.f32 0.2, %v15215_v39  ;;  %v15219_v14 = vadd.f32 %v7651_v48, %v5633_v60  ;;  %10947 = vmatprep.subr.bf16.mxu1 %v8579_v15  ;;  %v21995_v48 = vld [vmem:[#allocation26_spill] sm:$0xff] }
 0x701   : > { %v8124_v20 = vmul.f32 0.2, %v15217_v45  ;;  %7914 = vmatmul.mubr.bf16.gmra.mrb[216].mxu0 %v14508_v5  ;;  %10948 = vmatpush1.bf16.msra.mxu1 %v8578_v0  ;;  %v8378_v1 = vmax.f32 %v15213_v32, %v8122_v10  ;;  %v20027_v0 = vld [vmem:[%s21806_s1 + $0xe58] sm:$0xff] }
 0x702   : > { %v8125_v62 = vmul.f32 0.2, %v15219_v14  ;;  %7923 = vmatprep.mubr.bf16.mxu0 %v14517_v49  ;;  %v8379_v47 = vmax.f32 %v15215_v39, %v8123_v12  ;;  %v20032_v32 = vld [vmem:[%s21806_s1 + $0xe78] sm:$0xff]  ;;  %v21993_v39 = vld [vmem:[#allocation24_spill] sm:$0xff]  ;;  %v21994_v49 = vld [vmem:[#allocation25_spill] sm:$0xff]  ;;  %v5653_v12 = vadd.f32 %v21995_v48, %v1780_v3 }
 0x703   : > { %v8380_v4 = vmax.f32 %v15217_v45, %v8124_v20  ;;  %v5649_v30 = vadd.f32 %v21993_v39, %v1775_v11  ;;  %v5651_v23 = vadd.f32 %v21994_v49, %v1780_v3  ;;  %v20044_v20 = vld [vmem:[%s21806_s1 + $0x1380] sm:$0xff]  ;;  %v1795_v3 = vpop.permute.xlu0 %1794 }
 0x704   : > { %v8381_v56 = vmax.f32 %v15219_v14, %v8125_v62  ;;  %v7655_v63 = vpop.f32.mrb[112].mxu0  ;;  %10717 = vmatmul.mubr.bf16.gmra.mrb[212].mxu1 %v14798_v16  ;;  %v14533_v16 = vcombine.high %v20027_v0, %v20032_v32  ;;  %v22000_v39 = vld [vmem:[#allocation31_spill] sm:$0xff] }
 0x705   : > { %v8580_v26 = vpack.c.bf16 %v8380_v4, %v8378_v1  ;;  %v15221_v9 = vadd.f32 %v7655_v63, %v5637_v35  ;;  %v7657_v7 = vpop.f32.mrb[113].mxu0  ;;  %10726 = vmatprep.mubr.bf16.mxu1 %v14807_v6  ;;  %v8770_v6 = vld [vmem:[%s21806_s1 + $0x13a0] sm:$0xff]  ;;  %v14814_v35 = vcombine.low %v20016_v27, %v8762_v54  ;;  %v14532_v54 = vcombine.low %v20027_v0, %v20032_v32 }
 0x706   : > { %v15223_v43 = vadd.f32 %v7657_v7, %v5639_v28  ;;  %v7659_v46 = vpop.f32.mrb[114].mxu0  ;;  %v8581_v37 = vpack.c.bf16 %v8381_v56, %v8379_v47  ;;  %v14823_v25 = vcombine.high %v20044_v20, %v8770_v6  ;;  %v5657_v28 = vadd.f32 %v21996_v2, %v1785_v17  ;;  %v1790_v7 = vpop.permute.xlu1 %1789 }
 0x707   : > { %v8126_v19 = vmul.f32 0.2, %v15221_v9  ;;  %v15225_v50 = vadd.f32 %v7659_v46, %v5641_v59  ;;  %v7661_v34 = vpop.f32.mrb[115].mxu0 }
 0x708   : > { %v8127_v58 = vmul.f32 0.2, %v15223_v43  ;;  %v15227_v57 = vadd.f32 %v7661_v34, %v5643_v61  ;;  %10949 = vmatprep.subr.bf16.mxu1 %v8581_v37  ;;  %v21999_v34 = vld [vmem:[#allocation30_spill] sm:$0xff] }
 0x709   : > { %v8128_v8 = vmul.f32 0.2, %v15225_v50  ;;  %7924 = vmatmul.mubr.bf16.gmra.mrb[220].mxu0 %v14516_v51  ;;  %10950 = vmatpush1.bf16.msra.mxu1 %v8580_v26  ;;  %v8382_v38 = vmax.f32 %v15221_v9, %v8126_v19  ;;  %v20055_v26 = vld [vmem:[%s21806_s1 + $0xe98] sm:$0xff] }
 0x70a   : > { %v8129_v13 = vmul.f32 0.2, %v15227_v57  ;;  %7933 = vmatprep.mubr.bf16.mxu0 %v14525_v24  ;;  %v8383_v42 = vmax.f32 %v15223_v43, %v8127_v58  ;;  %v20060_v9 = vld [vmem:[%s21806_s1 + $0xeb8] sm:$0xff]  ;;  %v21997_v43 = vld [vmem:[#allocation28_spill] sm:$0xff]  ;;  %v21998_v24 = vld [vmem:[#allocation29_spill] sm:$0xff]  ;;  %v5663_v58 = vadd.f32 %v21999_v34, %v1790_v7 }
 0x70b   : > { %v8384_v41 = vmax.f32 %v15225_v50, %v8128_v8  ;;  %v5659_v46 = vadd.f32 %v21997_v43, %v1785_v17  ;;  %v5661_v27 = vadd.f32 %v21998_v24, %v1790_v7  ;;  %v20072_v8 = vld [vmem:[%s21806_s1 + $0x13c0] sm:$0xff]  ;;  %v1805_v7 = vpop.permute.xlu0 %1804 }
 0x70c   : > { %v8385_v52 = vmax.f32 %v15227_v57, %v8129_v13  ;;  %v7665_v5 = vpop.f32.mrb[116].mxu0  ;;  %10727 = vmatmul.mubr.bf16.gmra.mrb[216].mxu1 %v14806_v44  ;;  %v14541_v44 = vcombine.high %v20055_v26, %v20060_v9  ;;  %v22004_v43 = vld [vmem:[#allocation35_spill] sm:$0xff] }
 0x70d   : > { %v8582_v31 = vpack.c.bf16 %v8384_v41, %v8382_v38  ;;  %v15229_v60 = vadd.f32 %v7665_v5, %v5647_v36  ;;  %v7667_v15 = vpop.f32.mrb[117].mxu0  ;;  %10736 = vmatprep.mubr.bf16.mxu1 %v14815_v53  ;;  %v8778_v53 = vld [vmem:[%s21806_s1 + $0x13e0] sm:$0xff]  ;;  %v14822_v36 = vcombine.low %v20044_v20, %v8770_v6  ;;  %v14540_v6 = vcombine.low %v20055_v26, %v20060_v9 }
 0x70e   : > { %v15231_v10 = vadd.f32 %v7667_v15, %v5649_v30  ;;  %v7669_v45 = vpop.f32.mrb[118].mxu0  ;;  %v8583_v14 = vpack.c.bf16 %v8385_v52, %v8383_v42  ;;  %v14831_v32 = vcombine.high %v20072_v8, %v8778_v53  ;;  %v5667_v30 = vadd.f32 %v22000_v39, %v1795_v3  ;;  %v1800_v15 = vpop.permute.xlu1 %1799 }
 0x70f   : > { %v8130_v33 = vmul.f32 0.2, %v15229_v60  ;;  %v15233_v62 = vadd.f32 %v7669_v45, %v5651_v23  ;;  %v7671_v1 = vpop.f32.mrb[119].mxu0 }
 0x710   : > { %v8131_v4 = vmul.f32 0.2, %v15231_v10  ;;  %v15235_v18 = vadd.f32 %v7671_v1, %v5653_v12  ;;  %10951 = vmatprep.subr.bf16.mxu1 %v8583_v14  ;;  %v22003_v1 = vld [vmem:[#allocation34_spill] sm:$0xff] }
 0x711   : > { %v8132_v21 = vmul.f32 0.2, %v15233_v62  ;;  %7934 = vmatmul.mubr.bf16.gmra.mrb[224].mxu0 %v14524_v29  ;;  %10952 = vmatpush1.bf16.msra.mxu1 %v8582_v31  ;;  %v8386_v56 = vmax.f32 %v15229_v60, %v8130_v33  ;;  %v20083_v31 = vld [vmem:[%s21806_s1 + $0xed8] sm:$0xff] }
 0x712   : > { %v8133_v47 = vmul.f32 0.2, %v15235_v18  ;;  %7943 = vmatprep.mubr.bf16.mxu0 %v14533_v16  ;;  %v8387_v22 = vmax.f32 %v15231_v10, %v8131_v4  ;;  %v20088_v60 = vld [vmem:[%s21806_s1 + $0xef8] sm:$0xff]  ;;  %v22001_v10 = vld [vmem:[#allocation32_spill] sm:$0xff]  ;;  %v22002_v16 = vld [vmem:[#allocation33_spill] sm:$0xff]  ;;  %v5673_v4 = vadd.f32 %v22003_v1, %v1800_v15 }
 0x713   : > { %v8388_v63 = vmax.f32 %v15233_v62, %v8132_v21  ;;  %v5669_v45 = vadd.f32 %v22001_v10, %v1795_v3  ;;  %v5671_v20 = vadd.f32 %v22002_v16, %v1800_v15  ;;  %v20100_v21 = vld [vmem:[%s21806_s1 + $0x1400] sm:$0xff]  ;;  %v1815_v15 = vpop.permute.xlu0 %1814 }
 0x714   : > { %v8389_v59 = vmax.f32 %v15235_v18, %v8133_v47  ;;  %v7675_v51 = vpop.f32.mrb[120].mxu0  ;;  %10737 = vmatmul.mubr.bf16.gmra.mrb[220].mxu1 %v14814_v35  ;;  %v14549_v35 = vcombine.high %v20083_v31, %v20088_v60  ;;  %v22008_v10 = vld [vmem:[#allocation39_spill] sm:$0xff] }
 0x715   : > { %v8584_v55 = vpack.c.bf16 %v8388_v63, %v8386_v56  ;;  %v15237_v61 = vadd.f32 %v7675_v51, %v5657_v28  ;;  %v7677_v37 = vpop.f32.mrb[121].mxu0  ;;  %10746 = vmatprep.mubr.bf16.mxu1 %v14823_v25  ;;  %v8786_v25 = vld [vmem:[%s21806_s1 + $0x1420] sm:$0xff]  ;;  %v14830_v28 = vcombine.low %v20072_v8, %v8778_v53  ;;  %v14548_v53 = vcombine.low %v20083_v31, %v20088_v60 }
 0x716   : > { %v15239_v19 = vadd.f32 %v7677_v37, %v5659_v46  ;;  %v7679_v50 = vpop.f32.mrb[122].mxu0  ;;  %v8585_v57 = vpack.c.bf16 %v8389_v59, %v8387_v22  ;;  %v14839_v9 = vcombine.high %v20100_v21, %v8786_v25  ;;  %v5677_v46 = vadd.f32 %v22004_v43, %v1805_v7  ;;  %v1810_v37 = vpop.permute.xlu1 %1809 }
 0x717   : > { %v8134_v11 = vmul.f32 0.2, %v15237_v61  ;;  %v15241_v13 = vadd.f32 %v7679_v50, %v5661_v27  ;;  %v7681_v38 = vpop.f32.mrb[123].mxu0 }
 0x718   : > { %v8135_v41 = vmul.f32 0.2, %v15239_v19  ;;  %v15243_v40 = vadd.f32 %v7681_v38, %v5663_v58  ;;  %10953 = vmatprep.subr.bf16.mxu1 %v8585_v57  ;;  %v22007_v38 = vld [vmem:[#allocation38_spill] sm:$0xff] }
 0x719   : > { %v8136_v0 = vmul.f32 0.2, %v15241_v13  ;;  %7944 = vmatmul.mubr.bf16.gmra.mrb[228].mxu0 %v14532_v54  ;;  %10954 = vmatpush1.bf16.msra.mxu1 %v8584_v55  ;;  %v8390_v52 = vmax.f32 %v15237_v61, %v8134_v11  ;;  %v20111_v55 = vld [vmem:[%s21806_s1 + $0xf18] sm:$0xff] }
 0x71a   : > { %v8137_v42 = vmul.f32 0.2, %v15243_v40  ;;  %7953 = vmatprep.mubr.bf16.mxu0 %v14541_v44  ;;  %v8391_v49 = vmax.f32 %v15239_v19, %v8135_v41  ;;  %v20116_v61 = vld [vmem:[%s21806_s1 + $0xf38] sm:$0xff]  ;;  %v22005_v19 = vld [vmem:[#allocation36_spill] sm:$0xff]  ;;  %v22006_v44 = vld [vmem:[#allocation37_spill] sm:$0xff]  ;;  %v5683_v41 = vadd.f32 %v22007_v38, %v1810_v37 }
 0x71b   : > { %v8392_v5 = vmax.f32 %v15241_v13, %v8136_v0  ;;  %v5679_v50 = vadd.f32 %v22005_v19, %v1805_v7  ;;  %v5681_v8 = vadd.f32 %v22006_v44, %v1810_v37  ;;  %v8790_v0 = vld [vmem:[%s21806_s1 + $0x1440] sm:$0xff]  ;;  %v1825_v37 = vpop.permute.xlu0 %1824 }
 0x71c   : > { %v8393_v23 = vmax.f32 %v15243_v40, %v8137_v42  ;;  %v7685_v29 = vpop.f32.mrb[124].mxu0  ;;  %10747 = vmatmul.mubr.bf16.gmra.mrb[224].mxu1 %v14822_v36  ;;  %v14557_v36 = vcombine.high %v20111_v55, %v20116_v61  ;;  %v22012_v19 = vld [vmem:[#allocation43_spill] sm:$0xff] }
 0x71d   : > { %v8586_v48 = vpack.c.bf16 %v8392_v5, %v8390_v52  ;;  %v15245_v12 = vadd.f32 %v7685_v29, %v5667_v30  ;;  %v7687_v14 = vpop.f32.mrb[125].mxu0  ;;  %10756 = vmatprep.mubr.bf16.mxu1 %v14831_v32  ;;  %v8794_v32 = vld [vmem:[%s21806_s1 + $0x1460] sm:$0xff]  ;;  %v14838_v30 = vcombine.low %v20100_v21, %v8786_v25  ;;  %v14556_v25 = vcombine.low %v20111_v55, %v20116_v61 }
 0x71e   : > { %v15247_v33 = vadd.f32 %v7687_v14, %v5669_v45  ;;  %v7689_v62 = vpop.f32.mrb[126].mxu0  ;;  %v8587_v18 = vpack.c.bf16 %v8393_v23, %v8391_v49  ;;  %v14847_v60 = vcombine.high %v8790_v0, %v8794_v32  ;;  %v5687_v45 = vadd.f32 %v22008_v10, %v1815_v15  ;;  %v1820_v14 = vpop.permute.xlu1 %1819 }
 0x71f   : > { %v8138_v17 = vmul.f32 0.2, %v15245_v12  ;;  %v15249_v47 = vadd.f32 %v7689_v62, %v5671_v20  ;;  %v7691_v56 = vpop.f32.mrb[127].mxu0 }
 0x720   : > { %v8139_v63 = vmul.f32 0.2, %v15247_v33  ;;  %v15251_v2 = vadd.f32 %v7691_v56, %v5673_v4  ;;  %10955 = vmatprep.subr.bf16.mxu1 %v8587_v18  ;;  %v22011_v56 = vld [vmem:[#allocation42_spill] sm:$0xff] }
 0x721   : > { %v8140_v26 = vmul.f32 0.2, %v15249_v47  ;;  %7954 = vmatmul.mubr.bf16.gmra.mrb[232].mxu0 %v14540_v6  ;;  %10956 = vmatpush1.bf16.msra.mxu1 %v8586_v48  ;;  %v8394_v59 = vmax.f32 %v15245_v12, %v8138_v17  ;;  %v20136_v48 = vld [vmem:[%s21806_s1 + $0xf58] sm:$0xff] }
 0x722   : > { %v8141_v22 = vmul.f32 0.2, %v15251_v2  ;;  %7963 = vmatprep.mubr.bf16.mxu0 %v14549_v35  ;;  %v8395_v24 = vmax.f32 %v15247_v33, %v8139_v63  ;;  %v20141_v12 = vld [vmem:[%s21806_s1 + $0xf78] sm:$0xff]  ;;  %v22009_v33 = vld [vmem:[#allocation40_spill] sm:$0xff]  ;;  %v22010_v35 = vld [vmem:[#allocation41_spill] sm:$0xff]  ;;  %v5693_v63 = vadd.f32 %v22011_v56, %v1820_v14 }
 0x723   : > { %v8396_v51 = vmax.f32 %v15249_v47, %v8140_v26  ;;  %v5689_v62 = vadd.f32 %v22009_v33, %v1815_v15  ;;  %v5691_v21 = vadd.f32 %v22010_v35, %v1820_v14  ;;  %v8798_v26 = vld [vmem:[%s21806_s1 + $0x1480] sm:$0xff]  ;;  %v1835_v14 = vpop.permute.xlu0 %1834 }
 0x724   : > { %v8397_v27 = vmax.f32 %v15251_v2, %v8141_v22  ;;  %v7695_v54 = vpop.f32.mrb[128].mxu0  ;;  %10757 = vmatmul.mubr.bf16.gmra.mrb[228].mxu1 %v14830_v28  ;;  %v14565_v28 = vcombine.high %v20136_v48, %v20141_v12  ;;  %v22016_v33 = vld [vmem:[#allocation47_spill] sm:$0xff] }
 0x725   : > { %v8588_v34 = vpack.c.bf16 %v8396_v51, %v8394_v59  ;;  %v15253_v58 = vadd.f32 %v7695_v54, %v5677_v46  ;;  %v7697_v57 = vpop.f32.mrb[129].mxu0  ;;  %10766 = vmatprep.mubr.bf16.mxu1 %v14839_v9  ;;  %v8802_v9 = vld [vmem:[%s21806_s1 + $0x14a0] sm:$0xff]  ;;  %v14846_v46 = vcombine.low %v8790_v0, %v8794_v32  ;;  %v14564_v32 = vcombine.low %v20136_v48, %v20141_v12 }
 0x726   : > { %v15255_v11 = vadd.f32 %v7697_v57, %v5679_v50  ;;  %v7699_v13 = vpop.f32.mrb[130].mxu0  ;;  %v8589_v40 = vpack.c.bf16 %v8397_v27, %v8395_v24  ;;  %v14855_v61 = vcombine.high %v8798_v26, %v8802_v9  ;;  %v5697_v50 = vadd.f32 %v22012_v19, %v1825_v37  ;;  %v1830_v57 = vpop.permute.xlu1 %1829 }
 0x727   : > { %v8142_v3 = vmul.f32 0.2, %v15253_v58  ;;  %v15257_v42 = vadd.f32 %v7699_v13, %v5681_v8  ;;  %v7701_v52 = vpop.f32.mrb[131].mxu0 }
 0x728   : > { %v8143_v5 = vmul.f32 0.2, %v15255_v11  ;;  %v15259_v39 = vadd.f32 %v7701_v52, %v5683_v41  ;;  %10957 = vmatprep.subr.bf16.mxu1 %v8589_v40  ;;  %v22015_v52 = vld [vmem:[#allocation46_spill] sm:$0xff] }
 0x729   : > { %v8144_v31 = vmul.f32 0.2, %v15257_v42  ;;  %7964 = vmatmul.mubr.bf16.gmra.mrb[236].mxu0 %v14548_v53  ;;  %10958 = vmatpush1.bf16.msra.mxu1 %v8588_v34  ;;  %v8398_v23 = vmax.f32 %v15253_v58, %v8142_v3  ;;  %v20162_v34 = vld [vmem:[%s21806_s1 + $0xf98] sm:$0xff] }
 0x72a   : > { %v8145_v49 = vmul.f32 0.2, %v15259_v39  ;;  %7973 = vmatprep.mubr.bf16.mxu0 %v14557_v36  ;;  %v8399_v16 = vmax.f32 %v15255_v11, %v8143_v5  ;;  %v20167_v58 = vld [vmem:[%s21806_s1 + $0xfb8] sm:$0xff]  ;;  %v22013_v11 = vld [vmem:[#allocation44_spill] sm:$0xff]  ;;  %v22014_v36 = vld [vmem:[#allocation45_spill] sm:$0xff]  ;;  %v5703_v5 = vadd.f32 %v22015_v52, %v1830_v57  ;;  %v1840_v35 = vpop.permute.xlu1 %1839 }
 0x72b   : > { %v8400_v29 = vmax.f32 %v15257_v42, %v8144_v31  ;;  %v5699_v13 = vadd.f32 %v22013_v11, %v1825_v37  ;;  %v5701_v0 = vadd.f32 %v22014_v36, %v1830_v57  ;;  %v8810_v31 = vld [vmem:[%s21806_s1 + $0x14e0] sm:$0xff] }
 0x72c   : > { %v8401_v20 = vmax.f32 %v15259_v39, %v8145_v49  ;;  %v7705_v6 = vpop.f32.mrb[132].mxu0  ;;  %10767 = vmatmul.mubr.bf16.gmra.mrb[232].mxu1 %v14838_v30  ;;  %v14573_v39 = vcombine.high %v20162_v34, %v20167_v58  ;;  %v8806_v30 = vld [vmem:[%s21806_s1 + $0x14c0] sm:$0xff] }
 0x72d   : > { %v20144_v1 = vpack.c.bf16 %v8400_v29, %v8398_v23  ;;  %v15261_v4 = vadd.f32 %v7705_v6, %v5687_v45  ;;  %v7707_v18 = vpop.f32.mrb[133].mxu0  ;;  %10776 = vmatprep.mubr.bf16.mxu1 %v14847_v60  ;;  %v14854_v45 = vcombine.low %v8798_v26, %v8802_v9  ;;  %v14863_v12 = vcombine.high %v8806_v30, %v8810_v31  ;;  %v22018_v26 = vld [vmem:[#allocation49_spill] sm:$0xff] }
 0x72e   : > { %v15263_v17 = vadd.f32 %v7707_v18, %v5689_v62  ;;  %v7709_v47 = vpop.f32.mrb[134].mxu0  ;;  %v8591_v2 = vpack.c.bf16 %v8401_v20, %v8399_v16  ;;  %v5707_v62 = vadd.f32 %v22016_v33, %v1835_v14  ;;  %v1353_v18 = vld [vmem:[%s21806_s1 + $0xff8] sm:$0xff]  ;;  %v5711_v9 = vadd.f32 %v22018_v26, %v1840_v35 }
 0x72f   : > { %v8146_v7 = vmul.f32 0.2, %v15261_v4  ;;  %v15265_v22 = vadd.f32 %v7709_v47, %v5691_v21  ;;  %v7711_v59 = vpop.f32.mrb[135].mxu0  ;;  %v22017_v47 = vld [vmem:[#allocation48_spill] sm:$0xff] }
 0x730   : > { %v8147_v51 = vmul.f32 0.2, %v15263_v17  ;;  %v15267_v43 = vadd.f32 %v7711_v59, %v5693_v63  ;;  %11280 = vmatprep.subr.bf16.mxu1 %v8591_v2  ;;  %v5709_v56 = vadd.f32 %v22017_v47, %v1835_v14  ;;  %v22024_v47 = vld [vmem:[#allocation55_spill] sm:$0xff] }
 0x731   : > { %v8148_v55 = vmul.f32 0.2, %v15265_v22  ;;  %7974 = vmatmul.mubr.bf16.gmra.mrb[240].mxu0 %v14556_v25  ;;  %v8402_v27 = vmax.f32 %v15261_v4, %v8146_v7  ;;  %v1349_v4 = vld [vmem:[%s21806_s1 + $0xfd8] sm:$0xff]  ;;  %v14572_v7 = vcombine.low %v20162_v34, %v20167_v58  ;;  %v14862_v34 = vcombine.low %v8806_v30, %v8810_v31  ;;  %v22022_v30 = vld [vmem:[#allocation53_spill] sm:$0xff] }
 0x732   : > { %v8149_v24 = vmul.f32 0.2, %v15267_v43  ;;  %7983 = vmatprep.mubr.bf16.mxu0 %v14565_v28  ;;  %v8403_v44 = vmax.f32 %v15263_v17, %v8147_v51  ;;  %v22019_v51 = vld [vmem:[#allocation50_spill] sm:$0xff] }
 0x733   : > { %v8404_v54 = vmax.f32 %v15265_v22, %v8148_v55  ;;  %v8814_v55 = vld [vmem:[%s21806_s1 + $0x1500] sm:$0xff] }
 0x734   : > { %v8405_v8 = vmax.f32 %v15267_v43, %v8149_v24  ;;  %v7715_v53 = vpop.f32.mrb[136].mxu0  ;;  %10777 = vmatmul.mubr.bf16.gmra.mrb[236].mxu1 %v14846_v46  ;;  %v5713_v43 = vadd.f32 %v22019_v51, %v1840_v35  ;;  %v14581_v46 = vcombine.high %v1349_v4, %v1353_v18 }
 0x735   : > { %v20170_v38 = vpack.c.bf16 %v8404_v54, %v8402_v27  ;;  %v15269_v41 = vadd.f32 %v7715_v53, %v5697_v50  ;;  %v7717_v40 = vpop.f32.mrb[137].mxu0  ;;  %10786 = vmatprep.mubr.bf16.mxu1 %v14855_v61  ;;  %v8818_v61 = vld [vmem:[%s21806_s1 + $0x1520] sm:$0xff] }
 0x736   : > { %v15271_v3 = vadd.f32 %v7717_v40, %v5699_v13  ;;  %v7719_v42 = vpop.f32.mrb[138].mxu0  ;;  %v20184_v60 = vpack.c.bf16 %v8405_v8, %v8403_v44  ;;  %v14871_v57 = vcombine.high %v8814_v55, %v8818_v61  ;;  %v1845_v44 = vpop.permute.xlu0 %1844  ;;  %v22020_v13 = vld [vmem:[#allocation51_spill] sm:$0xff] }
 0x737   : > { %v8150_v15 = vmul.f32 0.2, %v15269_v41  ;;  %v15273_v49 = vadd.f32 %v7719_v42, %v5701_v0  ;;  %v7721_v23 = vpop.f32.mrb[139].mxu0  ;;  %v1850_v40 = vpop.permute.xlu1 %1849 }
 0x738   : > { %v8151_v29 = vmul.f32 0.2, %v15271_v3  ;;  %v15275_v10 = vadd.f32 %v7721_v23, %v5703_v5  ;;  %v5721_v31 = vadd.f32 %v22022_v30, %v1850_v40 }
 0x739   : > { %v8152_v48 = vmul.f32 0.2, %v15273_v49  ;;  %7984 = vmatmul.mubr.bf16.gmra.mrb[244].mxu0 %v14564_v32  ;;  %v8406_v20 = vmax.f32 %v15269_v41, %v8150_v15  ;;  %v5717_v41 = vadd.f32 %v22020_v13, %v1845_v44  ;;  %v14580_v15 = vcombine.low %v1349_v4, %v1353_v18 }
 0x73a   : > { %v8153_v16 = vmul.f32 0.2, %v15275_v10  ;;  %7993 = vmatprep.mubr.bf16.mxu0 %v14573_v39  ;;  %v8407_v21 = vmax.f32 %v15271_v3, %v8151_v29  ;;  %v22021_v3 = vld [vmem:[#allocation52_spill] sm:$0xff]  ;;  %v22023_v29 = vld [vmem:[#allocation54_spill] sm:$0xff]  ;;  %v1855_v35 = vpop.permute.xlu0 %1854 }
 0x73b   : > { %v8408_v6 = vmax.f32 %v15273_v49, %v8152_v48  ;;  %v5719_v42 = vadd.f32 %v22021_v3, %v1845_v44  ;;  %v8826_v48 = vld [vmem:[%s21806_s1 + $0x1560] sm:$0xff] }
 0x73c   : > { %v8409_v25 = vmax.f32 %v15275_v10, %v8153_v16  ;;  %v7725_v17 = vpop.f32.mrb[140].mxu0  ;;  %10787 = vmatmul.mubr.bf16.gmra.mrb[240].mxu1 %v14854_v45  ;;  %v5723_v10 = vadd.f32 %v22023_v29, %v1850_v40  ;;  %v8822_v45 = vld [vmem:[%s21806_s1 + $0x1540] sm:$0xff] }
 0x73d   : > { %v20194_v63 = vpack.c.bf16 %v8408_v6, %v8406_v20  ;;  %v15277_v2 = vadd.f32 %v7725_v17, %v5707_v62  ;;  %v7727_v28 = vpop.f32.mrb[141].mxu0  ;;  %10796 = vmatprep.mubr.bf16.mxu1 %v14863_v12  ;;  %v14870_v62 = vcombine.low %v8814_v55, %v8818_v61  ;;  %v14879_v18 = vcombine.high %v8822_v45, %v8826_v48  ;;  %v22028_v3 = vld [vmem:[#allocation59_spill] sm:$0xff] }
 0x73e   : > { %v15279_v22 = vadd.f32 %v7727_v28, %v5709_v56  ;;  %v7729_v59 = vpop.f32.mrb[142].mxu0  ;;  %v20206_v37 = vpack.c.bf16 %v8409_v25, %v8407_v21  ;;  %v5727_v56 = vadd.f32 %v22024_v47, %v1855_v35  ;;  %v1865_v40 = vpop.permute.xlu0 %1864 }
 0x73f   : > { %v8154_v24 = vmul.f32 0.2, %v15277_v2  ;;  %v15281_v27 = vadd.f32 %v7729_v59, %v5711_v9  ;;  %v7731_v54 = vpop.f32.mrb[143].mxu0 }
 0x740   : > { %v8155_v19 = vmul.f32 0.2, %v15279_v22  ;;  %v15283_v50 = vadd.f32 %v7731_v54, %v5713_v43 }
 0x741   : > { %v8156_v58 = vmul.f32 0.2, %v15281_v27  ;;  %7994 = vmatmul.mubr.bf16.gmra.mrb[248].mxu0 %v14572_v7  ;;  %v8410_v53 = vmax.f32 %v15277_v2, %v8154_v24  ;;  %v1860_v2 = vpop.permute.xlu1 %1859  ;;  %v22025_v7 = vld [vmem:[#allocation56_spill] sm:$0xff] }
 0x742   : > { %v8157_v8 = vmul.f32 0.2, %v15283_v50  ;;  %8003 = vmatprep.mubr.bf16.mxu0 %v14581_v46  ;;  %v8411_v36 = vmax.f32 %v15279_v22, %v8155_v19  ;;  %v5729_v22 = vadd.f32 %v22025_v7, %v1855_v35  ;;  %v22026_v46 = vld [vmem:[#allocation57_spill] sm:$0xff]  ;;  %v8830_v19 = vld [vmem:[%s21806_s1 + $0x1580] sm:$0xff] }
 0x743   : > { %v8412_v11 = vmax.f32 %v15281_v27, %v8156_v58  ;;  %v5731_v55 = vadd.f32 %v22026_v46, %v1860_v2  ;;  %v22027_v27 = vld [vmem:[#allocation58_spill] sm:$0xff] }
 0x744   : > { %v8413_v0 = vmax.f32 %v15283_v50, %v8157_v8  ;;  %v7735_v32 = vpop.f32.mrb[144].mxu0  ;;  %10797 = vmatmul.mubr.bf16.gmra.mrb[244].mxu1 %v14862_v34  ;;  %v5733_v54 = vadd.f32 %v22027_v27, %v1860_v2  ;;  %v8834_v50 = vld [vmem:[%s21806_s1 + $0x15a0] sm:$0xff] }
 0x745   : > { %v20210_v52 = vpack.c.bf16 %v8412_v11, %v8410_v53  ;;  %v15285_v5 = vadd.f32 %v7735_v32, %v5717_v41  ;;  %v7737_v39 = vpop.f32.mrb[145].mxu0  ;;  %10806 = vmatprep.mubr.bf16.mxu1 %v14871_v57  ;;  %v14878_v11 = vcombine.low %v8822_v45, %v8826_v48  ;;  %v14887_v41 = vcombine.high %v8830_v19, %v8834_v50  ;;  %v22030_v45 = vld [vmem:[#allocation61_spill] sm:$0xff] }
 0x746   : > { %v15287_v49 = vadd.f32 %v7737_v39, %v5719_v42  ;;  %v7739_v23 = vpop.f32.mrb[146].mxu0  ;;  %v20220_v12 = vpack.c.bf16 %v8413_v0, %v8411_v36  ;;  %v5737_v42 = vadd.f32 %v22028_v3, %v1865_v40  ;;  %v14886_v47 = vcombine.low %v8830_v19, %v8834_v50  ;;  %v22034_v19 = vld [vmem:[#allocation65_spill] sm:$0xff] }
 0x747   : > { %v8158_v14 = vmul.f32 0.2, %v15285_v5  ;;  %v15289_v16 = vadd.f32 %v7739_v23, %v5721_v31  ;;  %v7741_v20 = vpop.f32.mrb[147].mxu0 }
 0x748   : > { %v8159_v6 = vmul.f32 0.2, %v15287_v49  ;;  %v15291_v33 = vadd.f32 %v7741_v20, %v5723_v10  ;;  %v22031_v20 = vld [vmem:[#allocation62_spill] sm:$0xff] }
 0x749   : > { %v8160_v4 = vmul.f32 0.2, %v15289_v16  ;;  %8004 = vmatmul.mubr.bf16.gmra.mrb[252].mxu0 %v14580_v15  ;;  %v8414_v25 = vmax.f32 %v15285_v5, %v8158_v14  ;;  %v1870_v5 = vpop.permute.xlu1 %1869  ;;  %v22029_v15 = vld [vmem:[#allocation60_spill] sm:$0xff] }
 0x74a   : > { %v8161_v21 = vmul.f32 0.2, %v15291_v33  ;;  %v8415_v28 = vmax.f32 %v15287_v49, %v8159_v6  ;;  %v5739_v49 = vadd.f32 %v22029_v15, %v1865_v40  ;;  %v5741_v48 = vadd.f32 %v22030_v45, %v1870_v5 }
 0x74b   : > { %v8416_v17 = vmax.f32 %v15289_v16, %v8160_v4  ;;  %v5743_v6 = vadd.f32 %v22031_v20, %v1870_v5 }
 0x74c   : > { %v8417_v26 = vmax.f32 %v15291_v33, %v8161_v21  ;;  %v7745_v9 = vpop.f32.mrb[148].mxu0  ;;  %10807 = vmatmul.mubr.bf16.gmra.mrb[248].mxu1 %v14870_v62  ;;  %v8838_v33 = vld [vmem:[%s21806_s1 + $0x15c0] sm:$0xff] }
 0x74d   : > { %v20224_v59 = vpack.c.bf16 %v8416_v17, %v8414_v25  ;;  %v15293_v51 = vadd.f32 %v7745_v9, %v5727_v56  ;;  %v7747_v43 = vpop.f32.mrb[149].mxu0  ;;  %10816 = vmatprep.mubr.bf16.mxu1 %v14879_v18  ;;  %v8842_v62 = vld [vmem:[%s21806_s1 + $0x15e0] sm:$0xff] }
 0x74e   : > { %v15295_v61 = vadd.f32 %v7747_v43, %v5729_v22  ;;  %v7749_v24 = vpop.f32.mrb[150].mxu0  ;;  %v20234_v34 = vpack.c.bf16 %v8417_v26, %v8415_v28  ;;  %v14895_v2 = vcombine.high %v8838_v33, %v8842_v62  ;;  %v1875_v28 = vpop.permute.xlu0 %1874  ;;  %v22032_v22 = vld [vmem:[#allocation63_spill] sm:$0xff]  ;;  %v14894_v5 = vcombine.low %v8838_v33, %v8842_v62  ;;  %v22038_v33 = vld [vmem:[#allocation69_spill] sm:$0xff] }
 0x74f   : > { %v8162_v58 = vmul.f32 0.2, %v15293_v51  ;;  %v15297_v57 = vadd.f32 %v7749_v24, %v5731_v55  ;;  %v7751_v44 = vpop.f32.mrb[151].mxu0  ;;  %v1880_v43 = vpop.permute.xlu1 %1879  ;;  %v22033_v24 = vld [vmem:[#allocation64_spill] sm:$0xff] }
 0x750   : > { %v8163_v8 = vmul.f32 0.2, %v15295_v61  ;;  %v15299_v53 = vadd.f32 %v7751_v44, %v5733_v54  ;;  %v5749_v27 = vadd.f32 %v22033_v24, %v1875_v28  ;;  %v5751_v50 = vadd.f32 %v22034_v19, %v1880_v43 }
 0x751   : > { %v8164_v13 = vmul.f32 0.2, %v15297_v57  ;;  %v8418_v0 = vmax.f32 %v15293_v51, %v8162_v58  ;;  %v5747_v51 = vadd.f32 %v22032_v22, %v1875_v28  ;;  %v8854_v28 = vld [vmem:[%s21806_s1 + $0x1640] sm:$0xff] }
 0x752   : > { %v8165_v36 = vmul.f32 0.2, %v15299_v53  ;;  %v8419_v39 = vmax.f32 %v15295_v61, %v8163_v8 }
 0x753   : > { %v8420_v32 = vmax.f32 %v15297_v57, %v8164_v13  ;;  %v8846_v13 = vld [vmem:[%s21806_s1 + $0x1600] sm:$0xff] }
 0x754   : > { %v8421_v30 = vmax.f32 %v15299_v53, %v8165_v36  ;;  %v7755_v31 = vpop.f32.mrb[152].mxu0  ;;  %10817 = vmatmul.mubr.bf16.gmra.mrb[252].mxu1 %v14878_v11  ;;  %v22035_v53 = vld [vmem:[#allocation66_spill] sm:$0xff] }
 0x755   : > { %v20238_v23 = vpack.c.bf16 %v8420_v32, %v8418_v0  ;;  %v15301_v29 = vadd.f32 %v7755_v31, %v5737_v42  ;;  %v7757_v10 = vpop.f32.mrb[153].mxu0  ;;  %10826 = vmatprep.mubr.bf16.mxu1 %v14887_v41  ;;  %v5753_v11 = vadd.f32 %v22035_v53, %v1880_v43  ;;  %v8850_v41 = vld [vmem:[%s21806_s1 + $0x1620] sm:$0xff]  ;;  %v1885_v31 = vpop.permute.xlu0 %1884 }
 0x756   : > { %v15303_v14 = vadd.f32 %v7757_v10, %v5739_v49  ;;  %v7759_v16 = vpop.f32.mrb[154].mxu0  ;;  %v20248_v4 = vpack.c.bf16 %v8421_v30, %v8419_v39  ;;  %v14903_v30 = vcombine.high %v8846_v13, %v8850_v41  ;;  %v22036_v10 = vld [vmem:[#allocation67_spill] sm:$0xff] }
 0x757   : > { %v8166_v18 = vmul.f32 0.2, %v15301_v29  ;;  %v15305_v35 = vadd.f32 %v7759_v16, %v5741_v48  ;;  %v7761_v21 = vpop.f32.mrb[155].mxu0  ;;  %v5757_v45 = vadd.f32 %v22036_v10, %v1885_v31  ;;  %v1890_v48 = vpop.permute.xlu1 %1889 }
 0x758   : > { %v8167_v25 = vmul.f32 0.2, %v15303_v14  ;;  %v15307_v17 = vadd.f32 %v7761_v21, %v5743_v6  ;;  %v22037_v6 = vld [vmem:[#allocation68_spill] sm:$0xff]  ;;  %v5761_v62 = vadd.f32 %v22038_v33, %v1890_v48 }
 0x759   : > { %v8168_v56 = vmul.f32 0.2, %v15305_v35  ;;  %v8422_v9 = vmax.f32 %v15301_v29, %v8166_v18  ;;  %v5759_v18 = vadd.f32 %v22037_v6, %v1885_v31  ;;  %v22043_v31 = vld [vmem:[#allocation74_spill] sm:$0xff] }
 0x75a   : > { %v8169_v26 = vmul.f32 0.2, %v15307_v17  ;;  %v8423_v46 = vmax.f32 %v15303_v14, %v8167_v25 }
 0x75b   : > { %v8424_v7 = vmax.f32 %v15305_v35, %v8168_v56  ;;  %v22039_v56 = vld [vmem:[#allocation70_spill] sm:$0xff] }
 0x75c   : > { %v8425_v55 = vmax.f32 %v15307_v17, %v8169_v26  ;;  %v7765_v61 = vpop.f32.mrb[156].mxu0  ;;  %10827 = vmatmul.mubr.bf16.gmra.mrb[0].mxu1 %v14886_v47  ;;  %v8858_v26 = vld [vmem:[%s21806_s1 + $0x1660] sm:$0xff] }
 0x75d   : > { %v20252_v54 = vpack.c.bf16 %v8424_v7, %v8422_v9  ;;  %v15309_v58 = vadd.f32 %v7765_v61, %v5747_v51  ;;  %v7767_v57 = vpop.f32.mrb[157].mxu0  ;;  %10836 = vmatprep.mubr.bf16.mxu1 %v14895_v2  ;;  %v5763_v2 = vadd.f32 %v22039_v56, %v1890_v48  ;;  %v14911_v24 = vcombine.high %v8854_v28, %v8858_v26 }
 0x75e   : > { %v15311_v44 = vadd.f32 %v7767_v57, %v5749_v27  ;;  %v7769_v8 = vpop.f32.mrb[158].mxu0  ;;  %v20262_v40 = vpack.c.bf16 %v8425_v55, %v8423_v46  ;;  %v14902_v55 = vcombine.low %v8846_v13, %v8850_v41  ;;  %v1895_v27 = vpop.permute.xlu0 %1894  ;;  %v22042_v13 = vld [vmem:[#allocation73_spill] sm:$0xff]  ;;  %v14910_v6 = vcombine.low %v8854_v28, %v8858_v26 }
 0x75f   : > { %v8170_v36 = vmul.f32 0.2, %v15309_v58  ;;  %v15313_v0 = vadd.f32 %v7769_v8, %v5751_v50  ;;  %v7771_v32 = vpop.f32.mrb[159].mxu0  ;;  %v22040_v50 = vld [vmem:[#allocation71_spill] sm:$0xff]  ;;  %v1900_v8 = vpop.permute.xlu1 %1899  ;;  %v22046_v28 = vld [vmem:[#allocation77_spill] sm:$0xff] }
 0x760   : > { %v8171_v3 = vmul.f32 0.2, %v15311_v44  ;;  %v15315_v42 = vadd.f32 %v7771_v32, %v5753_v11  ;;  %v5771_v41 = vadd.f32 %v22042_v13, %v1900_v8 }
 0x761   : > { %v8172_v39 = vmul.f32 0.2, %v15313_v0  ;;  %v8426_v49 = vmax.f32 %v15309_v58, %v8170_v36 }
 0x762   : > { %v8173_v15 = vmul.f32 0.2, %v15315_v42  ;;  %v8427_v14 = vmax.f32 %v15311_v44, %v8171_v3  ;;  %v5767_v44 = vadd.f32 %v22040_v50, %v1895_v27  ;;  %v8870_v50 = vld [vmem:[%s21806_s1 + $0x16c0] sm:$0xff] }
 0x763   : > { %v8428_v29 = vmax.f32 %v15313_v0, %v8172_v39  ;;  %v22041_v0 = vld [vmem:[#allocation72_spill] sm:$0xff] }
 0x764   : > { %v8429_v16 = vmax.f32 %v15315_v42, %v8173_v15  ;;  %v7775_v20 = vpop.f32.mrb[160].mxu0  ;;  %10837 = vmatmul.mubr.bf16.gmra.mrb[4].mxu1 %v14894_v5  ;;  %v5769_v32 = vadd.f32 %v22041_v0, %v1895_v27  ;;  %v5773_v15 = vadd.f32 %v22043_v31, %v1900_v8 }
 0x765   : > { %v20266_v35 = vpack.c.bf16 %v8428_v29, %v8426_v49  ;;  %v15317_v21 = vadd.f32 %v7775_v20, %v5757_v45  ;;  %v7777_v25 = vpop.f32.mrb[161].mxu0  ;;  %10846 = vmatprep.mubr.bf16.mxu1 %v14903_v30  ;;  %v8862_v49 = vld [vmem:[%s21806_s1 + $0x1680] sm:$0xff] }
 0x766   : > { %v15319_v17 = vadd.f32 %v7777_v25, %v5759_v18  ;;  %v7779_v47 = vpop.f32.mrb[162].mxu0  ;;  %v20276_v9 = vpack.c.bf16 %v8429_v16, %v8427_v14  ;;  %v8866_v29 = vld [vmem:[%s21806_s1 + $0x16a0] sm:$0xff]  ;;  %v1905_v25 = vpop.permute.xlu0 %1904 }
 0x767   : > { %v8174_v7 = vmul.f32 0.2, %v15317_v21  ;;  %v15321_v22 = vadd.f32 %v7779_v47, %v5761_v62  ;;  %v7781_v51 = vpop.f32.mrb[163].mxu0  ;;  %v22044_v47 = vld [vmem:[#allocation75_spill] sm:$0xff] }
 0x768   : > { %v8175_v43 = vmul.f32 0.2, %v15319_v17  ;;  %v15323_v46 = vadd.f32 %v7781_v51, %v5763_v2  ;;  %v5777_v56 = vadd.f32 %v22044_v47, %v1905_v25  ;;  %v1910_v2 = vpop.permute.xlu1 %1909  ;;  %v22051_v47 = vld [vmem:[#allocation82_spill] sm:$0xff] }
 0x769   : > { %v8176_v61 = vmul.f32 0.2, %v15321_v22  ;;  %v8430_v57 = vmax.f32 %v15317_v21, %v8174_v7  ;;  %v14919_v21 = vcombine.high %v8862_v49, %v8866_v29  ;;  %v5781_v26 = vadd.f32 %v22046_v28, %v1910_v2 }
 0x76a   : > { %v8177_v58 = vmul.f32 0.2, %v15323_v46  ;;  %v8431_v53 = vmax.f32 %v15319_v17, %v8175_v43  ;;  %v22045_v43 = vld [vmem:[#allocation76_spill] sm:$0xff] }
 0x76b   : > { %v8432_v19 = vmax.f32 %v15321_v22, %v8176_v61 }
 0x76c   : > { %v8433_v11 = vmax.f32 %v15323_v46, %v8177_v58  ;;  %v7785_v36 = vpop.f32.mrb[164].mxu0  ;;  %10847 = vmatmul.mubr.bf16.gmra.mrb[8].mxu1 %v14902_v55  ;;  %v5779_v46 = vadd.f32 %v22045_v43, %v1905_v25 }
 0x76d   : > { %v20280_v3 = vpack.c.bf16 %v8432_v19, %v8430_v57  ;;  %v15325_v42 = vadd.f32 %v7785_v36, %v5767_v44  ;;  %v7787_v5 = vpop.f32.mrb[165].mxu0  ;;  %10856 = vmatprep.mubr.bf16.mxu1 %v14911_v24  ;;  %v22047_v57 = vld [vmem:[#allocation78_spill] sm:$0xff]  ;;  %v8874_v44 = vld [vmem:[%s21806_s1 + $0x16e0] sm:$0xff] }
 0x76e   : > { %v15327_v39 = vadd.f32 %v7787_v5, %v5769_v32  ;;  %v7789_v30 = vpop.f32.mrb[166].mxu0  ;;  %v20290_v10 = vpack.c.bf16 %v8433_v11, %v8431_v53  ;;  %v5783_v19 = vadd.f32 %v22047_v57, %v1910_v2  ;;  %v14927_v13 = vcombine.high %v8870_v50, %v8874_v44  ;;  %v8878_v2 = vld [vmem:[%s21806_s1 + $0x1700] sm:$0xff] }
 0x76f   : > { %v8178_v45 = vmul.f32 0.2, %v15325_v42  ;;  %v15329_v48 = vadd.f32 %v7789_v30, %v5771_v41  ;;  %v7791_v14 = vpop.f32.mrb[167].mxu0  ;;  %v1915_v41 = vpop.permute.xlu0 %1914  ;;  %v14926_v28 = vcombine.low %v8870_v50, %v8874_v44  ;;  %v22054_v50 = vld [vmem:[#allocation85_spill] sm:$0xff] }
 0x770   : > { %v8179_v16 = vmul.f32 0.2, %v15327_v39  ;;  %v15331_v20 = vadd.f32 %v7791_v14, %v5773_v15  ;;  %v22048_v15 = vld [vmem:[#allocation79_spill] sm:$0xff] }
 0x771   : > { %v8180_v18 = vmul.f32 0.2, %v15329_v48  ;;  %v8434_v62 = vmax.f32 %v15325_v42, %v8178_v45  ;;  %v14918_v42 = vcombine.low %v8862_v49, %v8866_v29  ;;  %v5787_v45 = vadd.f32 %v22048_v15, %v1915_v41  ;;  %v22050_v49 = vld [vmem:[#allocation81_spill] sm:$0xff] }
 0x772   : > { %v8181_v33 = vmul.f32 0.2, %v15331_v20  ;;  %v8435_v7 = vmax.f32 %v15327_v39, %v8179_v16 }
 0x773   : > { %v8436_v17 = vmax.f32 %v15329_v48, %v8180_v18  ;;  %v1920_v48 = vpop.permute.xlu1 %1919 }
 0x774   : > { %v8437_v22 = vmax.f32 %v15331_v20, %v8181_v33  ;;  %v7795_v51 = vpop.f32.mrb[168].mxu0  ;;  %10857 = vmatmul.mubr.bf16.gmra.mrb[12].mxu1 %v14910_v6  ;;  %v22049_v6 = vld [vmem:[#allocation80_spill] sm:$0xff]  ;;  %v5791_v29 = vadd.f32 %v22050_v49, %v1920_v48 }
 0x775   : > { %v20294_v55 = vpack.c.bf16 %v8436_v17, %v8434_v62  ;;  %v15333_v61 = vadd.f32 %v7795_v51, %v5777_v56  ;;  %v7797_v24 = vpop.f32.mrb[169].mxu0  ;;  %10866 = vmatprep.mubr.bf16.mxu1 %v14919_v21  ;;  %v5789_v18 = vadd.f32 %v22049_v6, %v1915_v41  ;;  %v5793_v56 = vadd.f32 %v22051_v47, %v1920_v48  ;;  %v22055_v48 = vld [vmem:[#allocation86_spill] sm:$0xff] }
 0x776   : > { %v15335_v27 = vadd.f32 %v7797_v24, %v5779_v46  ;;  %v7799_v58 = vpop.f32.mrb[170].mxu0  ;;  %v20304_v8 = vpack.c.bf16 %v8437_v22, %v8435_v7  ;;  %v8882_v7 = vld [vmem:[%s21806_s1 + $0x1720] sm:$0xff] }
 0x777   : > { %v8182_v53 = vmul.f32 0.2, %v15333_v61  ;;  %v15337_v11 = vadd.f32 %v7799_v58, %v5781_v26  ;;  %v7801_v36 = vpop.f32.mrb[171].mxu0  ;;  %v1925_v58 = vpop.permute.xlu0 %1924 }
 0x778   : > { %v8183_v0 = vmul.f32 0.2, %v15335_v27  ;;  %v15339_v32 = vadd.f32 %v7801_v36, %v5783_v19 }
 0x779   : > { %v8184_v5 = vmul.f32 0.2, %v15337_v11  ;;  %v8438_v30 = vmax.f32 %v15333_v61, %v8182_v53 }
 0x77a   : > { %v8185_v39 = vmul.f32 0.2, %v15339_v32  ;;  %v8439_v14 = vmax.f32 %v15335_v27, %v8183_v0  ;;  %v14935_v27 = vcombine.high %v8878_v2, %v8882_v7  ;;  %v1930_v0 = vpop.permute.xlu1 %1929 }
 0x77b   : > { %v8440_v31 = vmax.f32 %v15337_v11, %v8184_v5  ;;  %v22052_v11 = vld [vmem:[#allocation83_spill] sm:$0xff]  ;;  %v5801_v44 = vadd.f32 %v22054_v50, %v1930_v0 }
 0x77c   : > { %v8441_v16 = vmax.f32 %v15339_v32, %v8185_v39  ;;  %v7805_v20 = vpop.f32.mrb[172].mxu0  ;;  %10867 = vmatmul.mubr.bf16.gmra.mrb[16].mxu1 %v14918_v42  ;;  %v5797_v36 = vadd.f32 %v22052_v11, %v1925_v58 }
 0x77d   : > { %v20308_v21 = vpack.c.bf16 %v8440_v31, %v8438_v30  ;;  %v15341_v25 = vadd.f32 %v7805_v20, %v5787_v45  ;;  %v7807_v33 = vpop.f32.mrb[173].mxu0  ;;  %10876 = vmatprep.mubr.bf16.mxu1 %v14927_v13  ;;  %v22053_v13 = vld [vmem:[#allocation84_spill] sm:$0xff]  ;;  %v8890_v20 = vld [vmem:[%s21806_s1 + $0x1760] sm:$0xff] }
 0x77e   : > { %v15343_v62 = vadd.f32 %v7807_v33, %v5789_v18  ;;  %v7809_v17 = vpop.f32.mrb[174].mxu0  ;;  %v20318_v22 = vpack.c.bf16 %v8441_v16, %v8439_v14  ;;  %v5799_v41 = vadd.f32 %v22053_v13, %v1925_v58  ;;  %v5803_v14 = vadd.f32 %v22055_v48, %v1930_v0  ;;  %v8886_v16 = vld [vmem:[%s21806_s1 + $0x1740] sm:$0xff] }
 0x77f   : > { %v8186_v51 = vmul.f32 0.2, %v15341_v25  ;;  %v15345_v43 = vadd.f32 %v7809_v17, %v5791_v29  ;;  %v7811_v46 = vpop.f32.mrb[175].mxu0  ;;  %v14943_v47 = vcombine.high %v8886_v16, %v8890_v20  ;;  %v8894_v13 = vld [vmem:[%s21806_s1 + $0x1780] sm:$0xff]  ;;  %v14942_v48 = vcombine.low %v8886_v16, %v8890_v20  ;;  %v22062_v16 = vld [vmem:[#allocation93_spill] sm:$0xff] }
 0x780   : > { %v8187_v61 = vmul.f32 0.2, %v15343_v62  ;;  %v15347_v24 = vadd.f32 %v7811_v46, %v5793_v56  ;;  %v1935_v56 = vpop.permute.xlu0 %1934 }
 0x781   : > { %v8188_v26 = vmul.f32 0.2, %v15345_v43  ;;  %v8442_v19 = vmax.f32 %v15341_v25, %v8186_v51 }
 0x782   : > { %v8189_v57 = vmul.f32 0.2, %v15347_v24  ;;  %v8443_v32 = vmax.f32 %v15343_v62, %v8187_v61  ;;  %v14934_v62 = vcombine.low %v8878_v2, %v8882_v7  ;;  %v22056_v61 = vld [vmem:[#allocation87_spill] sm:$0xff]  ;;  %v22058_v2 = vld [vmem:[#allocation89_spill] sm:$0xff] }
 0x783   : > { %v8444_v53 = vmax.f32 %v15345_v43, %v8188_v26 }
 0x784   : > { %v8445_v42 = vmax.f32 %v15347_v24, %v8189_v57  ;;  %v7815_v5 = vpop.f32.mrb[176].mxu0  ;;  %10877 = vmatmul.mubr.bf16.gmra.mrb[20].mxu1 %v14926_v28  ;;  %v5807_v24 = vadd.f32 %v22056_v61, %v1935_v56  ;;  %v1940_v28 = vpop.permute.xlu1 %1939  ;;  %v22057_v57 = vld [vmem:[#allocation88_spill] sm:$0xff] }
 0x785   : > { %v20322_v39 = vpack.c.bf16 %v8444_v53, %v8442_v19  ;;  %v15349_v30 = vadd.f32 %v7815_v5, %v5797_v36  ;;  %v7817_v31 = vpop.f32.mrb[177].mxu0  ;;  %10886 = vmatprep.mubr.bf16.mxu1 %v14935_v27  ;;  %v5809_v19 = vadd.f32 %v22057_v57, %v1935_v56  ;;  %v5811_v7 = vadd.f32 %v22058_v2, %v1940_v28  ;;  %v22063_v57 = vld [vmem:[#allocation94_spill] sm:$0xff] }
 0x786   : > { %v15351_v15 = vadd.f32 %v7817_v31, %v5799_v41  ;;  %v7819_v45 = vpop.f32.mrb[178].mxu0  ;;  %v20332_v6 = vpack.c.bf16 %v8445_v42, %v8443_v32  ;;  %v22059_v42 = vld [vmem:[#allocation90_spill] sm:$0xff]  ;;  %v8898_v41 = vld [vmem:[%s21806_s1 + $0x17a0] sm:$0xff] }
 0x787   : > { %v8190_v18 = vmul.f32 0.2, %v15349_v30  ;;  %v15353_v25 = vadd.f32 %v7819_v45, %v5801_v44  ;;  %v7821_v33 = vpop.f32.mrb[179].mxu0  ;;  %v5813_v5 = vadd.f32 %v22059_v42, %v1940_v28 }
 0x788   : > { %v8191_v49 = vmul.f32 0.2, %v15351_v15  ;;  %v15355_v29 = vadd.f32 %v7821_v33, %v5803_v14 }
 0x789   : > { %v8192_v17 = vmul.f32 0.2, %v15353_v25  ;;  %v8446_v43 = vmax.f32 %v15349_v30, %v8190_v18  ;;  %v14951_v18 = vcombine.high %v8894_v13, %v8898_v41 }
 0x78a   : > { %v8193_v51 = vmul.f32 0.2, %v15355_v29  ;;  %v8447_v26 = vmax.f32 %v15351_v15, %v8191_v49 }
 0x78b   : > { %v8448_v46 = vmax.f32 %v15353_v25, %v8192_v17  ;;  %v1945_v25 = vpop.permute.xlu0 %1944 }
 0x78c   : > { %v8449_v27 = vmax.f32 %v15355_v29, %v8193_v51  ;;  %v7825_v58 = vpop.f32.mrb[180].mxu0  ;;  %10887 = vmatmul.mubr.bf16.gmra.mrb[24].mxu1 %v14934_v62  ;;  %v22060_v62 = vld [vmem:[#allocation91_spill] sm:$0xff] }
 0x78d   : > { %v20336_v53 = vpack.c.bf16 %v8448_v46, %v8446_v43  ;;  %v15357_v11 = vadd.f32 %v7825_v58, %v5807_v24  ;;  %v7827_v36 = vpop.f32.mrb[181].mxu0  ;;  %10896 = vmatprep.mubr.bf16.mxu1 %v14943_v47  ;;  %v5817_v17 = vadd.f32 %v22060_v62, %v1945_v25  ;;  %v1950_v47 = vpop.permute.xlu1 %1949  ;;  %v22061_v46 = vld [vmem:[#allocation92_spill] sm:$0xff] }
 0x78e   : > { %v15359_v0 = vadd.f32 %v7827_v36, %v5809_v19  ;;  %v7829_v32 = vpop.f32.mrb[182].mxu0  ;;  %v20346_v30 = vpack.c.bf16 %v8449_v27, %v8447_v26  ;;  %v5819_v61 = vadd.f32 %v22061_v46, %v1945_v25  ;;  %v5821_v20 = vadd.f32 %v22062_v16, %v1950_v47  ;;  %v8906_v36 = vld [vmem:[%s21806_s1 + $0x17e0] sm:$0xff]  ;;  %v8655_v16 = vld [vmem:[%s21806_s1 + $0x1008] sm:$0xff] }
 0x78f   : > { %v8194_v31 = vmul.f32 0.2, %v15357_v11  ;;  %v15361_v50 = vadd.f32 %v7829_v32, %v5811_v7  ;;  %v7831_v44 = vpop.f32.mrb[183].mxu0  ;;  %v5823_v19 = vadd.f32 %v22063_v57, %v1950_v47 }
 0x790   : > { %v8195_v15 = vmul.f32 0.2, %v15359_v0  ;;  %v15363_v45 = vadd.f32 %v7831_v44, %v5813_v5 }
 0x791   : > { %v8196_v14 = vmul.f32 0.2, %v15361_v50  ;;  %v8450_v49 = vmax.f32 %v15357_v11, %v8194_v31  ;;  %v8902_v11 = vld [vmem:[%s21806_s1 + $0x17c0] sm:$0xff]  ;;  %v14950_v31 = vcombine.low %v8894_v13, %v8898_v41  ;;  %v22066_v13 = vld [vmem:[#allocation97_spill] sm:$0xff] }
 0x792   : > { %v8197_v33 = vmul.f32 0.2, %v15363_v45  ;;  %v8451_v56 = vmax.f32 %v15359_v0, %v8195_v15  ;;  %v14959_v44 = vcombine.high %v8902_v11, %v8906_v36  ;;  %v1955_v15 = vpop.permute.xlu0 %1954 }
 0x793   : > { %v8452_v29 = vmax.f32 %v15361_v50, %v8196_v14 }
 0x794   : > { %v8453_v51 = vmax.f32 %v15363_v45, %v8197_v33  ;;  %v7835_v43 = vpop.f32.mrb[184].mxu0  ;;  %10897 = vmatmul.mubr.bf16.gmra.mrb[28].mxu1 %v14942_v48  ;;  %v1960_v33 = vpop.permute.xlu1 %1959 }
 0x795   : > { %v20350_v24 = vpack.c.bf16 %v8452_v29, %v8450_v49  ;;  %v15365_v28 = vadd.f32 %v7835_v43, %v5817_v17  ;;  %v7837_v26 = vpop.f32.mrb[185].mxu0  ;;  %10906 = vmatprep.mubr.bf16.mxu1 %v14951_v18  ;;  %v22064_v18 = vld [vmem:[#allocation95_spill] sm:$0xff]  ;;  %v22065_v17 = vld [vmem:[#allocation96_spill] sm:$0xff]  ;;  %v5831_v41 = vadd.f32 %v22066_v13, %v1960_v33 }
 0x796   : > { %v15367_v27 = vadd.f32 %v7837_v26, %v5819_v61  ;;  %v7839_v58 = vpop.f32.mrb[186].mxu0  ;;  %v20360_v2 = vpack.c.bf16 %v8453_v51, %v8451_v56  ;;  %v5827_v25 = vadd.f32 %v22064_v18, %v1955_v15  ;;  %v5829_v47 = vadd.f32 %v22065_v17, %v1955_v15 }
 0x797   : > { %v8198_v7 = vmul.f32 0.2, %v15365_v28  ;;  %v15369_v0 = vadd.f32 %v7839_v58, %v5821_v20  ;;  %v7841_v32 = vpop.f32.mrb[187].mxu0  ;;  %v8659_v20 = vld [vmem:[%s21806_s1 + $0x1028] sm:$0xff] }
 0x798   : > { %v8199_v42 = vmul.f32 0.2, %v15367_v27  ;;  %v15371_v5 = vadd.f32 %v7841_v32, %v5823_v19  ;;  %v14958_v32 = vcombine.low %v8902_v11, %v8906_v36  ;;  %v22070_v11 = vld [vmem:[#allocation101_spill] sm:$0xff] }
 0x799   : > { %v8200_v50 = vmul.f32 0.2, %v15369_v0  ;;  %v8454_v48 = vmax.f32 %v15365_v28, %v8198_v7  ;;  %v22067_v28 = vld [vmem:[#allocation98_spill] sm:$0xff] }
 0x79a   : > { %v8201_v45 = vmul.f32 0.2, %v15371_v5  ;;  %v8455_v49 = vmax.f32 %v15367_v27, %v8199_v42  ;;  %v5833_v26 = vadd.f32 %v22067_v28, %v1960_v33 }
 0x79b   : > { %v8456_v14 = vmax.f32 %v15369_v0, %v8200_v50 }
 0x79c   : > { %v8457_v29 = vmax.f32 %v15371_v5, %v8201_v45  ;;  %v7845_v62 = vpop.f32.mrb[188].mxu0  ;;  %10907 = vmatmul.mubr.bf16.gmra.mrb[32].mxu1 %v14950_v31  ;;  %v14713_v5 = vcombine.high %v8655_v16, %v8659_v20  ;;  %v1965_v31 = vpop.permute.xlu0 %1964  ;;  %v22068_v45 = vld [vmem:[#allocation99_spill] sm:$0xff] }
 0x79d   : > { %v20364_v56 = vpack.c.bf16 %v8456_v14, %v8454_v48  ;;  %v15373_v51 = vadd.f32 %v7845_v62, %v5827_v25  ;;  %v7847_v43 = vpop.f32.mrb[189].mxu0  ;;  %10916 = vmatprep.mubr.bf16.mxu1 %v14959_v44  ;;  %v5837_v48 = vadd.f32 %v22068_v45, %v1965_v31  ;;  %v1970_v14 = vpop.permute.xlu1 %1969 }
 0x79e   : > { %v15375_v46 = vadd.f32 %v7847_v43, %v5829_v47  ;;  %v7849_v61 = vpop.f32.mrb[190].mxu0  ;;  %v20374_v27 = vpack.c.bf16 %v8457_v29, %v8455_v49  ;;  %v22069_v49 = vld [vmem:[#allocation100_spill] sm:$0xff]  ;;  %v5841_v36 = vadd.f32 %v22070_v11, %v1970_v14 }
 0x79f   : > { %v8202_v58 = vmul.f32 0.2, %v15373_v51  ;;  %v15377_v57 = vadd.f32 %v7849_v61, %v5831_v41  ;;  %v7851_v19 = vpop.f32.mrb[191].mxu0  ;;  %v5839_v29 = vadd.f32 %v22069_v49, %v1965_v31  ;;  %v8667_v61 = vld [vmem:[%s21806_s1 + $0x1068] sm:$0xff] }
 0x7a0   : > { %v8203_v7 = vmul.f32 0.2, %v15375_v46  ;;  %v15379_v0 = vadd.f32 %v7851_v19, %v5833_v26 }
 0x7a1   : > { %v8204_v42 = vmul.f32 0.2, %v15377_v57  ;;  %v8458_v44 = vmax.f32 %v15373_v51, %v8202_v58  ;;  %v22071_v51 = vld [vmem:[#allocation102_spill] sm:$0xff] }
 0x7a2   : > { %v8205_v50 = vmul.f32 0.2, %v15379_v0  ;;  %v8459_v18 = vmax.f32 %v15375_v46, %v8203_v7  ;;  %v5843_v41 = vadd.f32 %v22071_v51, %v1970_v14  ;;  %v8663_v46 = vld [vmem:[%s21806_s1 + $0x1048] sm:$0xff] }
 0x7a3   : > { %v8460_v15 = vmax.f32 %v15377_v57, %v8204_v42  ;;  %v14721_v42 = vcombine.high %v8663_v46, %v8667_v61  ;;  %v8671_v51 = vld [vmem:[%s21806_s1 + $0x1088] sm:$0xff] }
 0x7a4   : > { %v8461_v25 = vmax.f32 %v15379_v0, %v8205_v50  ;;  %v7855_v33 = vpop.f32.mrb[192].mxu0  ;;  %10917 = vmatmul.mubr.bf16.gmra.mrb[36].mxu1 %v14958_v32  ;;  %v14712_v0 = vcombine.low %v8655_v16, %v8659_v20  ;;  %v22074_v20 = vld [vmem:[#allocation105_spill] sm:$0xff] }
 0x7a5   : > { %v20378_v62 = vpack.c.bf16 %v8460_v15, %v8458_v44  ;;  %v15381_v17 = vadd.f32 %v7855_v33, %v5837_v48  ;;  %v7857_v47 = vpop.f32.mrb[193].mxu0  ;;  %10959 = vmatprep.mubr.bf16.mxu1 %v14713_v5  ;;  %v1975_v5 = vpop.permute.xlu0 %1974  ;;  %v22072_v15 = vld [vmem:[#allocation103_spill] sm:$0xff] }
 0x7a6   : > { %v15383_v43 = vadd.f32 %v7857_v47, %v5839_v29  ;;  %v7859_v13 = vpop.f32.mrb[194].mxu0  ;;  %v20388_v28 = vpack.c.bf16 %v8461_v25, %v8459_v18  ;;  %v5847_v45 = vadd.f32 %v22072_v15, %v1975_v5  ;;  %v1980_v48 = vpop.permute.xlu1 %1979  ;;  %v22073_v18 = vld [vmem:[#allocation104_spill] sm:$0xff] }
 0x7a7   : > { %v8206_v26 = vmul.f32 0.2, %v15381_v17  ;;  %v15385_v58 = vadd.f32 %v7859_v13, %v5841_v36  ;;  %v7861_v57 = vpop.f32.mrb[195].mxu0  ;;  %v5849_v25 = vadd.f32 %v22073_v18, %v1975_v5  ;;  %v5851_v11 = vadd.f32 %v22074_v20, %v1980_v48  ;;  %v22075_v13 = vld [vmem:[#allocation106_spill] sm:$0xff] }
 0x7a8   : > { %v8207_v19 = vmul.f32 0.2, %v15383_v43  ;;  %v15387_v7 = vadd.f32 %v7861_v57, %v5843_v41  ;;  %v8675_v41 = vld [vmem:[%s21806_s1 + $0x10a8] sm:$0xff]  ;;  %v22079_v20 = vld [vmem:[#allocation110_spill] sm:$0xff] }
 0x7a9   : > { %v8208_v32 = vmul.f32 0.2, %v15385_v58  ;;  %v8462_v50 = vmax.f32 %v15381_v17, %v8206_v26 }
 0x7aa   : > { %v8209_v31 = vmul.f32 0.2, %v15387_v7  ;;  %v8463_v14 = vmax.f32 %v15383_v43, %v8207_v19  ;;  %v5853_v43 = vadd.f32 %v22075_v13, %v1980_v48 }
 0x7ab   : > { %v8464_v44 = vmax.f32 %v15385_v58, %v8208_v32  ;;  %v14729_v32 = vcombine.high %v8671_v51, %v8675_v41 }
 0x7ac   : > { %v8465_v33 = vmax.f32 %v15387_v7, %v8209_v31  ;;  %v7865_v49 = vpop.f32.mrb[196].mxu0  ;;  %10960 = vmatmul.mubr.bf16.vlgmr.msra.gmra.mrb[168].mxu1 %v14712_v0  ;;  %v14720_v0 = vcombine.low %v8663_v46, %v8667_v61 }
 0x7ad   : > { %v20392_v29 = vpack.c.bf16 %v8464_v44, %v8462_v50  ;;  %v15389_v47 = vadd.f32 %v7865_v49, %v5847_v45  ;;  %11281 = vmatpush1.bf16.msra.mxu1 %v20144_v1  ;;  %v7867_v16 = vpop.f32.mrb[197].mxu0  ;;  %10969 = vmatprep.mubr.bf16.mxu1 %v14721_v42  ;;  %v1985_v42 = vpop.permute.xlu0 %1984  ;;  %v22076_v44 = vld [vmem:[#allocation107_spill] sm:$0xff]  ;;  %v22077_v49 = vld [vmem:[#allocation108_spill] sm:$0xff] }
 0x7ae   : > { %v15391_v17 = vadd.f32 %v7867_v16, %v5849_v25  ;;  %11282 = vmatprep.subr.bf16.mxu1 %v20184_v60  ;;  %v7869_v36 = vpop.f32.mrb[198].mxu0  ;;  %v20404_v26 = vpack.c.bf16 %v8465_v33, %v8463_v14  ;;  %v5857_v15 = vadd.f32 %v22076_v44, %v1985_v42  ;;  %v1990_v45 = vpop.permute.xlu1 %1989  ;;  %v5859_v18 = vadd.f32 %v22077_v49, %v1985_v42  ;;  %v22078_v25 = vld [vmem:[#allocation109_spill] sm:$0xff] }
 0x7af   : > { %v8210_v1 = vmul.f32 0.2, %v15389_v47  ;;  %v15393_v58 = vadd.f32 %v7869_v36, %v5851_v11  ;;  %v7871_v57 = vpop.f32.mrb[199].mxu0  ;;  %v5861_v16 = vadd.f32 %v22078_v25, %v1990_v45  ;;  %v5863_v11 = vadd.f32 %v22079_v20, %v1990_v45  ;;  %v8683_v36 = vld [vmem:[%s21806_s1 + $0x10e8] sm:$0xff] }
 0x7b0   : > { %v8211_v19 = vmul.f32 0.2, %v15391_v17  ;;  %v15395_v7 = vadd.f32 %v7871_v57, %v5853_v43  ;;  %v8687_v25 = vld [vmem:[%s21806_s1 + $0x1108] sm:$0xff] }
 0x7b1   : > { %v8212_v60 = vmul.f32 0.2, %v15393_v58  ;;  %11283 = vmatpush1.bf16.msra.mxu1 %v20170_v38  ;;  %v8466_v31 = vmax.f32 %v15389_v47, %v8210_v1 }
 0x7b2   : > { %v8213_v5 = vmul.f32 0.2, %v15395_v7  ;;  %11284 = vmatprep.subr.bf16.mxu1 %v20206_v37  ;;  %v8467_v48 = vmax.f32 %v15391_v17, %v8211_v19  ;;  %v8679_v17 = vld [vmem:[%s21806_s1 + $0x10c8] sm:$0xff]  ;;  %v14728_v19 = vcombine.low %v8671_v51, %v8675_v41 }
 0x7b3   : > { %v8468_v50 = vmax.f32 %v15393_v58, %v8212_v60 }
 0x7b4   : > { %v8469_v14 = vmax.f32 %v15395_v7, %v8213_v5  ;;  %v7875_v33 = vpop.f32.mrb[200].mxu0  ;;  %10970 = vmatmul.mubr.bf16.gmra.mrb[172].mxu1 %v14720_v0  ;;  %v14737_v7 = vcombine.high %v8679_v17, %v8683_v36  ;;  %v1995_v0 = vpop.permute.xlu0 %1994  ;;  %v22080_v5 = vld [vmem:[#allocation111_spill] sm:$0xff] }
 0x7b5   : > { %v20410_v46 = vpack.c.bf16 %v8468_v50, %v8466_v31  ;;  %v15397_v61 = vadd.f32 %v7875_v33, %v5857_v15  ;;  %11285 = vmatpush1.bf16.msra.mxu1 %v20194_v63  ;;  %v7877_v38 = vpop.f32.mrb[201].mxu0  ;;  %10979 = vmatprep.mubr.bf16.mxu1 %v14729_v32  ;;  %v5867_v31 = vadd.f32 %v22080_v5, %v1995_v0  ;;  %v2000_v50 = vpop.permute.xlu1 %1999  ;;  %v22082_v33 = vld [vmem:[#allocation113_spill] sm:$0xff] }
 0x7b6   : > { %v15399_v37 = vadd.f32 %v7877_v38, %v5859_v18  ;;  %11286 = vmatprep.subr.bf16.mxu1 %v20220_v12  ;;  %v7879_v47 = vpop.f32.mrb[202].mxu0  ;;  %v20422_v13 = vpack.c.bf16 %v8469_v14, %v8467_v48  ;;  %v22081_v48 = vld [vmem:[#allocation112_spill] sm:$0xff]  ;;  %v5871_v49 = vadd.f32 %v22082_v33, %v2000_v50 }
 0x7b7   : > { %v8214_v63 = vmul.f32 0.2, %v15397_v61  ;;  %v15401_v43 = vadd.f32 %v7879_v47, %v5861_v16  ;;  %v7881_v1 = vpop.f32.mrb[203].mxu0  ;;  %v5869_v14 = vadd.f32 %v22081_v48, %v1995_v0  ;;  %v8691_v16 = vld [vmem:[%s21806_s1 + $0x1128] sm:$0xff]  ;;  %v22087_v48 = vld [vmem:[#allocation118_spill] sm:$0xff] }
 0x7b8   : > { %v8215_v58 = vmul.f32 0.2, %v15399_v37  ;;  %v15403_v57 = vadd.f32 %v7881_v1, %v5863_v11  ;;  %v14745_v1 = vcombine.high %v8687_v25, %v8691_v16 }
 0x7b9   : > { %v8216_v12 = vmul.f32 0.2, %v15401_v43  ;;  %11287 = vmatpush1.bf16.msra.mxu1 %v20210_v52  ;;  %v8470_v32 = vmax.f32 %v15397_v61, %v8214_v63  ;;  %v22083_v61 = vld [vmem:[#allocation114_spill] sm:$0xff] }
 0x7ba   : > { %v8217_v60 = vmul.f32 0.2, %v15403_v57  ;;  %11288 = vmatprep.subr.bf16.mxu1 %v20234_v34  ;;  %v8471_v44 = vmax.f32 %v15399_v37, %v8215_v58  ;;  %v5873_v38 = vadd.f32 %v22083_v61, %v2000_v50  ;;  %v2005_v58 = vpop.permute.xlu0 %2004 }
 0x7bb   : > { %v8472_v42 = vmax.f32 %v15401_v43, %v8216_v12  ;;  %v14736_v43 = vcombine.low %v8679_v17, %v8683_v36 }
 0x7bc   : > { %v8473_v15 = vmax.f32 %v15403_v57, %v8217_v60  ;;  %v7885_v45 = vpop.f32.mrb[204].mxu0  ;;  %10980 = vmatmul.mubr.bf16.gmra.mrb[176].mxu1 %v14728_v19  ;;  %v2010_v60 = vpop.permute.xlu1 %2009 }
 0x7bd   : > { %v20428_v51 = vpack.c.bf16 %v8472_v42, %v8470_v32  ;;  %v15405_v41 = vadd.f32 %v7885_v45, %v5867_v31  ;;  %11289 = vmatpush1.bf16.msra.mxu1 %v20224_v59  ;;  %v7887_v52 = vpop.f32.mrb[205].mxu0  ;;  %10989 = vmatprep.mubr.bf16.mxu1 %v14737_v7  ;;  %v22084_v7 = vld [vmem:[#allocation115_spill] sm:$0xff]  ;;  %v22085_v31 = vld [vmem:[#allocation116_spill] sm:$0xff] }
 0x7be   : > { %v15407_v34 = vadd.f32 %v7887_v52, %v5869_v14  ;;  %11290 = vmatprep.subr.bf16.mxu1 %v20248_v4  ;;  %v7889_v18 = vpop.f32.mrb[206].mxu0  ;;  %v20440_v37 = vpack.c.bf16 %v8473_v15, %v8471_v44  ;;  %v5877_v0 = vadd.f32 %v22084_v7, %v2005_v58  ;;  %v5879_v50 = vadd.f32 %v22085_v31, %v2005_v58  ;;  %v22086_v44 = vld [vmem:[#allocation117_spill] sm:$0xff]  ;;  %v8699_v52 = vld [vmem:[%s21806_s1 + $0x1168] sm:$0xff] }
 0x7bf   : > { %v8218_v59 = vmul.f32 0.2, %v15405_v41  ;;  %v15409_v47 = vadd.f32 %v7889_v18, %v5871_v49  ;;  %v7891_v20 = vpop.f32.mrb[207].mxu0  ;;  %v5881_v15 = vadd.f32 %v22086_v44, %v2010_v60  ;;  %v5883_v14 = vadd.f32 %v22087_v48, %v2010_v60  ;;  %v8703_v31 = vld [vmem:[%s21806_s1 + $0x1188] sm:$0xff] }
 0x7c0   : > { %v8219_v11 = vmul.f32 0.2, %v15407_v34  ;;  %v15411_v63 = vadd.f32 %v7891_v20, %v5873_v38  ;;  %v14744_v38 = vcombine.low %v8687_v25, %v8691_v16 }
 0x7c1   : > { %v8220_v4 = vmul.f32 0.2, %v15409_v47  ;;  %11291 = vmatpush1.bf16.msra.mxu1 %v20238_v23  ;;  %v8474_v19 = vmax.f32 %v15405_v41, %v8218_v59  ;;  %v8695_v41 = vld [vmem:[%s21806_s1 + $0x1148] sm:$0xff] }
 0x7c2   : > { %v8221_v57 = vmul.f32 0.2, %v15411_v63  ;;  %11292 = vmatprep.subr.bf16.mxu1 %v20262_v40  ;;  %v8475_v32 = vmax.f32 %v15407_v34, %v8219_v11  ;;  %v14753_v59 = vcombine.high %v8695_v41, %v8699_v52 }
 0x7c3   : > { %v8476_v12 = vmax.f32 %v15409_v47, %v8220_v4  ;;  %v2015_v47 = vpop.permute.xlu0 %2014 }
 0x7c4   : > { %v8477_v42 = vmax.f32 %v15411_v63, %v8221_v57  ;;  %v7895_v5 = vpop.f32.mrb[208].mxu0  ;;  %10990 = vmatmul.mubr.bf16.gmra.mrb[180].mxu1 %v14736_v43  ;;  %v22088_v43 = vld [vmem:[#allocation119_spill] sm:$0xff] }
 0x7c5   : > { %v20446_v17 = vpack.c.bf16 %v8476_v12, %v8474_v19  ;;  %v15413_v36 = vadd.f32 %v7895_v5, %v5877_v0  ;;  %11293 = vmatpush1.bf16.msra.mxu1 %v20252_v54  ;;  %v7897_v23 = vpop.f32.mrb[209].mxu0  ;;  %10999 = vmatprep.mubr.bf16.mxu1 %v14745_v1  ;;  %v5887_v4 = vadd.f32 %v22088_v43, %v2015_v47  ;;  %v2020_v1 = vpop.permute.xlu1 %2019  ;;  %v22089_v12 = vld [vmem:[#allocation120_spill] sm:$0xff]  ;;  %v22090_v0 = vld [vmem:[#allocation121_spill] sm:$0xff] }
 0x7c6   : > { %v15415_v40 = vadd.f32 %v7897_v23, %v5879_v50  ;;  %11294 = vmatprep.subr.bf16.mxu1 %v20276_v9  ;;  %v7899_v45 = vpop.f32.mrb[210].mxu0  ;;  %v20458_v33 = vpack.c.bf16 %v8477_v42, %v8475_v32  ;;  %v5889_v7 = vadd.f32 %v22089_v12, %v2015_v47  ;;  %v5891_v60 = vadd.f32 %v22090_v0, %v2020_v1  ;;  %v22091_v42 = vld [vmem:[#allocation122_spill] sm:$0xff]  ;;  %v8707_v50 = vld [vmem:[%s21806_s1 + $0x11a8] sm:$0xff] }
 0x7c7   : > { %v8222_v54 = vmul.f32 0.2, %v15413_v36  ;;  %v15417_v49 = vadd.f32 %v7899_v45, %v5881_v15  ;;  %v7901_v34 = vpop.f32.mrb[211].mxu0  ;;  %v5893_v5 = vadd.f32 %v22091_v42, %v2020_v1  ;;  %v14752_v45 = vcombine.low %v8695_v41, %v8699_v52  ;;  %v22095_v1 = vld [vmem:[#allocation126_spill] sm:$0xff] }
 0x7c8   : > { %v8223_v18 = vmul.f32 0.2, %v15415_v40  ;;  %v15419_v61 = vadd.f32 %v7901_v34, %v5883_v14  ;;  %v14761_v48 = vcombine.high %v8703_v31, %v8707_v50  ;;  %v2025_v14 = vpop.permute.xlu0 %2024 }
 0x7c9   : > { %v8224_v9 = vmul.f32 0.2, %v15417_v49  ;;  %11295 = vmatpush1.bf16.msra.mxu1 %v20266_v35  ;;  %v8478_v11 = vmax.f32 %v15413_v36, %v8222_v54 }
 0x7ca   : > { %v8225_v20 = vmul.f32 0.2, %v15419_v61  ;;  %11296 = vmatprep.subr.bf16.mxu1 %v20290_v10  ;;  %v8479_v58 = vmax.f32 %v15415_v40, %v8223_v18  ;;  %v22092_v18 = vld [vmem:[#allocation123_spill] sm:$0xff] }
 0x7cb   : > { %v8480_v63 = vmax.f32 %v15417_v49, %v8224_v9 }
 0x7cc   : > { %v8481_v57 = vmax.f32 %v15419_v61, %v8225_v20  ;;  %v7905_v19 = vpop.f32.mrb[212].mxu0  ;;  %11000 = vmatmul.mubr.bf16.gmra.mrb[184].mxu1 %v14744_v38  ;;  %v5897_v61 = vadd.f32 %v22092_v18, %v2025_v14  ;;  %v2030_v38 = vpop.permute.xlu1 %2029  ;;  %v22093_v20 = vld [vmem:[#allocation124_spill] sm:$0xff]  ;;  %v22099_v18 = vld [vmem:[#allocation130_spill] sm:$0xff] }
 0x7cd   : > { %v20464_v25 = vpack.c.bf16 %v8480_v63, %v8478_v11  ;;  %v15421_v16 = vadd.f32 %v7905_v19, %v5887_v4  ;;  %11297 = vmatpush1.bf16.msra.mxu1 %v20280_v3  ;;  %v7907_v35 = vpop.f32.mrb[213].mxu0  ;;  %11009 = vmatprep.mubr.bf16.mxu1 %v14753_v59  ;;  %v5899_v11 = vadd.f32 %v22093_v20, %v2025_v14  ;;  %v22094_v63 = vld [vmem:[#allocation125_spill] sm:$0xff]  ;;  %v8715_v19 = vld [vmem:[%s21806_s1 + $0x11e8] sm:$0xff] }
 0x7ce   : > { %v15423_v10 = vadd.f32 %v7907_v35, %v5889_v7  ;;  %11298 = vmatprep.subr.bf16.mxu1 %v20304_v8  ;;  %v7909_v32 = vpop.f32.mrb[214].mxu0  ;;  %v20476_v36 = vpack.c.bf16 %v8481_v57, %v8479_v58  ;;  %v5901_v43 = vadd.f32 %v22094_v63, %v2030_v38  ;;  %v5903_v58 = vadd.f32 %v22095_v1, %v2030_v38  ;;  %v8711_v57 = vld [vmem:[%s21806_s1 + $0x11c8] sm:$0xff] }
 0x7cf   : > { %v8226_v3 = vmul.f32 0.2, %v15421_v16  ;;  %v15425_v23 = vadd.f32 %v7909_v32, %v5891_v60  ;;  %v7911_v44 = vpop.f32.mrb[215].mxu0  ;;  %v14760_v60 = vcombine.low %v8703_v31, %v8707_v50  ;;  %v2035_v32 = vpop.permute.xlu0 %2034  ;;  %v8719_v38 = vld [vmem:[%s21806_s1 + $0x1208] sm:$0xff] }
 0x7d0   : > { %v8227_v15 = vmul.f32 0.2, %v15423_v10  ;;  %v15427_v40 = vadd.f32 %v7911_v44, %v5893_v5 }
 0x7d1   : > { %v8228_v8 = vmul.f32 0.2, %v15425_v23  ;;  %11299 = vmatpush1.bf16.msra.mxu1 %v20294_v55  ;;  %v8482_v49 = vmax.f32 %v15421_v16, %v8226_v3 }
 0x7d2   : > { %v8229_v54 = vmul.f32 0.2, %v15427_v40  ;;  %11300 = vmatprep.subr.bf16.mxu1 %v20318_v22  ;;  %v8483_v9 = vmax.f32 %v15423_v10, %v8227_v15  ;;  %v14769_v10 = vcombine.high %v8711_v57, %v8715_v19  ;;  %v2040_v15 = vpop.permute.xlu1 %2039 }
 0x7d3   : > { %v8484_v34 = vmax.f32 %v15425_v23, %v8228_v8  ;;  %v22096_v23 = vld [vmem:[#allocation127_spill] sm:$0xff] }
 0x7d4   : > { %v8485_v59 = vmax.f32 %v15427_v40, %v8229_v54  ;;  %v7915_v47 = vpop.f32.mrb[216].mxu0  ;;  %11010 = vmatmul.mubr.bf16.gmra.mrb[188].mxu1 %v14752_v45  ;;  %v5907_v44 = vadd.f32 %v22096_v23, %v2035_v32  ;;  %v22098_v54 = vld [vmem:[#allocation129_spill] sm:$0xff]  ;;  %v8727_v23 = vld [vmem:[%s21806_s1 + $0x1248] sm:$0xff] }
 0x7d5   : > { %v20482_v41 = vpack.c.bf16 %v8484_v34, %v8482_v49  ;;  %v15429_v52 = vadd.f32 %v7915_v47, %v5897_v61  ;;  %11301 = vmatpush1.bf16.msra.mxu1 %v20308_v21  ;;  %v7917_v55 = vpop.f32.mrb[217].mxu0  ;;  %11019 = vmatprep.mubr.bf16.mxu1 %v14761_v48  ;;  %v22097_v48 = vld [vmem:[#allocation128_spill] sm:$0xff]  ;;  %v5911_v49 = vadd.f32 %v22098_v54, %v2040_v15 }
 0x7d6   : > { %v15431_v22 = vadd.f32 %v7917_v55, %v5899_v11  ;;  %11302 = vmatprep.subr.bf16.mxu1 %v20332_v6  ;;  %v7919_v4 = vpop.f32.mrb[218].mxu0  ;;  %v20494_v12 = vpack.c.bf16 %v8485_v59, %v8483_v9  ;;  %v5909_v14 = vadd.f32 %v22097_v48, %v2035_v32  ;;  %v5913_v61 = vadd.f32 %v22099_v18, %v2040_v15  ;;  %v8723_v9 = vld [vmem:[%s21806_s1 + $0x1228] sm:$0xff] }
 0x7d7   : > { %v8230_v21 = vmul.f32 0.2, %v15429_v52  ;;  %v15433_v7 = vadd.f32 %v7919_v4, %v5901_v43  ;;  %v7921_v16 = vpop.f32.mrb[219].mxu0  ;;  %v14768_v55 = vcombine.low %v8711_v57, %v8715_v19  ;;  %v14777_v63 = vcombine.high %v8719_v38, %v8723_v9  ;;  %v2045_v43 = vpop.permute.xlu0 %2044 }
 0x7d8   : > { %v8231_v35 = vmul.f32 0.2, %v15431_v22  ;;  %v15435_v0 = vadd.f32 %v7921_v16, %v5903_v58  ;;  %v22100_v58 = vld [vmem:[#allocation131_spill] sm:$0xff] }
 0x7d9   : > { %v8232_v6 = vmul.f32 0.2, %v15433_v7  ;;  %11303 = vmatpush1.bf16.msra.mxu1 %v20322_v39  ;;  %v8486_v5 = vmax.f32 %v15429_v52, %v8230_v21  ;;  %v5917_v21 = vadd.f32 %v22100_v58, %v2045_v43 }
 0x7da   : > { %v8233_v42 = vmul.f32 0.2, %v15435_v0  ;;  %11304 = vmatprep.subr.bf16.mxu1 %v20346_v30  ;;  %v8487_v40 = vmax.f32 %v15431_v22, %v8231_v35 }
 0x7db   : > { %v8488_v3 = vmax.f32 %v15433_v7, %v8232_v6  ;;  %v2050_v7 = vpop.permute.xlu1 %2049 }
 0x7dc   : > { %v8489_v45 = vmax.f32 %v15435_v0, %v8233_v42  ;;  %v7925_v8 = vpop.f32.mrb[220].mxu0  ;;  %11020 = vmatmul.mubr.bf16.gmra.mrb[192].mxu1 %v14760_v60  ;;  %v22101_v60 = vld [vmem:[#allocation132_spill] sm:$0xff] }
 0x7dd   : > { %v20500_v31 = vpack.c.bf16 %v8488_v3, %v8486_v5  ;;  %v15437_v50 = vadd.f32 %v7925_v8, %v5907_v44  ;;  %11305 = vmatpush1.bf16.msra.mxu1 %v20336_v53  ;;  %v7927_v39 = vpop.f32.mrb[221].mxu0  ;;  %11029 = vmatprep.mubr.bf16.mxu1 %v14769_v10  ;;  %v5919_v6 = vadd.f32 %v22101_v60, %v2045_v43  ;;  %v22102_v10 = vld [vmem:[#allocation133_spill] sm:$0xff]  ;;  %v22103_v5 = vld [vmem:[#allocation134_spill] sm:$0xff]  ;;  %v8731_v44 = vld [vmem:[%s21806_s1 + $0x1268] sm:$0xff] }
 0x7de   : > { %v15439_v30 = vadd.f32 %v7927_v39, %v5909_v14  ;;  %11306 = vmatprep.subr.bf16.mxu1 %v20360_v2  ;;  %v7929_v34 = vpop.f32.mrb[222].mxu0  ;;  %v20512_v59 = vpack.c.bf16 %v8489_v45, %v8487_v40  ;;  %v5921_v32 = vadd.f32 %v22102_v10, %v2050_v7  ;;  %v5923_v3 = vadd.f32 %v22103_v5, %v2050_v7  ;;  %v2055_v39 = vpop.permute.xlu0 %2054  ;;  %v22107_v43 = vld [vmem:[#allocation138_spill] sm:$0xff] }
 0x7df   : > { %v8234_v53 = vmul.f32 0.2, %v15437_v50  ;;  %v15441_v47 = vadd.f32 %v7929_v34, %v5911_v49  ;;  %v7931_v20 = vpop.f32.mrb[223].mxu0  ;;  %v14776_v14 = vcombine.low %v8719_v38, %v8723_v9  ;;  %v22104_v34 = vld [vmem:[#allocation135_spill] sm:$0xff]  ;;  %v14784_v60 = vcombine.low %v8727_v23, %v8731_v44 }
 0x7e0   : > { %v8235_v11 = vmul.f32 0.2, %v15439_v30  ;;  %v15443_v52 = vadd.f32 %v7931_v20, %v5913_v61  ;;  %v5927_v18 = vadd.f32 %v22104_v34, %v2055_v39  ;;  %v2060_v61 = vpop.permute.xlu1 %2059  ;;  %v8743_v34 = vld [vmem:[%s21806_s1 + $0x12c8] sm:$0xff] }
 0x7e1   : > { %v8236_v2 = vmul.f32 0.2, %v15441_v47  ;;  %11307 = vmatpush1.bf16.msra.mxu1 %v20350_v24  ;;  %v8490_v4 = vmax.f32 %v15437_v50, %v8234_v53  ;;  %v14785_v50 = vcombine.high %v8727_v23, %v8731_v44  ;;  %v22110_v23 = vld [vmem:[#allocation141_spill] sm:$0xff] }
 0x7e2   : > { %v8237_v22 = vmul.f32 0.2, %v15443_v52  ;;  %11308 = vmatprep.subr.bf16.mxu1 %v20374_v27  ;;  %v8491_v16 = vmax.f32 %v15439_v30, %v8235_v11  ;;  %v22105_v11 = vld [vmem:[#allocation136_spill] sm:$0xff] }
 0x7e3   : > { %v8492_v1 = vmax.f32 %v15441_v47, %v8236_v2 }
 0x7e4   : > { %v8493_v35 = vmax.f32 %v15443_v52, %v8237_v22  ;;  %v7935_v0 = vpop.f32.mrb[224].mxu0  ;;  %11030 = vmatmul.mubr.bf16.gmra.mrb[196].mxu1 %v14768_v55  ;;  %v5929_v52 = vadd.f32 %v22105_v11, %v2055_v39  ;;  %v22106_v55 = vld [vmem:[#allocation137_spill] sm:$0xff]  ;;  %v5933_v22 = vadd.f32 %v22107_v43, %v2060_v61 }
 0x7e5   : > { %v20518_v57 = vpack.c.bf16 %v8492_v1, %v8490_v4  ;;  %v15445_v19 = vadd.f32 %v7935_v0, %v5917_v21  ;;  %11309 = vmatpush1.bf16.msra.mxu1 %v20364_v56  ;;  %v7937_v24 = vpop.f32.mrb[225].mxu0  ;;  %11039 = vmatprep.mubr.bf16.mxu1 %v14777_v63  ;;  %v5931_v2 = vadd.f32 %v22106_v55, %v2060_v61  ;;  %v8735_v4 = vld [vmem:[%s21806_s1 + $0x1288] sm:$0xff] }
 0x7e6   : > { %v15447_v27 = vadd.f32 %v7937_v24, %v5919_v6  ;;  %11310 = vmatprep.subr.bf16.mxu1 %v20388_v28  ;;  %v7939_v42 = vpop.f32.mrb[226].mxu0  ;;  %v20530_v15 = vpack.c.bf16 %v8493_v35, %v8491_v16  ;;  %v8739_v1 = vld [vmem:[%s21806_s1 + $0x12a8] sm:$0xff]  ;;  %v2065_v24 = vpop.permute.xlu0 %2064 }
 0x7e7   : > { %v8238_v56 = vmul.f32 0.2, %v15445_v19  ;;  %v15449_v40 = vadd.f32 %v7939_v42, %v5921_v32  ;;  %v7941_v45 = vpop.f32.mrb[227].mxu0  ;;  %v22108_v42 = vld [vmem:[#allocation139_spill] sm:$0xff] }
 0x7e8   : > { %v8239_v8 = vmul.f32 0.2, %v15447_v27  ;;  %v15451_v48 = vadd.f32 %v7941_v45, %v5923_v3  ;;  %v5937_v5 = vadd.f32 %v22108_v42, %v2065_v24  ;;  %v2070_v3 = vpop.permute.xlu1 %2069  ;;  %v22115_v42 = vld [vmem:[#allocation146_spill] sm:$0xff] }
 0x7e9   : > { %v8240_v28 = vmul.f32 0.2, %v15449_v40  ;;  %11311 = vmatpush1.bf16.msra.mxu1 %v20378_v62  ;;  %v8494_v49 = vmax.f32 %v15445_v19, %v8238_v56  ;;  %v14793_v19 = vcombine.high %v8735_v4, %v8739_v1  ;;  %v5941_v44 = vadd.f32 %v22110_v23, %v2070_v3 }
 0x7ea   : > { %v8241_v54 = vmul.f32 0.2, %v15451_v48  ;;  %11633 = vmatprep.subr.bf16.mxu1 %v20404_v26  ;;  %v8495_v53 = vmax.f32 %v15447_v27, %v8239_v8  ;;  %v22109_v8 = vld [vmem:[#allocation140_spill] sm:$0xff] }
 0x7eb   : > { %v8496_v30 = vmax.f32 %v15449_v40, %v8240_v28 }
 0x7ec   : > { %v8497_v47 = vmax.f32 %v15451_v48, %v8241_v54  ;;  %v7945_v20 = vpop.f32.mrb[228].mxu0  ;;  %11040 = vmatmul.mubr.bf16.gmra.mrb[200].mxu1 %v14776_v14  ;;  %v5939_v48 = vadd.f32 %v22109_v8, %v2065_v24 }
 0x7ed   : > { %v20536_v38 = vpack.c.bf16 %v8496_v30, %v8494_v49  ;;  %v15453_v9 = vadd.f32 %v7945_v20, %v5927_v18  ;;  %v7947_v62 = vpop.f32.mrb[229].mxu0  ;;  %11049 = vmatprep.mubr.bf16.mxu1 %v14785_v50  ;;  %v22111_v49 = vld [vmem:[#allocation142_spill] sm:$0xff]  ;;  %v8747_v18 = vld [vmem:[%s21806_s1 + $0x12e8] sm:$0xff] }
 0x7ee   : > { %v15455_v63 = vadd.f32 %v7947_v62, %v5929_v52  ;;  %v7949_v26 = vpop.f32.mrb[230].mxu0  ;;  %v20546_v58 = vpack.c.bf16 %v8497_v47, %v8495_v53  ;;  %v5943_v30 = vadd.f32 %v22111_v49, %v2070_v3  ;;  %v14801_v55 = vcombine.high %v8743_v34, %v8747_v18  ;;  %v8751_v3 = vld [vmem:[%s21806_s1 + $0x1308] sm:$0xff] }
 0x7ef   : > { %v8242_v21 = vmul.f32 0.2, %v15453_v9  ;;  %v15457_v7 = vadd.f32 %v7949_v26, %v5931_v2  ;;  %v7951_v16 = vpop.f32.mrb[231].mxu0  ;;  %v2075_v2 = vpop.permute.xlu0 %2074  ;;  %v14800_v23 = vcombine.low %v8743_v34, %v8747_v18  ;;  %v22118_v34 = vld [vmem:[#allocation149_spill] sm:$0xff] }
 0x7f0   : > { %v8243_v35 = vmul.f32 0.2, %v15455_v63  ;;  %v15459_v0 = vadd.f32 %v7951_v16, %v5933_v22  ;;  %v22112_v22 = vld [vmem:[#allocation143_spill] sm:$0xff] }
 0x7f1   : > { %v8244_v6 = vmul.f32 0.2, %v15457_v7  ;;  %v8498_v32 = vmax.f32 %v15453_v9, %v8242_v21  ;;  %v14792_v9 = vcombine.low %v8735_v4, %v8739_v1  ;;  %v5947_v21 = vadd.f32 %v22112_v22, %v2075_v2  ;;  %v22114_v4 = vld [vmem:[#allocation145_spill] sm:$0xff] }
 0x7f2   : > { %v8245_v10 = vmul.f32 0.2, %v15459_v0  ;;  %v8499_v56 = vmax.f32 %v15455_v63, %v8243_v35  ;;  %v2080_v35 = vpop.permute.xlu1 %2079 }
 0x7f3   : > { %v8500_v27 = vmax.f32 %v15457_v7, %v8244_v6  ;;  %v22113_v7 = vld [vmem:[#allocation144_spill] sm:$0xff]  ;;  %v5951_v1 = vadd.f32 %v22114_v4, %v2080_v35 }
 0x7f4   : > { %v8501_v40 = vmax.f32 %v15459_v0, %v8245_v10  ;;  %v7955_v45 = vpop.f32.mrb[232].mxu0  ;;  %11050 = vmatmul.mubr.bf16.gmra.mrb[204].mxu1 %v14784_v60  ;;  %v5949_v16 = vadd.f32 %v22113_v7, %v2075_v2  ;;  %v22119_v7 = vld [vmem:[#allocation150_spill] sm:$0xff] }
 0x7f5   : > { %v20550_v14 = vpack.c.bf16 %v8500_v27, %v8498_v32  ;;  %v15461_v28 = vadd.f32 %v7955_v45, %v5937_v5  ;;  %v7957_v50 = vpop.f32.mrb[233].mxu0  ;;  %11059 = vmatprep.mubr.bf16.mxu1 %v14793_v19  ;;  %v5953_v5 = vadd.f32 %v22115_v42, %v2080_v35  ;;  %v8759_v35 = vld [vmem:[%s21806_s1 + $0x1348] sm:$0xff] }
 0x7f6   : > { %v15463_v39 = vadd.f32 %v7957_v50, %v5939_v48  ;;  %v7959_v54 = vpop.f32.mrb[234].mxu0  ;;  %v20560_v61 = vpack.c.bf16 %v8501_v40, %v8499_v56  ;;  %v8755_v56 = vld [vmem:[%s21806_s1 + $0x1328] sm:$0xff] }
 0x7f7   : > { %v8246_v53 = vmul.f32 0.2, %v15461_v28  ;;  %v15465_v47 = vadd.f32 %v7959_v54, %v5941_v44  ;;  %v7961_v20 = vpop.f32.mrb[235].mxu0  ;;  %v2085_v54 = vpop.permute.xlu0 %2084 }
 0x7f8   : > { %v8247_v11 = vmul.f32 0.2, %v15463_v39  ;;  %v15467_v52 = vadd.f32 %v7961_v20, %v5943_v30 }
 0x7f9   : > { %v8248_v62 = vmul.f32 0.2, %v15465_v47  ;;  %v8502_v26 = vmax.f32 %v15461_v28, %v8246_v53 }
 0x7fa   : > { %v8249_v63 = vmul.f32 0.2, %v15467_v52  ;;  %v8503_v0 = vmax.f32 %v15463_v39, %v8247_v11  ;;  %v14809_v39 = vcombine.high %v8751_v3, %v8755_v56  ;;  %v22117_v11 = vld [vmem:[#allocation148_spill] sm:$0xff] }
 0x7fb   : > { %v8504_v43 = vmax.f32 %v15465_v47, %v8248_v62  ;;  %v22116_v47 = vld [vmem:[#allocation147_spill] sm:$0xff] }
 0x7fc   : > { %v8505_v60 = vmax.f32 %v15467_v52, %v8249_v63  ;;  %v7965_v6 = vpop.f32.mrb[236].mxu0  ;;  %11060 = vmatmul.mubr.bf16.gmra.mrb[208].mxu1 %v14792_v9  ;;  %v5957_v20 = vadd.f32 %v22116_v47, %v2085_v54  ;;  %v5959_v52 = vadd.f32 %v22117_v11, %v2085_v54  ;;  %v2090_v9 = vpop.permute.xlu1 %2089 }
 0x7fd   : > { %v20564_v19 = vpack.c.bf16 %v8504_v43, %v8502_v26  ;;  %v15469_v24 = vadd.f32 %v7965_v6, %v5947_v21  ;;  %v7967_v10 = vpop.f32.mrb[237].mxu0  ;;  %11069 = vmatprep.mubr.bf16.mxu1 %v14801_v55  ;;  %v5961_v18 = vadd.f32 %v22118_v34, %v2090_v9 }
 0x7fe   : > { %v15471_v32 = vadd.f32 %v7967_v10, %v5949_v16  ;;  %v7969_v27 = vpop.f32.mrb[238].mxu0  ;;  %v20574_v40 = vpack.c.bf16 %v8505_v60, %v8503_v0  ;;  %v5963_v16 = vadd.f32 %v22119_v7, %v2090_v9  ;;  %v8763_v0 = vld [vmem:[%s21806_s1 + $0x1368] sm:$0xff]  ;;  %v22123_v9 = vld [vmem:[#allocation154_spill] sm:$0xff] }
 0x7ff   : > { %v8250_v45 = vmul.f32 0.2, %v15469_v24  ;;  %v15473_v8 = vadd.f32 %v7969_v27, %v5951_v1  ;;  %v7971_v48 = vpop.f32.mrb[239].mxu0  ;;  %v14817_v42 = vcombine.high %v8759_v35, %v8763_v0  ;;  %v14816_v7 = vcombine.low %v8759_v35, %v8763_v0  ;;  %v22126_v35 = vld [vmem:[#allocation157_spill] sm:$0xff] }
 0x800   : > { %v8251_v28 = vmul.f32 0.2, %v15471_v32  ;;  %v15475_v50 = vadd.f32 %v7971_v48, %v5953_v5  ;;  %v2095_v5 = vpop.permute.xlu0 %2094 }
 0x801   : > { %v8252_v44 = vmul.f32 0.2, %v15473_v8  ;;  %v8506_v30 = vmax.f32 %v15469_v24, %v8250_v45 }
 0x802   : > { %v8253_v49 = vmul.f32 0.2, %v15475_v50  ;;  %v8507_v62 = vmax.f32 %v15471_v32, %v8251_v28  ;;  %v14808_v32 = vcombine.low %v8751_v3, %v8755_v56  ;;  %v22120_v28 = vld [vmem:[#allocation151_spill] sm:$0xff]  ;;  %v22122_v3 = vld [vmem:[#allocation153_spill] sm:$0xff] }
 0x803   : > { %v8508_v53 = vmax.f32 %v15473_v8, %v8252_v44 }
 0x804   : > { %v8509_v55 = vmax.f32 %v15475_v50, %v8253_v49  ;;  %v7975_v2 = vpop.f32.mrb[240].mxu0  ;;  %11070 = vmatmul.mubr.bf16.gmra.mrb[212].mxu1 %v14800_v23  ;;  %v5967_v50 = vadd.f32 %v22120_v28, %v2095_v5  ;;  %v22121_v23 = vld [vmem:[#allocation152_spill] sm:$0xff] }
 0x805   : > { %v20578_v63 = vpack.c.bf16 %v8508_v53, %v8506_v30  ;;  %v15477_v26 = vadd.f32 %v7975_v2, %v5957_v20  ;;  %v7977_v43 = vpop.f32.mrb[241].mxu0  ;;  %11079 = vmatprep.mubr.bf16.mxu1 %v14809_v39  ;;  %v5969_v44 = vadd.f32 %v22121_v23, %v2095_v5  ;;  %v2100_v39 = vpop.permute.xlu1 %2099  ;;  %v8771_v2 = vld [vmem:[%s21806_s1 + $0x13a8] sm:$0xff] }
 0x806   : > { %v15479_v22 = vadd.f32 %v7977_v43, %v5959_v52  ;;  %v7979_v21 = vpop.f32.mrb[242].mxu0  ;;  %v20588_v60 = vpack.c.bf16 %v8509_v55, %v8507_v62  ;;  %v5971_v56 = vadd.f32 %v22122_v3, %v2100_v39  ;;  %v5973_v62 = vadd.f32 %v22123_v9, %v2100_v39  ;;  %v8767_v55 = vld [vmem:[%s21806_s1 + $0x1388] sm:$0xff] }
 0x807   : > { %v8254_v6 = vmul.f32 0.2, %v15477_v26  ;;  %v15481_v24 = vadd.f32 %v7979_v21, %v5961_v18  ;;  %v7981_v10 = vpop.f32.mrb[243].mxu0 }
 0x808   : > { %v8255_v4 = vmul.f32 0.2, %v15479_v22  ;;  %v15483_v1 = vadd.f32 %v7981_v10, %v5963_v16 }
 0x809   : > { %v8256_v27 = vmul.f32 0.2, %v15481_v24  ;;  %v8510_v8 = vmax.f32 %v15477_v26, %v8254_v6  ;;  %v14825_v6 = vcombine.high %v8767_v55, %v8771_v2 }
 0x80a   : > { %v8257_v45 = vmul.f32 0.2, %v15483_v1  ;;  %v8511_v54 = vmax.f32 %v15479_v22, %v8255_v4 }
 0x80b   : > { %v8512_v48 = vmax.f32 %v15481_v24, %v8256_v27  ;;  %v2105_v24 = vpop.permute.xlu0 %2104 }
 0x80c   : > { %v8513_v49 = vmax.f32 %v15483_v1, %v8257_v45  ;;  %v7985_v30 = vpop.f32.mrb[244].mxu0  ;;  %11080 = vmatmul.mubr.bf16.gmra.mrb[216].mxu1 %v14808_v32  ;;  %v22124_v32 = vld [vmem:[#allocation155_spill] sm:$0xff]  ;;  %v2110_v45 = vpop.permute.xlu1 %2109 }
 0x80d   : > { %v20592_v53 = vpack.c.bf16 %v8512_v48, %v8510_v8  ;;  %v15485_v47 = vadd.f32 %v7985_v30, %v5967_v50  ;;  %v7987_v20 = vpop.f32.mrb[245].mxu0  ;;  %11089 = vmatprep.mubr.bf16.mxu1 %v14817_v42  ;;  %v5977_v27 = vadd.f32 %v22124_v32, %v2105_v24  ;;  %v22125_v42 = vld [vmem:[#allocation156_spill] sm:$0xff]  ;;  %v5981_v0 = vadd.f32 %v22126_v35, %v2110_v45 }
 0x80e   : > { %v15487_v11 = vadd.f32 %v7987_v20, %v5969_v44  ;;  %v7989_v52 = vpop.f32.mrb[246].mxu0  ;;  %v20602_v26 = vpack.c.bf16 %v8513_v49, %v8511_v54  ;;  %v5979_v5 = vadd.f32 %v22125_v42, %v2105_v24  ;;  %v22127_v49 = vld [vmem:[#allocation158_spill] sm:$0xff]  ;;  %v8779_v20 = vld [vmem:[%s21806_s1 + $0x13e8] sm:$0xff]  ;;  %v22128_v24 = vld [vmem:[#allocation159_spill] sm:$0xff] }
 0x80f   : > { %v8258_v43 = vmul.f32 0.2, %v15485_v47  ;;  %v15489_v34 = vadd.f32 %v7989_v52, %v5971_v56  ;;  %v7991_v18 = vpop.f32.mrb[247].mxu0  ;;  %v5983_v30 = vadd.f32 %v22127_v49, %v2110_v45  ;;  %v2115_v9 = vpop.permute.xlu0 %2114  ;;  %v8783_v35 = vld [vmem:[%s21806_s1 + $0x1408] sm:$0xff] }
 0x810   : > { %v8259_v22 = vmul.f32 0.2, %v15487_v11  ;;  %v15491_v21 = vadd.f32 %v7991_v18, %v5973_v62 }
 0x811   : > { %v8260_v16 = vmul.f32 0.2, %v15489_v34  ;;  %v8514_v4 = vmax.f32 %v15485_v47, %v8258_v43  ;;  %v8775_v47 = vld [vmem:[%s21806_s1 + $0x13c8] sm:$0xff] }
 0x812   : > { %v8261_v10 = vmul.f32 0.2, %v15491_v21  ;;  %v8515_v8 = vmax.f32 %v15487_v11, %v8259_v22  ;;  %v14833_v22 = vcombine.high %v8775_v47, %v8779_v20 }
 0x813   : > { %v8516_v1 = vmax.f32 %v15489_v34, %v8260_v16  ;;  %v14824_v34 = vcombine.low %v8767_v55, %v8771_v2  ;;  %v22131_v2 = vld [vmem:[#allocation162_spill] sm:$0xff] }
 0x814   : > { %v8517_v48 = vmax.f32 %v15491_v21, %v8261_v10  ;;  %v7995_v28 = vpop.f32.mrb[248].mxu0  ;;  %11090 = vmatmul.mubr.bf16.gmra.mrb[220].mxu1 %v14816_v7  ;;  %v2120_v21 = vpop.permute.xlu1 %2119  ;;  %v5987_v10 = vadd.f32 %v22128_v24, %v2115_v9 }
 0x815   : > { %v20606_v50 = vpack.c.bf16 %v8516_v1, %v8514_v4  ;;  %v15493_v23 = vadd.f32 %v7995_v28, %v5977_v27  ;;  %v7997_v44 = vpop.f32.mrb[249].mxu0  ;;  %11099 = vmatprep.mubr.bf16.mxu1 %v14825_v6  ;;  %v22129_v4 = vld [vmem:[#allocation160_spill] sm:$0xff]  ;;  %v5993_v28 = vadd.f32 %v22131_v2, %v2120_v21 }
 0x816   : > { %v15495_v39 = vadd.f32 %v7997_v44, %v5979_v5  ;;  %v7999_v54 = vpop.f32.mrb[250].mxu0  ;;  %v20616_v3 = vpack.c.bf16 %v8517_v48, %v8515_v8  ;;  %v5989_v1 = vadd.f32 %v22129_v4, %v2115_v9  ;;  %v22130_v48 = vld [vmem:[#allocation161_spill] sm:$0xff]  ;;  %v8803_v4 = vld [vmem:[%s21806_s1 + $0x14a8] sm:$0xff] }
 0x817   : > { %v8262_v56 = vmul.f32 0.2, %v15493_v23  ;;  %v15497_v11 = vadd.f32 %v7999_v54, %v5981_v0  ;;  %v8001_v52 = vpop.f32.mrb[251].mxu0  ;;  %v5991_v55 = vadd.f32 %v22130_v48, %v2120_v21  ;;  %v8787_v0 = vld [vmem:[%s21806_s1 + $0x1428] sm:$0xff] }
 0x818   : > { %v8263_v62 = vmul.f32 0.2, %v15495_v39  ;;  %v15499_v43 = vadd.f32 %v8001_v52, %v5983_v30  ;;  %v14832_v52 = vcombine.low %v8775_v47, %v8779_v20  ;;  %v14840_v20 = vcombine.low %v8783_v35, %v8787_v0  ;;  %v8815_v48 = vld [vmem:[%s21806_s1 + $0x1508] sm:$0xff] }
 0x819   : > { %v8264_v18 = vmul.f32 0.2, %v15497_v11  ;;  %v8518_v16 = vmax.f32 %v15493_v23, %v8262_v56 }
 0x81a   : > { %v8265_v7 = vmul.f32 0.2, %v15499_v43  ;;  %v8519_v32 = vmax.f32 %v15495_v39, %v8263_v62  ;;  %v14841_v62 = vcombine.high %v8783_v35, %v8787_v0 }
 0x81b   : > { %v8520_v6 = vmax.f32 %v15497_v11, %v8264_v18 }
 0x81c   : > { %v8521_v27 = vmax.f32 %v15499_v43, %v8265_v7  ;;  %v8005_v42 = vpop.f32.mrb[252].mxu0  ;;  %11100 = vmatmul.mubr.bf16.gmra.mrb[224].mxu1 %v14824_v34 }
 0x81d   : > { %v20620_v5 = vpack.c.bf16 %v8520_v6, %v8518_v16  ;;  %v15501_v45 = vadd.f32 %v8005_v42, %v5987_v10  ;;  %v8007_v8 = vpop.f32.mrb[253].mxu0  ;;  %11109 = vmatprep.mubr.bf16.mxu1 %v14833_v22  ;;  %v8791_v16 = vld [vmem:[%s21806_s1 + $0x1448] sm:$0xff] }
 0x81e   : > { %v15503_v44 = vadd.f32 %v8007_v8, %v5989_v1  ;;  %v8009_v23 = vpop.f32.mrb[254].mxu0  ;;  %v20630_v39 = vpack.c.bf16 %v8521_v27, %v8519_v32  ;;  %v8795_v6 = vld [vmem:[%s21806_s1 + $0x1468] sm:$0xff] }
 0x81f   : > { %v8266_v54 = vmul.f32 0.2, %v15501_v45  ;;  %v15505_v49 = vadd.f32 %v8009_v23, %v5991_v55  ;;  %v8011_v30 = vpop.f32.mrb[255].mxu0  ;;  %v14849_v24 = vcombine.high %v8791_v16, %v8795_v6  ;;  %v8799_v10 = vld [vmem:[%s21806_s1 + $0x1488] sm:$0xff]  ;;  %v14848_v1 = vcombine.low %v8791_v16, %v8795_v6 }
 0x820   : > { %v8267_v56 = vmul.f32 0.2, %v15503_v44  ;;  %v15507_v11 = vadd.f32 %v8011_v30, %v5993_v28  ;;  %v14857_v32 = vcombine.high %v8799_v10, %v8803_v4  ;;  %v8807_v27 = vld [vmem:[%s21806_s1 + $0x14c8] sm:$0xff] }
 0x821   : > { %v8268_v9 = vmul.f32 0.2, %v15505_v49  ;;  %v8522_v34 = vmax.f32 %v15501_v45, %v8266_v54  ;;  %v8811_v42 = vld [vmem:[%s21806_s1 + $0x14e8] sm:$0xff]  ;;  %v14856_v45 = vcombine.low %v8799_v10, %v8803_v4 }
 0x822   : > { %v8269_v43 = vmul.f32 0.2, %v15507_v11  ;;  %v8523_v22 = vmax.f32 %v15503_v44, %v8267_v56  ;;  %v14865_v8 = vcombine.high %v8807_v27, %v8811_v42  ;;  %v8819_v55 = vld [vmem:[%s21806_s1 + $0x1528] sm:$0xff]  ;;  %v14864_v2 = vcombine.low %v8807_v27, %v8811_v42 }
 0x823   : > { %v8524_v18 = vmax.f32 %v15505_v49, %v8268_v9  ;;  %v14873_v28 = vcombine.high %v8815_v48, %v8819_v55  ;;  %v8823_v44 = vld [vmem:[%s21806_s1 + $0x1548] sm:$0xff]  ;;  %v14872_v35 = vcombine.low %v8815_v48, %v8819_v55 }
 0x824   : > { %v8525_v21 = vmax.f32 %v15507_v11, %v8269_v43  ;;  %11110 = vmatmul.mubr.bf16.gmra.mrb[228].mxu1 %v14832_v52  ;;  %v8827_v23 = vld [vmem:[%s21806_s1 + $0x1568] sm:$0xff] }
 0x825   : > { %v20632_v7 = vpack.c.bf16 %v8524_v18, %v8522_v34  ;;  %11119 = vmatprep.mubr.bf16.mxu1 %v14841_v62  ;;  %v14881_v0 = vcombine.high %v8823_v44, %v8827_v23  ;;  %v8831_v54 = vld [vmem:[%s21806_s1 + $0x1588] sm:$0xff]  ;;  %v14880_v30 = vcombine.low %v8823_v44, %v8827_v23 }
 0x826   : > { %v20640_v47 = vpack.c.bf16 %v8525_v21, %v8523_v22  ;;  %v8835_v49 = vld [vmem:[%s21806_s1 + $0x15a8] sm:$0xff] }
 0x827   : > { %v14889_v56 = vcombine.high %v8831_v54, %v8835_v49  ;;  %v8839_v11 = vld [vmem:[%s21806_s1 + $0x15c8] sm:$0xff]  ;;  %v14888_v9 = vcombine.low %v8831_v54, %v8835_v49 }
 0x828   : > { %v8843_v52 = vld [vmem:[%s21806_s1 + $0x15e8] sm:$0xff] }
 0x829   : > { %v14897_v62 = vcombine.high %v8839_v11, %v8843_v52  ;;  %v8847_v43 = vld [vmem:[%s21806_s1 + $0x1608] sm:$0xff]  ;;  %v14896_v18 = vcombine.low %v8839_v11, %v8843_v52 }
 0x82a   : > { %v8851_v34 = vld [vmem:[%s21806_s1 + $0x1628] sm:$0xff] }
 0x82b   : > { %v14905_v22 = vcombine.high %v8847_v43, %v8851_v34  ;;  %v8855_v21 = vld [vmem:[%s21806_s1 + $0x1648] sm:$0xff]  ;;  %v14904_v6 = vcombine.low %v8847_v43, %v8851_v34  ;;  %v8660_v43 = vld [vmem:[%s21806_s1 + $0x1030] sm:$0xff] }
 0x82c   : > { %11120 = vmatmul.mubr.bf16.gmra.mrb[232].mxu1 %v14840_v20  ;;  %v8859_v16 = vld [vmem:[%s21806_s1 + $0x1668] sm:$0xff] }
 0x82d   : > { %11129 = vmatprep.mubr.bf16.mxu1 %v14849_v24  ;;  %v14913_v20 = vcombine.high %v8855_v21, %v8859_v16  ;;  %v8863_v24 = vld [vmem:[%s21806_s1 + $0x1688] sm:$0xff]  ;;  %v14912_v4 = vcombine.low %v8855_v21, %v8859_v16  ;;  %v8668_v21 = vld [vmem:[%s21806_s1 + $0x1070] sm:$0xff] }
 0x82e   : > { %v8867_v10 = vld [vmem:[%s21806_s1 + $0x16a8] sm:$0xff] }
 0x82f   : > { %v8875_v27 = vld [vmem:[%s21806_s1 + $0x16e8] sm:$0xff]  ;;  %v14920_v42 = vcombine.low %v8863_v24, %v8867_v10 }
 0x830   : > { %v8883_v48 = vld [vmem:[%s21806_s1 + $0x1728] sm:$0xff] }
 0x831   : > { %v8891_v44 = vld [vmem:[%s21806_s1 + $0x1768] sm:$0xff] }
 0x832   : > { %v8899_v54 = vld [vmem:[%s21806_s1 + $0x17a8] sm:$0xff] }
 0x833   : > { %v8907_v11 = vld [vmem:[%s21806_s1 + $0x17e8] sm:$0xff] }
 0x834   : > { %11130 = vmatmul.mubr.bf16.gmra.mrb[236].mxu1 %v14848_v1  ;;  %v14921_v1 = vcombine.high %v8863_v24, %v8867_v10  ;;  %v8676_v24 = vld [vmem:[%s21806_s1 + $0x10b0] sm:$0xff] }
 0x835   : > { %11139 = vmatprep.mubr.bf16.mxu1 %v14857_v32  ;;  %v8871_v32 = vld [vmem:[%s21806_s1 + $0x16c8] sm:$0xff] }
 0x836   : > { %v14928_v55 = vcombine.low %v8871_v32, %v8875_v27 }
 0x83c   : > { %11140 = vmatmul.mubr.bf16.gmra.mrb[240].mxu1 %v14856_v45  ;;  %v14929_v45 = vcombine.high %v8871_v32, %v8875_v27  ;;  %v8744_v27 = vld [vmem:[%s21806_s1 + $0x12d0] sm:$0xff] }
 0x83d   : > { %11149 = vmatprep.mubr.bf16.mxu1 %v14865_v8  ;;  %v8879_v8 = vld [vmem:[%s21806_s1 + $0x1708] sm:$0xff] }
 0x83e   : > { %v14936_v23 = vcombine.low %v8879_v8, %v8883_v48 }
 0x844   : > { %11150 = vmatmul.mubr.bf16.gmra.mrb[244].mxu1 %v14864_v2  ;;  %v14937_v2 = vcombine.high %v8879_v8, %v8883_v48  ;;  %v8752_v8 = vld [vmem:[%s21806_s1 + $0x1310] sm:$0xff] }
 0x845   : > { %11159 = vmatprep.mubr.bf16.mxu1 %v14873_v28  ;;  %v8887_v28 = vld [vmem:[%s21806_s1 + $0x1748] sm:$0xff]  ;;  %v8756_v48 = vld [vmem:[%s21806_s1 + $0x1330] sm:$0xff] }
 0x846   : > { %v14944_v49 = vcombine.low %v8887_v28, %v8891_v44 }
 0x84c   : > { %11160 = vmatmul.mubr.bf16.gmra.mrb[248].mxu1 %v14872_v35  ;;  %v14945_v35 = vcombine.high %v8887_v28, %v8891_v44  ;;  %v8760_v28 = vld [vmem:[%s21806_s1 + $0x1350] sm:$0xff] }
 0x84d   : > { %11169 = vmatprep.mubr.bf16.mxu1 %v14881_v0  ;;  %v8895_v0 = vld [vmem:[%s21806_s1 + $0x1788] sm:$0xff]  ;;  %v8764_v44 = vld [vmem:[%s21806_s1 + $0x1370] sm:$0xff] }
 0x84e   : > { %v14952_v52 = vcombine.low %v8895_v0, %v8899_v54 }
 0x854   : > { %11170 = vmatmul.mubr.bf16.gmra.mrb[252].mxu1 %v14880_v30  ;;  %v14953_v30 = vcombine.high %v8895_v0, %v8899_v54  ;;  %v8768_v0 = vld [vmem:[%s21806_s1 + $0x1390] sm:$0xff] }
 0x855   : > { %11179 = vmatprep.mubr.bf16.mxu1 %v14889_v56  ;;  %v8903_v56 = vld [vmem:[%s21806_s1 + $0x17c8] sm:$0xff]  ;;  %v8772_v54 = vld [vmem:[%s21806_s1 + $0x13b0] sm:$0xff] }
 0x856   : > { %v14960_v34 = vcombine.low %v8903_v56, %v8907_v11 }
 0x85c   : > { %11180 = vmatmul.mubr.bf16.gmra.mrb[0].mxu1 %v14888_v9  ;;  %v14961_v9 = vcombine.high %v8903_v56, %v8907_v11  ;;  %v8776_v56 = vld [vmem:[%s21806_s1 + $0x13d0] sm:$0xff] }
 0x85d   : > { %11189 = vmatprep.mubr.bf16.mxu1 %v14897_v62  ;;  %v8656_v62 = vld [vmem:[%s21806_s1 + $0x1010] sm:$0xff] }
 0x85e   : > { %v14714_v16 = vcombine.low %v8656_v62, %v8660_v43  ;;  %v8780_v11 = vld [vmem:[%s21806_s1 + $0x13f0] sm:$0xff] }
 0x864   : > { %11190 = vmatmul.mubr.bf16.gmra.mrb[4].mxu1 %v14896_v18  ;;  %v14715_v18 = vcombine.high %v8656_v62, %v8660_v43  ;;  %v8784_v62 = vld [vmem:[%s21806_s1 + $0x1410] sm:$0xff] }
 0x865   : > { %11199 = vmatprep.mubr.bf16.mxu1 %v14905_v22  ;;  %v8664_v22 = vld [vmem:[%s21806_s1 + $0x1050] sm:$0xff] }
 0x866   : > { %v14722_v10 = vcombine.low %v8664_v22, %v8668_v21  ;;  %v8788_v43 = vld [vmem:[%s21806_s1 + $0x1430] sm:$0xff] }
 0x86c   : > { %11200 = vmatmul.mubr.bf16.gmra.mrb[8].mxu1 %v14904_v6  ;;  %v14723_v6 = vcombine.high %v8664_v22, %v8668_v21  ;;  %v8792_v22 = vld [vmem:[%s21806_s1 + $0x1450] sm:$0xff] }
 0x86d   : > { %11209 = vmatprep.mubr.bf16.mxu1 %v14913_v20  ;;  %v8672_v20 = vld [vmem:[%s21806_s1 + $0x1090] sm:$0xff] }
 0x86e   : > { %v8796_v21 = vld [vmem:[%s21806_s1 + $0x1470] sm:$0xff] }
 0x874   : > { %11210 = vmatmul.mubr.bf16.gmra.mrb[12].mxu1 %v14912_v4  ;;  %v14731_v4 = vcombine.high %v8672_v20, %v8676_v24 }
 0x875   : > { %11219 = vmatprep.mubr.bf16.mxu1 %v14921_v1  ;;  %v14730_v1 = vcombine.low %v8672_v20, %v8676_v24  ;;  %v8800_v20 = vld [vmem:[%s21806_s1 + $0x1490] sm:$0xff] }
 0x876   : > { %v8804_v24 = vld [vmem:[%s21806_s1 + $0x14b0] sm:$0xff] }
 0x87c   : > { %11220 = vmatmul.mubr.bf16.gmra.mrb[16].mxu1 %v14920_v42 }
 0x87d   : > { %11229 = vmatprep.mubr.bf16.mxu1 %v14929_v45 }
 0x884   : > { %11230 = vmatmul.mubr.bf16.gmra.mrb[20].mxu1 %v14928_v55 }
 0x885   : > { %11239 = vmatprep.mubr.bf16.mxu1 %v14937_v2  ;;  %v14811_v2 = vcombine.high %v8752_v8, %v8756_v48 }
 0x88c   : > { %11240 = vmatmul.mubr.bf16.gmra.mrb[24].mxu1 %v14936_v23  ;;  %v14810_v23 = vcombine.low %v8752_v8, %v8756_v48  ;;  %v8852_v8 = vld [vmem:[%s21806_s1 + $0x1630] sm:$0xff] }
 0x88d   : > { %11249 = vmatprep.mubr.bf16.mxu1 %v14945_v35  ;;  %v14819_v35 = vcombine.high %v8760_v28, %v8764_v44  ;;  %v8924_v48 = vld [vmem:[%s21807_s2 + $0x70] sm:$0xff] }
 0x894   : > { %11250 = vmatmul.mubr.bf16.gmra.mrb[28].mxu1 %v14944_v49  ;;  %v14818_v49 = vcombine.low %v8760_v28, %v8764_v44  ;;  %v8926_v44 = vld [vmem:[%s21807_s2 + $0x80] sm:$0xff] }
 0x895   : > { %11259 = vmatprep.mubr.bf16.mxu1 %v14953_v30  ;;  %v14827_v30 = vcombine.high %v8768_v0, %v8772_v54 }
 0x89c   : > { %11260 = vmatmul.mubr.bf16.gmra.mrb[32].mxu1 %v14952_v52  ;;  %v14826_v52 = vcombine.low %v8768_v0, %v8772_v54  ;;  %v8860_v0 = vld [vmem:[%s21806_s1 + $0x1670] sm:$0xff] }
 0x89d   : > { %11269 = vmatprep.mubr.bf16.mxu1 %v14961_v9  ;;  %v14835_v9 = vcombine.high %v8776_v56, %v8780_v11  ;;  %v8928_v54 = vld [vmem:[%s21807_s2 + $0x90] sm:$0xff] }
 0x8a4   : > { %11270 = vmatmul.mubr.bf16.gmra.mrb[36].mxu1 %v14960_v34  ;;  %v14834_v34 = vcombine.low %v8776_v56, %v8780_v11  ;;  %v8930_v11 = vld [vmem:[%s21807_s2 + $0xa0] sm:$0xff] }
 0x8a5   : > { %11312 = vmatprep.mubr.bf16.mxu1 %v14715_v18  ;;  %v14843_v18 = vcombine.high %v8784_v62, %v8788_v43 }
 0x8ac   : > { %11313 = vmatmul.mubr.bf16.vlgmr.msra.gmra.mrb[168].mxu1 %v14714_v16  ;;  %v14842_v16 = vcombine.low %v8784_v62, %v8788_v43  ;;  %v8868_v62 = vld [vmem:[%s21806_s1 + $0x16b0] sm:$0xff] }
 0x8ad   : > { %11634 = vmatpush1.bf16.msra.mxu1 %v20392_v29  ;;  %11322 = vmatprep.mubr.bf16.mxu1 %v14723_v6  ;;  %v8680_v29 = vld [vmem:[%s21806_s1 + $0x10d0] sm:$0xff]  ;;  %v14851_v6 = vcombine.high %v8792_v22, %v8796_v21 }
 0x8ae   : > { %11635 = vmatprep.subr.bf16.mxu1 %v20422_v13  ;;  %v8684_v13 = vld [vmem:[%s21806_s1 + $0x10f0] sm:$0xff] }
 0x8af   : > { %v8932_v43 = vld [vmem:[%s21807_s2 + $0xb0] sm:$0xff] }
 0x8b1   : > { %11636 = vmatpush1.bf16.msra.mxu1 %v20410_v46  ;;  %v14739_v46 = vcombine.high %v8680_v29, %v8684_v13 }
 0x8b2   : > { %11637 = vmatprep.subr.bf16.mxu1 %v20440_v37  ;;  %v8692_v37 = vld [vmem:[%s21806_s1 + $0x1130] sm:$0xff] }
 0x8b4   : > { %11323 = vmatmul.mubr.bf16.gmra.mrb[172].mxu1 %v14722_v10  ;;  %v14850_v10 = vcombine.low %v8792_v22, %v8796_v21  ;;  %v8934_v21 = vld [vmem:[%s21807_s2 + $0xc0] sm:$0xff] }
 0x8b5   : > { %11638 = vmatpush1.bf16.msra.mxu1 %v20428_v51  ;;  %11332 = vmatprep.mubr.bf16.mxu1 %v14731_v4  ;;  %v8688_v51 = vld [vmem:[%s21806_s1 + $0x1110] sm:$0xff]  ;;  %v14859_v4 = vcombine.high %v8800_v20, %v8804_v24 }
 0x8b6   : > { %11639 = vmatprep.subr.bf16.mxu1 %v20458_v33  ;;  %v14738_v33 = vcombine.low %v8680_v29, %v8684_v13  ;;  %v8808_v29 = vld [vmem:[%s21806_s1 + $0x14d0] sm:$0xff] }
 0x8b7   : > { %v8812_v13 = vld [vmem:[%s21806_s1 + $0x14f0] sm:$0xff] }
 0x8b9   : > { %11640 = vmatpush1.bf16.msra.mxu1 %v20446_v17  ;;  %v14747_v17 = vcombine.high %v8688_v51, %v8692_v37 }
 0x8ba   : > { %11641 = vmatprep.subr.bf16.mxu1 %v20476_v36  ;;  %v8700_v36 = vld [vmem:[%s21806_s1 + $0x1170] sm:$0xff] }
 0x8bc   : > { %11333 = vmatmul.mubr.bf16.gmra.mrb[176].mxu1 %v14730_v1  ;;  %v14858_v1 = vcombine.low %v8800_v20, %v8804_v24  ;;  %v8876_v20 = vld [vmem:[%s21806_s1 + $0x16f0] sm:$0xff] }
 0x8bd   : > { %11642 = vmatpush1.bf16.msra.mxu1 %v20464_v25  ;;  %11342 = vmatprep.mubr.bf16.mxu1 %v14739_v46  ;;  %v8696_v25 = vld [vmem:[%s21806_s1 + $0x1150] sm:$0xff]  ;;  %v14867_v46 = vcombine.high %v8808_v29, %v8812_v13 }
 0x8be   : > { %11643 = vmatprep.subr.bf16.mxu1 %v20494_v12  ;;  %v14746_v12 = vcombine.low %v8688_v51, %v8692_v37  ;;  %v8816_v51 = vld [vmem:[%s21806_s1 + $0x1510] sm:$0xff] }
 0x8bf   : > { %v8820_v37 = vld [vmem:[%s21806_s1 + $0x1530] sm:$0xff] }
 0x8c0   : > { %v8936_v24 = vld [vmem:[%s21807_s2 + $0xd0] sm:$0xff] }
 0x8c1   : > { %11644 = vmatpush1.bf16.msra.mxu1 %v20482_v41  ;;  %v14755_v41 = vcombine.high %v8696_v25, %v8700_v36 }
 0x8c2   : > { %11645 = vmatprep.subr.bf16.mxu1 %v20512_v59  ;;  %v8708_v59 = vld [vmem:[%s21806_s1 + $0x11b0] sm:$0xff] }
 0x8c4   : > { %11343 = vmatmul.mubr.bf16.gmra.mrb[180].mxu1 %v14738_v33  ;;  %v14866_v33 = vcombine.low %v8808_v29, %v8812_v13  ;;  %v8938_v13 = vld [vmem:[%s21807_s2 + $0xe0] sm:$0xff] }
 0x8c5   : > { %11646 = vmatpush1.bf16.msra.mxu1 %v20500_v31  ;;  %11352 = vmatprep.mubr.bf16.mxu1 %v14747_v17  ;;  %v8704_v31 = vld [vmem:[%s21806_s1 + $0x1190] sm:$0xff]  ;;  %v14875_v17 = vcombine.high %v8816_v51, %v8820_v37 }
 0x8c6   : > { %11647 = vmatprep.subr.bf16.mxu1 %v20530_v15  ;;  %v14754_v15 = vcombine.low %v8696_v25, %v8700_v36  ;;  %v17007_v25 = vmov 1   ;;  %v8911_v36 = vld [vmem:[%s21807_s2 + $0x8] sm:$0xff] }
 0x8c7   : > { %16782 = vset.pattern.permute.xlu1 %v17007_v25  ;;  %16781 = vset.pattern.permute.xlu0 %v17007_v25 }
 0x8c8   : > { %8981 = vperm.xlu1 %16782, %v8911_v36   ;;  %v8942_v36 = vld [vmem:[%s21807_s2 + $0x100] sm:$0xff] }
 0x8c9   : > { %11648 = vmatpush1.bf16.msra.mxu1 %v20518_v57  ;;  %v14763_v57 = vcombine.high %v8704_v31, %v8708_v59 }
 0x8ca   : > { %11649 = vmatprep.subr.bf16.mxu1 %v20546_v58  ;;  %v8716_v58 = vld [vmem:[%s21806_s1 + $0x11f0] sm:$0xff] }
 0x8cc   : > { %11353 = vmatmul.mubr.bf16.gmra.mrb[184].mxu1 %v14746_v12  ;;  %v8910_v12 = vld [vmem:[%s21807_s2] sm:$0xff] }
 0x8cd   : > { %11650 = vmatpush1.bf16.msra.mxu1 %v20536_v38  ;;  %11362 = vmatprep.mubr.bf16.mxu1 %v14755_v41  ;;  %v8712_v38 = vld [vmem:[%s21806_s1 + $0x11d0] sm:$0xff] }
 0x8ce   : > { %11651 = vmatprep.subr.bf16.mxu1 %v20560_v61  ;;  %v14762_v61 = vcombine.low %v8704_v31, %v8708_v59  ;;  %8976 = vperm.xlu0 %16781, %v8910_v12   ;;  %v8824_v41 = vld [vmem:[%s21806_s1 + $0x1550] sm:$0xff]  ;;  %v8943_v12 = vld [vmem:[%s21807_s2 + $0x108] sm:$0xff] }
 0x8cf   : > { %v8828_v31 = vld [vmem:[%s21806_s1 + $0x1570] sm:$0xff] }
 0x8d0   : > { %v8912_v59 = vld [vmem:[%s21807_s2 + $0x10] sm:$0xff] }
 0x8d1   : > { %11652 = vmatpush1.bf16.msra.mxu1 %v20550_v14  ;;  %v14771_v14 = vcombine.high %v8712_v38, %v8716_v58  ;;  %8986 = vperm.xlu1 %16782, %v8912_v59   ;;  %v8944_v59 = vld [vmem:[%s21807_s2 + $0x110] sm:$0xff] }
 0x8d2   : > { %11653 = vmatprep.subr.bf16.mxu1 %v20574_v40  ;;  %v8724_v40 = vld [vmem:[%s21806_s1 + $0x1230] sm:$0xff] }
 0x8d4   : > { %11363 = vmatmul.mubr.bf16.gmra.mrb[188].mxu1 %v14754_v15  ;;  %v8913_v15 = vld [vmem:[%s21807_s2 + $0x18] sm:$0xff] }
 0x8d5   : > { %11654 = vmatpush1.bf16.msra.mxu1 %v20564_v19  ;;  %11372 = vmatprep.mubr.bf16.mxu1 %v14763_v57  ;;  %v8720_v19 = vld [vmem:[%s21806_s1 + $0x1210] sm:$0xff]  ;;  %v14874_v57 = vcombine.low %v8816_v51, %v8820_v37 }
 0x8d6   : > { %11655 = vmatprep.subr.bf16.mxu1 %v20588_v60  ;;  %v14770_v60 = vcombine.low %v8712_v38, %v8716_v58  ;;  %v14883_v38 = vcombine.high %v8824_v41, %v8828_v31  ;;  %8991 = vperm.xlu0 %16781, %v8913_v15   ;;  %v8914_v58 = vld [vmem:[%s21807_s2 + $0x20] sm:$0xff]  ;;  %v8884_v51 = vld [vmem:[%s21806_s1 + $0x1730] sm:$0xff]  ;;  %v8945_v15 = vld [vmem:[%s21807_s2 + $0x118] sm:$0xff] }
 0x8d7   : > { %8996 = vperm.xlu1 %16782, %v8914_v58   ;;  %v8940_v37 = vld [vmem:[%s21807_s2 + $0xf0] sm:$0xff]  ;;  %v8946_v58 = vld [vmem:[%s21807_s2 + $0x120] sm:$0xff] }
 0x8d9   : > { %11656 = vmatpush1.bf16.msra.mxu1 %v20578_v63  ;;  %v14779_v63 = vcombine.high %v8720_v19, %v8724_v40 }
 0x8da   : > { %11657 = vmatprep.subr.bf16.mxu1 %v20602_v26  ;;  %v8732_v26 = vld [vmem:[%s21806_s1 + $0x1270] sm:$0xff] }
 0x8dc   : > { %11373 = vmatmul.mubr.bf16.gmra.mrb[192].mxu1 %v14762_v61  ;;  %v8915_v61 = vld [vmem:[%s21807_s2 + $0x28] sm:$0xff] }
 0x8dd   : > { %11658 = vmatpush1.bf16.msra.mxu1 %v20592_v53  ;;  %11382 = vmatprep.mubr.bf16.mxu1 %v14771_v14  ;;  %v8728_v53 = vld [vmem:[%s21806_s1 + $0x1250] sm:$0xff] }
 0x8de   : > { %11659 = vmatprep.subr.bf16.mxu1 %v20616_v3  ;;  %v14778_v3 = vcombine.low %v8720_v19, %v8724_v40  ;;  %9001 = vperm.xlu0 %16781, %v8915_v61   ;;  %v8832_v14 = vld [vmem:[%s21806_s1 + $0x1590] sm:$0xff]  ;;  %v8947_v61 = vld [vmem:[%s21807_s2 + $0x128] sm:$0xff] }
 0x8df   : > { %v8836_v19 = vld [vmem:[%s21806_s1 + $0x15b0] sm:$0xff] }
 0x8e0   : > { %v8916_v40 = vld [vmem:[%s21807_s2 + $0x30] sm:$0xff] }
 0x8e1   : > { %11660 = vmatpush1.bf16.msra.mxu1 %v20606_v50  ;;  %v14787_v50 = vcombine.high %v8728_v53, %v8732_v26  ;;  %9006 = vperm.xlu1 %16782, %v8916_v40   ;;  %v8948_v40 = vld [vmem:[%s21807_s2 + $0x130] sm:$0xff] }
 0x8e2   : > { %11661 = vmatprep.subr.bf16.mxu1 %v20630_v39  ;;  %v8740_v39 = vld [vmem:[%s21806_s1 + $0x12b0] sm:$0xff] }
 0x8e4   : > { %11383 = vmatmul.mubr.bf16.gmra.mrb[196].mxu1 %v14770_v60  ;;  %v8917_v60 = vld [vmem:[%s21807_s2 + $0x38] sm:$0xff] }
 0x8e5   : > { %11662 = vmatpush1.bf16.msra.mxu1 %v20620_v5  ;;  %11392 = vmatprep.mubr.bf16.mxu1 %v14779_v63  ;;  %v8736_v5 = vld [vmem:[%s21806_s1 + $0x1290] sm:$0xff]  ;;  %v14882_v63 = vcombine.low %v8824_v41, %v8828_v31 }
 0x8e6   : > { %11663 = vmatprep.subr.bf16.mxu1 %v20640_v47  ;;  %v14786_v47 = vcombine.low %v8728_v53, %v8732_v26  ;;  %v14795_v32 = vcombine.high %v8736_v5, %v8740_v39  ;;  %v14794_v42 = vcombine.low %v8736_v5, %v8740_v39  ;;  %v14891_v53 = vcombine.high %v8832_v14, %v8836_v19  ;;  %v8918_v26 = vld [vmem:[%s21807_s2 + $0x40] sm:$0xff]  ;;  %v8844_v5 = vld [vmem:[%s21806_s1 + $0x15f0] sm:$0xff] }
 0x8e7   : > { %9011 = vperm.xlu0 %16781, %v8917_v60   ;;  %9016 = vperm.xlu1 %16782, %v8918_v26   ;;  %v8920_v39 = vld [vmem:[%s21807_s2 + $0x50] sm:$0xff]  ;;  %v8949_v60 = vld [vmem:[%s21807_s2 + $0x138] sm:$0xff]  ;;  %v8950_v26 = vld [vmem:[%s21807_s2 + $0x140] sm:$0xff] }
 0x8e8   : > { %v8888_v41 = vld [vmem:[%s21806_s1 + $0x1750] sm:$0xff] }
 0x8e9   : > { %11664 = vmatpush1.bf16.msra.mxu1 %v20632_v7  ;;  %v8748_v7 = vld [vmem:[%s21806_s1 + $0x12f0] sm:$0xff] }
 0x8ea   : > { %v14803_v45 = vcombine.high %v8744_v27, %v8748_v7  ;;  %v14802_v55 = vcombine.low %v8744_v27, %v8748_v7  ;;  %v8922_v7 = vld [vmem:[%s21807_s2 + $0x60] sm:$0xff]  ;;  %v8892_v31 = vld [vmem:[%s21806_s1 + $0x1770] sm:$0xff] }
 0x8eb   : > { %9026 = vperm.xlu1 %16782, %v8920_v39   ;;  %v8952_v39 = vld [vmem:[%s21807_s2 + $0x150] sm:$0xff] }
 0x8ec   : > { %11393 = vmatmul.mubr.bf16.gmra.mrb[200].mxu1 %v14778_v3  ;;  %v8919_v3 = vld [vmem:[%s21807_s2 + $0x48] sm:$0xff] }
 0x8ed   : > { %11402 = vmatprep.mubr.bf16.mxu1 %v14787_v50  ;;  %9021 = vperm.xlu0 %16781, %v8919_v3   ;;  %v8840_v50 = vld [vmem:[%s21806_s1 + $0x15d0] sm:$0xff]  ;;  %v8951_v3 = vld [vmem:[%s21807_s2 + $0x148] sm:$0xff] }
 0x8ee   : > { %v14899_v27 = vcombine.high %v8840_v50, %v8844_v5 }
 0x8ef   : > { %9036 = vperm.xlu1 %16782, %v8922_v7   ;;  %v8954_v7 = vld [vmem:[%s21807_s2 + $0x160] sm:$0xff] }
 0x8f3   : > { %9046 = vperm.xlu1 %16782, %v8924_v48   ;;  %v8956_v48 = vld [vmem:[%s21807_s2 + $0x170] sm:$0xff] }
 0x8f4   : > { %11403 = vmatmul.mubr.bf16.gmra.mrb[204].mxu1 %v14786_v47  ;;  %v8921_v47 = vld [vmem:[%s21807_s2 + $0x58] sm:$0xff] }
 0x8f5   : > { %11412 = vmatprep.mubr.bf16.mxu1 %v14795_v32  ;;  %v14890_v32 = vcombine.low %v8832_v14, %v8836_v19  ;;  %9031 = vperm.xlu0 %16781, %v8921_v47   ;;  %v8896_v14 = vld [vmem:[%s21806_s1 + $0x1790] sm:$0xff]  ;;  %v8953_v47 = vld [vmem:[%s21807_s2 + $0x158] sm:$0xff] }
 0x8f6   : > { %v8900_v19 = vld [vmem:[%s21806_s1 + $0x17b0] sm:$0xff] }
 0x8f7   : > { %9056 = vperm.xlu1 %16782, %v8926_v44   ;;  %v8958_v44 = vld [vmem:[%s21807_s2 + $0x180] sm:$0xff] }
 0x8fb   : > { %9066 = vperm.xlu1 %16782, %v8928_v54   ;;  %v8960_v54 = vld [vmem:[%s21807_s2 + $0x190] sm:$0xff] }
 0x8fc   : > { %11413 = vmatmul.mubr.bf16.gmra.mrb[208].mxu1 %v14794_v42  ;;  %v8923_v42 = vld [vmem:[%s21807_s2 + $0x68] sm:$0xff] }
 0x8fd   : > { %11422 = vmatprep.mubr.bf16.mxu1 %v14803_v45  ;;  %9041 = vperm.xlu0 %16781, %v8923_v42   ;;  %v8848_v45 = vld [vmem:[%s21806_s1 + $0x1610] sm:$0xff]  ;;  %v8955_v42 = vld [vmem:[%s21807_s2 + $0x168] sm:$0xff] }
 0x8fe   : > { %v14907_v28 = vcombine.high %v8848_v45, %v8852_v8 }
 0x8ff   : > { %9076 = vperm.xlu1 %16782, %v8930_v11   ;;  %v8962_v11 = vld [vmem:[%s21807_s2 + $0x1a0] sm:$0xff] }
 0x903   : > { %9086 = vperm.xlu1 %16782, %v8932_v43   ;;  %v8964_v43 = vld [vmem:[%s21807_s2 + $0x1b0] sm:$0xff] }
 0x904   : > { %11423 = vmatmul.mubr.bf16.gmra.mrb[212].mxu1 %v14802_v55  ;;  %v8925_v55 = vld [vmem:[%s21807_s2 + $0x78] sm:$0xff] }
 0x905   : > { %11432 = vmatprep.mubr.bf16.mxu1 %v14811_v2  ;;  %v14898_v2 = vcombine.low %v8840_v50, %v8844_v5  ;;  %9051 = vperm.xlu0 %16781, %v8925_v55   ;;  %v8904_v50 = vld [vmem:[%s21806_s1 + $0x17d0] sm:$0xff]  ;;  %v8957_v55 = vld [vmem:[%s21807_s2 + $0x178] sm:$0xff] }
 0x906   : > { %v8908_v5 = vld [vmem:[%s21806_s1 + $0x17f0] sm:$0xff] }
 0x907   : > { %9096 = vperm.xlu1 %16782, %v8934_v21   ;;  %v8966_v21 = vld [vmem:[%s21807_s2 + $0x1c0] sm:$0xff] }
 0x90b   : > { %9106 = vperm.xlu1 %16782, %v8936_v24   ;;  %v8968_v24 = vld [vmem:[%s21807_s2 + $0x1d0] sm:$0xff] }
 0x90c   : > { %11433 = vmatmul.mubr.bf16.gmra.mrb[216].mxu1 %v14810_v23  ;;  %v8927_v23 = vld [vmem:[%s21807_s2 + $0x88] sm:$0xff] }
 0x90d   : > { %11442 = vmatprep.mubr.bf16.mxu1 %v14819_v35  ;;  %9061 = vperm.xlu0 %16781, %v8927_v23   ;;  %v8856_v35 = vld [vmem:[%s21806_s1 + $0x1650] sm:$0xff]  ;;  %v8959_v23 = vld [vmem:[%s21807_s2 + $0x188] sm:$0xff] }
 0x90e   : > { %v14915_v56 = vcombine.high %v8856_v35, %v8860_v0 }
 0x90f   : > { %9116 = vperm.xlu1 %16782, %v8938_v13   ;;  %v8970_v13 = vld [vmem:[%s21807_s2 + $0x1e0] sm:$0xff] }
 0x913   : > { %9126 = vperm.xlu1 %16782, %v8940_v37   ;;  %v8972_v37 = vld [vmem:[%s21807_s2 + $0x1f0] sm:$0xff] }
 0x914   : > { %11443 = vmatmul.mubr.bf16.gmra.mrb[220].mxu1 %v14818_v49  ;;  %v8929_v49 = vld [vmem:[%s21807_s2 + $0x98] sm:$0xff] }
 0x915   : > { %11452 = vmatprep.mubr.bf16.mxu1 %v14827_v30  ;;  %v14906_v30 = vcombine.low %v8848_v45, %v8852_v8  ;;  %9071 = vperm.xlu0 %16781, %v8929_v49   ;;  %v8657_v45 = vld [vmem:[%s21806_s1 + $0x1018] sm:$0xff] }
 0x916   : > { %v8661_v8 = vld [vmem:[%s21806_s1 + $0x1038] sm:$0xff] }
 0x917   : > { %9136 = vperm.xlu1 %16782, %v8942_v36   ;;  %v8961_v49 = vld [vmem:[%s21807_s2 + $0x198] sm:$0xff] }
 0x918   : > { %v8697_v36 = vld [vmem:[%s21806_s1 + $0x1158] sm:$0xff] }
 0x91b   : > { %9146 = vperm.xlu1 %16782, %v8944_v59   ;;  %v8705_v59 = vld [vmem:[%s21806_s1 + $0x1198] sm:$0xff] }
 0x91c   : > { %11453 = vmatmul.mubr.bf16.gmra.mrb[224].mxu1 %v14826_v52  ;;  %v8931_v52 = vld [vmem:[%s21807_s2 + $0xa8] sm:$0xff] }
 0x91d   : > { %11462 = vmatprep.mubr.bf16.mxu1 %v14835_v9  ;;  %9081 = vperm.xlu0 %16781, %v8931_v52   ;;  %v8864_v9 = vld [vmem:[%s21806_s1 + $0x1690] sm:$0xff]  ;;  %v8963_v52 = vld [vmem:[%s21807_s2 + $0x1a8] sm:$0xff] }
 0x91e   : > { %v14923_v22 = vcombine.high %v8864_v9, %v8868_v62 }
 0x91f   : > { %9156 = vperm.xlu1 %16782, %v8946_v58   ;;  %v8713_v58 = vld [vmem:[%s21806_s1 + $0x11d8] sm:$0xff] }
 0x923   : > { %9166 = vperm.xlu1 %16782, %v8948_v40   ;;  %v8721_v40 = vld [vmem:[%s21806_s1 + $0x1218] sm:$0xff] }
 0x924   : > { %11463 = vmatmul.mubr.bf16.gmra.mrb[228].mxu1 %v14834_v34  ;;  %v8933_v34 = vld [vmem:[%s21807_s2 + $0xb8] sm:$0xff] }
 0x925   : > { %11472 = vmatprep.mubr.bf16.mxu1 %v14843_v18  ;;  %v14914_v18 = vcombine.low %v8856_v35, %v8860_v0  ;;  %9091 = vperm.xlu0 %16781, %v8933_v34   ;;  %v8665_v35 = vld [vmem:[%s21806_s1 + $0x1058] sm:$0xff] }
 0x926   : > { %v8669_v0 = vld [vmem:[%s21806_s1 + $0x1078] sm:$0xff] }
 0x927   : > { %9176 = vperm.xlu1 %16782, %v8950_v26   ;;  %v8965_v34 = vld [vmem:[%s21807_s2 + $0x1b8] sm:$0xff] }
 0x928   : > { %v8729_v26 = vld [vmem:[%s21806_s1 + $0x1258] sm:$0xff] }
 0x92b   : > { %9186 = vperm.xlu1 %16782, %v8952_v39   ;;  %v8737_v39 = vld [vmem:[%s21806_s1 + $0x1298] sm:$0xff] }
 0x92c   : > { %11473 = vmatmul.mubr.bf16.gmra.mrb[232].mxu1 %v14842_v16  ;;  %v8935_v16 = vld [vmem:[%s21807_s2 + $0xc8] sm:$0xff] }
 0x92d   : > { %11482 = vmatprep.mubr.bf16.mxu1 %v14851_v6  ;;  %9101 = vperm.xlu0 %16781, %v8935_v16   ;;  %v8872_v6 = vld [vmem:[%s21806_s1 + $0x16d0] sm:$0xff]  ;;  %v8967_v16 = vld [vmem:[%s21807_s2 + $0x1c8] sm:$0xff] }
 0x92e   : > { %v14931_v29 = vcombine.high %v8872_v6, %v8876_v20 }
 0x92f   : > { %9196 = vperm.xlu1 %16782, %v8954_v7   ;;  %v8745_v7 = vld [vmem:[%s21806_s1 + $0x12d8] sm:$0xff] }
 0x933   : > { %9206 = vperm.xlu1 %16782, %v8956_v48   ;;  %v8753_v48 = vld [vmem:[%s21806_s1 + $0x1318] sm:$0xff] }
 0x934   : > { %11483 = vmatmul.mubr.bf16.gmra.mrb[236].mxu1 %v14850_v10  ;;  %v8937_v10 = vld [vmem:[%s21807_s2 + $0xd8] sm:$0xff] }
 0x935   : > { %11492 = vmatprep.mubr.bf16.mxu1 %v14859_v4  ;;  %v14922_v4 = vcombine.low %v8864_v9, %v8868_v62  ;;  %9111 = vperm.xlu0 %16781, %v8937_v10   ;;  %v8673_v9 = vld [vmem:[%s21806_s1 + $0x1098] sm:$0xff] }
 0x936   : > { %v8677_v62 = vld [vmem:[%s21806_s1 + $0x10b8] sm:$0xff] }
 0x937   : > { %9216 = vperm.xlu1 %16782, %v8958_v44   ;;  %v8969_v10 = vld [vmem:[%s21807_s2 + $0x1d8] sm:$0xff] }
 0x938   : > { %v8761_v44 = vld [vmem:[%s21806_s1 + $0x1358] sm:$0xff] }
 0x93b   : > { %9226 = vperm.xlu1 %16782, %v8960_v54   ;;  %v8769_v54 = vld [vmem:[%s21806_s1 + $0x1398] sm:$0xff] }
 0x93c   : > { %11493 = vmatmul.mubr.bf16.gmra.mrb[240].mxu1 %v14858_v1  ;;  %v8939_v1 = vld [vmem:[%s21807_s2 + $0xe8] sm:$0xff] }
 0x93d   : > { %11502 = vmatprep.mubr.bf16.mxu1 %v14867_v46  ;;  %9121 = vperm.xlu0 %16781, %v8939_v1   ;;  %v8880_v46 = vld [vmem:[%s21806_s1 + $0x1710] sm:$0xff]  ;;  %v8971_v1 = vld [vmem:[%s21807_s2 + $0x1e8] sm:$0xff] }
 0x93e   : > { %v14939_v25 = vcombine.high %v8880_v46, %v8884_v51 }
 0x93f   : > { %9236 = vperm.xlu1 %16782, %v8962_v11   ;;  %v8777_v11 = vld [vmem:[%s21806_s1 + $0x13d8] sm:$0xff] }
 0x943   : > { %9246 = vperm.xlu1 %16782, %v8964_v43   ;;  %v8785_v43 = vld [vmem:[%s21806_s1 + $0x1418] sm:$0xff] }
 0x944   : > { %11503 = vmatmul.mubr.bf16.gmra.mrb[244].mxu1 %v14866_v33  ;;  %v8941_v33 = vld [vmem:[%s21807_s2 + $0xf8] sm:$0xff] }
 0x945   : > { %11512 = vmatprep.mubr.bf16.mxu1 %v14875_v17  ;;  %v14930_v17 = vcombine.low %v8872_v6, %v8876_v20  ;;  %9131 = vperm.xlu0 %16781, %v8941_v33   ;;  %v8681_v6 = vld [vmem:[%s21806_s1 + $0x10d8] sm:$0xff] }
 0x946   : > { %v8685_v20 = vld [vmem:[%s21806_s1 + $0x10f8] sm:$0xff] }
 0x947   : > { %9256 = vperm.xlu1 %16782, %v8966_v21   ;;  %v8973_v33 = vld [vmem:[%s21807_s2 + $0x1f8] sm:$0xff] }
 0x948   : > { %v8793_v21 = vld [vmem:[%s21806_s1 + $0x1458] sm:$0xff] }
 0x949   : > { %9141 = vperm.xlu0 %16781, %v8943_v12   ;;  %v8701_v12 = vld [vmem:[%s21806_s1 + $0x1178] sm:$0xff] }
 0x94b   : > { %9266 = vperm.xlu1 %16782, %v8968_v24   ;;  %v8801_v24 = vld [vmem:[%s21806_s1 + $0x1498] sm:$0xff] }
 0x94c   : > { %11513 = vmatmul.mubr.bf16.gmra.mrb[248].mxu1 %v14874_v57  ;;  %v14938_v57 = vcombine.low %v8880_v46, %v8884_v51  ;;  %v8689_v46 = vld [vmem:[%s21806_s1 + $0x1118] sm:$0xff] }
 0x94d   : > { %11522 = vmatprep.mubr.bf16.mxu1 %v14883_v38  ;;  %v14947_v38 = vcombine.high %v8888_v41, %v8892_v31  ;;  %9151 = vperm.xlu0 %16781, %v8945_v15   ;;  %v8693_v51 = vld [vmem:[%s21806_s1 + $0x1138] sm:$0xff] }
 0x94e   : > { %v8709_v15 = vld [vmem:[%s21806_s1 + $0x11b8] sm:$0xff] }
 0x94f   : > { %9276 = vperm.xlu1 %16782, %v8970_v13   ;;  %v8809_v13 = vld [vmem:[%s21806_s1 + $0x14d8] sm:$0xff] }
 0x951   : > { %9161 = vperm.xlu0 %16781, %v8947_v61   ;;  %v8717_v61 = vld [vmem:[%s21806_s1 + $0x11f8] sm:$0xff] }
 0x953   : > { %9286 = vperm.xlu1 %16782, %v8972_v37   ;;  %v8817_v37 = vld [vmem:[%s21806_s1 + $0x1518] sm:$0xff] }
 0x954   : > { %11523 = vmatmul.mubr.bf16.gmra.mrb[252].mxu1 %v14882_v63  ;;  %v14946_v63 = vcombine.low %v8888_v41, %v8892_v31  ;;  %v14748_v41 = vcombine.low %v8689_v46, %v8693_v51  ;;  %v14757_v31 = vcombine.high %v8697_v36, %v8701_v12 }
 0x955   : > { %11532 = vmatprep.mubr.bf16.mxu1 %v14891_v53  ;;  %v14955_v53 = vcombine.high %v8896_v14, %v8900_v19  ;;  %9171 = vperm.xlu0 %16781, %v8949_v60   ;;  %v8725_v60 = vld [vmem:[%s21806_s1 + $0x1238] sm:$0xff] }
 0x959   : > { %9181 = vperm.xlu0 %16781, %v8951_v3   ;;  %v8733_v3 = vld [vmem:[%s21806_s1 + $0x1278] sm:$0xff] }
 0x95c   : > { %11533 = vmatmul.mubr.bf16.gmra.mrb[0].mxu1 %v14890_v32  ;;  %v14954_v32 = vcombine.low %v8896_v14, %v8900_v19  ;;  %v14764_v14 = vcombine.low %v8705_v59, %v8709_v15  ;;  %v14773_v19 = vcombine.high %v8713_v58, %v8717_v61 }
 0x95d   : > { %11542 = vmatprep.mubr.bf16.mxu1 %v14899_v27  ;;  %v14963_v27 = vcombine.high %v8904_v50, %v8908_v5  ;;  %9191 = vperm.xlu0 %16781, %v8953_v47   ;;  %v8741_v47 = vld [vmem:[%s21806_s1 + $0x12b8] sm:$0xff] }
 0x961   : > { %9201 = vperm.xlu0 %16781, %v8955_v42   ;;  %v8749_v42 = vld [vmem:[%s21806_s1 + $0x12f8] sm:$0xff] }
 0x964   : > { %11543 = vmatmul.mubr.bf16.gmra.mrb[4].mxu1 %v14898_v2  ;;  %v14962_v2 = vcombine.low %v8904_v50, %v8908_v5  ;;  %v14780_v50 = vcombine.low %v8721_v40, %v8725_v60  ;;  %v14789_v5 = vcombine.high %v8729_v26, %v8733_v3 }
 0x965   : > { %11552 = vmatprep.mubr.bf16.mxu1 %v14907_v28  ;;  %v14717_v28 = vcombine.high %v8657_v45, %v8661_v8  ;;  %9211 = vperm.xlu0 %16781, %v8957_v55   ;;  %v8757_v55 = vld [vmem:[%s21806_s1 + $0x1338] sm:$0xff] }
 0x969   : > { %9221 = vperm.xlu0 %16781, %v8959_v23   ;;  %v8765_v23 = vld [vmem:[%s21806_s1 + $0x1378] sm:$0xff] }
 0x96c   : > { %11553 = vmatmul.mubr.bf16.gmra.mrb[8].mxu1 %v14906_v30  ;;  %v14716_v30 = vcombine.low %v8657_v45, %v8661_v8  ;;  %v14796_v45 = vcombine.low %v8737_v39, %v8741_v47  ;;  %v14805_v8 = vcombine.high %v8745_v7, %v8749_v42 }
 0x96d   : > { %11562 = vmatprep.mubr.bf16.mxu1 %v14915_v56  ;;  %v14725_v56 = vcombine.high %v8665_v35, %v8669_v0  ;;  %9231 = vperm.xlu0 %16781, %v8961_v49   ;;  %v8773_v49 = vld [vmem:[%s21806_s1 + $0x13b8] sm:$0xff] }
 0x971   : > { %9241 = vperm.xlu0 %16781, %v8963_v52   ;;  %v8781_v52 = vld [vmem:[%s21806_s1 + $0x13f8] sm:$0xff] }
 0x974   : > { %11563 = vmatmul.mubr.bf16.gmra.mrb[12].mxu1 %v14914_v18  ;;  %v14724_v18 = vcombine.low %v8665_v35, %v8669_v0  ;;  %v14812_v35 = vcombine.low %v8753_v48, %v8757_v55  ;;  %v14821_v0 = vcombine.high %v8761_v44, %v8765_v23 }
 0x975   : > { %11572 = vmatprep.mubr.bf16.mxu1 %v14923_v22  ;;  %v14733_v22 = vcombine.high %v8673_v9, %v8677_v62  ;;  %9251 = vperm.xlu0 %16781, %v8965_v34   ;;  %v8789_v34 = vld [vmem:[%s21806_s1 + $0x1438] sm:$0xff] }
 0x979   : > { %9261 = vperm.xlu0 %16781, %v8967_v16   ;;  %v8797_v16 = vld [vmem:[%s21806_s1 + $0x1478] sm:$0xff] }
 0x97c   : > { %11573 = vmatmul.mubr.bf16.gmra.mrb[16].mxu1 %v14922_v4  ;;  %v14732_v4 = vcombine.low %v8673_v9, %v8677_v62  ;;  %v14828_v9 = vcombine.low %v8769_v54, %v8773_v49  ;;  %v14837_v62 = vcombine.high %v8777_v11, %v8781_v52 }
 0x97d   : > { %11582 = vmatprep.mubr.bf16.mxu1 %v14931_v29  ;;  %v14741_v29 = vcombine.high %v8681_v6, %v8685_v20  ;;  %9271 = vperm.xlu0 %16781, %v8969_v10   ;;  %v8805_v10 = vld [vmem:[%s21806_s1 + $0x14b8] sm:$0xff] }
 0x981   : > { %9281 = vperm.xlu0 %16781, %v8971_v1   ;;  %v8813_v1 = vld [vmem:[%s21806_s1 + $0x14f8] sm:$0xff] }
 0x984   : > { %11583 = vmatmul.mubr.bf16.gmra.mrb[20].mxu1 %v14930_v17  ;;  %v14740_v17 = vcombine.low %v8681_v6, %v8685_v20  ;;  %v14844_v6 = vcombine.low %v8785_v43, %v8789_v34  ;;  %v14853_v20 = vcombine.high %v8793_v21, %v8797_v16 }
 0x985   : > { %11592 = vmatprep.mubr.bf16.mxu1 %v14939_v25  ;;  %v14749_v25 = vcombine.high %v8689_v46, %v8693_v51  ;;  %9291 = vperm.xlu0 %16781, %v8973_v33   ;;  %v14860_v46 = vcombine.low %v8801_v24, %v8805_v10  ;;  %v14869_v51 = vcombine.high %v8809_v13, %v8813_v1  ;;  %v8821_v33 = vld [vmem:[%s21806_s1 + $0x1538] sm:$0xff] }
 0x98c   : > { %11593 = vmatmul.mubr.bf16.gmra.mrb[24].mxu1 %v14938_v57  ;;  %v14756_v57 = vcombine.low %v8697_v36, %v8701_v12  ;;  %v8825_v36 = vld [vmem:[%s21806_s1 + $0x1558] sm:$0xff] }
 0x98d   : > { %11602 = vmatprep.mubr.bf16.mxu1 %v14947_v38  ;;  %v14765_v38 = vcombine.high %v8705_v59, %v8709_v15  ;;  %v8829_v12 = vld [vmem:[%s21806_s1 + $0x1578] sm:$0xff] }
 0x98e   : > { %v8833_v59 = vld [vmem:[%s21806_s1 + $0x1598] sm:$0xff] }
 0x98f   : > { %v8837_v15 = vld [vmem:[%s21806_s1 + $0x15b8] sm:$0xff] }
 0x994   : > { %11603 = vmatmul.mubr.bf16.gmra.mrb[28].mxu1 %v14946_v63  ;;  %v14772_v63 = vcombine.low %v8713_v58, %v8717_v61  ;;  %v8841_v58 = vld [vmem:[%s21806_s1 + $0x15d8] sm:$0xff] }
 0x995   : > { %11612 = vmatprep.mubr.bf16.mxu1 %v14955_v53  ;;  %v14781_v53 = vcombine.high %v8721_v40, %v8725_v60  ;;  %v8845_v61 = vld [vmem:[%s21806_s1 + $0x15f8] sm:$0xff] }
 0x996   : > { %v8849_v40 = vld [vmem:[%s21806_s1 + $0x1618] sm:$0xff] }
 0x997   : > { %v8853_v60 = vld [vmem:[%s21806_s1 + $0x1638] sm:$0xff] }
 0x99c   : > { %11613 = vmatmul.mubr.bf16.gmra.mrb[32].mxu1 %v14954_v32  ;;  %v14788_v32 = vcombine.low %v8729_v26, %v8733_v3  ;;  %v8857_v26 = vld [vmem:[%s21806_s1 + $0x1658] sm:$0xff] }
 0x99d   : > { %11622 = vmatprep.mubr.bf16.mxu1 %v14963_v27  ;;  %v14797_v27 = vcombine.high %v8737_v39, %v8741_v47  ;;  %v8861_v3 = vld [vmem:[%s21806_s1 + $0x1678] sm:$0xff] }
 0x99e   : > { %v8865_v39 = vld [vmem:[%s21806_s1 + $0x1698] sm:$0xff] }
 0x99f   : > { %v8869_v47 = vld [vmem:[%s21806_s1 + $0x16b8] sm:$0xff] }
 0x9a4   : > { %11623 = vmatmul.mubr.bf16.gmra.mrb[36].mxu1 %v14962_v2  ;;  %v14804_v2 = vcombine.low %v8745_v7, %v8749_v42  ;;  %v8873_v7 = vld [vmem:[%s21806_s1 + $0x16d8] sm:$0xff] }
 0x9a5   : > { %11665 = vmatprep.mubr.bf16.mxu1 %v14717_v28  ;;  %v14813_v28 = vcombine.high %v8753_v48, %v8757_v55  ;;  %v8877_v42 = vld [vmem:[%s21806_s1 + $0x16f8] sm:$0xff] }
 0x9a6   : > { %v8881_v48 = vld [vmem:[%s21806_s1 + $0x1718] sm:$0xff] }
 0x9a7   : > { %v8885_v55 = vld [vmem:[%s21806_s1 + $0x1738] sm:$0xff] }
 0x9ac   : > { %11666 = vmatmul.mubr.bf16.vlgmr.msra.gmra.mrb[168].mxu1 %v14716_v30  ;;  %v14820_v30 = vcombine.low %v8761_v44, %v8765_v23 }
 0x9ad   : > { %11675 = vmatprep.mubr.bf16.mxu1 %v14725_v56  ;;  %v14829_v56 = vcombine.high %v8769_v54, %v8773_v49 }
 0x9b4   : > { %11676 = vmatmul.mubr.bf16.gmra.mrb[172].mxu1 %v14724_v18  ;;  %v14836_v18 = vcombine.low %v8777_v11, %v8781_v52 }
 0x9b5   : > { %11685 = vmatprep.mubr.bf16.mxu1 %v14733_v22  ;;  %v14845_v22 = vcombine.high %v8785_v43, %v8789_v34  ;;  %v21318_v34 = vld [vmem:[%s21806_s1 + $0x1800] sm:$0xff] }
 0x9bc   : > { %11686 = vmatmul.mubr.bf16.gmra.mrb[176].mxu1 %v14732_v4  ;;  %v14852_v4 = vcombine.low %v8793_v21, %v8797_v16 }
 0x9bd   : > { %11695 = vmatprep.mubr.bf16.mxu1 %v14741_v29  ;;  %v14861_v29 = vcombine.high %v8801_v24, %v8805_v10 }
 0x9c4   : > { %11696 = vmatmul.mubr.bf16.gmra.mrb[180].mxu1 %v14740_v17  ;;  %v14868_v17 = vcombine.low %v8809_v13, %v8813_v1 }
 0x9c5   : > { %11705 = vmatprep.mubr.bf16.mxu1 %v14749_v25  ;;  %v14877_v25 = vcombine.high %v8817_v37, %v8821_v33 }
 0x9cc   : > { %11706 = vmatmul.mubr.bf16.gmra.mrb[184].mxu1 %v14748_v41  ;;  %v14876_v41 = vcombine.low %v8817_v37, %v8821_v33  ;;  %v14940_v37 = vcombine.low %v8881_v48, %v8885_v55 }
 0x9cd   : > { %11715 = vmatprep.mubr.bf16.mxu1 %v14757_v31  ;;  %v14885_v31 = vcombine.high %v8825_v36, %v8829_v12 }
 0x9d4   : > { %11716 = vmatmul.mubr.bf16.gmra.mrb[188].mxu1 %v14756_v57  ;;  %v14884_v57 = vcombine.low %v8825_v36, %v8829_v12 }
 0x9d5   : > { %11725 = vmatprep.mubr.bf16.mxu1 %v14765_v38  ;;  %v14893_v38 = vcombine.high %v8833_v59, %v8837_v15 }
 0x9dc   : > { %11726 = vmatmul.mubr.bf16.gmra.mrb[192].mxu1 %v14764_v14  ;;  %v14892_v14 = vcombine.low %v8833_v59, %v8837_v15 }
 0x9dd   : > { %11735 = vmatprep.mubr.bf16.mxu1 %v14773_v19  ;;  %v14901_v19 = vcombine.high %v8841_v58, %v8845_v61 }
 0x9e4   : > { %11736 = vmatmul.mubr.bf16.gmra.mrb[196].mxu1 %v14772_v63  ;;  %v14900_v63 = vcombine.low %v8841_v58, %v8845_v61 }
 0x9e5   : > { %11745 = vmatprep.mubr.bf16.mxu1 %v14781_v53  ;;  %v14909_v53 = vcombine.high %v8849_v40, %v8853_v60 }
 0x9ec   : > { %11746 = vmatmul.mubr.bf16.gmra.mrb[200].mxu1 %v14780_v50  ;;  %v14908_v50 = vcombine.low %v8849_v40, %v8853_v60  ;;  %v8901_v40 = vld [vmem:[%s21806_s1 + $0x17b8] sm:$0xff] }
 0x9ed   : > { %11755 = vmatprep.mubr.bf16.mxu1 %v14789_v5  ;;  %v14917_v5 = vcombine.high %v8857_v26, %v8861_v3 }
 0x9f4   : > { %11756 = vmatmul.mubr.bf16.gmra.mrb[204].mxu1 %v14788_v32  ;;  %v14916_v32 = vcombine.low %v8857_v26, %v8861_v3 }
 0x9f5   : > { %11765 = vmatprep.mubr.bf16.mxu1 %v14797_v27  ;;  %v14925_v27 = vcombine.high %v8865_v39, %v8869_v47 }
 0x9fc   : > { %11766 = vmatmul.mubr.bf16.gmra.mrb[208].mxu1 %v14796_v45  ;;  %v14924_v45 = vcombine.low %v8865_v39, %v8869_v47 }
 0x9fd   : > { %11775 = vmatprep.mubr.bf16.mxu1 %v14805_v8  ;;  %v14933_v8 = vcombine.high %v8873_v7, %v8877_v42 }
 0xa04   : > { %11776 = vmatmul.mubr.bf16.gmra.mrb[212].mxu1 %v14804_v2  ;;  %v8977_v2 = vpop.permute.xlu0 %8976 }
 0xa05   : > { %11785 = vmatprep.mubr.bf16.mxu1 %v14813_v28 }
 0xa08   : > { %v8992_v33 = vpop.permute.xlu0 %8991 }
 0xa0c   : > { %11786 = vmatmul.mubr.bf16.gmra.mrb[216].mxu1 %v14812_v35  ;;  %v14932_v35 = vcombine.low %v8873_v7, %v8877_v42  ;;  %v9002_v47 = vpop.permute.xlu0 %9001 }
 0xa0d   : > { %11795 = vmatprep.mubr.bf16.mxu1 %v14821_v0  ;;  %v8982_v0 = vpop.permute.xlu1 %8981 }
 0xa11   : > { %v8987_v10 = vpop.permute.xlu1 %8986 }
 0xa14   : > { %11796 = vmatmul.mubr.bf16.gmra.mrb[220].mxu1 %v14820_v30  ;;  %v14941_v30 = vcombine.high %v8881_v48, %v8885_v55 }
 0xa15   : > { %11805 = vmatprep.mubr.bf16.mxu1 %v14829_v56  ;;  %v8997_v60 = vpop.permute.xlu1 %8996 }
 0xa1c   : > { %11806 = vmatmul.mubr.bf16.gmra.mrb[224].mxu1 %v14828_v9 }
 0xa1d   : > { %11815 = vmatprep.mubr.bf16.mxu1 %v14837_v62 }
 0xa24   : > { %11816 = vmatmul.mubr.bf16.gmra.mrb[228].mxu1 %v14836_v18  ;;  %v21323_v18 = vld [vmem:[%s21806_s1 + $0x1820] sm:$0xff] }
 0xa25   : > { %11825 = vmatprep.mubr.bf16.mxu1 %v14845_v22  ;;  %v14966_v24 = vcombine.low %v21318_v34, %v21323_v18 }
 0xa2c   : > { %11826 = vmatmul.mubr.bf16.gmra.mrb[232].mxu1 %v14844_v6  ;;  %v8889_v6 = vld [vmem:[%s21806_s1 + $0x1758] sm:$0xff] }
 0xa2d   : > { %11835 = vmatprep.mubr.bf16.mxu1 %v14853_v20  ;;  %v8893_v20 = vld [vmem:[%s21806_s1 + $0x1778] sm:$0xff] }
 0xa2e   : > { %v14949_v12 = vcombine.high %v8889_v6, %v8893_v20  ;;  %v14948_v39 = vcombine.low %v8889_v6, %v8893_v20 }
 0xa34   : > { %11836 = vmatmul.mubr.bf16.gmra.mrb[236].mxu1 %v14852_v4 }
 0xa35   : > { %11845 = vmatprep.mubr.bf16.mxu1 %v14861_v29 }
 0xa3c   : > { %11846 = vmatmul.mubr.bf16.gmra.mrb[240].mxu1 %v14860_v46 }
 0xa3d   : > { %11855 = vmatprep.mubr.bf16.mxu1 %v14869_v51 }
 0xa44   : > { %11856 = vmatmul.mubr.bf16.gmra.mrb[244].mxu1 %v14868_v17 }
 0xa45   : > { %11865 = vmatprep.mubr.bf16.mxu1 %v14877_v25 }
 0xa4c   : > { %11866 = vmatmul.mubr.bf16.gmra.mrb[248].mxu1 %v14876_v41 }
 0xa4d   : > { %11875 = vmatprep.mubr.bf16.mxu1 %v14885_v31 }
 0xa54   : > { %11876 = vmatmul.mubr.bf16.gmra.mrb[252].mxu1 %v14884_v57 }
 0xa55   : > { %11885 = vmatprep.mubr.bf16.mxu1 %v14893_v38 }
 0xa5c   : > { %11886 = vmatmul.mubr.bf16.gmra.mrb[0].mxu1 %v14892_v14 }
 0xa5d   : > { %11895 = vmatprep.mubr.bf16.mxu1 %v14901_v19  ;;  %v8897_v19 = vld [vmem:[%s21806_s1 + $0x1798] sm:$0xff] }
 0xa5e   : > { %v14957_v42 = vcombine.high %v8897_v19, %v8901_v40 }
 0xa64   : > { %11896 = vmatmul.mubr.bf16.gmra.mrb[4].mxu1 %v14900_v63 }
 0xa65   : > { %11905 = vmatprep.mubr.bf16.mxu1 %v14909_v53 }
 0xa6c   : > { %11906 = vmatmul.mubr.bf16.gmra.mrb[8].mxu1 %v14908_v50 }
 0xa6d   : > { %11915 = vmatprep.mubr.bf16.mxu1 %v14917_v5 }
 0xa74   : > { %11916 = vmatmul.mubr.bf16.gmra.mrb[12].mxu1 %v14916_v32 }
 0xa75   : > { %11925 = vmatprep.mubr.bf16.mxu1 %v14925_v27 }
 0xa7c   : > { %11926 = vmatmul.mubr.bf16.gmra.mrb[16].mxu1 %v14924_v45 }
 0xa7d   : > { %11935 = vmatprep.mubr.bf16.mxu1 %v14933_v8 }
 0xa7f   : > { %v11667_v28 = vpop.f32.mrb[168].mxu1 }
 0xa80   : > { %v15508_v44 = vadd.f32 %v11667_v28, %v8977_v2  ;;  %v11669_v23 = vpop.f32.mrb[169].mxu1 }
 0xa81   : > { %v15509_v54 = vadd.f32 %v11669_v23, %v8977_v2  ;;  %v11671_v49 = vpop.f32.mrb[170].mxu1 }
 0xa82   : > { %v11986_v56 = vmul.f32 0.2, %v15508_v44  ;;  %v15510_v11 = vadd.f32 %v11671_v49, %v8982_v0  ;;  %v11673_v52 = vpop.f32.mrb[171].mxu1  ;;  %v9007_v49 = vpop.permute.xlu1 %9006 }
 0xa83   : > { %v11987_v9 = vmul.f32 0.2, %v15509_v54  ;;  %v15511_v62 = vadd.f32 %v11673_v52, %v8982_v0  ;;  %v8905_v0 = vld [vmem:[%s21806_s1 + $0x17d8] sm:$0xff] }
 0xa84   : > { %v11988_v43 = vmul.f32 0.2, %v15510_v11  ;;  %11936 = vmatmul.mubr.bf16.gmra.mrb[20].mxu1 %v14932_v35  ;;  %v12114_v21 = vmax.f32 %v15508_v44, %v11986_v56 }
 0xa85   : > { %v11989_v22 = vmul.f32 0.2, %v15511_v62  ;;  %11945 = vmatprep.mubr.bf16.mxu1 %v14941_v30  ;;  %v12115_v4 = vmax.f32 %v15509_v54, %v11987_v9  ;;  %v8909_v54 = vld [vmem:[%s21806_s1 + $0x17f8] sm:$0xff] }
 0xa86   : > { %v12116_v16 = vmax.f32 %v15510_v11, %v11988_v43  ;;  %v14956_v43 = vcombine.low %v8897_v19, %v8901_v40  ;;  %v14965_v20 = vcombine.high %v8905_v0, %v8909_v54 }
 0xa87   : > { %v12117_v29 = vmax.f32 %v15511_v62, %v11989_v22  ;;  %v11677_v13 = vpop.f32.mrb[172].mxu1  ;;  %v9012_v22 = vpop.permute.xlu0 %9011 }
 0xa88   : > { %v12242_v1 = vpack.c.bf16 %v12116_v16, %v12114_v21  ;;  %v15512_v46 = vadd.f32 %v11677_v13, %v8987_v10  ;;  %v11679_v51 = vpop.f32.mrb[173].mxu1 }
 0xa89   : > { %v15513_v17 = vadd.f32 %v11679_v51, %v8987_v10  ;;  %v11681_v25 = vpop.f32.mrb[174].mxu1  ;;  %v12243_v36 = vpack.c.bf16 %v12117_v29, %v12115_v4 }
 0xa8a   : > { %v11990_v41 = vmul.f32 0.2, %v15512_v46  ;;  %v15514_v31 = vadd.f32 %v11681_v25, %v8992_v33  ;;  %v11683_v59 = vpop.f32.mrb[175].mxu1 }
 0xa8b   : > { %v11991_v15 = vmul.f32 0.2, %v15513_v17  ;;  %v15515_v57 = vadd.f32 %v11683_v59, %v8992_v33  ;;  %12882 = vmatprep.subr.bf16.mxu1 %v12243_v36 }
 0xa8c   : > { %v11992_v38 = vmul.f32 0.2, %v15514_v31  ;;  %11946 = vmatmul.mubr.bf16.gmra.mrb[24].mxu1 %v14940_v37  ;;  %v12118_v61 = vmax.f32 %v15512_v46, %v11990_v41 }
 0xa8d   : > { %v11993_v58 = vmul.f32 0.2, %v15515_v57  ;;  %12883 = vmatpush1.bf16.msra.mxu1 %v12242_v1  ;;  %11955 = vmatprep.mubr.bf16.mxu1 %v14949_v12  ;;  %v12119_v63 = vmax.f32 %v15513_v17, %v11991_v15  ;;  %v9017_v17 = vpop.permute.xlu1 %9016  ;;  %v14964_v15 = vcombine.low %v8905_v0, %v8909_v54 }
 0xa8e   : > { %v12120_v14 = vmax.f32 %v15514_v31, %v11992_v38 }
 0xa8f   : > { %v12121_v53 = vmax.f32 %v15515_v57, %v11993_v58  ;;  %v11687_v26 = vpop.f32.mrb[176].mxu1  ;;  %v9022_v57 = vpop.permute.xlu0 %9021 }
 0xa90   : > { %v12244_v3 = vpack.c.bf16 %v12120_v14, %v12118_v61  ;;  %v15516_v50 = vadd.f32 %v11687_v26, %v8997_v60  ;;  %v11689_v5 = vpop.f32.mrb[177].mxu1  ;;  %v14967_v14 = vcombine.high %v21318_v34, %v21323_v18 }
 0xa91   : > { %v15517_v32 = vadd.f32 %v11689_v5, %v8997_v60  ;;  %v11691_v27 = vpop.f32.mrb[178].mxu1  ;;  %v12245_v7 = vpack.c.bf16 %v12121_v53, %v12119_v63 }
 0xa92   : > { %v11994_v45 = vmul.f32 0.2, %v15516_v50  ;;  %v15518_v8 = vadd.f32 %v11691_v27, %v9002_v47  ;;  %v11693_v48 = vpop.f32.mrb[179].mxu1 }
 0xa93   : > { %v11995_v55 = vmul.f32 0.2, %v15517_v32  ;;  %v15519_v2 = vadd.f32 %v11693_v48, %v9002_v47  ;;  %12884 = vmatprep.subr.bf16.mxu1 %v12245_v7 }
 0xa94   : > { %v11996_v28 = vmul.f32 0.2, %v15518_v8  ;;  %11956 = vmatmul.mubr.bf16.gmra.mrb[28].mxu1 %v14948_v39  ;;  %v12122_v23 = vmax.f32 %v15516_v50, %v11994_v45  ;;  %v9027_v39 = vpop.permute.xlu1 %9026 }
 0xa95   : > { %v11997_v44 = vmul.f32 0.2, %v15519_v2  ;;  %12885 = vmatpush1.bf16.msra.mxu1 %v12244_v3  ;;  %11965 = vmatprep.mubr.bf16.mxu1 %v14957_v42  ;;  %v12123_v30 = vmax.f32 %v15517_v32, %v11995_v55 }
 0xa96   : > { %v12124_v35 = vmax.f32 %v15518_v8, %v11996_v28  ;;  %v9032_v8 = vpop.permute.xlu0 %9031 }
 0xa97   : > { %v12125_v56 = vmax.f32 %v15519_v2, %v11997_v44  ;;  %v11697_v11 = vpop.f32.mrb[180].mxu1 }
 0xa98   : > { %v12246_v52 = vpack.c.bf16 %v12124_v35, %v12122_v23  ;;  %v15520_v9 = vadd.f32 %v11697_v11, %v9007_v49  ;;  %v11699_v62 = vpop.f32.mrb[181].mxu1  ;;  %v9037_v11 = vpop.permute.xlu1 %9036 }
 0xa99   : > { %v15521_v21 = vadd.f32 %v11699_v62, %v9007_v49  ;;  %v11701_v16 = vpop.f32.mrb[182].mxu1  ;;  %v12247_v6 = vpack.c.bf16 %v12125_v56, %v12123_v30 }
 0xa9a   : > { %v11998_v10 = vmul.f32 0.2, %v15520_v9  ;;  %v15522_v4 = vadd.f32 %v11701_v16, %v9012_v22  ;;  %v11703_v29 = vpop.f32.mrb[183].mxu1  ;;  %v9042_v16 = vpop.permute.xlu0 %9041 }
 0xa9b   : > { %v11999_v13 = vmul.f32 0.2, %v15521_v21  ;;  %v15523_v1 = vadd.f32 %v11703_v29, %v9012_v22  ;;  %12886 = vmatprep.subr.bf16.mxu1 %v12247_v6 }
 0xa9c   : > { %v12000_v46 = vmul.f32 0.2, %v15522_v4  ;;  %11966 = vmatmul.mubr.bf16.gmra.mrb[32].mxu1 %v14956_v43  ;;  %v12126_v37 = vmax.f32 %v15520_v9, %v11998_v10 }
 0xa9d   : > { %v12001_v51 = vmul.f32 0.2, %v15523_v1  ;;  %12887 = vmatpush1.bf16.msra.mxu1 %v12246_v52  ;;  %11975 = vmatprep.mubr.bf16.mxu1 %v14965_v20  ;;  %v12127_v25 = vmax.f32 %v15521_v21, %v11999_v13 }
 0xa9e   : > { %v12128_v33 = vmax.f32 %v15522_v4, %v12000_v46 }
 0xa9f   : > { %v12129_v36 = vmax.f32 %v15523_v1, %v12001_v51  ;;  %v11707_v12 = vpop.f32.mrb[184].mxu1 }
 0xaa0   : > { %v12248_v41 = vpack.c.bf16 %v12128_v33, %v12126_v37  ;;  %v15524_v31 = vadd.f32 %v11707_v12, %v9017_v17  ;;  %v11709_v59 = vpop.f32.mrb[185].mxu1 }
 0xaa1   : > { %v15525_v38 = vadd.f32 %v11709_v59, %v9017_v17  ;;  %v11711_v58 = vpop.f32.mrb[186].mxu1  ;;  %v12249_v61 = vpack.c.bf16 %v12129_v36, %v12127_v25  ;;  %v9047_v25 = vpop.permute.xlu1 %9046 }
 0xaa2   : > { %v12002_v19 = vmul.f32 0.2, %v15524_v31  ;;  %v15526_v40 = vadd.f32 %v11711_v58, %v9022_v57  ;;  %v11713_v60 = vpop.f32.mrb[187].mxu1 }
 0xaa3   : > { %v12003_v63 = vmul.f32 0.2, %v15525_v38  ;;  %v15527_v53 = vadd.f32 %v11713_v60, %v9022_v57  ;;  %12888 = vmatprep.subr.bf16.mxu1 %v12249_v61  ;;  %v9052_v57 = vpop.permute.xlu0 %9051 }
 0xaa4   : > { %v12004_v26 = vmul.f32 0.2, %v15526_v40  ;;  %11976 = vmatmul.mubr.bf16.gmra.mrb[36].mxu1 %v14964_v15  ;;  %v12130_v50 = vmax.f32 %v15524_v31, %v12002_v19 }
 0xaa5   : > { %v12005_v3 = vmul.f32 0.2, %v15527_v53  ;;  %12889 = vmatpush1.bf16.msra.mxu1 %v12248_v41  ;;  %12914 = vmatprep.mubr.bf16.mxu1 %v14967_v14  ;;  %v12131_v47 = vmax.f32 %v15525_v38, %v12003_v63 }
 0xaa6   : > { %v12132_v5 = vmax.f32 %v15526_v40, %v12004_v26 }
 0xaa7   : > { %v12133_v32 = vmax.f32 %v15527_v53, %v12005_v3  ;;  %v11717_v27 = vpop.f32.mrb[188].mxu1 }
 0xaa8   : > { %v12250_v7 = vpack.c.bf16 %v12132_v5, %v12130_v50  ;;  %v15528_v42 = vadd.f32 %v11717_v27, %v9027_v39  ;;  %v11719_v45 = vpop.f32.mrb[189].mxu1  ;;  %v9057_v5 = vpop.permute.xlu1 %9056 }
 0xaa9   : > { %v15529_v48 = vadd.f32 %v11719_v45, %v9027_v39  ;;  %v11721_v55 = vpop.f32.mrb[190].mxu1  ;;  %v12251_v2 = vpack.c.bf16 %v12133_v32, %v12131_v47  ;;  %v9062_v45 = vpop.permute.xlu0 %9061 }
 0xaaa   : > { %v12006_v28 = vmul.f32 0.2, %v15528_v42  ;;  %v15530_v44 = vadd.f32 %v11721_v55, %v9032_v8  ;;  %v11723_v23 = vpop.f32.mrb[191].mxu1 }
 0xaab   : > { %v12007_v35 = vmul.f32 0.2, %v15529_v48  ;;  %v15531_v0 = vadd.f32 %v11723_v23, %v9032_v8  ;;  %12890 = vmatprep.subr.bf16.mxu1 %v12251_v2 }
 0xaac   : > { %v12008_v54 = vmul.f32 0.2, %v15530_v44  ;;  %12891 = vmatpush1.bf16.msra.mxu1 %v12250_v7  ;;  %v12134_v30 = vmax.f32 %v15528_v42, %v12006_v28 }
 0xaad   : > { %v12009_v49 = vmul.f32 0.2, %v15531_v0  ;;  %v12135_v52 = vmax.f32 %v15529_v48, %v12007_v35 }
 0xaae   : > { %v12136_v56 = vmax.f32 %v15530_v44, %v12008_v54 }
 0xaaf   : > { %v12137_v9 = vmax.f32 %v15531_v0, %v12009_v49  ;;  %v11727_v62 = vpop.f32.mrb[192].mxu1 }
 0xab0   : > { %v12252_v43 = vpack.c.bf16 %v12136_v56, %v12134_v30  ;;  %v15532_v22 = vadd.f32 %v11727_v62, %v9037_v11  ;;  %v11729_v21 = vpop.f32.mrb[193].mxu1  ;;  %v9067_v56 = vpop.permute.xlu1 %9066 }
 0xab1   : > { %v15533_v6 = vadd.f32 %v11729_v21, %v9037_v11  ;;  %v11731_v20 = vpop.f32.mrb[194].mxu1  ;;  %v12253_v10 = vpack.c.bf16 %v12137_v9, %v12135_v52  ;;  %v9072_v21 = vpop.permute.xlu0 %9071 }
 0xab2   : > { %v12010_v4 = vmul.f32 0.2, %v15532_v22  ;;  %v15534_v29 = vadd.f32 %v11731_v20, %v9042_v16  ;;  %v11733_v13 = vpop.f32.mrb[195].mxu1 }
 0xab3   : > { %v12011_v1 = vmul.f32 0.2, %v15533_v6  ;;  %v15535_v46 = vadd.f32 %v11733_v13, %v9042_v16  ;;  %12892 = vmatprep.subr.bf16.mxu1 %v12253_v10 }
 0xab4   : > { %v12012_v51 = vmul.f32 0.2, %v15534_v29  ;;  %12893 = vmatpush1.bf16.msra.mxu1 %v12252_v43  ;;  %v12138_v33 = vmax.f32 %v15532_v22, %v12010_v4 }
 0xab5   : > { %v12013_v37 = vmul.f32 0.2, %v15535_v46  ;;  %v12139_v36 = vmax.f32 %v15533_v6, %v12011_v1 }
 0xab6   : > { %v12140_v17 = vmax.f32 %v15534_v29, %v12012_v51 }
 0xab7   : > { %v12141_v12 = vmax.f32 %v15535_v46, %v12013_v37  ;;  %v11737_v41 = vpop.f32.mrb[196].mxu1 }
 0xab8   : > { %v12254_v31 = vpack.c.bf16 %v12140_v17, %v12138_v33  ;;  %v15536_v59 = vadd.f32 %v11737_v41, %v9047_v25  ;;  %v11739_v15 = vpop.f32.mrb[197].mxu1  ;;  %v9077_v17 = vpop.permute.xlu1 %9076 }
 0xab9   : > { %v15537_v38 = vadd.f32 %v11739_v15, %v9047_v25  ;;  %v11741_v58 = vpop.f32.mrb[198].mxu1  ;;  %v12255_v61 = vpack.c.bf16 %v12141_v12, %v12139_v36  ;;  %v9082_v15 = vpop.permute.xlu0 %9081 }
 0xaba   : > { %v12014_v14 = vmul.f32 0.2, %v15536_v59  ;;  %v15538_v19 = vadd.f32 %v11741_v58, %v9052_v57  ;;  %v11743_v40 = vpop.f32.mrb[199].mxu1 }
 0xabb   : > { %v12015_v60 = vmul.f32 0.2, %v15537_v38  ;;  %v15539_v63 = vadd.f32 %v11743_v40, %v9052_v57  ;;  %12894 = vmatprep.subr.bf16.mxu1 %v12255_v61 }
 0xabc   : > { %v12016_v53 = vmul.f32 0.2, %v15538_v19  ;;  %12895 = vmatpush1.bf16.msra.mxu1 %v12254_v31  ;;  %v12142_v3 = vmax.f32 %v15536_v59, %v12014_v14 }
 0xabd   : > { %v12017_v26 = vmul.f32 0.2, %v15539_v63  ;;  %v12143_v39 = vmax.f32 %v15537_v38, %v12015_v60 }
 0xabe   : > { %v12144_v50 = vmax.f32 %v15538_v19, %v12016_v53 }
 0xabf   : > { %v12145_v47 = vmax.f32 %v15539_v63, %v12017_v26  ;;  %v11747_v32 = vpop.f32.mrb[200].mxu1 }
 0xac0   : > { %v12256_v27 = vpack.c.bf16 %v12144_v50, %v12142_v3  ;;  %v15540_v7 = vadd.f32 %v11747_v32, %v9057_v5  ;;  %v11749_v42 = vpop.f32.mrb[201].mxu1  ;;  %v9087_v50 = vpop.permute.xlu1 %9086 }
 0xac1   : > { %v15541_v8 = vadd.f32 %v11749_v42, %v9057_v5  ;;  %v11751_v48 = vpop.f32.mrb[202].mxu1  ;;  %v12257_v55 = vpack.c.bf16 %v12145_v47, %v12143_v39  ;;  %v9092_v42 = vpop.permute.xlu0 %9091 }
 0xac2   : > { %v12018_v2 = vmul.f32 0.2, %v15540_v7  ;;  %v15542_v28 = vadd.f32 %v11751_v48, %v9062_v45  ;;  %v11753_v44 = vpop.f32.mrb[203].mxu1 }
 0xac3   : > { %v12019_v23 = vmul.f32 0.2, %v15541_v8  ;;  %v15543_v35 = vadd.f32 %v11753_v44, %v9062_v45  ;;  %12896 = vmatprep.subr.bf16.mxu1 %v12257_v55 }
 0xac4   : > { %v12020_v0 = vmul.f32 0.2, %v15542_v28  ;;  %12897 = vmatpush1.bf16.msra.mxu1 %v12256_v27  ;;  %v12146_v49 = vmax.f32 %v15540_v7, %v12018_v2 }
 0xac5   : > { %v12021_v54 = vmul.f32 0.2, %v15543_v35  ;;  %v12147_v11 = vmax.f32 %v15541_v8, %v12019_v23 }
 0xac6   : > { %v12148_v30 = vmax.f32 %v15542_v28, %v12020_v0 }
 0xac7   : > { %v12149_v52 = vmax.f32 %v15543_v35, %v12021_v54  ;;  %v11757_v9 = vpop.f32.mrb[204].mxu1 }
 0xac8   : > { %v12258_v62 = vpack.c.bf16 %v12148_v30, %v12146_v49  ;;  %v15544_v43 = vadd.f32 %v11757_v9, %v9067_v56  ;;  %v11759_v22 = vpop.f32.mrb[205].mxu1  ;;  %v9097_v30 = vpop.permute.xlu1 %9096 }
 0xac9   : > { %v15545_v16 = vadd.f32 %v11759_v22, %v9067_v56  ;;  %v11761_v6 = vpop.f32.mrb[206].mxu1  ;;  %v12259_v20 = vpack.c.bf16 %v12149_v52, %v12147_v11  ;;  %v9102_v22 = vpop.permute.xlu0 %9101 }
 0xaca   : > { %v12022_v10 = vmul.f32 0.2, %v15544_v43  ;;  %v15546_v4 = vadd.f32 %v11761_v6, %v9072_v21  ;;  %v11763_v29 = vpop.f32.mrb[207].mxu1 }
 0xacb   : > { %v12023_v13 = vmul.f32 0.2, %v15545_v16  ;;  %v15547_v1 = vadd.f32 %v11763_v29, %v9072_v21  ;;  %12898 = vmatprep.subr.bf16.mxu1 %v12259_v20 }
 0xacc   : > { %v12024_v46 = vmul.f32 0.2, %v15546_v4  ;;  %12899 = vmatpush1.bf16.msra.mxu1 %v12258_v62  ;;  %v12150_v37 = vmax.f32 %v15544_v43, %v12022_v10 }
 0xacd   : > { %v12025_v51 = vmul.f32 0.2, %v15547_v1  ;;  %v12151_v25 = vmax.f32 %v15545_v16, %v12023_v13 }
 0xace   : > { %v12152_v33 = vmax.f32 %v15546_v4, %v12024_v46 }
 0xacf   : > { %v12153_v36 = vmax.f32 %v15547_v1, %v12025_v51  ;;  %v11767_v12 = vpop.f32.mrb[208].mxu1 }
 0xad0   : > { %v12260_v41 = vpack.c.bf16 %v12152_v33, %v12150_v37  ;;  %v15548_v31 = vadd.f32 %v11767_v12, %v9077_v17  ;;  %v11769_v59 = vpop.f32.mrb[209].mxu1  ;;  %v9107_v33 = vpop.permute.xlu1 %9106 }
 0xad1   : > { %v15549_v57 = vadd.f32 %v11769_v59, %v9077_v17  ;;  %v11771_v38 = vpop.f32.mrb[210].mxu1  ;;  %v12261_v58 = vpack.c.bf16 %v12153_v36, %v12151_v25  ;;  %v9112_v59 = vpop.permute.xlu0 %9111 }
 0xad2   : > { %v12026_v61 = vmul.f32 0.2, %v15548_v31  ;;  %v15550_v14 = vadd.f32 %v11771_v38, %v9082_v15  ;;  %v11773_v19 = vpop.f32.mrb[211].mxu1 }
 0xad3   : > { %v12027_v40 = vmul.f32 0.2, %v15549_v57  ;;  %v15551_v60 = vadd.f32 %v11773_v19, %v9082_v15  ;;  %12900 = vmatprep.subr.bf16.mxu1 %v12261_v58 }
 0xad4   : > { %v12028_v63 = vmul.f32 0.2, %v15550_v14  ;;  %12901 = vmatpush1.bf16.msra.mxu1 %v12260_v41  ;;  %v12154_v26 = vmax.f32 %v15548_v31, %v12026_v61 }
 0xad5   : > { %v12029_v53 = vmul.f32 0.2, %v15551_v60  ;;  %v12155_v5 = vmax.f32 %v15549_v57, %v12027_v40 }
 0xad6   : > { %v12156_v3 = vmax.f32 %v15550_v14, %v12028_v63 }
 0xad7   : > { %v12157_v39 = vmax.f32 %v15551_v60, %v12029_v53  ;;  %v11777_v47 = vpop.f32.mrb[212].mxu1 }
 0xad8   : > { %v12262_v32 = vpack.c.bf16 %v12156_v3, %v12154_v26  ;;  %v15552_v27 = vadd.f32 %v11777_v47, %v9087_v50  ;;  %v11779_v7 = vpop.f32.mrb[213].mxu1  ;;  %v9117_v3 = vpop.permute.xlu1 %9116 }
 0xad9   : > { %v15553_v45 = vadd.f32 %v11779_v7, %v9087_v50  ;;  %v11781_v8 = vpop.f32.mrb[214].mxu1  ;;  %v12263_v48 = vpack.c.bf16 %v12157_v39, %v12155_v5  ;;  %v9122_v7 = vpop.permute.xlu0 %9121 }
 0xada   : > { %v12030_v55 = vmul.f32 0.2, %v15552_v27  ;;  %v15554_v2 = vadd.f32 %v11781_v8, %v9092_v42  ;;  %v11783_v28 = vpop.f32.mrb[215].mxu1 }
 0xadb   : > { %v12031_v44 = vmul.f32 0.2, %v15553_v45  ;;  %v15555_v23 = vadd.f32 %v11783_v28, %v9092_v42  ;;  %12902 = vmatprep.subr.bf16.mxu1 %v12263_v48 }
 0xadc   : > { %v12032_v35 = vmul.f32 0.2, %v15554_v2  ;;  %12903 = vmatpush1.bf16.msra.mxu1 %v12262_v32  ;;  %v12158_v54 = vmax.f32 %v15552_v27, %v12030_v55 }
 0xadd   : > { %v12033_v0 = vmul.f32 0.2, %v15555_v23  ;;  %v12159_v56 = vmax.f32 %v15553_v45, %v12031_v44 }
 0xade   : > { %v12160_v49 = vmax.f32 %v15554_v2, %v12032_v35 }
 0xadf   : > { %v12161_v11 = vmax.f32 %v15555_v23, %v12033_v0  ;;  %v11787_v52 = vpop.f32.mrb[216].mxu1 }
 0xae0   : > { %v12264_v9 = vpack.c.bf16 %v12160_v49, %v12158_v54  ;;  %v15556_v62 = vadd.f32 %v11787_v52, %v9097_v30  ;;  %v11789_v43 = vpop.f32.mrb[217].mxu1  ;;  %v9127_v49 = vpop.permute.xlu1 %9126 }
 0xae1   : > { %v15557_v21 = vadd.f32 %v11789_v43, %v9097_v30  ;;  %v11791_v16 = vpop.f32.mrb[218].mxu1  ;;  %v12265_v6 = vpack.c.bf16 %v12161_v11, %v12159_v56  ;;  %v9132_v43 = vpop.permute.xlu0 %9131 }
 0xae2   : > { %v12034_v20 = vmul.f32 0.2, %v15556_v62  ;;  %v15558_v10 = vadd.f32 %v11791_v16, %v9102_v22  ;;  %v11793_v4 = vpop.f32.mrb[219].mxu1 }
 0xae3   : > { %v12035_v29 = vmul.f32 0.2, %v15557_v21  ;;  %v15559_v13 = vadd.f32 %v11793_v4, %v9102_v22  ;;  %12904 = vmatprep.subr.bf16.mxu1 %v12265_v6 }
 0xae4   : > { %v12036_v1 = vmul.f32 0.2, %v15558_v10  ;;  %12905 = vmatpush1.bf16.msra.mxu1 %v12264_v9  ;;  %v12162_v51 = vmax.f32 %v15556_v62, %v12034_v20 }
 0xae5   : > { %v12037_v46 = vmul.f32 0.2, %v15559_v13  ;;  %v12163_v17 = vmax.f32 %v15557_v21, %v12035_v29 }
 0xae6   : > { %v12164_v37 = vmax.f32 %v15558_v10, %v12036_v1 }
 0xae7   : > { %v12165_v25 = vmax.f32 %v15559_v13, %v12037_v46  ;;  %v11797_v36 = vpop.f32.mrb[220].mxu1 }
 0xae8   : > { %v12266_v12 = vpack.c.bf16 %v12164_v37, %v12162_v51  ;;  %v15560_v41 = vadd.f32 %v11797_v36, %v9107_v33  ;;  %v11799_v31 = vpop.f32.mrb[221].mxu1  ;;  %v9137_v37 = vpop.permute.xlu1 %9136 }
 0xae9   : > { %v15561_v15 = vadd.f32 %v11799_v31, %v9107_v33  ;;  %v11801_v57 = vpop.f32.mrb[222].mxu1  ;;  %v12267_v38 = vpack.c.bf16 %v12165_v25, %v12163_v17  ;;  %v9142_v31 = vpop.permute.xlu0 %9141 }
 0xaea   : > { %v12038_v58 = vmul.f32 0.2, %v15560_v41  ;;  %v15562_v61 = vadd.f32 %v11801_v57, %v9112_v59  ;;  %v11803_v14 = vpop.f32.mrb[223].mxu1 }
 0xaeb   : > { %v12039_v19 = vmul.f32 0.2, %v15561_v15  ;;  %v15563_v40 = vadd.f32 %v11803_v14, %v9112_v59  ;;  %12906 = vmatprep.subr.bf16.mxu1 %v12267_v38  ;;  %v12310_v38 = vld [vmem:[%s21806_s1 + $0x1840] sm:$0xff] }
 0xaec   : > { %v12040_v60 = vmul.f32 0.2, %v15562_v61  ;;  %12907 = vmatpush1.bf16.msra.mxu1 %v12266_v12  ;;  %v12166_v53 = vmax.f32 %v15560_v41, %v12038_v58  ;;  %v12312_v58 = vld [vmem:[%s21806_s1 + $0x1860] sm:$0xff] }
 0xaed   : > { %v12041_v63 = vmul.f32 0.2, %v15563_v40  ;;  %v12167_v50 = vmax.f32 %v15561_v15, %v12039_v19 }
 0xaee   : > { %v12168_v26 = vmax.f32 %v15562_v61, %v12040_v60 }
 0xaef   : > { %v12169_v5 = vmax.f32 %v15563_v40, %v12041_v63  ;;  %v11807_v39 = vpop.f32.mrb[224].mxu1 }
 0xaf0   : > { %v12268_v47 = vpack.c.bf16 %v12168_v26, %v12166_v53  ;;  %v15564_v32 = vadd.f32 %v11807_v39, %v9117_v3  ;;  %v11809_v27 = vpop.f32.mrb[225].mxu1  ;;  %v14971_v53 = vcombine.high %v12310_v38, %v12312_v58 }
 0xaf1   : > { %v15565_v42 = vadd.f32 %v11809_v27, %v9117_v3  ;;  %v11811_v45 = vpop.f32.mrb[226].mxu1  ;;  %v12269_v8 = vpack.c.bf16 %v12169_v5, %v12167_v50  ;;  %v9147_v5 = vpop.permute.xlu1 %9146 }
 0xaf2   : > { %v12042_v48 = vmul.f32 0.2, %v15564_v32  ;;  %v15566_v55 = vadd.f32 %v11811_v45, %v9122_v7  ;;  %v11813_v2 = vpop.f32.mrb[227].mxu1  ;;  %v9152_v45 = vpop.permute.xlu0 %9151 }
 0xaf3   : > { %v12043_v28 = vmul.f32 0.2, %v15565_v42  ;;  %v15567_v44 = vadd.f32 %v11813_v2, %v9122_v7  ;;  %12908 = vmatprep.subr.bf16.mxu1 %v12269_v8  ;;  %v12314_v2 = vld [vmem:[%s21806_s1 + $0x1880] sm:$0xff] }
 0xaf4   : > { %v12044_v23 = vmul.f32 0.2, %v15566_v55  ;;  %12909 = vmatpush1.bf16.msra.mxu1 %v12268_v47  ;;  %v12170_v0 = vmax.f32 %v15564_v32, %v12042_v48 }
 0xaf5   : > { %v12045_v35 = vmul.f32 0.2, %v15567_v44  ;;  %v12171_v30 = vmax.f32 %v15565_v42, %v12043_v28  ;;  %v12316_v28 = vld [vmem:[%s21806_s1 + $0x18a0] sm:$0xff] }
 0xaf6   : > { %v12172_v54 = vmax.f32 %v15566_v55, %v12044_v23 }
 0xaf7   : > { %v12173_v56 = vmax.f32 %v15567_v44, %v12045_v35  ;;  %v11817_v11 = vpop.f32.mrb[228].mxu1  ;;  %v14970_v35 = vcombine.low %v12310_v38, %v12312_v58 }
 0xaf8   : > { %v12270_v52 = vpack.c.bf16 %v12172_v54, %v12170_v0  ;;  %v15568_v9 = vadd.f32 %v11817_v11, %v9127_v49  ;;  %v11819_v62 = vpop.f32.mrb[229].mxu1  ;;  %v14975_v54 = vcombine.high %v12314_v2, %v12316_v28  ;;  %v9157_v11 = vpop.permute.xlu1 %9156 }
 0xaf9   : > { %v15569_v22 = vadd.f32 %v11819_v62, %v9127_v49  ;;  %v11821_v21 = vpop.f32.mrb[230].mxu1  ;;  %v12271_v16 = vpack.c.bf16 %v12173_v56, %v12171_v30 }
 0xafa   : > { %v12046_v6 = vmul.f32 0.2, %v15568_v9  ;;  %v15570_v20 = vadd.f32 %v11821_v21, %v9132_v43  ;;  %v11823_v10 = vpop.f32.mrb[231].mxu1 }
 0xafb   : > { %v12047_v4 = vmul.f32 0.2, %v15569_v22  ;;  %v15571_v29 = vadd.f32 %v11823_v10, %v9132_v43  ;;  %12910 = vmatprep.subr.bf16.mxu1 %v12271_v16  ;;  %v9162_v16 = vpop.permute.xlu0 %9161 }
 0xafc   : > { %v12048_v13 = vmul.f32 0.2, %v15570_v20  ;;  %12911 = vmatpush1.bf16.msra.mxu1 %v12270_v52  ;;  %v12174_v46 = vmax.f32 %v15568_v9, %v12046_v6 }
 0xafd   : > { %v12049_v1 = vmul.f32 0.2, %v15571_v29  ;;  %v12175_v33 = vmax.f32 %v15569_v22, %v12047_v4  ;;  %v12318_v4 = vld [vmem:[%s21806_s1 + $0x18c0] sm:$0xff] }
 0xafe   : > { %v12176_v51 = vmax.f32 %v15570_v20, %v12048_v13 }
 0xaff   : > { %v12177_v17 = vmax.f32 %v15571_v29, %v12049_v1  ;;  %v11827_v25 = vpop.f32.mrb[232].mxu1  ;;  %v12320_v29 = vld [vmem:[%s21806_s1 + $0x18e0] sm:$0xff] }
 0xb00   : > { %v12272_v36 = vpack.c.bf16 %v12176_v51, %v12174_v46  ;;  %v15572_v12 = vadd.f32 %v11827_v25, %v9137_v37  ;;  %v11829_v41 = vpop.f32.mrb[233].mxu1  ;;  %v14979_v25 = vcombine.high %v12318_v4, %v12320_v29 }
 0xb01   : > { %v15573_v59 = vadd.f32 %v11829_v41, %v9137_v37  ;;  %v11831_v15 = vpop.f32.mrb[234].mxu1  ;;  %v12273_v57 = vpack.c.bf16 %v12177_v17, %v12175_v33  ;;  %v14974_v33 = vcombine.low %v12314_v2, %v12316_v28 }
 0xb02   : > { %v12050_v61 = vmul.f32 0.2, %v15572_v12  ;;  %v15574_v14 = vadd.f32 %v11831_v15, %v9142_v31  ;;  %v11833_v19 = vpop.f32.mrb[235].mxu1 }
 0xb03   : > { %v12051_v40 = vmul.f32 0.2, %v15573_v59  ;;  %v15575_v60 = vadd.f32 %v11833_v19, %v9142_v31  ;;  %12912 = vmatprep.subr.bf16.mxu1 %v12273_v57  ;;  %v9167_v31 = vpop.permute.xlu1 %9166 }
 0xb04   : > { %v12052_v63 = vmul.f32 0.2, %v15574_v14  ;;  %12913 = vmatpush1.bf16.msra.mxu1 %v12272_v36  ;;  %v12178_v3 = vmax.f32 %v15572_v12, %v12050_v61 }
 0xb05   : > { %v12053_v26 = vmul.f32 0.2, %v15575_v60  ;;  %v12179_v39 = vmax.f32 %v15573_v59, %v12051_v40 }
 0xb06   : > { %v12180_v50 = vmax.f32 %v15574_v14, %v12052_v63  ;;  %v9172_v14 = vpop.permute.xlu0 %9171  ;;  %v12322_v63 = vld [vmem:[%s21806_s1 + $0x1900] sm:$0xff] }
 0xb07   : > { %v12181_v47 = vmax.f32 %v15575_v60, %v12053_v26  ;;  %v11837_v32 = vpop.f32.mrb[236].mxu1  ;;  %12915 = vmatmul.mubr.bf16.vlgmr.msra.gmra.mrb[40].mxu1 %v14966_v24 }
 0xb08   : > { %v12274_v27 = vpack.c.bf16 %v12180_v50, %v12178_v3  ;;  %v15576_v7 = vadd.f32 %v11837_v32, %v9147_v5  ;;  %v11839_v42 = vpop.f32.mrb[237].mxu1  ;;  %12924 = vmatprep.mubr.bf16.mxu1 %v14971_v53  ;;  %v12324_v53 = vld [vmem:[%s21806_s1 + $0x1920] sm:$0xff] }
 0xb09   : > { %v15577_v8 = vadd.f32 %v11839_v42, %v9147_v5  ;;  %v11841_v48 = vpop.f32.mrb[238].mxu1  ;;  %v12275_v55 = vpack.c.bf16 %v12181_v47, %v12179_v39  ;;  %v14978_v47 = vcombine.low %v12318_v4, %v12320_v29 }
 0xb0a   : > { %v12054_v44 = vmul.f32 0.2, %v15576_v7  ;;  %v15578_v23 = vadd.f32 %v11841_v48, %v9152_v45  ;;  %v11843_v34 = vpop.f32.mrb[239].mxu1 }
 0xb0b   : > { %v12055_v18 = vmul.f32 0.2, %v15577_v8  ;;  %v15579_v24 = vadd.f32 %v11843_v34, %v9152_v45  ;;  %13075 = vmatprep.subr.bf16.mxu1 %v12275_v55  ;;  %v9182_v34 = vpop.permute.xlu0 %9181 }
 0xb0c   : > { %v12056_v0 = vmul.f32 0.2, %v15578_v23  ;;  %13076 = vmatpush1.bf16.msra.mxu1 %v12274_v27  ;;  %v12182_v30 = vmax.f32 %v15576_v7, %v12054_v44  ;;  %v14983_v27 = vcombine.high %v12322_v63, %v12324_v53 }
 0xb0d   : > { %v12057_v49 = vmul.f32 0.2, %v15579_v24  ;;  %v12183_v52 = vmax.f32 %v15577_v8, %v12055_v18  ;;  %v9177_v8 = vpop.permute.xlu1 %9176 }
 0xb0e   : > { %v12184_v56 = vmax.f32 %v15578_v23, %v12056_v0  ;;  %v12326_v0 = vld [vmem:[%s21806_s1 + $0x1940] sm:$0xff] }
 0xb0f   : > { %v12185_v9 = vmax.f32 %v15579_v24, %v12057_v49  ;;  %v11847_v62 = vpop.f32.mrb[240].mxu1  ;;  %12925 = vmatmul.mubr.bf16.gmra.mrb[44].mxu1 %v14970_v35 }
 0xb10   : > { %v12276_v43 = vpack.c.bf16 %v12184_v56, %v12182_v30  ;;  %v15580_v22 = vadd.f32 %v11847_v62, %v9157_v11  ;;  %v11849_v21 = vpop.f32.mrb[241].mxu1  ;;  %12934 = vmatprep.mubr.bf16.mxu1 %v14975_v54  ;;  %v12328_v54 = vld [vmem:[%s21806_s1 + $0x1960] sm:$0xff] }
 0xb11   : > { %v15581_v6 = vadd.f32 %v11849_v21, %v9157_v11  ;;  %v11851_v20 = vpop.f32.mrb[242].mxu1  ;;  %v12277_v10 = vpack.c.bf16 %v12185_v9, %v12183_v52  ;;  %v14982_v9 = vcombine.low %v12322_v63, %v12324_v53 }
 0xb12   : > { %v12058_v13 = vmul.f32 0.2, %v15580_v22  ;;  %v15582_v1 = vadd.f32 %v11851_v20, %v9162_v16  ;;  %v11853_v46 = vpop.f32.mrb[243].mxu1 }
 0xb13   : > { %v12059_v51 = vmul.f32 0.2, %v15581_v6  ;;  %v15583_v37 = vadd.f32 %v11853_v46, %v9162_v16  ;;  %13077 = vmatprep.subr.bf16.mxu1 %v12277_v10  ;;  %v9192_v46 = vpop.permute.xlu0 %9191 }
 0xb14   : > { %v12060_v17 = vmul.f32 0.2, %v15582_v1  ;;  %13078 = vmatpush1.bf16.msra.mxu1 %v12276_v43  ;;  %v12186_v12 = vmax.f32 %v15580_v22, %v12058_v13  ;;  %v14987_v43 = vcombine.high %v12326_v0, %v12328_v54 }
 0xb15   : > { %v12061_v36 = vmul.f32 0.2, %v15583_v37  ;;  %v12187_v59 = vmax.f32 %v15581_v6, %v12059_v51  ;;  %v9187_v6 = vpop.permute.xlu1 %9186 }
 0xb16   : > { %v12188_v41 = vmax.f32 %v15582_v1, %v12060_v17  ;;  %v12330_v17 = vld [vmem:[%s21806_s1 + $0x1980] sm:$0xff] }
 0xb17   : > { %v12189_v15 = vmax.f32 %v15583_v37, %v12061_v36  ;;  %v11857_v57 = vpop.f32.mrb[244].mxu1  ;;  %12935 = vmatmul.mubr.bf16.gmra.mrb[48].mxu1 %v14974_v33 }
 0xb18   : > { %v12278_v38 = vpack.c.bf16 %v12188_v41, %v12186_v12  ;;  %v15584_v58 = vadd.f32 %v11857_v57, %v9167_v31  ;;  %v11859_v61 = vpop.f32.mrb[245].mxu1  ;;  %12944 = vmatprep.mubr.bf16.mxu1 %v14979_v25  ;;  %v12332_v25 = vld [vmem:[%s21806_s1 + $0x19a0] sm:$0xff] }
 0xb19   : > { %v15585_v19 = vadd.f32 %v11859_v61, %v9167_v31  ;;  %v11861_v40 = vpop.f32.mrb[246].mxu1  ;;  %v12279_v60 = vpack.c.bf16 %v12189_v15, %v12187_v59  ;;  %v14986_v15 = vcombine.low %v12326_v0, %v12328_v54 }
 0xb1a   : > { %v12062_v26 = vmul.f32 0.2, %v15584_v58  ;;  %v15586_v3 = vadd.f32 %v11861_v40, %v9172_v14  ;;  %v11863_v50 = vpop.f32.mrb[247].mxu1 }
 0xb1b   : > { %v12063_v5 = vmul.f32 0.2, %v15585_v19  ;;  %v15587_v39 = vadd.f32 %v11863_v50, %v9172_v14  ;;  %13079 = vmatprep.subr.bf16.mxu1 %v12279_v60  ;;  %v9202_v50 = vpop.permute.xlu0 %9201 }
 0xb1c   : > { %v12064_v32 = vmul.f32 0.2, %v15586_v3  ;;  %13080 = vmatpush1.bf16.msra.mxu1 %v12278_v38  ;;  %v12190_v42 = vmax.f32 %v15584_v58, %v12062_v26  ;;  %v14991_v38 = vcombine.high %v12330_v17, %v12332_v25 }
 0xb1d   : > { %v12065_v7 = vmul.f32 0.2, %v15587_v39  ;;  %v12191_v48 = vmax.f32 %v15585_v19, %v12063_v5  ;;  %v9197_v19 = vpop.permute.xlu1 %9196 }
 0xb1e   : > { %v12192_v45 = vmax.f32 %v15586_v3, %v12064_v32  ;;  %v12334_v32 = vld [vmem:[%s21806_s1 + $0x19c0] sm:$0xff] }
 0xb1f   : > { %v12193_v55 = vmax.f32 %v15587_v39, %v12065_v7  ;;  %v11867_v2 = vpop.f32.mrb[248].mxu1  ;;  %12945 = vmatmul.mubr.bf16.gmra.mrb[52].mxu1 %v14978_v47 }
 0xb20   : > { %v12280_v28 = vpack.c.bf16 %v12192_v45, %v12190_v42  ;;  %v15588_v44 = vadd.f32 %v11867_v2, %v9177_v8  ;;  %v11869_v23 = vpop.f32.mrb[249].mxu1  ;;  %12954 = vmatprep.mubr.bf16.mxu1 %v14983_v27  ;;  %v12336_v27 = vld [vmem:[%s21806_s1 + $0x19e0] sm:$0xff] }
 0xb21   : > { %v15589_v18 = vadd.f32 %v11869_v23, %v9177_v8  ;;  %v11871_v24 = vpop.f32.mrb[250].mxu1  ;;  %v12281_v35 = vpack.c.bf16 %v12193_v55, %v12191_v48  ;;  %v14990_v55 = vcombine.low %v12330_v17, %v12332_v25 }
 0xb22   : > { %v12066_v49 = vmul.f32 0.2, %v15588_v44  ;;  %v15590_v30 = vadd.f32 %v11871_v24, %v9182_v34  ;;  %v11873_v56 = vpop.f32.mrb[251].mxu1 }
 0xb23   : > { %v12067_v11 = vmul.f32 0.2, %v15589_v18  ;;  %v15591_v52 = vadd.f32 %v11873_v56, %v9182_v34  ;;  %13081 = vmatprep.subr.bf16.mxu1 %v12281_v35  ;;  %v9212_v56 = vpop.permute.xlu0 %9211 }
 0xb24   : > { %v12068_v62 = vmul.f32 0.2, %v15590_v30  ;;  %13082 = vmatpush1.bf16.msra.mxu1 %v12280_v28  ;;  %v12194_v21 = vmax.f32 %v15588_v44, %v12066_v49  ;;  %v14995_v28 = vcombine.high %v12334_v32, %v12336_v27 }
 0xb25   : > { %v12069_v22 = vmul.f32 0.2, %v15591_v52  ;;  %v12195_v20 = vmax.f32 %v15589_v18, %v12067_v11  ;;  %v9207_v18 = vpop.permute.xlu1 %9206 }
 0xb26   : > { %v12196_v16 = vmax.f32 %v15590_v30, %v12068_v62  ;;  %v12338_v62 = vld [vmem:[%s21806_s1 + $0x1a00] sm:$0xff] }
 0xb27   : > { %v12197_v10 = vmax.f32 %v15591_v52, %v12069_v22  ;;  %v11877_v4 = vpop.f32.mrb[252].mxu1  ;;  %12955 = vmatmul.mubr.bf16.gmra.mrb[56].mxu1 %v14982_v9 }
 0xb28   : > { %v12282_v29 = vpack.c.bf16 %v12196_v16, %v12194_v21  ;;  %v15592_v13 = vadd.f32 %v11877_v4, %v9187_v6  ;;  %v11879_v1 = vpop.f32.mrb[253].mxu1  ;;  %12964 = vmatprep.mubr.bf16.mxu1 %v14987_v43  ;;  %v12340_v43 = vld [vmem:[%s21806_s1 + $0x1a20] sm:$0xff] }
 0xb29   : > { %v15593_v51 = vadd.f32 %v11879_v1, %v9187_v6  ;;  %v11881_v37 = vpop.f32.mrb[254].mxu1  ;;  %v12283_v33 = vpack.c.bf16 %v12197_v10, %v12195_v20  ;;  %v14994_v10 = vcombine.low %v12334_v32, %v12336_v27 }
 0xb2a   : > { %v12070_v36 = vmul.f32 0.2, %v15592_v13  ;;  %v15594_v12 = vadd.f32 %v11881_v37, %v9192_v46  ;;  %v11883_v41 = vpop.f32.mrb[255].mxu1 }
 0xb2b   : > { %v12071_v31 = vmul.f32 0.2, %v15593_v51  ;;  %v15595_v59 = vadd.f32 %v11883_v41, %v9192_v46  ;;  %13083 = vmatprep.subr.bf16.mxu1 %v12283_v33  ;;  %v9222_v41 = vpop.permute.xlu0 %9221 }
 0xb2c   : > { %v12072_v57 = vmul.f32 0.2, %v15594_v12  ;;  %13084 = vmatpush1.bf16.msra.mxu1 %v12282_v29  ;;  %v12198_v61 = vmax.f32 %v15592_v13, %v12070_v36  ;;  %v14999_v29 = vcombine.high %v12338_v62, %v12340_v43 }
 0xb2d   : > { %v12073_v58 = vmul.f32 0.2, %v15595_v59  ;;  %v12199_v40 = vmax.f32 %v15593_v51, %v12071_v31  ;;  %v9217_v51 = vpop.permute.xlu1 %9216 }
 0xb2e   : > { %v12200_v14 = vmax.f32 %v15594_v12, %v12072_v57  ;;  %v12342_v57 = vld [vmem:[%s21806_s1 + $0x1a40] sm:$0xff] }
 0xb2f   : > { %v12201_v60 = vmax.f32 %v15595_v59, %v12073_v58  ;;  %v11887_v63 = vpop.f32.mrb[0].mxu1  ;;  %12965 = vmatmul.mubr.bf16.gmra.mrb[60].mxu1 %v14986_v15 }
 0xb30   : > { %v12284_v53 = vpack.c.bf16 %v12200_v14, %v12198_v61  ;;  %v15596_v26 = vadd.f32 %v11887_v63, %v9197_v19  ;;  %v11889_v3 = vpop.f32.mrb[1].mxu1  ;;  %12974 = vmatprep.mubr.bf16.mxu1 %v14991_v38  ;;  %v12344_v38 = vld [vmem:[%s21806_s1 + $0x1a60] sm:$0xff] }
 0xb31   : > { %v15597_v5 = vadd.f32 %v11889_v3, %v9197_v19  ;;  %v11891_v39 = vpop.f32.mrb[2].mxu1  ;;  %v12285_v47 = vpack.c.bf16 %v12201_v60, %v12199_v40  ;;  %v14998_v60 = vcombine.low %v12338_v62, %v12340_v43 }
 0xb32   : > { %v12074_v7 = vmul.f32 0.2, %v15596_v26  ;;  %v15598_v42 = vadd.f32 %v11891_v39, %v9202_v50  ;;  %v11893_v45 = vpop.f32.mrb[3].mxu1 }
 0xb33   : > { %v12075_v8 = vmul.f32 0.2, %v15597_v5  ;;  %v15599_v48 = vadd.f32 %v11893_v45, %v9202_v50  ;;  %13085 = vmatprep.subr.bf16.mxu1 %v12285_v47  ;;  %v9232_v45 = vpop.permute.xlu0 %9231 }
 0xb34   : > { %v12076_v2 = vmul.f32 0.2, %v15598_v42  ;;  %13086 = vmatpush1.bf16.msra.mxu1 %v12284_v53  ;;  %v12202_v23 = vmax.f32 %v15596_v26, %v12074_v7  ;;  %v15003_v53 = vcombine.high %v12342_v57, %v12344_v38 }
 0xb35   : > { %v12077_v44 = vmul.f32 0.2, %v15599_v48  ;;  %v12203_v24 = vmax.f32 %v15597_v5, %v12075_v8  ;;  %v9227_v5 = vpop.permute.xlu1 %9226 }
 0xb36   : > { %v12204_v34 = vmax.f32 %v15598_v42, %v12076_v2  ;;  %v12346_v2 = vld [vmem:[%s21806_s1 + $0x1a80] sm:$0xff] }
 0xb37   : > { %v12205_v35 = vmax.f32 %v15599_v48, %v12077_v44  ;;  %v11897_v0 = vpop.f32.mrb[4].mxu1  ;;  %12975 = vmatmul.mubr.bf16.gmra.mrb[64].mxu1 %v14990_v55 }
 0xb38   : > { %v12286_v54 = vpack.c.bf16 %v12204_v34, %v12202_v23  ;;  %v15600_v49 = vadd.f32 %v11897_v0, %v9207_v18  ;;  %v11899_v30 = vpop.f32.mrb[5].mxu1  ;;  %12984 = vmatprep.mubr.bf16.mxu1 %v14995_v28  ;;  %v12348_v28 = vld [vmem:[%s21806_s1 + $0x1aa0] sm:$0xff] }
 0xb39   : > { %v15601_v11 = vadd.f32 %v11899_v30, %v9207_v18  ;;  %v11901_v52 = vpop.f32.mrb[6].mxu1  ;;  %v12287_v9 = vpack.c.bf16 %v12205_v35, %v12203_v24  ;;  %v15002_v35 = vcombine.low %v12342_v57, %v12344_v38 }
 0xb3a   : > { %v12078_v22 = vmul.f32 0.2, %v15600_v49  ;;  %v15602_v21 = vadd.f32 %v11901_v52, %v9212_v56  ;;  %v11903_v16 = vpop.f32.mrb[7].mxu1 }
 0xb3b   : > { %v12079_v6 = vmul.f32 0.2, %v15601_v11  ;;  %v15603_v20 = vadd.f32 %v11903_v16, %v9212_v56  ;;  %13087 = vmatprep.subr.bf16.mxu1 %v12287_v9  ;;  %v9242_v16 = vpop.permute.xlu0 %9241 }
 0xb3c   : > { %v12080_v4 = vmul.f32 0.2, %v15602_v21  ;;  %13088 = vmatpush1.bf16.msra.mxu1 %v12286_v54  ;;  %v12206_v1 = vmax.f32 %v15600_v49, %v12078_v22  ;;  %v15007_v54 = vcombine.high %v12346_v2, %v12348_v28 }
 0xb3d   : > { %v12081_v13 = vmul.f32 0.2, %v15603_v20  ;;  %v12207_v37 = vmax.f32 %v15601_v11, %v12079_v6  ;;  %v9237_v11 = vpop.permute.xlu1 %9236 }
 0xb3e   : > { %v12208_v46 = vmax.f32 %v15602_v21, %v12080_v4  ;;  %v12350_v4 = vld [vmem:[%s21806_s1 + $0x1ac0] sm:$0xff] }
 0xb3f   : > { %v12209_v33 = vmax.f32 %v15603_v20, %v12081_v13  ;;  %v11907_v17 = vpop.f32.mrb[8].mxu1  ;;  %12985 = vmatmul.mubr.bf16.gmra.mrb[68].mxu1 %v14994_v10 }
 0xb40   : > { %v12288_v25 = vpack.c.bf16 %v12208_v46, %v12206_v1  ;;  %v15604_v36 = vadd.f32 %v11907_v17, %v9217_v51  ;;  %v11909_v12 = vpop.f32.mrb[9].mxu1  ;;  %12994 = vmatprep.mubr.bf16.mxu1 %v14999_v29  ;;  %v12352_v29 = vld [vmem:[%s21806_s1 + $0x1ae0] sm:$0xff] }
 0xb41   : > { %v15605_v31 = vadd.f32 %v11909_v12, %v9217_v51  ;;  %v11911_v59 = vpop.f32.mrb[10].mxu1  ;;  %v12289_v15 = vpack.c.bf16 %v12209_v33, %v12207_v37  ;;  %v15006_v33 = vcombine.low %v12346_v2, %v12348_v28  ;;  %v21443_v28 = vld [vmem:[%s21807_s2 + $0x18] sm:$0xff] }
 0xb42   : > { %v12082_v58 = vmul.f32 0.2, %v15604_v36  ;;  %v15606_v61 = vadd.f32 %v11911_v59, %v9222_v41  ;;  %v11913_v14 = vpop.f32.mrb[11].mxu1  ;;  %v21419_v59 = vld [vmem:[%s21807_s2] sm:$0xff] }
 0xb43   : > { %v12083_v19 = vmul.f32 0.2, %v15605_v31  ;;  %v15607_v40 = vadd.f32 %v11913_v14, %v9222_v41  ;;  %13089 = vmatprep.subr.bf16.mxu1 %v12289_v15  ;;  %v9247_v15 = vpop.permute.xlu1 %9246 }
 0xb44   : > { %v12084_v63 = vmul.f32 0.2, %v15606_v61  ;;  %13090 = vmatpush1.bf16.msra.mxu1 %v12288_v25  ;;  %v12210_v3 = vmax.f32 %v15604_v36, %v12082_v58  ;;  %v15011_v25 = vcombine.high %v12350_v4, %v12352_v29 }
 0xb45   : > { %v12085_v26 = vmul.f32 0.2, %v15607_v40  ;;  %v12211_v39 = vmax.f32 %v15605_v31, %v12083_v19  ;;  %v17008_v31 = vmov 2  }
 0xb46   : > { %v12212_v50 = vmax.f32 %v15606_v61, %v12084_v63  ;;  %16783 = vset.pattern.permute.xlu1 %v17008_v31  ;;  %16784 = vset.pattern.permute.xlu0 %v17008_v31  ;;  %v21425_v61 = vld [vmem:[%s21807_s2 + $0x8] sm:$0xff] }
 0xb47   : > { %v12213_v47 = vmax.f32 %v15607_v40, %v12085_v26  ;;  %v11917_v32 = vpop.f32.mrb[12].mxu1  ;;  %12995 = vmatmul.mubr.bf16.gmra.mrb[72].mxu1 %v14998_v60  ;;  %12404 = vperm.xlu1 %16783, %v21419_v59   ;;  %v9252_v60 = vpop.permute.xlu0 %9251 }
 0xb48   : > { %v12290_v27 = vpack.c.bf16 %v12212_v50, %v12210_v3  ;;  %v15608_v7 = vadd.f32 %v11917_v32, %v9227_v5  ;;  %v11919_v42 = vpop.f32.mrb[13].mxu1  ;;  %13004 = vmatprep.mubr.bf16.mxu1 %v15003_v53  ;;  %12409 = vperm.xlu0 %16784, %v21425_v61   ;;  %v12354_v3 = vld [vmem:[%s21806_s1 + $0x1b00] sm:$0xff]  ;;  %v21437_v32 = vld [vmem:[%s21807_s2 + $0x10] sm:$0xff] }
 0xb49   : > { %v15609_v8 = vadd.f32 %v11919_v42, %v9227_v5  ;;  %v11921_v48 = vpop.f32.mrb[14].mxu1  ;;  %v12291_v55 = vpack.c.bf16 %v12213_v47, %v12211_v39  ;;  %v12356_v50 = vld [vmem:[%s21806_s1 + $0x1b20] sm:$0xff]  ;;  %v15010_v42 = vcombine.low %v12350_v4, %v12352_v29 }
 0xb4a   : > { %v12086_v44 = vmul.f32 0.2, %v15608_v7  ;;  %v15610_v23 = vadd.f32 %v11921_v48, %v9232_v45  ;;  %v11923_v34 = vpop.f32.mrb[15].mxu1 }
 0xb4b   : > { %v12087_v18 = vmul.f32 0.2, %v15609_v8  ;;  %v15611_v24 = vadd.f32 %v11923_v34, %v9232_v45  ;;  %13091 = vmatprep.subr.bf16.mxu1 %v12291_v55  ;;  %12414 = vperm.xlu1 %16783, %v21437_v32  }
 0xb4c   : > { %v12088_v0 = vmul.f32 0.2, %v15610_v23  ;;  %13092 = vmatpush1.bf16.msra.mxu1 %v12290_v27  ;;  %v12214_v30 = vmax.f32 %v15608_v7, %v12086_v44  ;;  %v9257_v44 = vpop.permute.xlu1 %9256 }
 0xb4d   : > { %v12089_v49 = vmul.f32 0.2, %v15611_v24  ;;  %v12215_v52 = vmax.f32 %v15609_v8, %v12087_v18  ;;  %v15015_v8 = vcombine.high %v12354_v3, %v12356_v50 }
 0xb4e   : > { %v12216_v56 = vmax.f32 %v15610_v23, %v12088_v0 }
 0xb4f   : > { %v12217_v9 = vmax.f32 %v15611_v24, %v12089_v49  ;;  %v11927_v62 = vpop.f32.mrb[16].mxu1  ;;  %13005 = vmatmul.mubr.bf16.gmra.mrb[76].mxu1 %v15002_v35  ;;  %12419 = vperm.xlu1 %16783, %v21443_v28  }
 0xb50   : > { %v12292_v43 = vpack.c.bf16 %v12216_v56, %v12214_v30  ;;  %v15612_v22 = vadd.f32 %v11927_v62, %v9237_v11  ;;  %v11929_v21 = vpop.f32.mrb[17].mxu1  ;;  %13014 = vmatprep.mubr.bf16.mxu1 %v15007_v54  ;;  %v9262_v54 = vpop.permute.xlu0 %9261 }
 0xb51   : > { %v15613_v6 = vadd.f32 %v11929_v21, %v9237_v11  ;;  %v11931_v20 = vpop.f32.mrb[18].mxu1  ;;  %v12293_v10 = vpack.c.bf16 %v12217_v9, %v12215_v52  ;;  %v12358_v11 = vld [vmem:[%s21806_s1 + $0x1b40] sm:$0xff] }
 0xb52   : > { %v12090_v13 = vmul.f32 0.2, %v15612_v22  ;;  %v15614_v1 = vadd.f32 %v11931_v20, %v9242_v16  ;;  %v11933_v46 = vpop.f32.mrb[19].mxu1  ;;  %v12360_v52 = vld [vmem:[%s21806_s1 + $0x1b60] sm:$0xff] }
 0xb53   : > { %v12091_v51 = vmul.f32 0.2, %v15613_v6  ;;  %v15615_v37 = vadd.f32 %v11933_v46, %v9242_v16  ;;  %13093 = vmatprep.subr.bf16.mxu1 %v12293_v10  ;;  %v15019_v10 = vcombine.high %v12358_v11, %v12360_v52  ;;  %v21466_v46 = vld [vmem:[%s21807_s2 + $0x38] sm:$0xff] }
 0xb54   : > { %v12092_v17 = vmul.f32 0.2, %v15614_v1  ;;  %13094 = vmatpush1.bf16.msra.mxu1 %v12292_v43  ;;  %v12218_v12 = vmax.f32 %v15612_v22, %v12090_v13  ;;  %v21455_v22 = vld [vmem:[%s21807_s2 + $0x28] sm:$0xff] }
 0xb55   : > { %v12093_v36 = vmul.f32 0.2, %v15615_v37  ;;  %v12219_v57 = vmax.f32 %v15613_v6, %v12091_v51  ;;  %v15014_v6 = vcombine.low %v12354_v3, %v12356_v50  ;;  %12429 = vperm.xlu1 %16783, %v21455_v22   ;;  %v9267_v51 = vpop.permute.xlu1 %9266  ;;  %v15018_v3 = vcombine.low %v12358_v11, %v12360_v52  ;;  %v21509_v11 = vld [vmem:[%s21807_s2 + $0x50] sm:$0xff]  ;;  %v21514_v52 = vld [vmem:[%s21807_s2 + $0x68] sm:$0xff] }
 0xb56   : > { %v12220_v41 = vmax.f32 %v15614_v1, %v12092_v17  ;;  %v21461_v1 = vld [vmem:[%s21807_s2 + $0x20] sm:$0xff] }
 0xb57   : > { %v12221_v38 = vmax.f32 %v15615_v37, %v12093_v36  ;;  %v11937_v58 = vpop.f32.mrb[20].mxu1  ;;  %13015 = vmatmul.mubr.bf16.gmra.mrb[80].mxu1 %v15006_v33  ;;  %12424 = vperm.xlu0 %16784, %v21461_v1  }
 0xb58   : > { %v12294_v14 = vpack.c.bf16 %v12220_v41, %v12218_v12  ;;  %v15616_v19 = vadd.f32 %v11937_v58, %v9247_v15  ;;  %v11939_v40 = vpop.f32.mrb[21].mxu1  ;;  %13024 = vmatprep.mubr.bf16.mxu1 %v15011_v25  ;;  %v9272_v41 = vpop.permute.xlu0 %9271  ;;  %v12364_v58 = vld [vmem:[%s21806_s1 + $0x1ba0] sm:$0xff] }
 0xb59   : > { %v15617_v63 = vadd.f32 %v11939_v40, %v9247_v15  ;;  %v11941_v53 = vpop.f32.mrb[22].mxu1  ;;  %v12295_v26 = vpack.c.bf16 %v12221_v38, %v12219_v57  ;;  %v12362_v38 = vld [vmem:[%s21806_s1 + $0x1b80] sm:$0xff]  ;;  %12439 = vperm.xlu1 %16783, %v21466_v46  }
 0xb5a   : > { %v12094_v5 = vmul.f32 0.2, %v15616_v19  ;;  %v15618_v39 = vadd.f32 %v11941_v53, %v9252_v60  ;;  %v11943_v47 = vpop.f32.mrb[23].mxu1 }
 0xb5b   : > { %v12095_v27 = vmul.f32 0.2, %v15617_v63  ;;  %v15619_v7 = vadd.f32 %v11943_v47, %v9252_v60  ;;  %13095 = vmatprep.subr.bf16.mxu1 %v12295_v26  ;;  %v21479_v60 = vld [vmem:[%s21807_s2 + $0x30] sm:$0xff] }
 0xb5c   : > { %v12096_v45 = vmul.f32 0.2, %v15618_v39  ;;  %13096 = vmatpush1.bf16.msra.mxu1 %v12294_v14  ;;  %v12222_v55 = vmax.f32 %v15616_v19, %v12094_v5  ;;  %12434 = vperm.xlu0 %16784, %v21479_v60   ;;  %v15023_v5 = vcombine.high %v12362_v38, %v12364_v58 }
 0xb5d   : > { %v12097_v48 = vmul.f32 0.2, %v15619_v7  ;;  %v12223_v23 = vmax.f32 %v15617_v63, %v12095_v27  ;;  %v21484_v63 = vld [vmem:[%s21807_s2 + $0x48] sm:$0xff] }
 0xb5e   : > { %v12224_v2 = vmax.f32 %v15618_v39, %v12096_v45  ;;  %12449 = vperm.xlu1 %16783, %v21484_v63   ;;  %v9277_v45 = vpop.permute.xlu1 %9276 }
 0xb5f   : > { %v12225_v34 = vmax.f32 %v15619_v7, %v12097_v48  ;;  %v11947_v18 = vpop.f32.mrb[24].mxu1  ;;  %13025 = vmatmul.mubr.bf16.gmra.mrb[84].mxu1 %v15010_v42  ;;  %v21491_v7 = vld [vmem:[%s21807_s2 + $0x40] sm:$0xff]  ;;  %v21496_v42 = vld [vmem:[%s21807_s2 + $0x58] sm:$0xff] }
 0xb60   : > { %v12296_v24 = vpack.c.bf16 %v12224_v2, %v12222_v55  ;;  %v15620_v35 = vadd.f32 %v11947_v18, %v9257_v44  ;;  %v11949_v0 = vpop.f32.mrb[25].mxu1  ;;  %13034 = vmatprep.mubr.bf16.mxu1 %v15015_v8  ;;  %12444 = vperm.xlu0 %16784, %v21491_v7  }
 0xb61   : > { %v15621_v49 = vadd.f32 %v11949_v0, %v9257_v44  ;;  %v11951_v30 = vpop.f32.mrb[26].mxu1  ;;  %v12297_v56 = vpack.c.bf16 %v12225_v34, %v12223_v23  ;;  %v9282_v34 = vpop.permute.xlu0 %9281  ;;  %v12366_v0 = vld [vmem:[%s21806_s1 + $0x1bc0] sm:$0xff] }
 0xb62   : > { %v12098_v9 = vmul.f32 0.2, %v15620_v35  ;;  %v15622_v62 = vadd.f32 %v11951_v30, %v9262_v54  ;;  %v11953_v43 = vpop.f32.mrb[27].mxu1  ;;  %12459 = vperm.xlu1 %16783, %v21496_v42  }
 0xb63   : > { %v12099_v21 = vmul.f32 0.2, %v15621_v49  ;;  %v15623_v16 = vadd.f32 %v11953_v43, %v9262_v54  ;;  %13097 = vmatprep.subr.bf16.mxu1 %v12297_v56  ;;  %v12368_v54 = vld [vmem:[%s21806_s1 + $0x1be0] sm:$0xff]  ;;  %v15022_v43 = vcombine.low %v12362_v38, %v12364_v58  ;;  %v12309_v38 = vld [vmem:[%s21806_s1 + $0x1828] sm:$0xff] }
 0xb64   : > { %v12100_v20 = vmul.f32 0.2, %v15622_v62  ;;  %13098 = vmatpush1.bf16.msra.mxu1 %v12296_v24  ;;  %v12226_v29 = vmax.f32 %v15620_v35, %v12098_v9  ;;  %12454 = vperm.xlu0 %16784, %v21509_v11  }
 0xb65   : > { %v12101_v4 = vmul.f32 0.2, %v15623_v16  ;;  %v12227_v37 = vmax.f32 %v15621_v49, %v12099_v21 }
 0xb66   : > { %v12228_v13 = vmax.f32 %v15622_v62, %v12100_v20  ;;  %12469 = vperm.xlu1 %16783, %v21514_v52  }
 0xb67   : > { %v12229_v33 = vmax.f32 %v15623_v16, %v12101_v4  ;;  %v11957_v17 = vpop.f32.mrb[28].mxu1  ;;  %13035 = vmatmul.mubr.bf16.gmra.mrb[88].mxu1 %v15014_v6  ;;  %v15027_v16 = vcombine.high %v12366_v0, %v12368_v54  ;;  %v21521_v4 = vld [vmem:[%s21807_s2 + $0x60] sm:$0xff] }
 0xb68   : > { %v12298_v25 = vpack.c.bf16 %v12228_v13, %v12226_v29  ;;  %v15624_v36 = vadd.f32 %v11957_v17, %v9267_v51  ;;  %v11959_v12 = vpop.f32.mrb[29].mxu1  ;;  %13044 = vmatprep.mubr.bf16.mxu1 %v15019_v10  ;;  %v21526_v29 = vld [vmem:[%s21807_s2 + $0x78] sm:$0xff]  ;;  %v9287_v13 = vpop.permute.xlu1 %9286  ;;  %12464 = vperm.xlu0 %16784, %v21521_v4  }
 0xb69   : > { %v15625_v31 = vadd.f32 %v11959_v12, %v9267_v51  ;;  %v11961_v15 = vpop.f32.mrb[30].mxu1  ;;  %v12299_v57 = vpack.c.bf16 %v12229_v33, %v12227_v37  ;;  %v9292_v12 = vpop.permute.xlu0 %9291 }
 0xb6a   : > { %v12102_v14 = vmul.f32 0.2, %v15624_v36  ;;  %v15626_v19 = vadd.f32 %v11961_v15, %v9272_v41  ;;  %v11963_v40 = vpop.f32.mrb[31].mxu1  ;;  %12479 = vperm.xlu1 %16783, %v21526_v29  }
 0xb6b   : > { %v12103_v53 = vmul.f32 0.2, %v15625_v31  ;;  %v15627_v26 = vadd.f32 %v11963_v40, %v9272_v41  ;;  %13099 = vmatprep.subr.bf16.mxu1 %v12299_v57  ;;  %v12307_v57 = vld [vmem:[%s21806_s1 + $0x1808] sm:$0xff]  ;;  %v21539_v40 = vld [vmem:[%s21807_s2 + $0x70] sm:$0xff] }
 0xb6c   : > { %v12104_v50 = vmul.f32 0.2, %v15626_v19  ;;  %13100 = vmatpush1.bf16.msra.mxu1 %v12298_v25  ;;  %v12230_v47 = vmax.f32 %v15624_v36, %v12102_v14  ;;  %12474 = vperm.xlu0 %16784, %v21539_v40  }
 0xb6d   : > { %v12105_v39 = vmul.f32 0.2, %v15627_v26  ;;  %v12231_v8 = vmax.f32 %v15625_v31, %v12103_v53  ;;  %v12387_v53 = vld [vmem:[%s21807_s2 + $0x88] sm:$0xff] }
 0xb6e   : > { %v12232_v27 = vmax.f32 %v15626_v19, %v12104_v50  ;;  %v15026_v50 = vcombine.low %v12366_v0, %v12368_v54  ;;  %12489 = vperm.xlu1 %16783, %v12387_v53   ;;  %v14968_v0 = vcombine.low %v12307_v57, %v12309_v38  ;;  %v12331_v53 = vld [vmem:[%s21806_s1 + $0x1988] sm:$0xff] }
 0xb6f   : > { %v12233_v48 = vmax.f32 %v15627_v26, %v12105_v39  ;;  %v11967_v55 = vpop.f32.mrb[32].mxu1  ;;  %13045 = vmatmul.mubr.bf16.gmra.mrb[92].mxu1 %v15018_v3  ;;  %v14969_v39 = vcombine.high %v12307_v57, %v12309_v38  ;;  %v12327_v38 = vld [vmem:[%s21806_s1 + $0x1948] sm:$0xff] }
 0xb70   : > { %v12300_v2 = vpack.c.bf16 %v12232_v27, %v12230_v47  ;;  %v15628_v44 = vadd.f32 %v11967_v55, %v9277_v45  ;;  %v11969_v23 = vpop.f32.mrb[33].mxu1  ;;  %13054 = vmatprep.mubr.bf16.mxu1 %v15023_v5 }
 0xb71   : > { %v15629_v18 = vadd.f32 %v11969_v23, %v9277_v45  ;;  %v11971_v24 = vpop.f32.mrb[34].mxu1  ;;  %v12301_v35 = vpack.c.bf16 %v12233_v48, %v12231_v8  ;;  %v12386_v8 = vld [vmem:[%s21807_s2 + $0x80] sm:$0xff]  ;;  %v12389_v48 = vld [vmem:[%s21807_s2 + $0x98] sm:$0xff]  ;;  %v12388_v23 = vld [vmem:[%s21807_s2 + $0x90] sm:$0xff] }
 0xb72   : > { %v12106_v49 = vmul.f32 0.2, %v15628_v44  ;;  %v15630_v30 = vadd.f32 %v11971_v24, %v9282_v34  ;;  %v11973_v56 = vpop.f32.mrb[35].mxu1  ;;  %12484 = vperm.xlu0 %16784, %v12386_v8   ;;  %v12313_v24 = vld [vmem:[%s21806_s1 + $0x1868] sm:$0xff]  ;;  %12499 = vperm.xlu1 %16783, %v12389_v48  }
 0xb73   : > { %v12107_v9 = vmul.f32 0.2, %v15629_v18  ;;  %v15631_v62 = vadd.f32 %v11973_v56, %v9282_v34  ;;  %13101 = vmatprep.subr.bf16.mxu1 %v12301_v35  ;;  %v12391_v35 = vld [vmem:[%s21807_s2 + $0xa8] sm:$0xff]  ;;  %v12392_v56 = vld [vmem:[%s21807_s2 + $0xb0] sm:$0xff] }
 0xb74   : > { %v12108_v21 = vmul.f32 0.2, %v15630_v30  ;;  %13102 = vmatpush1.bf16.msra.mxu1 %v12300_v2  ;;  %v12234_v20 = vmax.f32 %v15628_v44, %v12106_v49  ;;  %v12390_v49 = vld [vmem:[%s21807_s2 + $0xa0] sm:$0xff]  ;;  %v12341_v8 = vld [vmem:[%s21806_s1 + $0x1a28] sm:$0xff] }
 0xb75   : > { %v12109_v6 = vmul.f32 0.2, %v15631_v62  ;;  %v12235_v51 = vmax.f32 %v15629_v18, %v12107_v9  ;;  %v12311_v18 = vld [vmem:[%s21806_s1 + $0x1848] sm:$0xff] }
 0xb76   : > { %v12236_v10 = vmax.f32 %v15630_v30, %v12108_v21  ;;  %12494 = vperm.xlu0 %16784, %v12388_v23   ;;  %v14973_v54 = vcombine.high %v12311_v18, %v12313_v24  ;;  %12509 = vperm.xlu1 %16783, %v12391_v35   ;;  %v12393_v30 = vld [vmem:[%s21807_s2 + $0xb8] sm:$0xff]  ;;  %v12315_v9 = vld [vmem:[%s21806_s1 + $0x1888] sm:$0xff]  ;;  %v14972_v21 = vcombine.low %v12311_v18, %v12313_v24 }
 0xb77   : > { %v12237_v37 = vmax.f32 %v15631_v62, %v12109_v6  ;;  %v11977_v33 = vpop.f32.mrb[36].mxu1  ;;  %13055 = vmatmul.mubr.bf16.gmra.mrb[96].mxu1 %v15022_v43  ;;  %v12317_v62 = vld [vmem:[%s21806_s1 + $0x18a8] sm:$0xff]  ;;  %v12394_v6 = vld [vmem:[%s21807_s2 + $0xc0] sm:$0xff] }
 0xb78   : > { %v12302_v17 = vpack.c.bf16 %v12236_v10, %v12234_v20  ;;  %v15632_v25 = vadd.f32 %v11977_v33, %v9287_v13  ;;  %v11979_v36 = vpop.f32.mrb[37].mxu1  ;;  %13064 = vmatprep.mubr.bf16.mxu1 %v15027_v16  ;;  %v12395_v43 = vld [vmem:[%s21807_s2 + $0xc8] sm:$0xff]  ;;  %v14977_v16 = vcombine.high %v12315_v9, %v12317_v62  ;;  %v12397_v20 = vld [vmem:[%s21807_s2 + $0xd8] sm:$0xff]  ;;  %v12396_v10 = vld [vmem:[%s21807_s2 + $0xd0] sm:$0xff]  ;;  %v14976_v33 = vcombine.low %v12315_v9, %v12317_v62 }
 0xb79   : > { %v15633_v41 = vadd.f32 %v11979_v36, %v9287_v13  ;;  %v11981_v31 = vpop.f32.mrb[38].mxu1  ;;  %v12303_v15 = vpack.c.bf16 %v12237_v37, %v12235_v51  ;;  %v12319_v13 = vld [vmem:[%s21806_s1 + $0x18c8] sm:$0xff]  ;;  %v12401_v36 = vld [vmem:[%s21807_s2 + $0xf8] sm:$0xff] }
 0xb7a   : > { %v12110_v58 = vmul.f32 0.2, %v15632_v25  ;;  %v15634_v14 = vadd.f32 %v11981_v31, %v9292_v12  ;;  %v11983_v19 = vpop.f32.mrb[39].mxu1  ;;  %12504 = vperm.xlu0 %16784, %v12390_v49   ;;  %12519 = vperm.xlu1 %16783, %v12393_v30   ;;  %v12321_v51 = vld [vmem:[%s21806_s1 + $0x18e8] sm:$0xff] }
 0xb7b   : > { %v12111_v26 = vmul.f32 0.2, %v15633_v41  ;;  %v15635_v3 = vadd.f32 %v11983_v19, %v9292_v12  ;;  %13103 = vmatprep.subr.bf16.mxu1 %v12303_v15  ;;  %v12399_v37 = vld [vmem:[%s21807_s2 + $0xe8] sm:$0xff]  ;;  %v12400_v12 = vld [vmem:[%s21807_s2 + $0xf0] sm:$0xff]  ;;  %v14980_v15 = vcombine.low %v12319_v13, %v12321_v51 }
 0xb7c   : > { %v12112_v5 = vmul.f32 0.2, %v15634_v14  ;;  %13104 = vmatpush1.bf16.msra.mxu1 %v12302_v17  ;;  %v12238_v27 = vmax.f32 %v15632_v25, %v12110_v58  ;;  %v14981_v17 = vcombine.high %v12319_v13, %v12321_v51  ;;  %v12398_v25 = vld [vmem:[%s21807_s2 + $0xe0] sm:$0xff]  ;;  %v12325_v31 = vld [vmem:[%s21806_s1 + $0x1928] sm:$0xff] }
 0xb7d   : > { %v12113_v47 = vmul.f32 0.2, %v15635_v3  ;;  %v12239_v55 = vmax.f32 %v15633_v41, %v12111_v26  ;;  %v12323_v41 = vld [vmem:[%s21806_s1 + $0x1908] sm:$0xff] }
 0xb7e   : > { %v12240_v45 = vmax.f32 %v15634_v14, %v12112_v5  ;;  %12514 = vperm.xlu0 %16784, %v12392_v56   ;;  %12529 = vperm.xlu1 %16783, %v12395_v43   ;;  %v14985_v57 = vcombine.high %v12323_v41, %v12325_v31  ;;  %v12329_v58 = vld [vmem:[%s21806_s1 + $0x1968] sm:$0xff]  ;;  %v14984_v14 = vcombine.low %v12323_v41, %v12325_v31 }
 0xb7f   : > { %v12241_v2 = vmax.f32 %v15635_v3, %v12113_v47  ;;  %13065 = vmatmul.mubr.bf16.gmra.mrb[100].mxu1 %v15026_v50  ;;  %v14989_v19 = vcombine.high %v12327_v38, %v12329_v58  ;;  %v12333_v26 = vld [vmem:[%s21806_s1 + $0x19a8] sm:$0xff]  ;;  %v14988_v3 = vcombine.low %v12327_v38, %v12329_v58 }
 0xb80   : > { %v12304_v44 = vpack.c.bf16 %v12240_v45, %v12238_v27  ;;  %13107 = vmatprep.mubr.bf16.mxu1 %v14969_v39  ;;  %v14993_v50 = vcombine.high %v12331_v53, %v12333_v26  ;;  %v12335_v5 = vld [vmem:[%s21806_s1 + $0x19c8] sm:$0xff]  ;;  %v14992_v47 = vcombine.low %v12331_v53, %v12333_v26 }
 0xb81   : > { %v12305_v34 = vpack.c.bf16 %v12241_v2, %v12239_v55  ;;  %v12337_v39 = vld [vmem:[%s21806_s1 + $0x19e8] sm:$0xff] }
 0xb82   : > { %12524 = vperm.xlu0 %16784, %v12394_v6   ;;  %12539 = vperm.xlu1 %16783, %v12397_v20   ;;  %v14997_v27 = vcombine.high %v12335_v5, %v12337_v39  ;;  %v12339_v45 = vld [vmem:[%s21806_s1 + $0x1a08] sm:$0xff]  ;;  %v14996_v48 = vcombine.low %v12335_v5, %v12337_v39 }
 0xb83   : > { %13105 = vmatprep.subr.bf16.mxu1 %v12305_v34  ;;  %v15001_v55 = vcombine.high %v12339_v45, %v12341_v8  ;;  %v12343_v2 = vld [vmem:[%s21806_s1 + $0x1a48] sm:$0xff]  ;;  %v15000_v23 = vcombine.low %v12339_v45, %v12341_v8  ;;  %v21688_v45 = vld [vmem:[%s21806_s1 + $0x1c20] sm:$0xff] }
 0xb84   : > { %13106 = vmatpush1.bf16.msra.mxu1 %v12304_v44  ;;  %v12345_v44 = vld [vmem:[%s21806_s1 + $0x1a68] sm:$0xff] }
 0xb85   : > { %v15005_v34 = vcombine.high %v12343_v2, %v12345_v44  ;;  %v12347_v18 = vld [vmem:[%s21806_s1 + $0x1a88] sm:$0xff]  ;;  %v15004_v35 = vcombine.low %v12343_v2, %v12345_v44 }
 0xb86   : > { %12534 = vperm.xlu0 %16784, %v12396_v10   ;;  %12549 = vperm.xlu1 %16783, %v12399_v37   ;;  %v12349_v24 = vld [vmem:[%s21806_s1 + $0x1aa8] sm:$0xff] }
 0xb87   : > { %13108 = vmatmul.mubr.bf16.vlgmr.msra.gmra.mrb[40].mxu1 %v14968_v0  ;;  %v15009_v0 = vcombine.high %v12347_v18, %v12349_v24  ;;  %v12353_v49 = vld [vmem:[%s21806_s1 + $0x1ae8] sm:$0xff]  ;;  %v15008_v30 = vcombine.low %v12347_v18, %v12349_v24 }
 0xb88   : > { %13117 = vmatprep.mubr.bf16.mxu1 %v14973_v54  ;;  %v12351_v54 = vld [vmem:[%s21806_s1 + $0x1ac8] sm:$0xff] }
 0xb89   : > { %v15013_v56 = vcombine.high %v12351_v54, %v12353_v49  ;;  %v12355_v9 = vld [vmem:[%s21806_s1 + $0x1b08] sm:$0xff]  ;;  %v15012_v43 = vcombine.low %v12351_v54, %v12353_v49 }
 0xb8a   : > { %12544 = vperm.xlu0 %16784, %v12398_v25   ;;  %12559 = vperm.xlu1 %16783, %v12401_v36   ;;  %v12357_v62 = vld [vmem:[%s21806_s1 + $0x1b28] sm:$0xff] }
 0xb8b   : > { %v12361_v6 = vld [vmem:[%s21806_s1 + $0x1b68] sm:$0xff]  ;;  %v15016_v20 = vcombine.low %v12355_v9, %v12357_v62 }
 0xb8c   : > { %v12363_v13 = vld [vmem:[%s21806_s1 + $0x1b88] sm:$0xff] }
 0xb8d   : > { %v12365_v51 = vld [vmem:[%s21806_s1 + $0x1ba8] sm:$0xff] }
 0xb8e   : > { %12554 = vperm.xlu0 %16784, %v12400_v12   ;;  %v12369_v25 = vld [vmem:[%s21806_s1 + $0x1be8] sm:$0xff]  ;;  %v15024_v36 = vcombine.low %v12363_v13, %v12365_v51 }
 0xb8f   : > { %13118 = vmatmul.mubr.bf16.gmra.mrb[44].mxu1 %v14972_v21  ;;  %v15017_v21 = vcombine.high %v12355_v9, %v12357_v62 }
 0xb90   : > { %13127 = vmatprep.mubr.bf16.mxu1 %v14977_v16  ;;  %v12359_v16 = vld [vmem:[%s21806_s1 + $0x1b48] sm:$0xff] }
 0xb91   : > { %v15021_v10 = vcombine.high %v12359_v16, %v12361_v6  ;;  %v15020_v37 = vcombine.low %v12359_v16, %v12361_v6 }
 0xb97   : > { %13128 = vmatmul.mubr.bf16.gmra.mrb[48].mxu1 %v14976_v33  ;;  %v15025_v33 = vcombine.high %v12363_v13, %v12365_v51 }
 0xb98   : > { %13137 = vmatprep.mubr.bf16.mxu1 %v14981_v17  ;;  %v12367_v17 = vld [vmem:[%s21806_s1 + $0x1bc8] sm:$0xff] }
 0xb99   : > { %v15029_v12 = vcombine.high %v12367_v17, %v12369_v25  ;;  %v15028_v41 = vcombine.low %v12367_v17, %v12369_v25 }
 0xb9f   : > { %13138 = vmatmul.mubr.bf16.gmra.mrb[52].mxu1 %v14980_v15 }
 0xba0   : > { %13147 = vmatprep.mubr.bf16.mxu1 %v14985_v57 }
 0xba7   : > { %13148 = vmatmul.mubr.bf16.gmra.mrb[56].mxu1 %v14984_v14 }
 0xba8   : > { %13157 = vmatprep.mubr.bf16.mxu1 %v14989_v19 }
 0xbaf   : > { %13158 = vmatmul.mubr.bf16.gmra.mrb[60].mxu1 %v14988_v3 }
 0xbb0   : > { %13167 = vmatprep.mubr.bf16.mxu1 %v14993_v50 }
 0xbb7   : > { %13168 = vmatmul.mubr.bf16.gmra.mrb[64].mxu1 %v14992_v47 }
 0xbb8   : > { %13177 = vmatprep.mubr.bf16.mxu1 %v14997_v27  ;;  %v21683_v27 = vld [vmem:[%s21806_s1 + $0x1c00] sm:$0xff] }
 0xbbf   : > { %13178 = vmatmul.mubr.bf16.gmra.mrb[68].mxu1 %v14996_v48  ;;  %v15030_v48 = vcombine.low %v21683_v27, %v21688_v45 }
 0xbc0   : > { %13187 = vmatprep.mubr.bf16.mxu1 %v15001_v55  ;;  %v15031_v55 = vcombine.high %v21683_v27, %v21688_v45  ;;  %v13435_v27 = vld [vmem:[%s21806_s1 + $0x1ce0] sm:$0xff] }
 0xbc6   : > { %v12405_v31 = vpop.permute.xlu1 %12404 }
 0xbc7   : > { %13188 = vmatmul.mubr.bf16.gmra.mrb[72].mxu1 %v15000_v23  ;;  %v12410_v57 = vpop.permute.xlu0 %12409 }
 0xbc8   : > { %13197 = vmatprep.mubr.bf16.mxu1 %v15005_v34 }
 0xbca   : > { %v12415_v39 = vpop.permute.xlu1 %12414 }
 0xbcf   : > { %13198 = vmatmul.mubr.bf16.gmra.mrb[76].mxu1 %v15004_v35 }
 0xbd0   : > { %13207 = vmatprep.mubr.bf16.mxu1 %v15009_v0 }
 0xbd6   : > { %v12425_v17 = vpop.permute.xlu0 %12424 }
 0xbd7   : > { %13208 = vmatmul.mubr.bf16.gmra.mrb[80].mxu1 %v15008_v30  ;;  %v12420_v30 = vpop.permute.xlu1 %12419 }
 0xbd8   : > { %13217 = vmatprep.mubr.bf16.mxu1 %v15013_v56 }
 0xbdf   : > { %13218 = vmatmul.mubr.bf16.gmra.mrb[84].mxu1 %v15012_v43 }
 0xbe0   : > { %13227 = vmatprep.mubr.bf16.mxu1 %v15017_v21 }
 0xbe7   : > { %13228 = vmatmul.mubr.bf16.gmra.mrb[88].mxu1 %v15016_v20 }
 0xbe8   : > { %13237 = vmatprep.mubr.bf16.mxu1 %v15021_v10 }
 0xbef   : > { %13238 = vmatmul.mubr.bf16.gmra.mrb[92].mxu1 %v15020_v37 }
 0xbf0   : > { %13247 = vmatprep.mubr.bf16.mxu1 %v15025_v33 }
 0xbf7   : > { %13248 = vmatmul.mubr.bf16.gmra.mrb[96].mxu1 %v15024_v36 }
 0xbf8   : > { %13257 = vmatprep.mubr.bf16.mxu1 %v15029_v12 }
 0xbff   : > { %13258 = vmatmul.mubr.bf16.gmra.mrb[100].mxu1 %v15028_v41 }
 0xc00   : > { %13652 = vmatprep.mubr.bf16.mxu1 %v15031_v55  ;;  %v12435_v55 = vpop.permute.xlu0 %12434 }
 0xc5a   : > { %v13109_v15 = vpop.f32.mrb[40].mxu1 }
 0xc5b   : > { %v13111_v38 = vpop.f32.mrb[41].mxu1  ;;  %v15636_v58 = vadd.f32 %v13109_v15, %v12405_v31 }
 0xc5c   : > { %v13113_v14 = vpop.f32.mrb[42].mxu1  ;;  %v15637_v19 = vadd.f32 %v13111_v38, %v12405_v31  ;;  %v12430_v31 = vpop.permute.xlu1 %12429 }
 0xc5d   : > { %v13268_v53 = vmul.f32 0.2, %v15636_v58  ;;  %v15638_v26 = vadd.f32 %v13113_v14, %v12410_v57  ;;  %v13115_v3 = vpop.f32.mrb[43].mxu1 }
 0xc5e   : > { %v13269_v50 = vmul.f32 0.2, %v15637_v19  ;;  %v15639_v5 = vadd.f32 %v13115_v3, %v12410_v57 }
 0xc5f   : > { %v13270_v47 = vmul.f32 0.2, %v15638_v26  ;;  %v13332_v2 = vmax.f32 %v15636_v58, %v13268_v53 }
 0xc60   : > { %v13271_v8 = vmul.f32 0.2, %v15639_v5  ;;  %v13333_v23 = vmax.f32 %v15637_v19, %v13269_v50 }
 0xc61   : > { %v13334_v44 = vmax.f32 %v15638_v26, %v13270_v47 }
 0xc62   : > { %v13335_v34 = vmax.f32 %v15639_v5, %v13271_v8  ;;  %v13119_v18 = vpop.f32.mrb[44].mxu1 }
 0xc63   : > { %v13396_v24 = vpack.c.bf16 %v13334_v44, %v13332_v2  ;;  %v15640_v35 = vadd.f32 %v13119_v18, %v12415_v39  ;;  %v13121_v0 = vpop.f32.mrb[45].mxu1  ;;  %v12440_v18 = vpop.permute.xlu1 %12439 }
 0xc64   : > { %v15641_v54 = vadd.f32 %v13121_v0, %v12415_v39  ;;  %v13123_v49 = vpop.f32.mrb[46].mxu1  ;;  %v13397_v56 = vpack.c.bf16 %v13335_v34, %v13333_v23 }
 0xc65   : > { %v13272_v9 = vmul.f32 0.2, %v15640_v35  ;;  %v15642_v62 = vadd.f32 %v13123_v49, %v12420_v30  ;;  %v13125_v43 = vpop.f32.mrb[47].mxu1 }
 0xc66   : > { %v13273_v21 = vmul.f32 0.2, %v15641_v54  ;;  %v15643_v16 = vadd.f32 %v13125_v43, %v12420_v30  ;;  %13620 = vmatprep.subr.bf16.mxu1 %v13397_v56 }
 0xc67   : > { %v13274_v6 = vmul.f32 0.2, %v15642_v62  ;;  %13621 = vmatpush1.bf16.msra.mxu1 %v13396_v24  ;;  %v13336_v10 = vmax.f32 %v15640_v35, %v13272_v9 }
 0xc68   : > { %v13275_v20 = vmul.f32 0.2, %v15643_v16  ;;  %v13337_v51 = vmax.f32 %v15641_v54, %v13273_v21 }
 0xc69   : > { %v13338_v13 = vmax.f32 %v15642_v62, %v13274_v6 }
 0xc6a   : > { %v13339_v37 = vmax.f32 %v15643_v16, %v13275_v20  ;;  %v13129_v33 = vpop.f32.mrb[48].mxu1 }
 0xc6b   : > { %v13398_v25 = vpack.c.bf16 %v13338_v13, %v13336_v10  ;;  %v13131_v36 = vpop.f32.mrb[49].mxu1  ;;  %v15644_v12 = vadd.f32 %v13129_v33, %v12425_v17  ;;  %v12445_v10 = vpop.permute.xlu0 %12444 }
 0xc6c   : > { %v13133_v41 = vpop.f32.mrb[50].mxu1  ;;  %v15645_v15 = vadd.f32 %v13131_v36, %v12425_v17  ;;  %v13399_v57 = vpack.c.bf16 %v13339_v37, %v13337_v51  ;;  %v12450_v17 = vpop.permute.xlu1 %12449 }
 0xc6d   : > { %v15646_v38 = vadd.f32 %v13133_v41, %v12430_v31  ;;  %v13276_v58 = vmul.f32 0.2, %v15644_v12  ;;  %v13135_v14 = vpop.f32.mrb[51].mxu1 }
 0xc6e   : > { %v13277_v19 = vmul.f32 0.2, %v15645_v15  ;;  %v15647_v53 = vadd.f32 %v13135_v14, %v12430_v31  ;;  %13622 = vmatprep.subr.bf16.mxu1 %v13399_v57 }
 0xc6f   : > { %v13278_v26 = vmul.f32 0.2, %v15646_v38  ;;  %13623 = vmatpush1.bf16.msra.mxu1 %v13398_v25  ;;  %v13340_v5 = vmax.f32 %v15644_v12, %v13276_v58 }
 0xc70   : > { %v13279_v3 = vmul.f32 0.2, %v15647_v53  ;;  %v13341_v39 = vmax.f32 %v15645_v15, %v13277_v19 }
 0xc71   : > { %v13342_v50 = vmax.f32 %v15646_v38, %v13278_v26 }
 0xc72   : > { %v13343_v47 = vmax.f32 %v15647_v53, %v13279_v3  ;;  %v13139_v8 = vpop.f32.mrb[52].mxu1 }
 0xc73   : > { %v13400_v2 = vpack.c.bf16 %v13342_v50, %v13340_v5  ;;  %v13141_v44 = vpop.f32.mrb[53].mxu1  ;;  %v15648_v23 = vadd.f32 %v13139_v8, %v12435_v55  ;;  %v12455_v50 = vpop.permute.xlu0 %12454 }
 0xc74   : > { %v13143_v34 = vpop.f32.mrb[54].mxu1  ;;  %v15649_v24 = vadd.f32 %v13141_v44, %v12435_v55  ;;  %v13401_v35 = vpack.c.bf16 %v13343_v47, %v13341_v39  ;;  %v12460_v55 = vpop.permute.xlu1 %12459 }
 0xc75   : > { %v15650_v0 = vadd.f32 %v13143_v34, %v12440_v18  ;;  %v13280_v54 = vmul.f32 0.2, %v15648_v23  ;;  %v13145_v49 = vpop.f32.mrb[55].mxu1 }
 0xc76   : > { %v13281_v30 = vmul.f32 0.2, %v15649_v24  ;;  %v15651_v56 = vadd.f32 %v13145_v49, %v12440_v18  ;;  %13624 = vmatprep.subr.bf16.mxu1 %v13401_v35 }
 0xc77   : > { %v13282_v9 = vmul.f32 0.2, %v15650_v0  ;;  %13625 = vmatpush1.bf16.msra.mxu1 %v13400_v2  ;;  %v13344_v21 = vmax.f32 %v15648_v23, %v13280_v54 }
 0xc78   : > { %v13283_v62 = vmul.f32 0.2, %v15651_v56  ;;  %v13345_v16 = vmax.f32 %v15649_v24, %v13281_v30 }
 0xc79   : > { %v13346_v43 = vmax.f32 %v15650_v0, %v13282_v9 }
 0xc7a   : > { %v13347_v6 = vmax.f32 %v15651_v56, %v13283_v62  ;;  %v13149_v20 = vpop.f32.mrb[56].mxu1 }
 0xc7b   : > { %v13402_v13 = vpack.c.bf16 %v13346_v43, %v13344_v21  ;;  %v13151_v51 = vpop.f32.mrb[57].mxu1  ;;  %v15652_v37 = vadd.f32 %v13149_v20, %v12445_v10  ;;  %v12465_v43 = vpop.permute.xlu0 %12464 }
 0xc7c   : > { %v13153_v33 = vpop.f32.mrb[58].mxu1  ;;  %v15653_v25 = vadd.f32 %v13151_v51, %v12445_v10  ;;  %v13403_v36 = vpack.c.bf16 %v13347_v6, %v13345_v16  ;;  %v12470_v10 = vpop.permute.xlu1 %12469 }
 0xc7d   : > { %v15654_v12 = vadd.f32 %v13153_v33, %v12450_v17  ;;  %v13284_v41 = vmul.f32 0.2, %v15652_v37  ;;  %v13155_v31 = vpop.f32.mrb[59].mxu1 }
 0xc7e   : > { %v13285_v15 = vmul.f32 0.2, %v15653_v25  ;;  %v15655_v57 = vadd.f32 %v13155_v31, %v12450_v17  ;;  %13626 = vmatprep.subr.bf16.mxu1 %v13403_v36 }
 0xc7f   : > { %v13286_v38 = vmul.f32 0.2, %v15654_v12  ;;  %13627 = vmatpush1.bf16.msra.mxu1 %v13402_v13  ;;  %v13348_v19 = vmax.f32 %v15652_v37, %v13284_v41 }
 0xc80   : > { %v13287_v58 = vmul.f32 0.2, %v15655_v57  ;;  %v13349_v53 = vmax.f32 %v15653_v25, %v13285_v15 }
 0xc81   : > { %v13350_v14 = vmax.f32 %v15654_v12, %v13286_v38 }
 0xc82   : > { %v13351_v26 = vmax.f32 %v15655_v57, %v13287_v58  ;;  %v13159_v3 = vpop.f32.mrb[60].mxu1 }
 0xc83   : > { %v13404_v5 = vpack.c.bf16 %v13350_v14, %v13348_v19  ;;  %v13161_v39 = vpop.f32.mrb[61].mxu1  ;;  %v15656_v47 = vadd.f32 %v13159_v3, %v12455_v50  ;;  %v12475_v14 = vpop.permute.xlu0 %12474 }
 0xc84   : > { %v13163_v8 = vpop.f32.mrb[62].mxu1  ;;  %v15657_v2 = vadd.f32 %v13161_v39, %v12455_v50  ;;  %v13405_v44 = vpack.c.bf16 %v13351_v26, %v13349_v53  ;;  %v12480_v50 = vpop.permute.xlu1 %12479 }
 0xc85   : > { %v15658_v23 = vadd.f32 %v13163_v8, %v12460_v55  ;;  %v13288_v34 = vmul.f32 0.2, %v15656_v47  ;;  %v13165_v18 = vpop.f32.mrb[63].mxu1 }
 0xc86   : > { %v13289_v24 = vmul.f32 0.2, %v15657_v2  ;;  %v15659_v35 = vadd.f32 %v13165_v18, %v12460_v55  ;;  %13628 = vmatprep.subr.bf16.mxu1 %v13405_v44 }
 0xc87   : > { %v13290_v0 = vmul.f32 0.2, %v15658_v23  ;;  %13629 = vmatpush1.bf16.msra.mxu1 %v13404_v5  ;;  %v13352_v30 = vmax.f32 %v15656_v47, %v13288_v34 }
 0xc88   : > { %v13291_v54 = vmul.f32 0.2, %v15659_v35  ;;  %v13353_v56 = vmax.f32 %v15657_v2, %v13289_v24 }
 0xc89   : > { %v13354_v49 = vmax.f32 %v15658_v23, %v13290_v0 }
 0xc8a   : > { %v13355_v9 = vmax.f32 %v15659_v35, %v13291_v54  ;;  %v13169_v62 = vpop.f32.mrb[64].mxu1 }
 0xc8b   : > { %v13406_v21 = vpack.c.bf16 %v13354_v49, %v13352_v30  ;;  %v13171_v16 = vpop.f32.mrb[65].mxu1  ;;  %v15660_v6 = vadd.f32 %v13169_v62, %v12465_v43  ;;  %v12485_v49 = vpop.permute.xlu0 %12484  ;;  %v17009_v62 = vmov 3  }
 0xc8c   : > { %v13173_v20 = vpop.f32.mrb[66].mxu1  ;;  %v15661_v13 = vadd.f32 %v13171_v16, %v12465_v43  ;;  %v13407_v51 = vpack.c.bf16 %v13355_v9, %v13353_v56  ;;  %16786 = vset.pattern.permute.xlu1 %v17009_v62  ;;  %16785 = vset.pattern.permute.xlu0 %v17009_v62 }
 0xc8d   : > { %v15662_v37 = vadd.f32 %v13173_v20, %v12470_v10  ;;  %v13292_v33 = vmul.f32 0.2, %v15660_v6  ;;  %v13175_v17 = vpop.f32.mrb[67].mxu1  ;;  %13467 = vperm.xlu1 %16786, %v21425_v61   ;;  %13462 = vperm.xlu0 %16785, %v21419_v59  }
 0xc8e   : > { %v13293_v25 = vmul.f32 0.2, %v15661_v13  ;;  %v15663_v36 = vadd.f32 %v13175_v17, %v12470_v10  ;;  %13630 = vmatprep.subr.bf16.mxu1 %v13407_v51 }
 0xc8f   : > { %v13294_v12 = vmul.f32 0.2, %v15662_v37  ;;  %13631 = vmatpush1.bf16.msra.mxu1 %v13406_v21  ;;  %v13356_v15 = vmax.f32 %v15660_v6, %v13292_v33  ;;  %v12490_v21 = vpop.permute.xlu1 %12489 }
 0xc90   : > { %v13295_v41 = vmul.f32 0.2, %v15663_v36  ;;  %v13357_v57 = vmax.f32 %v15661_v13, %v13293_v25 }
 0xc91   : > { %v13358_v31 = vmax.f32 %v15662_v37, %v13294_v12  ;;  %13472 = vperm.xlu1 %16786, %v21437_v32   ;;  %13477 = vperm.xlu0 %16785, %v21443_v28  }
 0xc92   : > { %v13359_v38 = vmax.f32 %v15663_v36, %v13295_v41  ;;  %v13179_v58 = vpop.f32.mrb[68].mxu1 }
 0xc93   : > { %v13408_v19 = vpack.c.bf16 %v13358_v31, %v13356_v15  ;;  %v13181_v53 = vpop.f32.mrb[69].mxu1  ;;  %v15664_v26 = vadd.f32 %v13179_v58, %v12475_v14  ;;  %v12495_v31 = vpop.permute.xlu0 %12494 }
 0xc94   : > { %v13183_v3 = vpop.f32.mrb[70].mxu1  ;;  %v15665_v5 = vadd.f32 %v13181_v53, %v12475_v14  ;;  %v13409_v39 = vpack.c.bf16 %v13359_v38, %v13357_v57  ;;  %v12500_v58 = vpop.permute.xlu1 %12499 }
 0xc95   : > { %v15666_v47 = vadd.f32 %v13183_v3, %v12480_v50  ;;  %v13296_v8 = vmul.f32 0.2, %v15664_v26  ;;  %v13185_v55 = vpop.f32.mrb[71].mxu1  ;;  %13482 = vperm.xlu1 %16786, %v21461_v1   ;;  %13487 = vperm.xlu0 %16785, %v21455_v22  }
 0xc96   : > { %v13297_v2 = vmul.f32 0.2, %v15665_v5  ;;  %v15667_v44 = vadd.f32 %v13185_v55, %v12480_v50  ;;  %13632 = vmatprep.subr.bf16.mxu1 %v13409_v39 }
 0xc97   : > { %v13298_v23 = vmul.f32 0.2, %v15666_v47  ;;  %13633 = vmatpush1.bf16.msra.mxu1 %v13408_v19  ;;  %v13360_v24 = vmax.f32 %v15664_v26, %v13296_v8 }
 0xc98   : > { %v13299_v34 = vmul.f32 0.2, %v15667_v44  ;;  %v13361_v35 = vmax.f32 %v15665_v5, %v13297_v2  ;;  %v12505_v2 = vpop.permute.xlu0 %12504 }
 0xc99   : > { %v13362_v18 = vmax.f32 %v15666_v47, %v13298_v23  ;;  %13492 = vperm.xlu1 %16786, %v21479_v60   ;;  %13497 = vperm.xlu0 %16785, %v21466_v46  }
 0xc9a   : > { %v13363_v0 = vmax.f32 %v15667_v44, %v13299_v34  ;;  %v13189_v54 = vpop.f32.mrb[72].mxu1 }
 0xc9b   : > { %v13410_v30 = vpack.c.bf16 %v13362_v18, %v13360_v24  ;;  %v13191_v56 = vpop.f32.mrb[73].mxu1  ;;  %v15668_v9 = vadd.f32 %v13189_v54, %v12485_v49  ;;  %v12510_v18 = vpop.permute.xlu1 %12509 }
 0xc9c   : > { %v13193_v43 = vpop.f32.mrb[74].mxu1  ;;  %v15669_v16 = vadd.f32 %v13191_v56, %v12485_v49  ;;  %v13411_v6 = vpack.c.bf16 %v13363_v0, %v13361_v35 }
 0xc9d   : > { %v15670_v20 = vadd.f32 %v13193_v43, %v12490_v21  ;;  %v13300_v10 = vmul.f32 0.2, %v15668_v9  ;;  %v13195_v13 = vpop.f32.mrb[75].mxu1  ;;  %13502 = vperm.xlu1 %16786, %v21491_v7   ;;  %13507 = vperm.xlu0 %16785, %v21484_v63  }
 0xc9e   : > { %v13301_v51 = vmul.f32 0.2, %v15669_v16  ;;  %v15671_v37 = vadd.f32 %v13195_v13, %v12490_v21  ;;  %13634 = vmatprep.subr.bf16.mxu1 %v13411_v6 }
 0xc9f   : > { %v13302_v33 = vmul.f32 0.2, %v15670_v20  ;;  %13635 = vmatpush1.bf16.msra.mxu1 %v13410_v30  ;;  %v13364_v36 = vmax.f32 %v15668_v9, %v13300_v10  ;;  %v12520_v13 = vpop.permute.xlu1 %12519 }
 0xca0   : > { %v13303_v17 = vmul.f32 0.2, %v15671_v37  ;;  %v13365_v12 = vmax.f32 %v15669_v16, %v13301_v51  ;;  %v12515_v16 = vpop.permute.xlu0 %12514 }
 0xca1   : > { %v13366_v25 = vmax.f32 %v15670_v20, %v13302_v33  ;;  %13512 = vperm.xlu1 %16786, %v21509_v11   ;;  %13517 = vperm.xlu0 %16785, %v21496_v42  }
 0xca2   : > { %v13367_v41 = vmax.f32 %v15671_v37, %v13303_v17  ;;  %v13199_v61 = vpop.f32.mrb[76].mxu1 }
 0xca3   : > { %v13412_v59 = vpack.c.bf16 %v13366_v25, %v13364_v36  ;;  %v13201_v15 = vpop.f32.mrb[77].mxu1  ;;  %v15672_v57 = vadd.f32 %v13199_v61, %v12495_v31 }
 0xca4   : > { %v13203_v38 = vpop.f32.mrb[78].mxu1  ;;  %v15673_v14 = vadd.f32 %v13201_v15, %v12495_v31  ;;  %v13413_v19 = vpack.c.bf16 %v13367_v41, %v13365_v12  ;;  %v12525_v15 = vpop.permute.xlu0 %12524 }
 0xca5   : > { %v15674_v32 = vadd.f32 %v13203_v38, %v12500_v58  ;;  %v13304_v53 = vmul.f32 0.2, %v15672_v57  ;;  %v13205_v28 = vpop.f32.mrb[79].mxu1  ;;  %13522 = vperm.xlu1 %16786, %v21521_v4   ;;  %13527 = vperm.xlu0 %16785, %v21514_v52  }
 0xca6   : > { %v13305_v26 = vmul.f32 0.2, %v15673_v14  ;;  %v15675_v3 = vadd.f32 %v13205_v28, %v12500_v58  ;;  %13636 = vmatprep.subr.bf16.mxu1 %v13413_v19 }
 0xca7   : > { %v13306_v50 = vmul.f32 0.2, %v15674_v32  ;;  %13637 = vmatpush1.bf16.msra.mxu1 %v13412_v59  ;;  %v13368_v47 = vmax.f32 %v15672_v57, %v13304_v53 }
 0xca8   : > { %v13307_v5 = vmul.f32 0.2, %v15675_v3  ;;  %v13369_v8 = vmax.f32 %v15673_v14, %v13305_v26  ;;  %v12530_v14 = vpop.permute.xlu1 %12529 }
 0xca9   : > { %v13370_v39 = vmax.f32 %v15674_v32, %v13306_v50  ;;  %13532 = vperm.xlu1 %16786, %v21539_v40   ;;  %13537 = vperm.xlu0 %16785, %v21526_v29  }
 0xcaa   : > { %v13371_v55 = vmax.f32 %v15675_v3, %v13307_v5  ;;  %v13209_v1 = vpop.f32.mrb[80].mxu1 }
 0xcab   : > { %v13414_v22 = vpack.c.bf16 %v13370_v39, %v13368_v47  ;;  %v13211_v44 = vpop.f32.mrb[81].mxu1  ;;  %v15676_v23 = vadd.f32 %v13209_v1, %v12505_v2  ;;  %v12535_v1 = vpop.permute.xlu0 %12534 }
 0xcac   : > { %v13213_v34 = vpop.f32.mrb[82].mxu1  ;;  %v15677_v24 = vadd.f32 %v13211_v44, %v12505_v2  ;;  %v13415_v35 = vpack.c.bf16 %v13371_v55, %v13369_v8 }
 0xcad   : > { %v15678_v60 = vadd.f32 %v13213_v34, %v12510_v18  ;;  %v13308_v0 = vmul.f32 0.2, %v15676_v23  ;;  %v13215_v46 = vpop.f32.mrb[83].mxu1  ;;  %v12540_v34 = vpop.permute.xlu1 %12539 }
 0xcae   : > { %v13309_v54 = vmul.f32 0.2, %v15677_v24  ;;  %v15679_v49 = vadd.f32 %v13215_v46, %v12510_v18  ;;  %13638 = vmatprep.subr.bf16.mxu1 %v13415_v35 }
 0xcaf   : > { %v13310_v30 = vmul.f32 0.2, %v15678_v60  ;;  %13639 = vmatpush1.bf16.msra.mxu1 %v13414_v22  ;;  %v13372_v62 = vmax.f32 %v15676_v23, %v13308_v0 }
 0xcb0   : > { %v13311_v56 = vmul.f32 0.2, %v15679_v49  ;;  %v13373_v43 = vmax.f32 %v15677_v24, %v13309_v54 }
 0xcb1   : > { %v13374_v9 = vmax.f32 %v15678_v60, %v13310_v30 }
 0xcb2   : > { %v13375_v21 = vmax.f32 %v15679_v49, %v13311_v56  ;;  %v13219_v7 = vpop.f32.mrb[84].mxu1 }
 0xcb3   : > { %v13416_v63 = vpack.c.bf16 %v13374_v9, %v13372_v62  ;;  %v13221_v6 = vpop.f32.mrb[85].mxu1  ;;  %v15680_v20 = vadd.f32 %v13219_v7, %v12515_v16  ;;  %v12545_v7 = vpop.permute.xlu0 %12544 }
 0xcb4   : > { %v13223_v10 = vpop.f32.mrb[86].mxu1  ;;  %v15681_v51 = vadd.f32 %v13221_v6, %v12515_v16  ;;  %v13417_v37 = vpack.c.bf16 %v13375_v21, %v13373_v43 }
 0xcb5   : > { %v15682_v11 = vadd.f32 %v13223_v10, %v12520_v13  ;;  %v13312_v33 = vmul.f32 0.2, %v15680_v20  ;;  %v13225_v42 = vpop.f32.mrb[87].mxu1  ;;  %v12550_v10 = vpop.permute.xlu1 %12549 }
 0xcb6   : > { %v13313_v17 = vmul.f32 0.2, %v15681_v51  ;;  %v15683_v25 = vadd.f32 %v13225_v42, %v12520_v13  ;;  %13640 = vmatprep.subr.bf16.mxu1 %v13417_v37 }
 0xcb7   : > { %v13314_v36 = vmul.f32 0.2, %v15682_v11  ;;  %13641 = vmatpush1.bf16.msra.mxu1 %v13416_v63  ;;  %v13376_v61 = vmax.f32 %v15680_v20, %v13312_v33 }
 0xcb8   : > { %v13315_v12 = vmul.f32 0.2, %v15683_v25  ;;  %v13377_v31 = vmax.f32 %v15681_v51, %v13313_v17 }
 0xcb9   : > { %v13378_v41 = vmax.f32 %v15682_v11, %v13314_v36 }
 0xcba   : > { %v13379_v59 = vmax.f32 %v15683_v25, %v13315_v12  ;;  %v13229_v4 = vpop.f32.mrb[88].mxu1 }
 0xcbb   : > { %v13418_v52 = vpack.c.bf16 %v13378_v41, %v13376_v61  ;;  %v13231_v57 = vpop.f32.mrb[89].mxu1  ;;  %v15684_v38 = vadd.f32 %v13229_v4, %v12525_v15  ;;  %v12555_v4 = vpop.permute.xlu0 %12554 }
 0xcbc   : > { %v13233_v58 = vpop.f32.mrb[90].mxu1  ;;  %v15685_v19 = vadd.f32 %v13231_v57, %v12525_v15  ;;  %v13419_v32 = vpack.c.bf16 %v13379_v59, %v13377_v31 }
 0xcbd   : > { %v15686_v53 = vadd.f32 %v13233_v58, %v12530_v14  ;;  %v13316_v28 = vmul.f32 0.2, %v15684_v38  ;;  %v13235_v26 = vpop.f32.mrb[91].mxu1  ;;  %v12560_v58 = vpop.permute.xlu1 %12559 }
 0xcbe   : > { %v13317_v3 = vmul.f32 0.2, %v15685_v19  ;;  %v15687_v40 = vadd.f32 %v13235_v26, %v12530_v14  ;;  %13642 = vmatprep.subr.bf16.mxu1 %v13419_v32 }
 0xcbf   : > { %v13318_v29 = vmul.f32 0.2, %v15686_v53  ;;  %13643 = vmatpush1.bf16.msra.mxu1 %v13418_v52  ;;  %v13380_v39 = vmax.f32 %v15684_v38, %v13316_v28 }
 0xcc0   : > { %v13319_v50 = vmul.f32 0.2, %v15687_v40  ;;  %v13381_v47 = vmax.f32 %v15685_v19, %v13317_v3 }
 0xcc1   : > { %v13382_v5 = vmax.f32 %v15686_v53, %v13318_v29 }
 0xcc2   : > { %v13383_v8 = vmax.f32 %v15687_v40, %v13319_v50  ;;  %v13239_v55 = vpop.f32.mrb[92].mxu1 }
 0xcc3   : > { %v13420_v2 = vpack.c.bf16 %v13382_v5, %v13380_v39  ;;  %v13241_v22 = vpop.f32.mrb[93].mxu1  ;;  %v15688_v44 = vadd.f32 %v13239_v55, %v12535_v1 }
 0xcc4   : > { %v13243_v23 = vpop.f32.mrb[94].mxu1  ;;  %v15689_v18 = vadd.f32 %v13241_v22, %v12535_v1  ;;  %v13421_v24 = vpack.c.bf16 %v13383_v8, %v13381_v47  ;;  %v13430_v1 = vld [vmem:[%s21806_s1 + $0x1c40] sm:$0xff] }
 0xcc5   : > { %v15690_v35 = vadd.f32 %v13243_v23, %v12540_v34  ;;  %v13320_v60 = vmul.f32 0.2, %v15688_v44  ;;  %v13245_v0 = vpop.f32.mrb[95].mxu1  ;;  %v13433_v23 = vld [vmem:[%s21806_s1 + $0x1ca0] sm:$0xff] }
 0xcc6   : > { %v13321_v46 = vmul.f32 0.2, %v15689_v18  ;;  %v15691_v54 = vadd.f32 %v13245_v0, %v12540_v34  ;;  %13644 = vmatprep.subr.bf16.mxu1 %v13421_v24  ;;  %v13434_v24 = vld [vmem:[%s21806_s1 + $0x1cc0] sm:$0xff] }
 0xcc7   : > { %v13322_v49 = vmul.f32 0.2, %v15690_v35  ;;  %13645 = vmatpush1.bf16.msra.mxu1 %v13420_v2  ;;  %v13384_v9 = vmax.f32 %v15688_v44, %v13320_v60  ;;  %v13431_v2 = vld [vmem:[%s21806_s1 + $0x1c60] sm:$0xff]  ;;  %v15036_v0 = vcombine.low %v13434_v24, %v13435_v27 }
 0xcc8   : > { %v13323_v30 = vmul.f32 0.2, %v15691_v54  ;;  %v13385_v62 = vmax.f32 %v15689_v18, %v13321_v46  ;;  %v15033_v22 = vcombine.high %v13430_v1, %v13431_v2  ;;  %v13432_v44 = vld [vmem:[%s21806_s1 + $0x1c80] sm:$0xff]  ;;  %v15032_v34 = vcombine.low %v13430_v1, %v13431_v2 }
 0xcc9   : > { %v13386_v56 = vmax.f32 %v15690_v35, %v13322_v49  ;;  %v15035_v18 = vcombine.high %v13432_v44, %v13433_v23  ;;  %v15034_v45 = vcombine.low %v13432_v44, %v13433_v23  ;;  %v13436_v35 = vld [vmem:[%s21806_s1 + $0x1d00] sm:$0xff] }
 0xcca   : > { %v13387_v43 = vmax.f32 %v15691_v54, %v13323_v30  ;;  %v13249_v21 = vpop.f32.mrb[96].mxu1  ;;  %v13437_v60 = vld [vmem:[%s21806_s1 + $0x1d20] sm:$0xff] }
 0xccb   : > { %v13422_v16 = vpack.c.bf16 %v13386_v56, %v13384_v9  ;;  %v13251_v63 = vpop.f32.mrb[97].mxu1  ;;  %v15692_v6 = vadd.f32 %v13249_v21, %v12545_v7  ;;  %v15039_v46 = vcombine.high %v13436_v35, %v13437_v60  ;;  %v13438_v54 = vld [vmem:[%s21806_s1 + $0x1d40] sm:$0xff]  ;;  %v15038_v30 = vcombine.low %v13436_v35, %v13437_v60 }
 0xccc   : > { %v13253_v20 = vpop.f32.mrb[98].mxu1  ;;  %v15693_v13 = vadd.f32 %v13251_v63, %v12545_v7  ;;  %v13423_v51 = vpack.c.bf16 %v13387_v43, %v13385_v62  ;;  %v13439_v49 = vld [vmem:[%s21806_s1 + $0x1d60] sm:$0xff] }
 0xccd   : > { %v15694_v37 = vadd.f32 %v13253_v20, %v12550_v10  ;;  %v13324_v11 = vmul.f32 0.2, %v15692_v6  ;;  %v13255_v33 = vpop.f32.mrb[99].mxu1  ;;  %v15041_v56 = vcombine.high %v13438_v54, %v13439_v49  ;;  %v13440_v9 = vld [vmem:[%s21806_s1 + $0x1d80] sm:$0xff]  ;;  %v15040_v43 = vcombine.low %v13438_v54, %v13439_v49 }
 0xcce   : > { %v13325_v42 = vmul.f32 0.2, %v15693_v13  ;;  %v15695_v17 = vadd.f32 %v13255_v33, %v12550_v10  ;;  %13646 = vmatprep.subr.bf16.mxu1 %v13423_v51  ;;  %v13441_v62 = vld [vmem:[%s21806_s1 + $0x1da0] sm:$0xff]  ;;  %v22132_v10 = vmov 0   ;;  %v13818_v51 = vld [vmem:[%s21807_s2 + $0x8] sm:$0xff]  ;;  %v13820_v33 = vld [vmem:[%s21807_s2 + $0x18] sm:$0xff] }
 0xccf   : > { %v13326_v25 = vmul.f32 0.2, %v15694_v37  ;;  %13647 = vmatpush1.bf16.msra.mxu1 %v13422_v16  ;;  %v13388_v41 = vmax.f32 %v15692_v6, %v13324_v11  ;;  %v15043_v21 = vcombine.high %v13440_v9, %v13441_v62  ;;  %v13442_v7 = vld [vmem:[%s21806_s1 + $0x1dc0] sm:$0xff]  ;;  %v15042_v63 = vcombine.low %v13440_v9, %v13441_v62  ;;  %v13819_v11 = vld [vmem:[%s21807_s2 + $0x10] sm:$0xff] }
 0xcd0   : > { %v13327_v36 = vmul.f32 0.2, %v15695_v17  ;;  %v13389_v61 = vmax.f32 %v15693_v13, %v13325_v42  ;;  %v13443_v16 = vld [vmem:[%s21806_s1 + $0x1de0] sm:$0xff] }
 0xcd1   : > { %v13390_v12 = vmax.f32 %v15694_v37, %v13326_v25  ;;  %v15045_v6 = vcombine.high %v13442_v7, %v13443_v16  ;;  %v15044_v20 = vcombine.low %v13442_v7, %v13443_v16  ;;  %v13817_v13 = vld [vmem:[%s21807_s2] sm:$0xff]  ;;  %v17010_v37 = vmov 4  }
 0xcd2   : > { %v13391_v31 = vmax.f32 %v15695_v17, %v13327_v36  ;;  %v13259_v59 = vpop.f32.mrb[100].mxu1  ;;  %16787 = vset.pattern.permute.xlu1 %v17010_v37  ;;  %16788 = vset.pattern.permute.xlu0 %v17010_v37 }
 0xcd3   : > { %v13424_v15 = vpack.c.bf16 %v13390_v12, %v13388_v41  ;;  %v13261_v52 = vpop.f32.mrb[101].mxu1  ;;  %v15696_v57 = vadd.f32 %v13259_v59, %v12555_v4  ;;  %13823 = vperm.xlu1 %16787, %v13817_v13   ;;  %13828 = vperm.xlu0 %16788, %v13818_v51  }
 0xcd4   : > { %v13263_v38 = vpop.f32.mrb[102].mxu1  ;;  %v15697_v14 = vadd.f32 %v13261_v52, %v12555_v4  ;;  %v13425_v19 = vpack.c.bf16 %v13391_v31, %v13389_v61 }
 0xcd5   : > { %v15698_v32 = vadd.f32 %v13263_v38, %v12560_v58  ;;  %v13328_v53 = vmul.f32 0.2, %v15696_v57  ;;  %v13265_v28 = vpop.f32.mrb[103].mxu1 }
 0xcd6   : > { %v13329_v26 = vmul.f32 0.2, %v15697_v14  ;;  %v15699_v3 = vadd.f32 %v13265_v28, %v12560_v58  ;;  %13648 = vmatprep.subr.bf16.mxu1 %v13425_v19 }
 0xcd7   : > { %v13330_v40 = vmul.f32 0.2, %v15698_v32  ;;  %13649 = vmatpush1.bf16.msra.mxu1 %v13424_v15  ;;  %v13392_v5 = vmax.f32 %v15696_v57, %v13328_v53  ;;  %13833 = vperm.xlu1 %16787, %v13819_v11  }
 0xcd8   : > { %v13331_v29 = vmul.f32 0.2, %v15699_v3  ;;  %v13393_v39 = vmax.f32 %v15697_v14, %v13329_v26 }
 0xcd9   : > { %v13394_v50 = vmax.f32 %v15698_v32, %v13330_v40 }
 0xcda   : > { %v13395_v47 = vmax.f32 %v15699_v3, %v13331_v29 }
 0xcdb   : > { %v13426_v8 = vpack.c.bf16 %v13394_v50, %v13392_v5  ;;  %13838 = vperm.xlu1 %16787, %v13820_v33  }
 0xcdc   : > { %v13427_v55 = vpack.c.bf16 %v13395_v47, %v13393_v39 }
 0xcde   : > { %13650 = vmatprep.subr.bf16.mxu1 %v13427_v55 }
 0xcdf   : > { %13651 = vmatpush1.bf16.msra.mxu1 %v13426_v8 }
 0xce2   : > { %13653 = vmatmul.mubr.bf16.vlgmr.msra.gmra.mrb[104].mxu1 %v15030_v48  ;;  %v15037_v48 = vcombine.high %v13434_v24, %v13435_v27 }
 0xce3   : > { %13662 = vmatprep.mubr.bf16.mxu1 %v15033_v22 }
 0xcea   : > { %13663 = vmatmul.mubr.bf16.gmra.mrb[108].mxu1 %v15032_v34 }
 0xceb   : > { %13672 = vmatprep.mubr.bf16.mxu1 %v15035_v18 }
 0xcf2   : > { %13673 = vmatmul.mubr.bf16.gmra.mrb[112].mxu1 %v15034_v45 }
 0xcf3   : > { %13682 = vmatprep.mubr.bf16.mxu1 %v15037_v48 }
 0xcfa   : > { %13683 = vmatmul.mubr.bf16.gmra.mrb[116].mxu1 %v15036_v0 }
 0xcfb   : > { %13692 = vmatprep.mubr.bf16.mxu1 %v15039_v46 }
 0xd02   : > { %13693 = vmatmul.mubr.bf16.gmra.mrb[120].mxu1 %v15038_v30 }
 0xd03   : > { %13702 = vmatprep.mubr.bf16.mxu1 %v15041_v56 }
 0xd0a   : > { %13703 = vmatmul.mubr.bf16.gmra.mrb[124].mxu1 %v15040_v43 }
 0xd0b   : > { %13712 = vmatprep.mubr.bf16.mxu1 %v15043_v21 }
 0xd0c   : > { %v13463_v42 = vpop.permute.xlu0 %13462  ;;  %v13468_v25 = vpop.permute.xlu1 %13467 }
 0xd10   : > { %v13473_v58 = vpop.permute.xlu1 %13472  ;;  %v13478_v5 = vpop.permute.xlu0 %13477 }
 0xd12   : > { %13713 = vmatmul.mubr.bf16.gmra.mrb[128].mxu1 %v15042_v63 }
 0xd13   : > { %13722 = vmatprep.mubr.bf16.mxu1 %v15045_v6 }
 0xd14   : > { %v13483_v45 = vpop.permute.xlu1 %13482  ;;  %v13488_v54 = vpop.permute.xlu0 %13487 }
 0xd18   : > { %v13493_v51 = vpop.permute.xlu1 %13492 }
 0xd1a   : > { %13723 = vmatmul.mubr.bf16.gmra.mrb[132].mxu1 %v15044_v20 }
 0xd1b   : > { %13885 = vmatprep.mubr.bf16.mxu1 %v22132_v10 }
 0xdb5   : > { %v13654_v17 = vpop.f32.mrb[104].mxu1 }
 0xdb6   : > { %v13656_v36 = vpop.f32.mrb[105].mxu1  ;;  %v13655_v12 = vadd.f32 %v13654_v17, %v13463_v42 }
 0xdb7   : > { %v13658_v41 = vpop.f32.mrb[106].mxu1  ;;  %v13657_v61 = vadd.f32 %v13656_v36, %v13463_v42 }
 0xdb8   : > { %v13659_v31 = vadd.f32 %v13658_v41, %v13468_v25  ;;  %v13733_v59 = vmul.f32 0.2, %v13655_v12  ;;  %v13660_v4 = vpop.f32.mrb[107].mxu1 }
 0xdb9   : > { %v13734_v15 = vmul.f32 0.2, %v13657_v61  ;;  %v13661_v52 = vadd.f32 %v13660_v4, %v13468_v25  ;;  %v13498_v25 = vpop.permute.xlu0 %13497 }
 0xdba   : > { %v13735_v57 = vmul.f32 0.2, %v13659_v31  ;;  %v13765_v19 = vmax.f32 %v13655_v12, %v13733_v59 }
 0xdbb   : > { %v13736_v38 = vmul.f32 0.2, %v13661_v52  ;;  %v13766_v32 = vmax.f32 %v13657_v61, %v13734_v15 }
 0xdbc   : > { %v13767_v14 = vmax.f32 %v13659_v31, %v13735_v57 }
 0xdbd   : > { %v13768_v53 = vmax.f32 %v13661_v52, %v13736_v38  ;;  %v13664_v28 = vpop.f32.mrb[108].mxu1 }
 0xdbe   : > { %v13797_v26 = vpack.c.bf16 %v13767_v14, %v13765_v19  ;;  %v13666_v3 = vpop.f32.mrb[109].mxu1  ;;  %v13665_v40 = vadd.f32 %v13664_v28, %v13473_v58  ;;  %v13503_v19 = vpop.permute.xlu1 %13502 }
 0xdbf   : > { %v13668_v29 = vpop.f32.mrb[110].mxu1  ;;  %v13667_v50 = vadd.f32 %v13666_v3, %v13473_v58  ;;  %v13798_v39 = vpack.c.bf16 %v13768_v53, %v13766_v32 }
 0xdc0   : > { %v13737_v47 = vmul.f32 0.2, %v13665_v40  ;;  %v13669_v8 = vadd.f32 %v13668_v29, %v13478_v5  ;;  %v13670_v55 = vpop.f32.mrb[111].mxu1 }
 0xdc1   : > { %v13738_v1 = vmul.f32 0.2, %v13667_v50  ;;  %v13671_v2 = vadd.f32 %v13670_v55, %v13478_v5  ;;  %13853 = vmatprep.subr.bf16.mxu1 %v13798_v39 }
 0xdc2   : > { %v13739_v22 = vmul.f32 0.2, %v13669_v8  ;;  %13854 = vmatpush1.bf16.msra.mxu1 %v13797_v26  ;;  %v13769_v23 = vmax.f32 %v13665_v40, %v13737_v47  ;;  %v13508_v40 = vpop.permute.xlu0 %13507 }
 0xdc3   : > { %v13740_v44 = vmul.f32 0.2, %v13671_v2  ;;  %v13770_v18 = vmax.f32 %v13667_v50, %v13738_v1 }
 0xdc4   : > { %v13771_v34 = vmax.f32 %v13669_v8, %v13739_v22 }
 0xdc5   : > { %v13772_v24 = vmax.f32 %v13671_v2, %v13740_v44  ;;  %v13674_v27 = vpop.f32.mrb[112].mxu1 }
 0xdc6   : > { %v13799_v48 = vpack.c.bf16 %v13771_v34, %v13769_v23  ;;  %v13676_v35 = vpop.f32.mrb[113].mxu1  ;;  %v13675_v60 = vadd.f32 %v13674_v27, %v13483_v45 }
 0xdc7   : > { %v13678_v0 = vpop.f32.mrb[114].mxu1  ;;  %v13677_v46 = vadd.f32 %v13676_v35, %v13483_v45  ;;  %v13800_v49 = vpack.c.bf16 %v13772_v24, %v13770_v18  ;;  %v13513_v18 = vpop.permute.xlu1 %13512 }
 0xdc8   : > { %v13741_v30 = vmul.f32 0.2, %v13675_v60  ;;  %v13679_v56 = vadd.f32 %v13678_v0, %v13488_v54  ;;  %v13680_v9 = vpop.f32.mrb[115].mxu1 }
 0xdc9   : > { %v13742_v62 = vmul.f32 0.2, %v13677_v46  ;;  %v13681_v43 = vadd.f32 %v13680_v9, %v13488_v54  ;;  %13855 = vmatprep.subr.bf16.mxu1 %v13800_v49 }
 0xdca   : > { %v13743_v21 = vmul.f32 0.2, %v13679_v56  ;;  %13856 = vmatpush1.bf16.msra.mxu1 %v13799_v48  ;;  %v13773_v16 = vmax.f32 %v13675_v60, %v13741_v30  ;;  %v13518_v60 = vpop.permute.xlu0 %13517 }
 0xdcb   : > { %v13744_v7 = vmul.f32 0.2, %v13681_v43  ;;  %v13774_v6 = vmax.f32 %v13677_v46, %v13742_v62 }
 0xdcc   : > { %v13775_v63 = vmax.f32 %v13679_v56, %v13743_v21 }
 0xdcd   : > { %v13776_v20 = vmax.f32 %v13681_v43, %v13744_v7  ;;  %v13684_v13 = vpop.f32.mrb[116].mxu1 }
 0xdce   : > { %v13801_v37 = vpack.c.bf16 %v13775_v63, %v13773_v16  ;;  %v13686_v11 = vpop.f32.mrb[117].mxu1  ;;  %v13685_v33 = vadd.f32 %v13684_v13, %v13493_v51 }
 0xdcf   : > { %v13688_v42 = vpop.f32.mrb[118].mxu1  ;;  %v13687_v17 = vadd.f32 %v13686_v11, %v13493_v51  ;;  %v13802_v36 = vpack.c.bf16 %v13776_v20, %v13774_v6  ;;  %v13523_v6 = vpop.permute.xlu1 %13522 }
 0xdd0   : > { %v13745_v12 = vmul.f32 0.2, %v13685_v33  ;;  %v13689_v41 = vadd.f32 %v13688_v42, %v13498_v25  ;;  %v13690_v61 = vpop.f32.mrb[119].mxu1 }
 0xdd1   : > { %v13746_v31 = vmul.f32 0.2, %v13687_v17  ;;  %v13691_v59 = vadd.f32 %v13690_v61, %v13498_v25  ;;  %13857 = vmatprep.subr.bf16.mxu1 %v13802_v36 }
 0xdd2   : > { %v13747_v4 = vmul.f32 0.2, %v13689_v41  ;;  %13858 = vmatpush1.bf16.msra.mxu1 %v13801_v37  ;;  %v13777_v52 = vmax.f32 %v13685_v33, %v13745_v12  ;;  %v13528_v33 = vpop.permute.xlu0 %13527 }
 0xdd3   : > { %v13748_v15 = vmul.f32 0.2, %v13691_v59  ;;  %v13778_v38 = vmax.f32 %v13687_v17, %v13746_v31 }
 0xdd4   : > { %v13779_v57 = vmax.f32 %v13689_v41, %v13747_v4 }
 0xdd5   : > { %v13780_v58 = vmax.f32 %v13691_v59, %v13748_v15  ;;  %v13694_v14 = vpop.f32.mrb[120].mxu1 }
 0xdd6   : > { %v13803_v32 = vpack.c.bf16 %v13779_v57, %v13777_v52  ;;  %v13696_v53 = vpop.f32.mrb[121].mxu1  ;;  %v13695_v28 = vadd.f32 %v13694_v14, %v13503_v19 }
 0xdd7   : > { %v13698_v26 = vpop.f32.mrb[122].mxu1  ;;  %v13697_v3 = vadd.f32 %v13696_v53, %v13503_v19  ;;  %v13804_v29 = vpack.c.bf16 %v13780_v58, %v13778_v38  ;;  %v13533_v38 = vpop.permute.xlu1 %13532 }
 0xdd8   : > { %v13749_v50 = vmul.f32 0.2, %v13695_v28  ;;  %v13699_v5 = vadd.f32 %v13698_v26, %v13508_v40  ;;  %v13700_v39 = vpop.f32.mrb[123].mxu1 }
 0xdd9   : > { %v13750_v47 = vmul.f32 0.2, %v13697_v3  ;;  %v13701_v8 = vadd.f32 %v13700_v39, %v13508_v40  ;;  %13859 = vmatprep.subr.bf16.mxu1 %v13804_v29 }
 0xdda   : > { %v13751_v55 = vmul.f32 0.2, %v13699_v5  ;;  %13860 = vmatpush1.bf16.msra.mxu1 %v13803_v32  ;;  %v13781_v2 = vmax.f32 %v13695_v28, %v13749_v50  ;;  %v13538_v28 = vpop.permute.xlu0 %13537 }
 0xddb   : > { %v13752_v1 = vmul.f32 0.2, %v13701_v8  ;;  %v13782_v44 = vmax.f32 %v13697_v3, %v13750_v47 }
 0xddc   : > { %v13783_v22 = vmax.f32 %v13699_v5, %v13751_v55 }
 0xddd   : > { %v13784_v23 = vmax.f32 %v13701_v8, %v13752_v1  ;;  %v13704_v34 = vpop.f32.mrb[124].mxu1 }
 0xdde   : > { %v13805_v24 = vpack.c.bf16 %v13783_v22, %v13781_v2  ;;  %v13706_v27 = vpop.f32.mrb[125].mxu1  ;;  %v13705_v45 = vadd.f32 %v13704_v34, %v13513_v18 }
 0xddf   : > { %v13708_v48 = vpop.f32.mrb[126].mxu1  ;;  %v13707_v35 = vadd.f32 %v13706_v27, %v13513_v18  ;;  %v13806_v0 = vpack.c.bf16 %v13784_v23, %v13782_v44  ;;  %v13813_v44 = vld [vmem:[%s21806_s1 + $0x1e00] sm:$0xf] }
 0xde0   : > { %v13753_v46 = vmul.f32 0.2, %v13705_v45  ;;  %v13709_v54 = vadd.f32 %v13708_v48, %v13518_v60  ;;  %v13710_v49 = vpop.f32.mrb[127].mxu1  ;;  %v13814_v23 = vld [vmem:[%s21806_s1 + $0x1e20] sm:$0xf] }
 0xde1   : > { %v13754_v30 = vmul.f32 0.2, %v13707_v35  ;;  %v13711_v56 = vadd.f32 %v13710_v49, %v13518_v60  ;;  %13861 = vmatprep.subr.bf16.mxu1 %v13806_v0  ;;  %v15046_v18 = vcombine.low %v13813_v44, %v13814_v23  ;;  %v13816_v27 = vld [vmem:[%s21806_s1 + $0x1e60] sm:$0xf]  ;;  %v13824_v60 = vpop.permute.xlu1 %13823 }
 0xde2   : > { %v13755_v9 = vmul.f32 0.2, %v13709_v54  ;;  %13862 = vmatpush1.bf16.msra.mxu1 %v13805_v24  ;;  %v13785_v43 = vmax.f32 %v13705_v45, %v13753_v46  ;;  %v13815_v24 = vld [vmem:[%s21806_s1 + $0x1e40] sm:$0xf]  ;;  %v13829_v46 = vpop.permute.xlu0 %13828 }
 0xde3   : > { %v13756_v62 = vmul.f32 0.2, %v13711_v56  ;;  %v13786_v7 = vmax.f32 %v13707_v35, %v13754_v30  ;;  %v15047_v45 = vcombine.low %v13815_v24, %v13816_v27  ;;  %v13927_v48 = vld [vmem:[%s21807_s2] sm:$0x1]  ;;  %v17011_v35 = vmov 5  }
 0xde4   : > { %v13787_v21 = vmax.f32 %v13709_v54, %v13755_v9  ;;  %16789 = vset.pattern.permute.xlu0 %v17011_v35 }
 0xde5   : > { %v13788_v16 = vmax.f32 %v13711_v56, %v13756_v62  ;;  %v13714_v63 = vpop.f32.mrb[128].mxu1  ;;  %13930 = vperm.xlu0 %16789, %v13927_v48  }
 0xde6   : > { %v13807_v20 = vpack.c.bf16 %v13787_v21, %v13785_v43  ;;  %v13716_v13 = vpop.f32.mrb[129].mxu1  ;;  %v13715_v51 = vadd.f32 %v13714_v63, %v13523_v6 }
 0xde7   : > { %v13718_v37 = vpop.f32.mrb[130].mxu1  ;;  %v13717_v11 = vadd.f32 %v13716_v13, %v13523_v6  ;;  %v13808_v42 = vpack.c.bf16 %v13788_v16, %v13786_v7  ;;  %v13834_v7 = vpop.permute.xlu1 %13833 }
 0xde8   : > { %v13757_v17 = vmul.f32 0.2, %v13715_v51  ;;  %v13719_v25 = vadd.f32 %v13718_v37, %v13528_v33  ;;  %v13720_v36 = vpop.f32.mrb[131].mxu1 }
 0xde9   : > { %v13758_v12 = vmul.f32 0.2, %v13717_v11  ;;  %v13721_v41 = vadd.f32 %v13720_v36, %v13528_v33  ;;  %13863 = vmatprep.subr.bf16.mxu1 %v13808_v42 }
 0xdea   : > { %v13759_v61 = vmul.f32 0.2, %v13719_v25  ;;  %13864 = vmatpush1.bf16.msra.mxu1 %v13807_v20  ;;  %v13789_v59 = vmax.f32 %v13715_v51, %v13757_v17 }
 0xdeb   : > { %v13760_v31 = vmul.f32 0.2, %v13721_v41  ;;  %v13790_v15 = vmax.f32 %v13717_v11, %v13758_v12  ;;  %v13839_v36 = vpop.permute.xlu1 %13838 }
 0xdec   : > { %v13791_v4 = vmax.f32 %v13719_v25, %v13759_v61 }
 0xded   : > { %v13792_v52 = vmax.f32 %v13721_v41, %v13760_v31  ;;  %v13724_v57 = vpop.f32.mrb[132].mxu1 }
 0xdee   : > { %v13809_v58 = vpack.c.bf16 %v13791_v4, %v13789_v59  ;;  %v13726_v14 = vpop.f32.mrb[133].mxu1  ;;  %v13725_v19 = vadd.f32 %v13724_v57, %v13533_v38 }
 0xdef   : > { %v13728_v32 = vpop.f32.mrb[134].mxu1  ;;  %v13727_v53 = vadd.f32 %v13726_v14, %v13533_v38  ;;  %v13810_v26 = vpack.c.bf16 %v13792_v52, %v13790_v15 }
 0xdf0   : > { %v13761_v3 = vmul.f32 0.2, %v13725_v19  ;;  %v13729_v40 = vadd.f32 %v13728_v32, %v13538_v28  ;;  %v13730_v29 = vpop.f32.mrb[135].mxu1 }
 0xdf1   : > { %v13762_v50 = vmul.f32 0.2, %v13727_v53  ;;  %v13731_v5 = vadd.f32 %v13730_v29, %v13538_v28  ;;  %13865 = vmatprep.subr.bf16.mxu1 %v13810_v26  ;;  %v17012_v28 = vmov 1966171168  }
 0xdf2   : > { %v13763_v39 = vmul.f32 0.2, %v13729_v40  ;;  %13866 = vmatpush1.bf16.msra.mxu1 %v13809_v58  ;;  %v13793_v8 = vmax.f32 %v13725_v19, %v13761_v3  ;;  %v13982_v26 = vunpack.c.l.s4 %v17012_v28  ;;  %v13984_v3 = vlaneseq }
 0xdf3   : > { %v13764_v47 = vmul.f32 0.2, %v13731_v5  ;;  %v13794_v1 = vmax.f32 %v13727_v53, %v13762_v50  ;;  %v13926_v53 = vld [vmem:[%s21806_s1 + $0x1e80] sm:$0x1] }
 0xdf4   : > { %v13795_v55 = vmax.f32 %v13729_v40, %v13763_v39  ;;  %v13983_v40 = vunpack.c.0.s8 %v13982_v26  ;;  %v13985_v29 = vshrl.u32 %v13984_v3, 7  ;;  %vm13998_vm1 = vcmp.lt.s32.totalorder %v13984_v3, 256 }
 0xdf5   : > { %v13796_v2 = vmax.f32 %v13731_v5, %v13764_v47 }
 0xdf6   : > { %v13811_v22 = vpack.c.bf16 %v13795_v55, %v13793_v8  ;;  %v13986_v55 = vsub.s32 %v13983_v40, %v13985_v29 }
 0xdf7   : > { %v13812_v34 = vpack.c.bf16 %v13796_v2, %v13794_v1 }
 0xdf9   : > { %13867 = vmatprep.subr.bf16.mxu1 %v13812_v34 }
 0xdfa   : > { %13868 = vmatpush1.bf16.msra.mxu1 %v13811_v22 }
 0xdfd   : > { %13886 = vmatmul.mubr.bf16.vlgmr.msra.gmra.mrb[136].mxu1 %v15046_v18 }
 0xdfe   : > { %13895 = vmatprep.mubr.bf16.mxu1 %v22132_v10 }
 0xe05   : > { %13896 = vmatmul.mubr.bf16.gmra.mrb[140].mxu1 %v15047_v45 }
 0xe06   : > { %13969 = vmatprep.mubr.bf16.mxu1 %v22132_v10 }
 0xe64   : > { %v13931_v50 = vpop.permute.xlu0 %13930 }
 0xed0   : > { %v13887_v0 = vpop.f32.mrb[136].mxu1 }
 0xed1   : > { %v13888_v54 = vadd.f32 %v13887_v0, %v13824_v60  ;;  %v13889_v49 = vpop.f32.mrb[137].mxu1 }
 0xed2   : > { %v13890_v30 = vadd.f32 %v13889_v49, %v13824_v60  ;;  %v13891_v56 = vpop.f32.mrb[138].mxu1 }
 0xed3   : > { %v13906_v9 = vmul.f32 0.2, %v13888_v54  ;;  %v13892_v62 = vadd.f32 %v13891_v56, %v13829_v46  ;;  %v13893_v43 = vpop.f32.mrb[139].mxu1 }
 0xed4   : > { %v13907_v21 = vmul.f32 0.2, %v13890_v30  ;;  %v13894_v10 = vadd.f32 %v13893_v43, %v13829_v46 }
 0xed5   : > { %v13908_v16 = vmul.f32 0.2, %v13892_v62  ;;  %v13914_v6 = vmax.f32 %v13888_v54, %v13906_v9 }
 0xed6   : > { %v13909_v63 = vmul.f32 0.2, %v13894_v10  ;;  %v13915_v13 = vmax.f32 %v13890_v30, %v13907_v21 }
 0xed7   : > { %v13916_v20 = vmax.f32 %v13892_v62, %v13908_v16 }
 0xed8   : > { %v13917_v51 = vmax.f32 %v13894_v10, %v13909_v63  ;;  %v13897_v37 = vpop.f32.mrb[140].mxu1 }
 0xed9   : > { %v13922_v11 = vpack.c.bf16 %v13916_v20, %v13914_v6  ;;  %v13898_v33 = vadd.f32 %v13897_v37, %v13834_v7  ;;  %v13899_v42 = vpop.f32.mrb[141].mxu1 }
 0xeda   : > { %v13900_v17 = vadd.f32 %v13899_v42, %v13834_v7  ;;  %v13901_v25 = vpop.f32.mrb[142].mxu1  ;;  %v13923_v12 = vpack.c.bf16 %v13917_v51, %v13915_v13 }
 0xedb   : > { %v13910_v41 = vmul.f32 0.2, %v13898_v33  ;;  %v13902_v61 = vadd.f32 %v13901_v25, %v13839_v36  ;;  %v13903_v31 = vpop.f32.mrb[143].mxu1 }
 0xedc   : > { %v13911_v59 = vmul.f32 0.2, %v13900_v17  ;;  %v13904_v4 = vadd.f32 %v13903_v31, %v13839_v36  ;;  %13937 = vmatprep.subr.bf16.mxu1 %v13923_v12 }
 0xedd   : > { %v13912_v15 = vmul.f32 0.2, %v13902_v61  ;;  %13938 = vmatpush1.bf16.msra.mxu1 %v13922_v11  ;;  %v13918_v57 = vmax.f32 %v13898_v33, %v13910_v41 }
 0xede   : > { %v13913_v52 = vmul.f32 0.2, %v13904_v4  ;;  %v13919_v58 = vmax.f32 %v13900_v17, %v13911_v59 }
 0xedf   : > { %v13920_v38 = vmax.f32 %v13902_v61, %v13912_v15 }
 0xee0   : > { %v13921_v14 = vmax.f32 %v13904_v4, %v13913_v52 }
 0xee1   : > { %v13924_v19 = vpack.c.bf16 %v13920_v38, %v13918_v57 }
 0xee2   : > { %v13925_v32 = vpack.c.bf16 %v13921_v14, %v13919_v58 }
 0xee4   : > { %13939 = vmatprep.subr.bf16.mxu1 %v13925_v32 }
 0xee5   : > { %13940 = vmatpush1.bf16.msra.mxu1 %v13924_v19 }
 0xee8   : > { %15048 = vmatmul.mubr.msk.bf16.vlgmr.msra.gmra.mrb[144].mxu1 %vm13933_vm0, %v13926_v53 }
 0xfbb   : > { %v13971_v5 = vpop.f32.mrb[144].mxu1 }
 0xfbc   : > { %v13973_v39 = vpop.f32.mrb[145].mxu1  ;;  %v13972_v47 = vadd.f32 %v13971_v5, %v13931_v50 }
 0xfbd   : > { %v13975_v8 = vpop.f32.mrb[146].mxu1  ;;  %v13974_v1 = vadd.f32 %v13973_v39, %v13931_v50 }
 0xfbe   : > { %v13976_v2 = vpop.f32.mrb[147].mxu1 }
 0xfbf   : > { %v13980_v22 = vcombine.low %v13972_v47, %v13974_v1 }
 0xfc1   : > { %v13987_v44 = vrot.slane %v13980_v22, %v13986_v55 }
 0xfc3   : > { %v13994_v23 = vrot.slane %v13987_v44, %v13986_v55 }
 0xfc5   : > { %14000 = vst.msk [vmem:[%s712_s11] sm:$0x3] %vm13998_vm1, %v13994_v23 }
 0xfc6 PF: > { %p10_p9 = scmp.ge.s32.totalorder %s17050_s16, 4   ;;  %s22133_s12 = smov %s17000_s13 }
 0xfc7   : > { %s22134_s13 = smov %s17059_s19  ;;  %s22135_s14 = smov %s17050_s16 }
 0xfc8   :  { %12 = sbr.rel (!%p10_p9) target bundleno = 2 (0x2), region = 105 }

</bundles_post_ra>
